<compile_context>
chip_gen: v5e
topology: v5e:2x2
jax: 0.10.0
libtpu: 0.0.40
codegen_flags: <defaults>
</compile_context>

<pallas_src>
import functools

import jax
import jax.numpy as jnp
from jax.experimental import pallas as pl
from jax.experimental.pallas import tpu as pltpu

_BN_EPS = 1e-5


def _round_up(x, m):
    return (x + m - 1) // m * m


def _tpu_vmem_capacity():
    try:
        return int(pltpu.get_tpu_info().vmem_capacity_bytes)
    except Exception:
        return 64 * 2**20          # assume v7x-sized VMEM if the query fails


def _vmem_limit(est_bytes, cap):
    # v5e/v6e (128 MiB physical): allow up to ~96 MiB; v7x (64 MiB): ~45 MiB.
    hi = int(cap * 0.75) if cap > 80 * 2**20 else int(cap * 0.70)
    return int(min(max(2 * est_bytes, 16 * 2**20), hi))


def _stage_vmem_estimate(Bblk, Hp, Wp, Hi, Wi, Cin, Cout, use_im2col):
    """Rough per-step VMEM footprint (bytes) of one conv-stage grid step."""
    M = Bblk * Hi * Wi
    est = 0
    est += 2 * _round_up(Bblk * Hp * Wp, 16) * _round_up(Cin, 128) * 2    # x block (dbl buf, bf16)
    est += 2 * _round_up(9 * Cin, 16) * _round_up(Cout, 128) * 2          # weights (bf16)
    est += _round_up(Bblk * (Hi + 2) * (Wi + 2), 16) * _round_up(Cin, 128) * 2  # halo scratch
    est += _round_up(M, 8) * _round_up(Cout, 128) * 4                     # f32 accumulator
    est += 2 * _round_up(M, 16) * _round_up(Cout, 128) * 2                # conv out block (bf16)
    if use_im2col:
        est += _round_up(M, 16) * _round_up(9 * Cin, 128) * 2             # im2col patches
    return est


def _pick_bblk(N, Hp, Wp, Hi, Wi, Cin, Cout, use_im2col, cap):
    """Images per grid step: aim for M = Bblk*Hi*Wi >= 256 MXU rows, but keep
    the parallel grid length >= 2 when N >= 2 (v7x megacore) and stay within a
    VMEM budget derived from the detected capacity."""
    budget = int(cap * 0.55)
    best = 1
    for b in range(1, N + 1):
        if N % b:
            continue
        if N >= 2 and N // b < 2:
            break
        if _stage_vmem_estimate(b, Hp, Wp, Hi, Wi, Cin, Cout, use_im2col) > budget:
            break
        best = b
        if b * Hi * Wi >= 256:
            break
    return best


# ----------------------------------------------------------------------------
# Fused stage kernel:
#   (previous stage's BN affine [+ LeakyReLU] [+ MaxPool 2x2])   -- in VMEM
#   -> 3x3 conv (stride 1, pad 1, no bias) on the MXU, bf16 in / f32 acc
#   -> raw conv output (bf16) + per-step partial BN statistics (f32)
# ----------------------------------------------------------------------------
def _conv_stage_kernel(x_ref, w_ref, scale_ref, shift_ref, conv_ref, stats_ref,
                       pad_ref, *, Bblk, Hp, Wp, Cin, Cout,
                       pre_affine, pre_leaky, pre_pool, use_im2col):
    Hi, Wi = (Hp // 2, Wp // 2) if pre_pool else (Hp, Wp)

    x = x_ref[...]                                           # (Bblk, Hp, Wp, Cin)
    if pre_affine:
        # Fused epilogue of the PREVIOUS stage (BN scale/shift precomputed).
        y = x.astype(jnp.float32) * scale_ref[0] + shift_ref[0]
        if pre_leaky:
            y = jnp.maximum(y, 0.1 * y)
        if pre_pool:
            y = y.reshape(Bblk * Hi, 2, Wp, Cin).max(axis=1)
            y = y.reshape(Bblk * Hi, Wi, 2, Cin).max(axis=2)
            y = y.reshape(Bblk, Hi, Wi, Cin)
        x_in = y.astype(jnp.bfloat16)
    else:
        x_in = x.astype(jnp.bfloat16)                        # already bf16 input

    # 1-pixel zero halo built in VMEM scratch (no concat relayouts, no HBM pad).
    pad_ref[...] = jnp.zeros_like(pad_ref)
    pad_ref[:, 1:Hi + 1, 1:Wi + 1, :] = x_in

    M = Bblk * Hi * Wi
    if use_im2col:
        # Small Cin: one big-K (9*Cin) MXU matmul from an im2col patch matrix.
        cols = [pad_ref[:, dy:dy + Hi, dx:dx + Wi, :]
                for dy in range(3) for dx in range(3)]
        patches = jnp.concatenate(cols, axis=-1).reshape(M, 9 * Cin)
        acc = jnp.dot(patches, w_ref[...], preferred_element_type=jnp.float32)
    else:
        # Large Cin: nine accumulated K=Cin matmuls from shifted windows of the
        # padded scratch — no 9x patch buffer (critical for v7x 64 MiB VMEM).
        acc = jnp.zeros((M, Cout), jnp.float32)
        k = 0
        for dy in range(3):
            for dx in range(3):
                win = pad_ref[:, dy:dy + Hi, dx:dx + Wi, :].reshape(M, Cin)
                acc = acc + jnp.dot(win, w_ref[k * Cin:(k + 1) * Cin, :],
                                    preferred_element_type=jnp.float32)
                k += 1

    conv_ref[...] = acc.reshape(Bblk, Hi, Wi, Cout).astype(conv_ref.dtype)

    # One-pass partial BatchNorm statistics, taken from the f32 accumulator.
    s = jnp.sum(acc, axis=0, keepdims=True)                  # (1, Cout)
    ss = jnp.sum(acc * acc, axis=0, keepdims=True)           # (1, Cout)
    stats_ref[...] = jnp.concatenate([s, ss], axis=0)[None]  # (1, 2, Cout)


# ----------------------------------------------------------------------------
# Standalone BN affine + LeakyReLU for the FINAL stage only (no pool).
# ----------------------------------------------------------------------------
def _bn_act_kernel(conv_ref, scale_ref, shift_ref, out_ref):
    y = conv_ref[...].astype(jnp.float32) * scale_ref[0] + shift_ref[0]
    out_ref[...] = jnp.maximum(y, 0.1 * y).astype(out_ref.dtype)


# ----------------------------------------------------------------------------
# Stage wrapper
# ----------------------------------------------------------------------------
def conv3x3_stage(x, w, scale, shift, *, pre_leaky, pre_pool):
    """x: (N,Hp,Wp,Cin) bf16 (raw conv output of previous stage, or the input
    image for stage 1); w: (9*Cin, Cout) bf16; scale/shift: (1,Cin) f32 or None.
    Returns (raw conv output (N,Hi,Wi,Cout) bf16, partial stats (G,2,Cout) f32)."""
    N, Hp, Wp, Cin = x.shape
    Cout = w.shape[-1]
    assert w.shape[0] == 9 * Cin

    pre_affine = scale is not None
    if not pre_affine:
        pre_pool = False
        pre_leaky = False
        scale = jnp.ones((1, Cin), jnp.float32)
        shift = jnp.zeros((1, Cin), jnp.float32)
    Hi, Wi = (Hp // 2, Wp // 2) if pre_pool else (Hp, Wp)

    use_im2col = Cin < 64
    cap = _tpu_vmem_capacity()
    Bblk = _pick_bblk(N, Hp, Wp, Hi, Wi, Cin, Cout, use_im2col, cap)
    G = N // Bblk
    # TODO(synk): at real Darknet resolutions (e.g. 416x416) add an H-tile grid
    # dimension with a 1-row halo so the VMEM footprint stays bounded; the toy
    # 16x16 shapes fit whole images per step everywhere.

    kern = functools.partial(
        _conv_stage_kernel, Bblk=Bblk, Hp=Hp, Wp=Wp, Cin=Cin, Cout=Cout,
        pre_affine=pre_affine, pre_leaky=pre_leaky, pre_pool=pre_pool,
        use_im2col=use_im2col)

    est = _stage_vmem_estimate(Bblk, Hp, Wp, Hi, Wi, Cin, Cout, use_im2col)
    conv_out, stats = pl.pallas_call(
        kern,
        out_shape=(
            jax.ShapeDtypeStruct((N, Hi, Wi, Cout), jnp.bfloat16),
            jax.ShapeDtypeStruct((G, 2, Cout), jnp.float32),
        ),
        grid_spec=pltpu.PrefetchScalarGridSpec(
            num_scalar_prefetch=0,
            grid=(G,),
            in_specs=[
                pl.BlockSpec((Bblk, Hp, Wp, Cin), lambda g: (g, 0, 0, 0)),
                pl.BlockSpec((9 * Cin, Cout), lambda g: (0, 0)),   # resident weights
                pl.BlockSpec((1, Cin), lambda g: (0, 0)),
                pl.BlockSpec((1, Cin), lambda g: (0, 0)),
            ],
            out_specs=[
                pl.BlockSpec((Bblk, Hi, Wi, Cout), lambda g: (g, 0, 0, 0)),
                pl.BlockSpec((1, 2, Cout), lambda g: (g, 0, 0)),
            ],
            scratch_shapes=[
                pltpu.VMEM((Bblk, Hi + 2, Wi + 2, Cin), jnp.bfloat16),
            ],
        ),
        compiler_params=pltpu.CompilerParams(
            dimension_semantics=("parallel",),
            vmem_limit_bytes=_vmem_limit(est, cap),
        ),
        cost_estimate=pl.CostEstimate(
            flops=2 * N * Hi * Wi * 9 * Cin * Cout + 6 * N * Hp * Wp * Cin,
            transcendentals=0,
            bytes_accessed=(2 * N * Hp * Wp * Cin + 2 * 9 * Cin * Cout
                            + 2 * N * Hi * Wi * Cout + 4 * G * 2 * Cout
                            + 8 * Cin),
        ),
    )(x, w, scale, shift)
    return conv_out, stats


def _finalize_bn(stats, gamma, beta, count):
    """Training-mode BatchNorm2d: batch mean / biased variance -> scale, shift."""
    s = jnp.sum(stats, axis=0)                        # (2, Cout)
    mean = s[0] / count
    var = jnp.maximum(s[1] / count - mean * mean, 0.0)
    scale = gamma * jax.lax.rsqrt(var + _BN_EPS)
    shift = beta - mean * scale
    return scale.reshape(1, -1), shift.reshape(1, -1)


def bn_act(conv, scale, shift):
    """Final-stage BN affine + LeakyReLU(0.1) (no pool), f32 output."""
    N, H, W, C = conv.shape
    cap = _tpu_vmem_capacity()
    est = (_round_up(H * W, 16) * _round_up(C, 128) * (2 * 2 + 4 * 2)
           + 2 * _round_up(C, 128) * 4)
    return pl.pallas_call(
        _bn_act_kernel,
        out_shape=jax.ShapeDtypeStruct((N, H, W, C), jnp.float32),
        grid_spec=pltpu.PrefetchScalarGridSpec(
            num_scalar_prefetch=0,
            grid=(N,),
            in_specs=[
                pl.BlockSpec((1, H, W, C), lambda n: (n, 0, 0, 0)),
                pl.BlockSpec((1, C), lambda n: (0, 0)),
                pl.BlockSpec((1, C), lambda n: (0, 0)),
            ],
            out_specs=pl.BlockSpec((1, H, W, C), lambda n: (n, 0, 0, 0)),
        ),
        compiler_params=pltpu.CompilerParams(
            dimension_semantics=("parallel",),
            vmem_limit_bytes=_vmem_limit(est, cap),
        ),
        cost_estimate=pl.CostEstimate(
            flops=3 * N * H * W * C, transcendentals=0,
            bytes_accessed=2 * N * H * W * C + 8 * C + 4 * N * H * W * C),
    )(conv, scale, shift)


# ----------------------------------------------------------------------------
# Deterministic parameter construction (shapes from Darknet.__init__)
# ----------------------------------------------------------------------------
def init_params(key):
    specs = [("1", 3, 32), ("2", 32, 64), ("3", 64, 128), ("4", 128, 256)]
    params = {}
    for name, cin, cout in specs:
        key, sub = jax.random.split(key)
        # PyTorch (Cout,Cin,3,3) -> (kh,kw,Cin,Cout) -> (9*Cin, Cout), bf16 MXU feed.
        w = 0.05 * jax.random.normal(sub, (cout, cin, 3, 3), jnp.float32)
        w = jnp.transpose(w, (2, 3, 1, 0)).reshape(9 * cin, cout).astype(jnp.bfloat16)
        params["w" + name] = w
        params["g" + name] = jnp.ones((cout,), jnp.float32)    # BN gamma
        params["b" + name] = jnp.zeros((cout,), jnp.float32)   # BN beta
    return params


# ----------------------------------------------------------------------------
# Forward: the defined portion of Darknet.forward (meta_forward backbone)
# ----------------------------------------------------------------------------
def darknet_forward(params, x, metax, mask):
    # TODO(synk): Spectral_Discriminator/get_fft_feature and the PIL/numpy
    # mask-crop compositing at the top of meta_forward have no Pallas
    # equivalent (get_fft_feature is undefined); metax feeds the conv backbone.
    del x, mask
    N = metax.shape[0]
    m = jnp.transpose(metax, (0, 2, 3, 1)).astype(jnp.bfloat16)  # NCHW->NHWC, bf16 once

    # Stage 1: conv1. Its BN/act/pool epilogue is fused into stage 2's kernel.
    c1, st1 = conv3x3_stage(m, params["w1"], None, None,
                            pre_leaky=False, pre_pool=False)
    sc1, sh1 = _finalize_bn(st1, params["g1"], params["b1"],
                            float(N * c1.shape[1] * c1.shape[2]))

    # Stage 2: [bn1 + act + pool1] fused, then conv2.
    c2, st2 = conv3x3_stage(c1, params["w2"], sc1, sh1,
                            pre_leaky=True, pre_pool=True)
    sc2, sh2 = _finalize_bn(st2, params["g2"], params["b2"],
                            float(N * c2.shape[1] * c2.shape[2]))

    # Stage 3: [bn2 (no act) + pool2] fused, then conv3.
    c3, st3 = conv3x3_stage(c2, params["w3"], sc2, sh2,
                            pre_leaky=False, pre_pool=True)
    sc3, sh3 = _finalize_bn(st3, params["g3"], params["b3"],
                            float(N * c3.shape[1] * c3.shape[2]))

    # Stage 4: [bn3 + act + pool3] fused, then conv4.
    c4, st4 = conv3x3_stage(c3, params["w4"], sc3, sh3,
                            pre_leaky=True, pre_pool=True)
    sc4, sh4 = _finalize_bn(st4, params["g4"], params["b4"],
                            float(N * c4.shape[1] * c4.shape[2]))

    # Final epilogue: bn4 + LeakyReLU (no pool).
    out = bn_act(c4, sc4, sh4)

    # TODO(synk): Global_extract_layer, ODConv2d, GraphConv2, GEblock, yolov5
    # and the whole detect_forward head are undefined in the reference source;
    # returning the backbone feature map instead of detection outputs.
    return jnp.transpose(out, (0, 3, 1, 2))  # NHWC -> NCHW


if __name__ == "__main__":
    key = jax.random.PRNGKey(0)
    pkey, k1, k2, k3 = jax.random.split(key, 4)
    params = init_params(pkey)

    # Small shapes consistent with the module's forward signature.
    x = jax.random.normal(k1, (2, 3, 32, 32), jnp.float32)       # detection input
    metax = jax.random.normal(k2, (2, 3, 16, 16), jnp.float32)   # meta image (NCHW)
    mask = (jax.random.uniform(k3, (2, 1, 16, 16)) > 0.5).astype(jnp.float32)

    fwd = jax.jit(darknet_forward)
    out = fwd(params, x, metax, mask)
    out = jax.block_until_ready(out)
    assert out.shape == (2, 256, 2, 2), out.shape
    assert bool(jnp.all(jnp.isfinite(out)))
    print("KERNEL_OK")
</pallas_src>

<mosaic_0001>
module attributes {stable_mosaic.version = 11 : i64} {
  func.func @_conv_stage_kernel(%arg0: i32, %arg1: memref<1x16x16x3xbf16, #tpu.memory_space<vmem>>, %arg2: memref<27x32xbf16, #tpu.memory_space<vmem>>, %arg3: memref<1x3xf32, #tpu.memory_space<vmem>>, %arg4: memref<1x3xf32, #tpu.memory_space<vmem>>, %arg5: memref<1x16x16x32xbf16, #tpu.memory_space<vmem>>, %arg6: memref<1x2x32xf32, #tpu.memory_space<vmem>>, %arg7: memref<1x18x18x3xbf16, #tpu.memory_space<vmem>>) attributes {dimension_semantics = [#tpu.dimension_semantics<parallel>], iteration_bounds = array<i64: 2>, scalar_prefetch = 0 : i64, scratch_operands = 1 : i64, tpu.core_type = #tpu.core_type<tc>, window_params = [{transform_indices = @transform_0, window_bounds = array<i64: 1, 16, 16, 3>}, {pipeline_mode = #tpu.pipeline_mode<synchronous>, transform_indices = @transform_1, window_bounds = array<i64: 27, 32>}, {pipeline_mode = #tpu.pipeline_mode<synchronous>, transform_indices = @transform_2, window_bounds = array<i64: 1, 3>}, {pipeline_mode = #tpu.pipeline_mode<synchronous>, transform_indices = @transform_3, window_bounds = array<i64: 1, 3>}, {transform_indices = @transform_4, window_bounds = array<i64: 1, 16, 16, 32>}, {transform_indices = @transform_5, window_bounds = array<i64: 1, 2, 32>}]} {
    %c0 = arith.constant 0 : index
    %c0_0 = arith.constant 0 : index
    %c0_1 = arith.constant 0 : index
    %c0_2 = arith.constant 0 : index
    %0 = vector.load %arg1[%c0, %c0_0, %c0_1, %c0_2] : memref<1x16x16x3xbf16, #tpu.memory_space<vmem>>, vector<1x16x16x3xbf16>
    %cst = arith.constant 0.000000e+00 : bf16
    %1 = vector.broadcast %cst : bf16 to vector<1x18x18x3xbf16>
    %c0_3 = arith.constant 0 : index
    %c0_4 = arith.constant 0 : index
    %c0_5 = arith.constant 0 : index
    %c0_6 = arith.constant 0 : index
    %2 = vector.load %arg7[%c0_3, %c0_4, %c0_5, %c0_6] : memref<1x18x18x3xbf16, #tpu.memory_space<vmem>>, vector<1x18x18x3xbf16>
    tpu.vector_store %arg7[%c0_3, %c0_4, %c0_5, %c0_6], %1 {strides = array<i32>} : memref<1x18x18x3xbf16, #tpu.memory_space<vmem>>, vector<1x18x18x3xbf16>,
    %c0_7 = arith.constant 0 : index
    %c1 = arith.constant 1 : index
    %c1_8 = arith.constant 1 : index
    %c0_9 = arith.constant 0 : index
    %3 = vector.load %arg7[%c0_7, %c1, %c1_8, %c0_9] : memref<1x18x18x3xbf16, #tpu.memory_space<vmem>>, vector<1x16x16x3xbf16>
    tpu.vector_store %arg7[%c0_7, %c1, %c1_8, %c0_9], %0 {strides = array<i32>} : memref<1x18x18x3xbf16, #tpu.memory_space<vmem>>, vector<1x16x16x3xbf16>,
    %c0_10 = arith.constant 0 : index
    %c0_11 = arith.constant 0 : index
    %c0_12 = arith.constant 0 : index
    %c0_13 = arith.constant 0 : index
    %4 = vector.load %arg7[%c0_10, %c0_11, %c0_12, %c0_13] : memref<1x18x18x3xbf16, #tpu.memory_space<vmem>>, vector<1x16x16x3xbf16>
    %c0_14 = arith.constant 0 : index
    %c0_15 = arith.constant 0 : index
    %c1_16 = arith.constant 1 : index
    %c0_17 = arith.constant 0 : index
    %5 = vector.load %arg7[%c0_14, %c0_15, %c1_16, %c0_17] : memref<1x18x18x3xbf16, #tpu.memory_space<vmem>>, vector<1x16x16x3xbf16>
    %c0_18 = arith.constant 0 : index
    %c0_19 = arith.constant 0 : index
    %c2 = arith.constant 2 : index
    %c0_20 = arith.constant 0 : index
    %6 = vector.load %arg7[%c0_18, %c0_19, %c2, %c0_20] : memref<1x18x18x3xbf16, #tpu.memory_space<vmem>>, vector<1x16x16x3xbf16>
    %c0_21 = arith.constant 0 : index
    %c1_22 = arith.constant 1 : index
    %c0_23 = arith.constant 0 : index
    %c0_24 = arith.constant 0 : index
    %7 = vector.load %arg7[%c0_21, %c1_22, %c0_23, %c0_24] : memref<1x18x18x3xbf16, #tpu.memory_space<vmem>>, vector<1x16x16x3xbf16>
    %c0_25 = arith.constant 0 : index
    %c1_26 = arith.constant 1 : index
    %c1_27 = arith.constant 1 : index
    %c0_28 = arith.constant 0 : index
    %8 = vector.load %arg7[%c0_25, %c1_26, %c1_27, %c0_28] : memref<1x18x18x3xbf16, #tpu.memory_space<vmem>>, vector<1x16x16x3xbf16>
    %c0_29 = arith.constant 0 : index
    %c1_30 = arith.constant 1 : index
    %c2_31 = arith.constant 2 : index
    %c0_32 = arith.constant 0 : index
    %9 = vector.load %arg7[%c0_29, %c1_30, %c2_31, %c0_32] : memref<1x18x18x3xbf16, #tpu.memory_space<vmem>>, vector<1x16x16x3xbf16>
    %c0_33 = arith.constant 0 : index
    %c2_34 = arith.constant 2 : index
    %c0_35 = arith.constant 0 : index
    %c0_36 = arith.constant 0 : index
    %10 = vector.load %arg7[%c0_33, %c2_34, %c0_35, %c0_36] : memref<1x18x18x3xbf16, #tpu.memory_space<vmem>>, vector<1x16x16x3xbf16>
    %c0_37 = arith.constant 0 : index
    %c2_38 = arith.constant 2 : index
    %c1_39 = arith.constant 1 : index
    %c0_40 = arith.constant 0 : index
    %11 = vector.load %arg7[%c0_37, %c2_38, %c1_39, %c0_40] : memref<1x18x18x3xbf16, #tpu.memory_space<vmem>>, vector<1x16x16x3xbf16>
    %c0_41 = arith.constant 0 : index
    %c2_42 = arith.constant 2 : index
    %c2_43 = arith.constant 2 : index
    %c0_44 = arith.constant 0 : index
    %12 = vector.load %arg7[%c0_41, %c2_42, %c2_43, %c0_44] : memref<1x18x18x3xbf16, #tpu.memory_space<vmem>>, vector<1x16x16x3xbf16>
    %13 = tpu.concatenate %4, %5, %6, %7, %8, %9, %10, %11, %12 in 3 : vector<1x16x16x3xbf16>, vector<1x16x16x3xbf16>, vector<1x16x16x3xbf16>, vector<1x16x16x3xbf16>, vector<1x16x16x3xbf16>, vector<1x16x16x3xbf16>, vector<1x16x16x3xbf16>, vector<1x16x16x3xbf16>, vector<1x16x16x3xbf16> -> vector<1x16x16x27xbf16>
    %14 = vector.shape_cast %13 : vector<1x16x16x27xbf16> to vector<256x27xbf16>
    %c0_45 = arith.constant 0 : index
    %c0_46 = arith.constant 0 : index
    %15 = vector.load %arg2[%c0_45, %c0_46] : memref<27x32xbf16, #tpu.memory_space<vmem>>, vector<27x32xbf16>
    %cst_47 = arith.constant dense<0.000000e+00> : vector<256x32xf32>
    %16 = tpu.matmul %14, %15, %cst_47 {dimension_numbers = #tpu.dot_dimension_numbers<[1], [0], [0], [1], [0, 0, 1, 1], [], []>} : vector<256x27xbf16>, vector<27x32xbf16>, vector<256x32xf32> -> vector<256x32xf32>
    %17 = vector.shape_cast %16 : vector<256x32xf32> to vector<1x16x16x32xf32>
    %18 = arith.truncf %17 : vector<1x16x16x32xf32> to vector<1x16x16x32xbf16>
    %c0_48 = arith.constant 0 : index
    %c0_49 = arith.constant 0 : index
    %c0_50 = arith.constant 0 : index
    %c0_51 = arith.constant 0 : index
    %19 = vector.load %arg5[%c0_48, %c0_49, %c0_50, %c0_51] : memref<1x16x16x32xbf16, #tpu.memory_space<vmem>>, vector<1x16x16x32xbf16>
    tpu.vector_store %arg5[%c0_48, %c0_49, %c0_50, %c0_51], %18 {strides = array<i32>} : memref<1x16x16x32xbf16, #tpu.memory_space<vmem>>, vector<1x16x16x32xbf16>,
    %cst_52 = arith.constant dense<0.000000e+00> : vector<32xf32>
    %20 = vector.multi_reduction <add>, %16, %cst_52 [0] : vector<256x32xf32> to vector<32xf32>
    %21 = vector.shape_cast %20 : vector<32xf32> to vector<1x32xf32>
    %22 = arith.mulf %16, %16 : vector<256x32xf32>
    %cst_53 = arith.constant dense<0.000000e+00> : vector<32xf32>
    %23 = vector.multi_reduction <add>, %22, %cst_53 [0] : vector<256x32xf32> to vector<32xf32>
    %24 = vector.shape_cast %23 : vector<32xf32> to vector<1x32xf32>
    %25 = tpu.concatenate %21, %24 in 0 : vector<1x32xf32>, vector<1x32xf32> -> vector<2x32xf32>
    %26 = vector.shape_cast %25 : vector<2x32xf32> to vector<1x2x32xf32>
    %c0_54 = arith.constant 0 : index
    %c0_55 = arith.constant 0 : index
    %c0_56 = arith.constant 0 : index
    %27 = vector.load %arg6[%c0_54, %c0_55, %c0_56] : memref<1x2x32xf32, #tpu.memory_space<vmem>>, vector<1x2x32xf32>
    tpu.vector_store %arg6[%c0_54, %c0_55, %c0_56], %26 {strides = array<i32>} : memref<1x2x32xf32, #tpu.memory_space<vmem>>, vector<1x2x32xf32>,
    return
  }
  func.func @transform_0(%arg0: i32) -> (i32, i32, i32, i32) {
    %c0_i32 = arith.constant 0 : i32
    %c0_i32_0 = arith.constant 0 : i32
    %c0_i32_1 = arith.constant 0 : i32
    %c0_i32_2 = arith.constant 0 : i32
    return %arg0, %c0_i32, %c0_i32_0, %c0_i32_1 : i32, i32, i32, i32
  }
  func.func @transform_1(%arg0: i32) -> (i32, i32) {
    %c0_i32 = arith.constant 0 : i32
    %c0_i32_0 = arith.constant 0 : i32
    %c0_i32_1 = arith.constant 0 : i32
    return %c0_i32, %c0_i32_0 : i32, i32
  }
  func.func @transform_2(%arg0: i32) -> (i32, i32) {
    %c0_i32 = arith.constant 0 : i32
    %c0_i32_0 = arith.constant 0 : i32
    %c0_i32_1 = arith.constant 0 : i32
    return %c0_i32, %c0_i32_0 : i32, i32
  }
  func.func @transform_3(%arg0: i32) -> (i32, i32) {
    %c0_i32 = arith.constant 0 : i32
    %c0_i32_0 = arith.constant 0 : i32
    %c0_i32_1 = arith.constant 0 : i32
    return %c0_i32, %c0_i32_0 : i32, i32
  }
  func.func @transform_4(%arg0: i32) -> (i32, i32, i32, i32) {
    %c0_i32 = arith.constant 0 : i32
    %c0_i32_0 = arith.constant 0 : i32
    %c0_i32_1 = arith.constant 0 : i32
    %c0_i32_2 = arith.constant 0 : i32
    return %arg0, %c0_i32, %c0_i32_0, %c0_i32_1 : i32, i32, i32, i32
  }
  func.func @transform_5(%arg0: i32) -> (i32, i32, i32) {
    %c0_i32 = arith.constant 0 : i32
    %c0_i32_0 = arith.constant 0 : i32
    %c0_i32_1 = arith.constant 0 : i32
    return %arg0, %c0_i32, %c0_i32_0 : i32, i32, i32
  }
}

module attributes {stable_mosaic.version = 11 : i64} {
  func.func @_conv_stage_kernel(%arg0: i32, %arg1: memref<1x8x8x64xbf16, #tpu.memory_space<vmem>>, %arg2: memref<576x128xbf16, #tpu.memory_space<vmem>>, %arg3: memref<1x64xf32, #tpu.memory_space<vmem>>, %arg4: memref<1x64xf32, #tpu.memory_space<vmem>>, %arg5: memref<1x4x4x128xbf16, #tpu.memory_space<vmem>>, %arg6: memref<1x2x128xf32, #tpu.memory_space<vmem>>, %arg7: memref<1x6x6x64xbf16, #tpu.memory_space<vmem>>) attributes {dimension_semantics = [#tpu.dimension_semantics<parallel>], iteration_bounds = array<i64: 2>, scalar_prefetch = 0 : i64, scratch_operands = 1 : i64, tpu.core_type = #tpu.core_type<tc>, window_params = [{transform_indices = @transform_0, window_bounds = array<i64: 1, 8, 8, 64>}, {pipeline_mode = #tpu.pipeline_mode<synchronous>, transform_indices = @transform_1, window_bounds = array<i64: 576, 128>}, {pipeline_mode = #tpu.pipeline_mode<synchronous>, transform_indices = @transform_2, window_bounds = array<i64: 1, 64>}, {pipeline_mode = #tpu.pipeline_mode<synchronous>, transform_indices = @transform_3, window_bounds = array<i64: 1, 64>}, {transform_indices = @transform_4, window_bounds = array<i64: 1, 4, 4, 128>}, {transform_indices = @transform_5, window_bounds = array<i64: 1, 2, 128>}]} {
    %c0 = arith.constant 0 : index
    %c0_0 = arith.constant 0 : index
    %c0_1 = arith.constant 0 : index
    %c0_2 = arith.constant 0 : index
    %0 = vector.load %arg1[%c0, %c0_0, %c0_1, %c0_2] : memref<1x8x8x64xbf16, #tpu.memory_space<vmem>>, vector<1x8x8x64xbf16>
    %1 = arith.extf %0 : vector<1x8x8x64xbf16> to vector<1x8x8x64xf32>
    %c0_3 = arith.constant 0 : index
    %c0_4 = arith.constant 0 : index
    %2 = vector.load %arg3[%c0_3, %c0_4] : memref<1x64xf32, #tpu.memory_space<vmem>>, vector<1x64xf32>
    %3 = vector.shape_cast %2 : vector<1x64xf32> to vector<64xf32>
    %4 = vector.shape_cast %3 : vector<64xf32> to vector<1x1x1x64xf32>
    %5 = vector.broadcast %4 : vector<1x1x1x64xf32> to vector<1x8x8x64xf32>
    %6 = arith.mulf %1, %5 : vector<1x8x8x64xf32>
    %c0_5 = arith.constant 0 : index
    %c0_6 = arith.constant 0 : index
    %7 = vector.load %arg4[%c0_5, %c0_6] : memref<1x64xf32, #tpu.memory_space<vmem>>, vector<1x64xf32>
    %8 = vector.shape_cast %7 : vector<1x64xf32> to vector<64xf32>
    %9 = vector.shape_cast %8 : vector<64xf32> to vector<1x1x1x64xf32>
    %10 = vector.broadcast %9 : vector<1x1x1x64xf32> to vector<1x8x8x64xf32>
    %11 = arith.addf %6, %10 : vector<1x8x8x64xf32>
    %12 = vector.shape_cast %11 : vector<1x8x8x64xf32> to vector<4x2x8x64xf32>
    %cst = arith.constant dense<0xFF800000> : vector<4x8x64xf32>
    %13 = vector.multi_reduction <maximumf>, %12, %cst [1] : vector<4x2x8x64xf32> to vector<4x8x64xf32>
    %14 = vector.shape_cast %13 : vector<4x8x64xf32> to vector<4x4x2x64xf32>
    %cst_7 = arith.constant dense<0xFF800000> : vector<4x4x64xf32>
    %15 = vector.multi_reduction <maximumf>, %14, %cst_7 [2] : vector<4x4x2x64xf32> to vector<4x4x64xf32>
    %16 = vector.shape_cast %15 : vector<4x4x64xf32> to vector<1x4x4x64xf32>
    %17 = arith.truncf %16 : vector<1x4x4x64xf32> to vector<1x4x4x64xbf16>
    %cst_8 = arith.constant 0.000000e+00 : bf16
    %18 = vector.broadcast %cst_8 : bf16 to vector<1x6x6x64xbf16>
    %c0_9 = arith.constant 0 : index
    %c0_10 = arith.constant 0 : index
    %c0_11 = arith.constant 0 : index
    %c0_12 = arith.constant 0 : index
    %19 = vector.load %arg7[%c0_9, %c0_10, %c0_11, %c0_12] : memref<1x6x6x64xbf16, #tpu.memory_space<vmem>>, vector<1x6x6x64xbf16>
    tpu.vector_store %arg7[%c0_9, %c0_10, %c0_11, %c0_12], %18 {strides = array<i32>} : memref<1x6x6x64xbf16, #tpu.memory_space<vmem>>, vector<1x6x6x64xbf16>,
    %c0_13 = arith.constant 0 : index
    %c1 = arith.constant 1 : index
    %c1_14 = arith.constant 1 : index
    %c0_15 = arith.constant 0 : index
    %20 = vector.load %arg7[%c0_13, %c1, %c1_14, %c0_15] : memref<1x6x6x64xbf16, #tpu.memory_space<vmem>>, vector<1x4x4x64xbf16>
    tpu.vector_store %arg7[%c0_13, %c1, %c1_14, %c0_15], %17 {strides = array<i32>} : memref<1x6x6x64xbf16, #tpu.memory_space<vmem>>, vector<1x4x4x64xbf16>,
    %cst_16 = arith.constant 0.000000e+00 : f32
    %21 = vector.broadcast %cst_16 : f32 to vector<16x128xf32>
    %c0_17 = arith.constant 0 : index
    %c0_18 = arith.constant 0 : index
    %c0_19 = arith.constant 0 : index
    %c0_20 = arith.constant 0 : index
    %22 = vector.load %arg7[%c0_17, %c0_18, %c0_19, %c0_20] : memref<1x6x6x64xbf16, #tpu.memory_space<vmem>>, vector<1x4x4x64xbf16>
    %23 = vector.shape_cast %22 : vector<1x4x4x64xbf16> to vector<16x64xbf16>
    %c0_21 = arith.constant 0 : index
    %c0_22 = arith.constant 0 : index
    %24 = vector.load %arg2[%c0_21, %c0_22] : memref<576x128xbf16, #tpu.memory_space<vmem>>, vector<64x128xbf16>
    %cst_23 = arith.constant dense<0.000000e+00> : vector<16x128xf32>
    %25 = tpu.matmul %23, %24, %cst_23 {dimension_numbers = #tpu.dot_dimension_numbers<[1], [0], [0], [1], [0, 0, 1, 1], [], []>} : vector<16x64xbf16>, vector<64x128xbf16>, vector<16x128xf32> -> vector<16x128xf32>
    %26 = arith.addf %21, %25 : vector<16x128xf32>
    %c0_24 = arith.constant 0 : index
    %c0_25 = arith.constant 0 : index
    %c1_26 = arith.constant 1 : index
    %c0_27 = arith.constant 0 : index
    %27 = vector.load %arg7[%c0_24, %c0_25, %c1_26, %c0_27] : memref<1x6x6x64xbf16, #tpu.memory_space<vmem>>, vector<1x4x4x64xbf16>
    %28 = vector.shape_cast %27 : vector<1x4x4x64xbf16> to vector<16x64xbf16>
    %c64 = arith.constant 64 : index
    %c0_28 = arith.constant 0 : index
    %29 = vector.load %arg2[%c64, %c0_28] : memref<576x128xbf16, #tpu.memory_space<vmem>>, vector<64x128xbf16>
    %cst_29 = arith.constant dense<0.000000e+00> : vector<16x128xf32>
    %30 = tpu.matmul %28, %29, %cst_29 {dimension_numbers = #tpu.dot_dimension_numbers<[1], [0], [0], [1], [0, 0, 1, 1], [], []>} : vector<16x64xbf16>, vector<64x128xbf16>, vector<16x128xf32> -> vector<16x128xf32>
    %31 = arith.addf %26, %30 : vector<16x128xf32>
    %c0_30 = arith.constant 0 : index
    %c0_31 = arith.constant 0 : index
    %c2 = arith.constant 2 : index
    %c0_32 = arith.constant 0 : index
    %32 = vector.load %arg7[%c0_30, %c0_31, %c2, %c0_32] : memref<1x6x6x64xbf16, #tpu.memory_space<vmem>>, vector<1x4x4x64xbf16>
    %33 = vector.shape_cast %32 : vector<1x4x4x64xbf16> to vector<16x64xbf16>
    %c128 = arith.constant 128 : index
    %c0_33 = arith.constant 0 : index
    %34 = vector.load %arg2[%c128, %c0_33] : memref<576x128xbf16, #tpu.memory_space<vmem>>, vector<64x128xbf16>
    %cst_34 = arith.constant dense<0.000000e+00> : vector<16x128xf32>
    %35 = tpu.matmul %33, %34, %cst_34 {dimension_numbers = #tpu.dot_dimension_numbers<[1], [0], [0], [1], [0, 0, 1, 1], [], []>} : vector<16x64xbf16>, vector<64x128xbf16>, vector<16x128xf32> -> vector<16x128xf32>
    %36 = arith.addf %31, %35 : vector<16x128xf32>
    %c0_35 = arith.constant 0 : index
    %c1_36 = arith.constant 1 : index
    %c0_37 = arith.constant 0 : index
    %c0_38 = arith.constant 0 : index
    %37 = vector.load %arg7[%c0_35, %c1_36, %c0_37, %c0_38] : memref<1x6x6x64xbf16, #tpu.memory_space<vmem>>, vector<1x4x4x64xbf16>
    %38 = vector.shape_cast %37 : vector<1x4x4x64xbf16> to vector<16x64xbf16>
    %c192 = arith.constant 192 : index
    %c0_39 = arith.constant 0 : index
    %39 = vector.load %arg2[%c192, %c0_39] : memref<576x128xbf16, #tpu.memory_space<vmem>>, vector<64x128xbf16>
    %cst_40 = arith.constant dense<0.000000e+00> : vector<16x128xf32>
    %40 = tpu.matmul %38, %39, %cst_40 {dimension_numbers = #tpu.dot_dimension_numbers<[1], [0], [0], [1], [0, 0, 1, 1], [], []>} : vector<16x64xbf16>, vector<64x128xbf16>, vector<16x128xf32> -> vector<16x128xf32>
    %41 = arith.addf %36, %40 : vector<16x128xf32>
    %c0_41 = arith.constant 0 : index
    %c1_42 = arith.constant 1 : index
    %c1_43 = arith.constant 1 : index
    %c0_44 = arith.constant 0 : index
    %42 = vector.load %arg7[%c0_41, %c1_42, %c1_43, %c0_44] : memref<1x6x6x64xbf16, #tpu.memory_space<vmem>>, vector<1x4x4x64xbf16>
    %43 = vector.shape_cast %42 : vector<1x4x4x64xbf16> to vector<16x64xbf16>
    %c256 = arith.constant 256 : index
    %c0_45 = arith.constant 0 : index
    %44 = vector.load %arg2[%c256, %c0_45] : memref<576x128xbf16, #tpu.memory_space<vmem>>, vector<64x128xbf16>
    %cst_46 = arith.constant dense<0.000000e+00> : vector<16x128xf32>
    %45 = tpu.matmul %43, %44, %cst_46 {dimension_numbers = #tpu.dot_dimension_numbers<[1], [0], [0], [1], [0, 0, 1, 1], [], []>} : vector<16x64xbf16>, vector<64x128xbf16>, vector<16x128xf32> -> vector<16x128xf32>
    %46 = arith.addf %41, %45 : vector<16x128xf32>
    %c0_47 = arith.constant 0 : index
    %c1_48 = arith.constant 1 : index
    %c2_49 = arith.constant 2 : index
    %c0_50 = arith.constant 0 : index
    %47 = vector.load %arg7[%c0_47, %c1_48, %c2_49, %c0_50] : memref<1x6x6x64xbf16, #tpu.memory_space<vmem>>, vector<1x4x4x64xbf16>
    %48 = vector.shape_cast %47 : vector<1x4x4x64xbf16> to vector<16x64xbf16>
    %c320 = arith.constant 320 : index
    %c0_51 = arith.constant 0 : index
    %49 = vector.load %arg2[%c320, %c0_51] : memref<576x128xbf16, #tpu.memory_space<vmem>>, vector<64x128xbf16>
    %cst_52 = arith.constant dense<0.000000e+00> : vector<16x128xf32>
    %50 = tpu.matmul %48, %49, %cst_52 {dimension_numbers = #tpu.dot_dimension_numbers<[1], [0], [0], [1], [0, 0, 1, 1], [], []>} : vector<16x64xbf16>, vector<64x128xbf16>, vector<16x128xf32> -> vector<16x128xf32>
    %51 = arith.addf %46, %50 : vector<16x128xf32>
    %c0_53 = arith.constant 0 : index
    %c2_54 = arith.constant 2 : index
    %c0_55 = arith.constant 0 : index
    %c0_56 = arith.constant 0 : index
    %52 = vector.load %arg7[%c0_53, %c2_54, %c0_55, %c0_56] : memref<1x6x6x64xbf16, #tpu.memory_space<vmem>>, vector<1x4x4x64xbf16>
    %53 = vector.shape_cast %52 : vector<1x4x4x64xbf16> to vector<16x64xbf16>
    %c384 = arith.constant 384 : index
    %c0_57 = arith.constant 0 : index
    %54 = vector.load %arg2[%c384, %c0_57] : memref<576x128xbf16, #tpu.memory_space<vmem>>, vector<64x128xbf16>
    %cst_58 = arith.constant dense<0.000000e+00> : vector<16x128xf32>
    %55 = tpu.matmul %53, %54, %cst_58 {dimension_numbers = #tpu.dot_dimension_numbers<[1], [0], [0], [1], [0, 0, 1, 1], [], []>} : vector<16x64xbf16>, vector<64x128xbf16>, vector<16x128xf32> -> vector<16x128xf32>
    %56 = arith.addf %51, %55 : vector<16x128xf32>
    %c0_59 = arith.constant 0 : index
    %c2_60 = arith.constant 2 : index
    %c1_61 = arith.constant 1 : index
    %c0_62 = arith.constant 0 : index
    %57 = vector.load %arg7[%c0_59, %c2_60, %c1_61, %c0_62] : memref<1x6x6x64xbf16, #tpu.memory_space<vmem>>, vector<1x4x4x64xbf16>
    %58 = vector.shape_cast %57 : vector<1x4x4x64xbf16> to vector<16x64xbf16>
    %c448 = arith.constant 448 : index
    %c0_63 = arith.constant 0 : index
    %59 = vector.load %arg2[%c448, %c0_63] : memref<576x128xbf16, #tpu.memory_space<vmem>>, vector<64x128xbf16>
    %cst_64 = arith.constant dense<0.000000e+00> : vector<16x128xf32>
    %60 = tpu.matmul %58, %59, %cst_64 {dimension_numbers = #tpu.dot_dimension_numbers<[1], [0], [0], [1], [0, 0, 1, 1], [], []>} : vector<16x64xbf16>, vector<64x128xbf16>, vector<16x128xf32> -> vector<16x128xf32>
    %61 = arith.addf %56, %60 : vector<16x128xf32>
    %c0_65 = arith.constant 0 : index
    %c2_66 = arith.constant 2 : index
    %c2_67 = arith.constant 2 : index
    %c0_68 = arith.constant 0 : index
    %62 = vector.load %arg7[%c0_65, %c2_66, %c2_67, %c0_68] : memref<1x6x6x64xbf16, #tpu.memory_space<vmem>>, vector<1x4x4x64xbf16>
    %63 = vector.shape_cast %62 : vector<1x4x4x64xbf16> to vector<16x64xbf16>
    %c512 = arith.constant 512 : index
    %c0_69 = arith.constant 0 : index
    %64 = vector.load %arg2[%c512, %c0_69] : memref<576x128xbf16, #tpu.memory_space<vmem>>, vector<64x128xbf16>
    %cst_70 = arith.constant dense<0.000000e+00> : vector<16x128xf32>
    %65 = tpu.matmul %63, %64, %cst_70 {dimension_numbers = #tpu.dot_dimension_numbers<[1], [0], [0], [1], [0, 0, 1, 1], [], []>} : vector<16x64xbf16>, vector<64x128xbf16>, vector<16x128xf32> -> vector<16x128xf32>
    %66 = arith.addf %61, %65 : vector<16x128xf32>
    %67 = vector.shape_cast %66 : vector<16x128xf32> to vector<1x4x4x128xf32>
    %68 = arith.truncf %67 : vector<1x4x4x128xf32> to vector<1x4x4x128xbf16>
    %c0_71 = arith.constant 0 : index
    %c0_72 = arith.constant 0 : index
    %c0_73 = arith.constant 0 : index
    %c0_74 = arith.constant 0 : index
    %69 = vector.load %arg5[%c0_71, %c0_72, %c0_73, %c0_74] : memref<1x4x4x128xbf16, #tpu.memory_space<vmem>>, vector<1x4x4x128xbf16>
    tpu.vector_store %arg5[%c0_71, %c0_72, %c0_73, %c0_74], %68 {strides = array<i32>} : memref<1x4x4x128xbf16, #tpu.memory_space<vmem>>, vector<1x4x4x128xbf16>,
    %cst_75 = arith.constant dense<0.000000e+00> : vector<128xf32>
    %70 = vector.multi_reduction <add>, %66, %cst_75 [0] : vector<16x128xf32> to vector<128xf32>
    %71 = vector.shape_cast %70 : vector<128xf32> to vector<1x128xf32>
    %72 = arith.mulf %66, %66 : vector<16x128xf32>
    %cst_76 = arith.constant dense<0.000000e+00> : vector<128xf32>
    %73 = vector.multi_reduction <add>, %72, %cst_76 [0] : vector<16x128xf32> to vector<128xf32>
    %74 = vector.shape_cast %73 : vector<128xf32> to vector<1x128xf32>
    %75 = tpu.concatenate %71, %74 in 0 : vector<1x128xf32>, vector<1x128xf32> -> vector<2x128xf32>
    %76 = vector.shape_cast %75 : vector<2x128xf32> to vector<1x2x128xf32>
    %c0_77 = arith.constant 0 : index
    %c0_78 = arith.constant 0 : index
    %c0_79 = arith.constant 0 : index
    %77 = vector.load %arg6[%c0_77, %c0_78, %c0_79] : memref<1x2x128xf32, #tpu.memory_space<vmem>>, vector<1x2x128xf32>
    tpu.vector_store %arg6[%c0_77, %c0_78, %c0_79], %76 {strides = array<i32>} : memref<1x2x128xf32, #tpu.memory_space<vmem>>, vector<1x2x128xf32>,
    return
  }
  func.func @transform_0(%arg0: i32) -> (i32, i32, i32, i32) {
    %c0_i32 = arith.constant 0 : i32
    %c0_i32_0 = arith.constant 0 : i32
    %c0_i32_1 = arith.constant 0 : i32
    %c0_i32_2 = arith.constant 0 : i32
    return %arg0, %c0_i32, %c0_i32_0, %c0_i32_1 : i32, i32, i32, i32
  }
  func.func @transform_1(%arg0: i32) -> (i32, i32) {
    %c0_i32 = arith.constant 0 : i32
    %c0_i32_0 = arith.constant 0 : i32
    %c0_i32_1 = arith.constant 0 : i32
    return %c0_i32, %c0_i32_0 : i32, i32
  }
  func.func @transform_2(%arg0: i32) -> (i32, i32) {
    %c0_i32 = arith.constant 0 : i32
    %c0_i32_0 = arith.constant 0 : i32
    %c0_i32_1 = arith.constant 0 : i32
    return %c0_i32, %c0_i32_0 : i32, i32
  }
  func.func @transform_3(%arg0: i32) -> (i32, i32) {
    %c0_i32 = arith.constant 0 : i32
    %c0_i32_0 = arith.constant 0 : i32
    %c0_i32_1 = arith.constant 0 : i32
    return %c0_i32, %c0_i32_0 : i32, i32
  }
  func.func @transform_4(%arg0: i32) -> (i32, i32, i32, i32) {
    %c0_i32 = arith.constant 0 : i32
    %c0_i32_0 = arith.constant 0 : i32
    %c0_i32_1 = arith.constant 0 : i32
    %c0_i32_2 = arith.constant 0 : i32
    return %arg0, %c0_i32, %c0_i32_0, %c0_i32_1 : i32, i32, i32, i32
  }
  func.func @transform_5(%arg0: i32) -> (i32, i32, i32) {
    %c0_i32 = arith.constant 0 : i32
    %c0_i32_0 = arith.constant 0 : i32
    %c0_i32_1 = arith.constant 0 : i32
    return %arg0, %c0_i32, %c0_i32_0 : i32, i32, i32
  }
}

module attributes {stable_mosaic.version = 11 : i64} {
  func.func @_conv_stage_kernel(%arg0: i32, %arg1: memref<1x16x16x32xbf16, #tpu.memory_space<vmem>>, %arg2: memref<288x64xbf16, #tpu.memory_space<vmem>>, %arg3: memref<1x32xf32, #tpu.memory_space<vmem>>, %arg4: memref<1x32xf32, #tpu.memory_space<vmem>>, %arg5: memref<1x8x8x64xbf16, #tpu.memory_space<vmem>>, %arg6: memref<1x2x64xf32, #tpu.memory_space<vmem>>, %arg7: memref<1x10x10x32xbf16, #tpu.memory_space<vmem>>) attributes {dimension_semantics = [#tpu.dimension_semantics<parallel>], iteration_bounds = array<i64: 2>, scalar_prefetch = 0 : i64, scratch_operands = 1 : i64, tpu.core_type = #tpu.core_type<tc>, window_params = [{transform_indices = @transform_0, window_bounds = array<i64: 1, 16, 16, 32>}, {pipeline_mode = #tpu.pipeline_mode<synchronous>, transform_indices = @transform_1, window_bounds = array<i64: 288, 64>}, {pipeline_mode = #tpu.pipeline_mode<synchronous>, transform_indices = @transform_2, window_bounds = array<i64: 1, 32>}, {pipeline_mode = #tpu.pipeline_mode<synchronous>, transform_indices = @transform_3, window_bounds = array<i64: 1, 32>}, {transform_indices = @transform_4, window_bounds = array<i64: 1, 8, 8, 64>}, {transform_indices = @transform_5, window_bounds = array<i64: 1, 2, 64>}]} {
    %c0 = arith.constant 0 : index
    %c0_0 = arith.constant 0 : index
    %c0_1 = arith.constant 0 : index
    %c0_2 = arith.constant 0 : index
    %0 = vector.load %arg1[%c0, %c0_0, %c0_1, %c0_2] : memref<1x16x16x32xbf16, #tpu.memory_space<vmem>>, vector<1x16x16x32xbf16>
    %1 = arith.extf %0 : vector<1x16x16x32xbf16> to vector<1x16x16x32xf32>
    %c0_3 = arith.constant 0 : index
    %c0_4 = arith.constant 0 : index
    %2 = vector.load %arg3[%c0_3, %c0_4] : memref<1x32xf32, #tpu.memory_space<vmem>>, vector<1x32xf32>
    %3 = vector.shape_cast %2 : vector<1x32xf32> to vector<32xf32>
    %4 = vector.shape_cast %3 : vector<32xf32> to vector<1x1x1x32xf32>
    %5 = vector.broadcast %4 : vector<1x1x1x32xf32> to vector<1x16x16x32xf32>
    %6 = arith.mulf %1, %5 : vector<1x16x16x32xf32>
    %c0_5 = arith.constant 0 : index
    %c0_6 = arith.constant 0 : index
    %7 = vector.load %arg4[%c0_5, %c0_6] : memref<1x32xf32, #tpu.memory_space<vmem>>, vector<1x32xf32>
    %8 = vector.shape_cast %7 : vector<1x32xf32> to vector<32xf32>
    %9 = vector.shape_cast %8 : vector<32xf32> to vector<1x1x1x32xf32>
    %10 = vector.broadcast %9 : vector<1x1x1x32xf32> to vector<1x16x16x32xf32>
    %11 = arith.addf %6, %10 : vector<1x16x16x32xf32>
    %cst = arith.constant 1.000000e-01 : f32
    %12 = vector.broadcast %cst : f32 to vector<1x16x16x32xf32>
    %13 = arith.mulf %12, %11 : vector<1x16x16x32xf32>
    %14 = arith.maximumf %11, %13 : vector<1x16x16x32xf32>
    %15 = vector.shape_cast %14 : vector<1x16x16x32xf32> to vector<8x2x16x32xf32>
    %cst_7 = arith.constant dense<0xFF800000> : vector<8x16x32xf32>
    %16 = vector.multi_reduction <maximumf>, %15, %cst_7 [1] : vector<8x2x16x32xf32> to vector<8x16x32xf32>
    %17 = vector.shape_cast %16 : vector<8x16x32xf32> to vector<8x8x2x32xf32>
    %cst_8 = arith.constant dense<0xFF800000> : vector<8x8x32xf32>
    %18 = vector.multi_reduction <maximumf>, %17, %cst_8 [2] : vector<8x8x2x32xf32> to vector<8x8x32xf32>
    %19 = vector.shape_cast %18 : vector<8x8x32xf32> to vector<1x8x8x32xf32>
    %20 = arith.truncf %19 : vector<1x8x8x32xf32> to vector<1x8x8x32xbf16>
    %cst_9 = arith.constant 0.000000e+00 : bf16
    %21 = vector.broadcast %cst_9 : bf16 to vector<1x10x10x32xbf16>
    %c0_10 = arith.constant 0 : index
    %c0_11 = arith.constant 0 : index
    %c0_12 = arith.constant 0 : index
    %c0_13 = arith.constant 0 : index
    %22 = vector.load %arg7[%c0_10, %c0_11, %c0_12, %c0_13] : memref<1x10x10x32xbf16, #tpu.memory_space<vmem>>, vector<1x10x10x32xbf16>
    tpu.vector_store %arg7[%c0_10, %c0_11, %c0_12, %c0_13], %21 {strides = array<i32>} : memref<1x10x10x32xbf16, #tpu.memory_space<vmem>>, vector<1x10x10x32xbf16>,
    %c0_14 = arith.constant 0 : index
    %c1 = arith.constant 1 : index
    %c1_15 = arith.constant 1 : index
    %c0_16 = arith.constant 0 : index
    %23 = vector.load %arg7[%c0_14, %c1, %c1_15, %c0_16] : memref<1x10x10x32xbf16, #tpu.memory_space<vmem>>, vector<1x8x8x32xbf16>
    tpu.vector_store %arg7[%c0_14, %c1, %c1_15, %c0_16], %20 {strides = array<i32>} : memref<1x10x10x32xbf16, #tpu.memory_space<vmem>>, vector<1x8x8x32xbf16>,
    %c0_17 = arith.constant 0 : index
    %c0_18 = arith.constant 0 : index
    %c0_19 = arith.constant 0 : index
    %c0_20 = arith.constant 0 : index
    %24 = vector.load %arg7[%c0_17, %c0_18, %c0_19, %c0_20] : memref<1x10x10x32xbf16, #tpu.memory_space<vmem>>, vector<1x8x8x32xbf16>
    %c0_21 = arith.constant 0 : index
    %c0_22 = arith.constant 0 : index
    %c1_23 = arith.constant 1 : index
    %c0_24 = arith.constant 0 : index
    %25 = vector.load %arg7[%c0_21, %c0_22, %c1_23, %c0_24] : memref<1x10x10x32xbf16, #tpu.memory_space<vmem>>, vector<1x8x8x32xbf16>
    %c0_25 = arith.constant 0 : index
    %c0_26 = arith.constant 0 : index
    %c2 = arith.constant 2 : index
    %c0_27 = arith.constant 0 : index
    %26 = vector.load %arg7[%c0_25, %c0_26, %c2, %c0_27] : memref<1x10x10x32xbf16, #tpu.memory_space<vmem>>, vector<1x8x8x32xbf16>
    %c0_28 = arith.constant 0 : index
    %c1_29 = arith.constant 1 : index
    %c0_30 = arith.constant 0 : index
    %c0_31 = arith.constant 0 : index
    %27 = vector.load %arg7[%c0_28, %c1_29, %c0_30, %c0_31] : memref<1x10x10x32xbf16, #tpu.memory_space<vmem>>, vector<1x8x8x32xbf16>
    %c0_32 = arith.constant 0 : index
    %c1_33 = arith.constant 1 : index
    %c1_34 = arith.constant 1 : index
    %c0_35 = arith.constant 0 : index
    %28 = vector.load %arg7[%c0_32, %c1_33, %c1_34, %c0_35] : memref<1x10x10x32xbf16, #tpu.memory_space<vmem>>, vector<1x8x8x32xbf16>
    %c0_36 = arith.constant 0 : index
    %c1_37 = arith.constant 1 : index
    %c2_38 = arith.constant 2 : index
    %c0_39 = arith.constant 0 : index
    %29 = vector.load %arg7[%c0_36, %c1_37, %c2_38, %c0_39] : memref<1x10x10x32xbf16, #tpu.memory_space<vmem>>, vector<1x8x8x32xbf16>
    %c0_40 = arith.constant 0 : index
    %c2_41 = arith.constant 2 : index
    %c0_42 = arith.constant 0 : index
    %c0_43 = arith.constant 0 : index
    %30 = vector.load %arg7[%c0_40, %c2_41, %c0_42, %c0_43] : memref<1x10x10x32xbf16, #tpu.memory_space<vmem>>, vector<1x8x8x32xbf16>
    %c0_44 = arith.constant 0 : index
    %c2_45 = arith.constant 2 : index
    %c1_46 = arith.constant 1 : index
    %c0_47 = arith.constant 0 : index
    %31 = vector.load %arg7[%c0_44, %c2_45, %c1_46, %c0_47] : memref<1x10x10x32xbf16, #tpu.memory_space<vmem>>, vector<1x8x8x32xbf16>
    %c0_48 = arith.constant 0 : index
    %c2_49 = arith.constant 2 : index
    %c2_50 = arith.constant 2 : index
    %c0_51 = arith.constant 0 : index
    %32 = vector.load %arg7[%c0_48, %c2_49, %c2_50, %c0_51] : memref<1x10x10x32xbf16, #tpu.memory_space<vmem>>, vector<1x8x8x32xbf16>
    %33 = tpu.concatenate %24, %25, %26, %27, %28, %29, %30, %31, %32 in 3 : vector<1x8x8x32xbf16>, vector<1x8x8x32xbf16>, vector<1x8x8x32xbf16>, vector<1x8x8x32xbf16>, vector<1x8x8x32xbf16>, vector<1x8x8x32xbf16>, vector<1x8x8x32xbf16>, vector<1x8x8x32xbf16>, vector<1x8x8x32xbf16> -> vector<1x8x8x288xbf16>
    %34 = vector.shape_cast %33 : vector<1x8x8x288xbf16> to vector<64x288xbf16>
    %c0_52 = arith.constant 0 : index
    %c0_53 = arith.constant 0 : index
    %35 = vector.load %arg2[%c0_52, %c0_53] : memref<288x64xbf16, #tpu.memory_space<vmem>>, vector<288x64xbf16>
    %cst_54 = arith.constant dense<0.000000e+00> : vector<64x64xf32>
    %36 = tpu.matmul %34, %35, %cst_54 {dimension_numbers = #tpu.dot_dimension_numbers<[1], [0], [0], [1], [0, 0, 1, 1], [], []>} : vector<64x288xbf16>, vector<288x64xbf16>, vector<64x64xf32> -> vector<64x64xf32>
    %37 = vector.shape_cast %36 : vector<64x64xf32> to vector<1x8x8x64xf32>
    %38 = arith.truncf %37 : vector<1x8x8x64xf32> to vector<1x8x8x64xbf16>
    %c0_55 = arith.constant 0 : index
    %c0_56 = arith.constant 0 : index
    %c0_57 = arith.constant 0 : index
    %c0_58 = arith.constant 0 : index
    %39 = vector.load %arg5[%c0_55, %c0_56, %c0_57, %c0_58] : memref<1x8x8x64xbf16, #tpu.memory_space<vmem>>, vector<1x8x8x64xbf16>
    tpu.vector_store %arg5[%c0_55, %c0_56, %c0_57, %c0_58], %38 {strides = array<i32>} : memref<1x8x8x64xbf16, #tpu.memory_space<vmem>>, vector<1x8x8x64xbf16>,
    %cst_59 = arith.constant dense<0.000000e+00> : vector<64xf32>
    %40 = vector.multi_reduction <add>, %36, %cst_59 [0] : vector<64x64xf32> to vector<64xf32>
    %41 = vector.shape_cast %40 : vector<64xf32> to vector<1x64xf32>
    %42 = arith.mulf %36, %36 : vector<64x64xf32>
    %cst_60 = arith.constant dense<0.000000e+00> : vector<64xf32>
    %43 = vector.multi_reduction <add>, %42, %cst_60 [0] : vector<64x64xf32> to vector<64xf32>
    %44 = vector.shape_cast %43 : vector<64xf32> to vector<1x64xf32>
    %45 = tpu.concatenate %41, %44 in 0 : vector<1x64xf32>, vector<1x64xf32> -> vector<2x64xf32>
    %46 = vector.shape_cast %45 : vector<2x64xf32> to vector<1x2x64xf32>
    %c0_61 = arith.constant 0 : index
    %c0_62 = arith.constant 0 : index
    %c0_63 = arith.constant 0 : index
    %47 = vector.load %arg6[%c0_61, %c0_62, %c0_63] : memref<1x2x64xf32, #tpu.memory_space<vmem>>, vector<1x2x64xf32>
    tpu.vector_store %arg6[%c0_61, %c0_62, %c0_63], %46 {strides = array<i32>} : memref<1x2x64xf32, #tpu.memory_space<vmem>>, vector<1x2x64xf32>,
    return
  }
  func.func @transform_0(%arg0: i32) -> (i32, i32, i32, i32) {
    %c0_i32 = arith.constant 0 : i32
    %c0_i32_0 = arith.constant 0 : i32
    %c0_i32_1 = arith.constant 0 : i32
    %c0_i32_2 = arith.constant 0 : i32
    return %arg0, %c0_i32, %c0_i32_0, %c0_i32_1 : i32, i32, i32, i32
  }
  func.func @transform_1(%arg0: i32) -> (i32, i32) {
    %c0_i32 = arith.constant 0 : i32
    %c0_i32_0 = arith.constant 0 : i32
    %c0_i32_1 = arith.constant 0 : i32
    return %c0_i32, %c0_i32_0 : i32, i32
  }
  func.func @transform_2(%arg0: i32) -> (i32, i32) {
    %c0_i32 = arith.constant 0 : i32
    %c0_i32_0 = arith.constant 0 : i32
    %c0_i32_1 = arith.constant 0 : i32
    return %c0_i32, %c0_i32_0 : i32, i32
  }
  func.func @transform_3(%arg0: i32) -> (i32, i32) {
    %c0_i32 = arith.constant 0 : i32
    %c0_i32_0 = arith.constant 0 : i32
    %c0_i32_1 = arith.constant 0 : i32
    return %c0_i32, %c0_i32_0 : i32, i32
  }
  func.func @transform_4(%arg0: i32) -> (i32, i32, i32, i32) {
    %c0_i32 = arith.constant 0 : i32
    %c0_i32_0 = arith.constant 0 : i32
    %c0_i32_1 = arith.constant 0 : i32
    %c0_i32_2 = arith.constant 0 : i32
    return %arg0, %c0_i32, %c0_i32_0, %c0_i32_1 : i32, i32, i32, i32
  }
  func.func @transform_5(%arg0: i32) -> (i32, i32, i32) {
    %c0_i32 = arith.constant 0 : i32
    %c0_i32_0 = arith.constant 0 : i32
    %c0_i32_1 = arith.constant 0 : i32
    return %arg0, %c0_i32, %c0_i32_0 : i32, i32, i32
  }
}

module attributes {stable_mosaic.version = 11 : i64} {
  func.func @_conv_stage_kernel(%arg0: i32, %arg1: memref<1x4x4x128xbf16, #tpu.memory_space<vmem>>, %arg2: memref<1152x256xbf16, #tpu.memory_space<vmem>>, %arg3: memref<1x128xf32, #tpu.memory_space<vmem>>, %arg4: memref<1x128xf32, #tpu.memory_space<vmem>>, %arg5: memref<1x2x2x256xbf16, #tpu.memory_space<vmem>>, %arg6: memref<1x2x256xf32, #tpu.memory_space<vmem>>, %arg7: memref<1x4x4x128xbf16, #tpu.memory_space<vmem>>) attributes {dimension_semantics = [#tpu.dimension_semantics<parallel>], iteration_bounds = array<i64: 2>, scalar_prefetch = 0 : i64, scratch_operands = 1 : i64, tpu.core_type = #tpu.core_type<tc>, window_params = [{transform_indices = @transform_0, window_bounds = array<i64: 1, 4, 4, 128>}, {pipeline_mode = #tpu.pipeline_mode<synchronous>, transform_indices = @transform_1, window_bounds = array<i64: 1152, 256>}, {pipeline_mode = #tpu.pipeline_mode<synchronous>, transform_indices = @transform_2, window_bounds = array<i64: 1, 128>}, {pipeline_mode = #tpu.pipeline_mode<synchronous>, transform_indices = @transform_3, window_bounds = array<i64: 1, 128>}, {transform_indices = @transform_4, window_bounds = array<i64: 1, 2, 2, 256>}, {transform_indices = @transform_5, window_bounds = array<i64: 1, 2, 256>}]} {
    %c0 = arith.constant 0 : index
    %c0_0 = arith.constant 0 : index
    %c0_1 = arith.constant 0 : index
    %c0_2 = arith.constant 0 : index
    %0 = vector.load %arg1[%c0, %c0_0, %c0_1, %c0_2] : memref<1x4x4x128xbf16, #tpu.memory_space<vmem>>, vector<1x4x4x128xbf16>
    %1 = arith.extf %0 : vector<1x4x4x128xbf16> to vector<1x4x4x128xf32>
    %c0_3 = arith.constant 0 : index
    %c0_4 = arith.constant 0 : index
    %2 = vector.load %arg3[%c0_3, %c0_4] : memref<1x128xf32, #tpu.memory_space<vmem>>, vector<1x128xf32>
    %3 = vector.shape_cast %2 : vector<1x128xf32> to vector<128xf32>
    %4 = vector.shape_cast %3 : vector<128xf32> to vector<1x1x1x128xf32>
    %5 = vector.broadcast %4 : vector<1x1x1x128xf32> to vector<1x4x4x128xf32>
    %6 = arith.mulf %1, %5 : vector<1x4x4x128xf32>
    %c0_5 = arith.constant 0 : index
    %c0_6 = arith.constant 0 : index
    %7 = vector.load %arg4[%c0_5, %c0_6] : memref<1x128xf32, #tpu.memory_space<vmem>>, vector<1x128xf32>
    %8 = vector.shape_cast %7 : vector<1x128xf32> to vector<128xf32>
    %9 = vector.shape_cast %8 : vector<128xf32> to vector<1x1x1x128xf32>
    %10 = vector.broadcast %9 : vector<1x1x1x128xf32> to vector<1x4x4x128xf32>
    %11 = arith.addf %6, %10 : vector<1x4x4x128xf32>
    %cst = arith.constant 1.000000e-01 : f32
    %12 = vector.broadcast %cst : f32 to vector<1x4x4x128xf32>
    %13 = arith.mulf %12, %11 : vector<1x4x4x128xf32>
    %14 = arith.maximumf %11, %13 : vector<1x4x4x128xf32>
    %15 = vector.shape_cast %14 : vector<1x4x4x128xf32> to vector<2x2x4x128xf32>
    %cst_7 = arith.constant dense<0xFF800000> : vector<2x4x128xf32>
    %16 = vector.multi_reduction <maximumf>, %15, %cst_7 [1] : vector<2x2x4x128xf32> to vector<2x4x128xf32>
    %17 = vector.shape_cast %16 : vector<2x4x128xf32> to vector<2x2x2x128xf32>
    %cst_8 = arith.constant dense<0xFF800000> : vector<2x2x128xf32>
    %18 = vector.multi_reduction <maximumf>, %17, %cst_8 [2] : vector<2x2x2x128xf32> to vector<2x2x128xf32>
    %19 = vector.shape_cast %18 : vector<2x2x128xf32> to vector<1x2x2x128xf32>
    %20 = arith.truncf %19 : vector<1x2x2x128xf32> to vector<1x2x2x128xbf16>
    %cst_9 = arith.constant 0.000000e+00 : bf16
    %21 = vector.broadcast %cst_9 : bf16 to vector<1x4x4x128xbf16>
    %c0_10 = arith.constant 0 : index
    %c0_11 = arith.constant 0 : index
    %c0_12 = arith.constant 0 : index
    %c0_13 = arith.constant 0 : index
    %22 = vector.load %arg7[%c0_10, %c0_11, %c0_12, %c0_13] : memref<1x4x4x128xbf16, #tpu.memory_space<vmem>>, vector<1x4x4x128xbf16>
    tpu.vector_store %arg7[%c0_10, %c0_11, %c0_12, %c0_13], %21 {strides = array<i32>} : memref<1x4x4x128xbf16, #tpu.memory_space<vmem>>, vector<1x4x4x128xbf16>,
    %c0_14 = arith.constant 0 : index
    %c1 = arith.constant 1 : index
    %c1_15 = arith.constant 1 : index
    %c0_16 = arith.constant 0 : index
    %23 = vector.load %arg7[%c0_14, %c1, %c1_15, %c0_16] : memref<1x4x4x128xbf16, #tpu.memory_space<vmem>>, vector<1x2x2x128xbf16>
    tpu.vector_store %arg7[%c0_14, %c1, %c1_15, %c0_16], %20 {strides = array<i32>} : memref<1x4x4x128xbf16, #tpu.memory_space<vmem>>, vector<1x2x2x128xbf16>,
    %cst_17 = arith.constant 0.000000e+00 : f32
    %24 = vector.broadcast %cst_17 : f32 to vector<4x256xf32>
    %c0_18 = arith.constant 0 : index
    %c0_19 = arith.constant 0 : index
    %c0_20 = arith.constant 0 : index
    %c0_21 = arith.constant 0 : index
    %25 = vector.load %arg7[%c0_18, %c0_19, %c0_20, %c0_21] : memref<1x4x4x128xbf16, #tpu.memory_space<vmem>>, vector<1x2x2x128xbf16>
    %26 = vector.shape_cast %25 : vector<1x2x2x128xbf16> to vector<4x128xbf16>
    %c0_22 = arith.constant 0 : index
    %c0_23 = arith.constant 0 : index
    %27 = vector.load %arg2[%c0_22, %c0_23] : memref<1152x256xbf16, #tpu.memory_space<vmem>>, vector<128x256xbf16>
    %cst_24 = arith.constant dense<0.000000e+00> : vector<4x256xf32>
    %28 = tpu.matmul %26, %27, %cst_24 {dimension_numbers = #tpu.dot_dimension_numbers<[1], [0], [0], [1], [0, 0, 1, 1], [], []>} : vector<4x128xbf16>, vector<128x256xbf16>, vector<4x256xf32> -> vector<4x256xf32>
    %29 = arith.addf %24, %28 : vector<4x256xf32>
    %c0_25 = arith.constant 0 : index
    %c0_26 = arith.constant 0 : index
    %c1_27 = arith.constant 1 : index
    %c0_28 = arith.constant 0 : index
    %30 = vector.load %arg7[%c0_25, %c0_26, %c1_27, %c0_28] : memref<1x4x4x128xbf16, #tpu.memory_space<vmem>>, vector<1x2x2x128xbf16>
    %31 = vector.shape_cast %30 : vector<1x2x2x128xbf16> to vector<4x128xbf16>
    %c128 = arith.constant 128 : index
    %c0_29 = arith.constant 0 : index
    %32 = vector.load %arg2[%c128, %c0_29] : memref<1152x256xbf16, #tpu.memory_space<vmem>>, vector<128x256xbf16>
    %cst_30 = arith.constant dense<0.000000e+00> : vector<4x256xf32>
    %33 = tpu.matmul %31, %32, %cst_30 {dimension_numbers = #tpu.dot_dimension_numbers<[1], [0], [0], [1], [0, 0, 1, 1], [], []>} : vector<4x128xbf16>, vector<128x256xbf16>, vector<4x256xf32> -> vector<4x256xf32>
    %34 = arith.addf %29, %33 : vector<4x256xf32>
    %c0_31 = arith.constant 0 : index
    %c0_32 = arith.constant 0 : index
    %c2 = arith.constant 2 : index
    %c0_33 = arith.constant 0 : index
    %35 = vector.load %arg7[%c0_31, %c0_32, %c2, %c0_33] : memref<1x4x4x128xbf16, #tpu.memory_space<vmem>>, vector<1x2x2x128xbf16>
    %36 = vector.shape_cast %35 : vector<1x2x2x128xbf16> to vector<4x128xbf16>
    %c256 = arith.constant 256 : index
    %c0_34 = arith.constant 0 : index
    %37 = vector.load %arg2[%c256, %c0_34] : memref<1152x256xbf16, #tpu.memory_space<vmem>>, vector<128x256xbf16>
    %cst_35 = arith.constant dense<0.000000e+00> : vector<4x256xf32>
    %38 = tpu.matmul %36, %37, %cst_35 {dimension_numbers = #tpu.dot_dimension_numbers<[1], [0], [0], [1], [0, 0, 1, 1], [], []>} : vector<4x128xbf16>, vector<128x256xbf16>, vector<4x256xf32> -> vector<4x256xf32>
    %39 = arith.addf %34, %38 : vector<4x256xf32>
    %c0_36 = arith.constant 0 : index
    %c1_37 = arith.constant 1 : index
    %c0_38 = arith.constant 0 : index
    %c0_39 = arith.constant 0 : index
    %40 = vector.load %arg7[%c0_36, %c1_37, %c0_38, %c0_39] : memref<1x4x4x128xbf16, #tpu.memory_space<vmem>>, vector<1x2x2x128xbf16>
    %41 = vector.shape_cast %40 : vector<1x2x2x128xbf16> to vector<4x128xbf16>
    %c384 = arith.constant 384 : index
    %c0_40 = arith.constant 0 : index
    %42 = vector.load %arg2[%c384, %c0_40] : memref<1152x256xbf16, #tpu.memory_space<vmem>>, vector<128x256xbf16>
    %cst_41 = arith.constant dense<0.000000e+00> : vector<4x256xf32>
    %43 = tpu.matmul %41, %42, %cst_41 {dimension_numbers = #tpu.dot_dimension_numbers<[1], [0], [0], [1], [0, 0, 1, 1], [], []>} : vector<4x128xbf16>, vector<128x256xbf16>, vector<4x256xf32> -> vector<4x256xf32>
    %44 = arith.addf %39, %43 : vector<4x256xf32>
    %c0_42 = arith.constant 0 : index
    %c1_43 = arith.constant 1 : index
    %c1_44 = arith.constant 1 : index
    %c0_45 = arith.constant 0 : index
    %45 = vector.load %arg7[%c0_42, %c1_43, %c1_44, %c0_45] : memref<1x4x4x128xbf16, #tpu.memory_space<vmem>>, vector<1x2x2x128xbf16>
    %46 = vector.shape_cast %45 : vector<1x2x2x128xbf16> to vector<4x128xbf16>
    %c512 = arith.constant 512 : index
    %c0_46 = arith.constant 0 : index
    %47 = vector.load %arg2[%c512, %c0_46] : memref<1152x256xbf16, #tpu.memory_space<vmem>>, vector<128x256xbf16>
    %cst_47 = arith.constant dense<0.000000e+00> : vector<4x256xf32>
    %48 = tpu.matmul %46, %47, %cst_47 {dimension_numbers = #tpu.dot_dimension_numbers<[1], [0], [0], [1], [0, 0, 1, 1], [], []>} : vector<4x128xbf16>, vector<128x256xbf16>, vector<4x256xf32> -> vector<4x256xf32>
    %49 = arith.addf %44, %48 : vector<4x256xf32>
    %c0_48 = arith.constant 0 : index
    %c1_49 = arith.constant 1 : index
    %c2_50 = arith.constant 2 : index
    %c0_51 = arith.constant 0 : index
    %50 = vector.load %arg7[%c0_48, %c1_49, %c2_50, %c0_51] : memref<1x4x4x128xbf16, #tpu.memory_space<vmem>>, vector<1x2x2x128xbf16>
    %51 = vector.shape_cast %50 : vector<1x2x2x128xbf16> to vector<4x128xbf16>
    %c640 = arith.constant 640 : index
    %c0_52 = arith.constant 0 : index
    %52 = vector.load %arg2[%c640, %c0_52] : memref<1152x256xbf16, #tpu.memory_space<vmem>>, vector<128x256xbf16>
    %cst_53 = arith.constant dense<0.000000e+00> : vector<4x256xf32>
    %53 = tpu.matmul %51, %52, %cst_53 {dimension_numbers = #tpu.dot_dimension_numbers<[1], [0], [0], [1], [0, 0, 1, 1], [], []>} : vector<4x128xbf16>, vector<128x256xbf16>, vector<4x256xf32> -> vector<4x256xf32>
    %54 = arith.addf %49, %53 : vector<4x256xf32>
    %c0_54 = arith.constant 0 : index
    %c2_55 = arith.constant 2 : index
    %c0_56 = arith.constant 0 : index
    %c0_57 = arith.constant 0 : index
    %55 = vector.load %arg7[%c0_54, %c2_55, %c0_56, %c0_57] : memref<1x4x4x128xbf16, #tpu.memory_space<vmem>>, vector<1x2x2x128xbf16>
    %56 = vector.shape_cast %55 : vector<1x2x2x128xbf16> to vector<4x128xbf16>
    %c768 = arith.constant 768 : index
    %c0_58 = arith.constant 0 : index
    %57 = vector.load %arg2[%c768, %c0_58] : memref<1152x256xbf16, #tpu.memory_space<vmem>>, vector<128x256xbf16>
    %cst_59 = arith.constant dense<0.000000e+00> : vector<4x256xf32>
    %58 = tpu.matmul %56, %57, %cst_59 {dimension_numbers = #tpu.dot_dimension_numbers<[1], [0], [0], [1], [0, 0, 1, 1], [], []>} : vector<4x128xbf16>, vector<128x256xbf16>, vector<4x256xf32> -> vector<4x256xf32>
    %59 = arith.addf %54, %58 : vector<4x256xf32>
    %c0_60 = arith.constant 0 : index
    %c2_61 = arith.constant 2 : index
    %c1_62 = arith.constant 1 : index
    %c0_63 = arith.constant 0 : index
    %60 = vector.load %arg7[%c0_60, %c2_61, %c1_62, %c0_63] : memref<1x4x4x128xbf16, #tpu.memory_space<vmem>>, vector<1x2x2x128xbf16>
    %61 = vector.shape_cast %60 : vector<1x2x2x128xbf16> to vector<4x128xbf16>
    %c896 = arith.constant 896 : index
    %c0_64 = arith.constant 0 : index
    %62 = vector.load %arg2[%c896, %c0_64] : memref<1152x256xbf16, #tpu.memory_space<vmem>>, vector<128x256xbf16>
    %cst_65 = arith.constant dense<0.000000e+00> : vector<4x256xf32>
    %63 = tpu.matmul %61, %62, %cst_65 {dimension_numbers = #tpu.dot_dimension_numbers<[1], [0], [0], [1], [0, 0, 1, 1], [], []>} : vector<4x128xbf16>, vector<128x256xbf16>, vector<4x256xf32> -> vector<4x256xf32>
    %64 = arith.addf %59, %63 : vector<4x256xf32>
    %c0_66 = arith.constant 0 : index
    %c2_67 = arith.constant 2 : index
    %c2_68 = arith.constant 2 : index
    %c0_69 = arith.constant 0 : index
    %65 = vector.load %arg7[%c0_66, %c2_67, %c2_68, %c0_69] : memref<1x4x4x128xbf16, #tpu.memory_space<vmem>>, vector<1x2x2x128xbf16>
    %66 = vector.shape_cast %65 : vector<1x2x2x128xbf16> to vector<4x128xbf16>
    %c1024 = arith.constant 1024 : index
    %c0_70 = arith.constant 0 : index
    %67 = vector.load %arg2[%c1024, %c0_70] : memref<1152x256xbf16, #tpu.memory_space<vmem>>, vector<128x256xbf16>
    %cst_71 = arith.constant dense<0.000000e+00> : vector<4x256xf32>
    %68 = tpu.matmul %66, %67, %cst_71 {dimension_numbers = #tpu.dot_dimension_numbers<[1], [0], [0], [1], [0, 0, 1, 1], [], []>} : vector<4x128xbf16>, vector<128x256xbf16>, vector<4x256xf32> -> vector<4x256xf32>
    %69 = arith.addf %64, %68 : vector<4x256xf32>
    %70 = vector.shape_cast %69 : vector<4x256xf32> to vector<1x2x2x256xf32>
    %71 = arith.truncf %70 : vector<1x2x2x256xf32> to vector<1x2x2x256xbf16>
    %c0_72 = arith.constant 0 : index
    %c0_73 = arith.constant 0 : index
    %c0_74 = arith.constant 0 : index
    %c0_75 = arith.constant 0 : index
    %72 = vector.load %arg5[%c0_72, %c0_73, %c0_74, %c0_75] : memref<1x2x2x256xbf16, #tpu.memory_space<vmem>>, vector<1x2x2x256xbf16>
    tpu.vector_store %arg5[%c0_72, %c0_73, %c0_74, %c0_75], %71 {strides = array<i32>} : memref<1x2x2x256xbf16, #tpu.memory_space<vmem>>, vector<1x2x2x256xbf16>,
    %cst_76 = arith.constant dense<0.000000e+00> : vector<256xf32>
    %73 = vector.multi_reduction <add>, %69, %cst_76 [0] : vector<4x256xf32> to vector<256xf32>
    %74 = vector.shape_cast %73 : vector<256xf32> to vector<1x256xf32>
    %75 = arith.mulf %69, %69 : vector<4x256xf32>
    %cst_77 = arith.constant dense<0.000000e+00> : vector<256xf32>
    %76 = vector.multi_reduction <add>, %75, %cst_77 [0] : vector<4x256xf32> to vector<256xf32>
    %77 = vector.shape_cast %76 : vector<256xf32> to vector<1x256xf32>
    %78 = tpu.concatenate %74, %77 in 0 : vector<1x256xf32>, vector<1x256xf32> -> vector<2x256xf32>
    %79 = vector.shape_cast %78 : vector<2x256xf32> to vector<1x2x256xf32>
    %c0_78 = arith.constant 0 : index
    %c0_79 = arith.constant 0 : index
    %c0_80 = arith.constant 0 : index
    %80 = vector.load %arg6[%c0_78, %c0_79, %c0_80] : memref<1x2x256xf32, #tpu.memory_space<vmem>>, vector<1x2x256xf32>
    tpu.vector_store %arg6[%c0_78, %c0_79, %c0_80], %79 {strides = array<i32>} : memref<1x2x256xf32, #tpu.memory_space<vmem>>, vector<1x2x256xf32>,
    return
  }
  func.func @transform_0(%arg0: i32) -> (i32, i32, i32, i32) {
    %c0_i32 = arith.constant 0 : i32
    %c0_i32_0 = arith.constant 0 : i32
    %c0_i32_1 = arith.constant 0 : i32
    %c0_i32_2 = arith.constant 0 : i32
    return %arg0, %c0_i32, %c0_i32_0, %c0_i32_1 : i32, i32, i32, i32
  }
  func.func @transform_1(%arg0: i32) -> (i32, i32) {
    %c0_i32 = arith.constant 0 : i32
    %c0_i32_0 = arith.constant 0 : i32
    %c0_i32_1 = arith.constant 0 : i32
    return %c0_i32, %c0_i32_0 : i32, i32
  }
  func.func @transform_2(%arg0: i32) -> (i32, i32) {
    %c0_i32 = arith.constant 0 : i32
    %c0_i32_0 = arith.constant 0 : i32
    %c0_i32_1 = arith.constant 0 : i32
    return %c0_i32, %c0_i32_0 : i32, i32
  }
  func.func @transform_3(%arg0: i32) -> (i32, i32) {
    %c0_i32 = arith.constant 0 : i32
    %c0_i32_0 = arith.constant 0 : i32
    %c0_i32_1 = arith.constant 0 : i32
    return %c0_i32, %c0_i32_0 : i32, i32
  }
  func.func @transform_4(%arg0: i32) -> (i32, i32, i32, i32) {
    %c0_i32 = arith.constant 0 : i32
    %c0_i32_0 = arith.constant 0 : i32
    %c0_i32_1 = arith.constant 0 : i32
    %c0_i32_2 = arith.constant 0 : i32
    return %arg0, %c0_i32, %c0_i32_0, %c0_i32_1 : i32, i32, i32, i32
  }
  func.func @transform_5(%arg0: i32) -> (i32, i32, i32) {
    %c0_i32 = arith.constant 0 : i32
    %c0_i32_0 = arith.constant 0 : i32
    %c0_i32_1 = arith.constant 0 : i32
    return %arg0, %c0_i32, %c0_i32_0 : i32, i32, i32
  }
}

module attributes {stable_mosaic.version = 11 : i64} {
  func.func @_bn_act_kernel(%arg0: i32, %arg1: memref<1x2x2x256xbf16, #tpu.memory_space<vmem>>, %arg2: memref<1x256xf32, #tpu.memory_space<vmem>>, %arg3: memref<1x256xf32, #tpu.memory_space<vmem>>, %arg4: memref<1x2x2x256xf32, #tpu.memory_space<vmem>>) attributes {dimension_semantics = [#tpu.dimension_semantics<parallel>], iteration_bounds = array<i64: 2>, scalar_prefetch = 0 : i64, scratch_operands = 0 : i64, tpu.core_type = #tpu.core_type<tc>, window_params = [{transform_indices = @transform_0, window_bounds = array<i64: 1, 2, 2, 256>}, {pipeline_mode = #tpu.pipeline_mode<synchronous>, transform_indices = @transform_1, window_bounds = array<i64: 1, 256>}, {pipeline_mode = #tpu.pipeline_mode<synchronous>, transform_indices = @transform_2, window_bounds = array<i64: 1, 256>}, {transform_indices = @transform_3, window_bounds = array<i64: 1, 2, 2, 256>}]} {
    %c0 = arith.constant 0 : index
    %c0_0 = arith.constant 0 : index
    %c0_1 = arith.constant 0 : index
    %c0_2 = arith.constant 0 : index
    %0 = vector.load %arg1[%c0, %c0_0, %c0_1, %c0_2] : memref<1x2x2x256xbf16, #tpu.memory_space<vmem>>, vector<1x2x2x256xbf16>
    %1 = arith.extf %0 : vector<1x2x2x256xbf16> to vector<1x2x2x256xf32>
    %c0_3 = arith.constant 0 : index
    %c0_4 = arith.constant 0 : index
    %2 = vector.load %arg2[%c0_3, %c0_4] : memref<1x256xf32, #tpu.memory_space<vmem>>, vector<1x256xf32>
    %3 = vector.shape_cast %2 : vector<1x256xf32> to vector<256xf32>
    %4 = vector.shape_cast %3 : vector<256xf32> to vector<1x1x1x256xf32>
    %5 = vector.broadcast %4 : vector<1x1x1x256xf32> to vector<1x2x2x256xf32>
    %6 = arith.mulf %1, %5 : vector<1x2x2x256xf32>
    %c0_5 = arith.constant 0 : index
    %c0_6 = arith.constant 0 : index
    %7 = vector.load %arg3[%c0_5, %c0_6] : memref<1x256xf32, #tpu.memory_space<vmem>>, vector<1x256xf32>
    %8 = vector.shape_cast %7 : vector<1x256xf32> to vector<256xf32>
    %9 = vector.shape_cast %8 : vector<256xf32> to vector<1x1x1x256xf32>
    %10 = vector.broadcast %9 : vector<1x1x1x256xf32> to vector<1x2x2x256xf32>
    %11 = arith.addf %6, %10 : vector<1x2x2x256xf32>
    %cst = arith.constant 1.000000e-01 : f32
    %12 = vector.broadcast %cst : f32 to vector<1x2x2x256xf32>
    %13 = arith.mulf %12, %11 : vector<1x2x2x256xf32>
    %14 = arith.maximumf %11, %13 : vector<1x2x2x256xf32>
    %c0_7 = arith.constant 0 : index
    %c0_8 = arith.constant 0 : index
    %c0_9 = arith.constant 0 : index
    %c0_10 = arith.constant 0 : index
    %15 = vector.load %arg4[%c0_7, %c0_8, %c0_9, %c0_10] : memref<1x2x2x256xf32, #tpu.memory_space<vmem>>, vector<1x2x2x256xf32>
    tpu.vector_store %arg4[%c0_7, %c0_8, %c0_9, %c0_10], %14 {strides = array<i32>} : memref<1x2x2x256xf32, #tpu.memory_space<vmem>>, vector<1x2x2x256xf32>,
    return
  }
  func.func @transform_0(%arg0: i32) -> (i32, i32, i32, i32) {
    %c0_i32 = arith.constant 0 : i32
    %c0_i32_0 = arith.constant 0 : i32
    %c0_i32_1 = arith.constant 0 : i32
    %c0_i32_2 = arith.constant 0 : i32
    return %arg0, %c0_i32, %c0_i32_0, %c0_i32_1 : i32, i32, i32, i32
  }
  func.func @transform_1(%arg0: i32) -> (i32, i32) {
    %c0_i32 = arith.constant 0 : i32
    %c0_i32_0 = arith.constant 0 : i32
    %c0_i32_1 = arith.constant 0 : i32
    return %c0_i32, %c0_i32_0 : i32, i32
  }
  func.func @transform_2(%arg0: i32) -> (i32, i32) {
    %c0_i32 = arith.constant 0 : i32
    %c0_i32_0 = arith.constant 0 : i32
    %c0_i32_1 = arith.constant 0 : i32
    return %c0_i32, %c0_i32_0 : i32, i32
  }
  func.func @transform_3(%arg0: i32) -> (i32, i32, i32, i32) {
    %c0_i32 = arith.constant 0 : i32
    %c0_i32_0 = arith.constant 0 : i32
    %c0_i32_1 = arith.constant 0 : i32
    %c0_i32_2 = arith.constant 0 : i32
    return %arg0, %c0_i32, %c0_i32_0, %c0_i32_1 : i32, i32, i32, i32
  }
}

</mosaic_0001>

<bundles_post_ra>
// kernel: darknet_forward.7
= control target key start
LH: loop header
LB: loop body
LE: loop exit
PB: predicated region body
PF: predicated region fallthrough
CT: control target
= control target key end

     0   :  { %11 = vsyncpa [#allocation4], 0  ;;  %s2036_s18 = smov 0   ;;  %s2298_s0 = inlined_call_operand.vmem [shape: bf16[2,8,8,64], index: 0, kind: input, shape index: {}]   ;;  %s2299_s1 = inlined_call_operand.hbm [shape: bf16[576,128], index: 1, kind: input, shape index: {}]   ;;  %s2300_s2 = inlined_call_operand.vmem [shape: f32[1,64], index: 2, kind: input, shape index: {}]   ;;  %s2301_s3 = inlined_call_operand.vmem [shape: f32[1,64], index: 3, kind: input, shape index: {}]   ;;  %s2302_s4 = inlined_call_operand.vmem [shape: bf16[2,4,4,128], index: 4, kind: output, shape index: {0}]   ;;  %s2303_s5 = inlined_call_operand.vmem [shape: f32[2,2,128], index: 5, kind: output, shape index: {1}]  }
   0x1 LB: > { %s174_s21 = sshll.u32 %s2299_s1, 4  ;;  %s1688_s22 = sadd.s32 4294967295, %s2000_s18   ;;  %s2000_s18 = sphi %s2036_s18, %s17_s18   ;;  %s175_s21 = int_to_ptr.hbm [resolvable:$true] %s174_s21 }
   0x2   : > { %p1690_p0 = scmp.ge.s32.totalorder %s2000_s18, 1  ;;  %p163_p1 = scmp.lt.s32.totalorder %s2000_s18, 3 }
   0x3   : > { %p1944_p2 = scmp.eq.s32.totalorder %s1688_s22, 0  ;;  %s2002_s23 = smov [#allocation3]  }
   0x4   : > { %p164_p3 = pnand %p1690_p0, %p163_p1  ;;  %s176_s24 = sshll.u32 %s2002_s23, 4  ;;  %s177_s24 = int_to_ptr.vmem [resolvable:$true] %s176_s24 }
   0x5   : > { %s2003_s25 = smov 64   ;;  %s2004_s26 = smov 4  }
   0x6   : > { %p1940_p4 = pneg %p164_p3  ;;  %206 = sbr.rel (%p164_p3) target bundleno = 347 (0x15b), region = 36 }
   0x8   : > { %p1941_p5 = pnand %p1944_p2, %p1940_p4 }
   0xa   : > { %1943 = dma.hbm_to_vmem [thread:$0]  (!%p1941_p5), %s175_s21, 4608, %s177_s24, [#allocation4], %s2003_s25, %s2003_s25, %s2004_s26  }
   0xb   : > { %1995 = dma.done.wait (%p1944_p2), [#allocation4], 4608  }
   0xc   : > { %1997 = vsyncadd (%p1944_p2), [#allocation4], 4294962688  ;;  %p239_p6 = scmp.lt.s32.totalorder %s1688_s22, 1  ;;  %v1888_v0 = vld [vmem:[#allocation3 + $0x38] sm:$0xff]  ;;  %v1887_v3 = vld [vmem:[#allocation3 + $0x30] sm:$0xff]  ;;  %vm294_vm0 = vcmask 523264  }
   0xd   : > { %v1892_v1 = vld [vmem:[#allocation3 + $0x58] sm:$0xff]  ;;  %701 = vmatpush.bf16.msra.mxu0 %v1888_v0  ;;  %v1891_v4 = vld [vmem:[#allocation3 + $0x50] sm:$0xff]  ;;  %v1958_v18 = vld [vmem:[%s2300_s2] ss:$0 sm:$0xff]  ;;  %vm335_vm1 = vcmask 517120   ;;  %vm464_vm2 = vcmask 518144  }
   0xe   : > { %s2313_s22 = smov (!%p239_p6, %s1688_s22), 1  ;;  %v1884_v2 = vld [vmem:[#allocation3 + $0x18] sm:$0xff]  ;;  %876 = vmatpush.bf16.msra.mxu2 %v1892_v1  ;;  %v1883_v6 = vld [vmem:[#allocation3 + $0x10] sm:$0xff]  ;;  %v1886_v19 = vld [vmem:[#allocation3 + $0x28] sm:$0xff]  ;;  %vm503_vm3 = vcmask 1042434   ;;  %vm505_vm4 = vcmask 1043459  }
   0xf   : > { %s1879_s27 = sshll.u32 %s2313_s22, 5  ;;  %v1896_v5 = vld [vmem:[#allocation3 + $0x78] sm:$0xff]  ;;  %753 = vmatpush.bf16.msra.mxu1 %v1884_v2  ;;  %v1895_v7 = vld [vmem:[#allocation3 + $0x70] sm:$0xff]  ;;  %v1890_v20 = vld [vmem:[#allocation3 + $0x48] sm:$0xff]  ;;  %vm507_vm5 = vcmask 1044484   ;;  %vm566_vm8 = vcmask 1041408  }
  0x10   : > { %s243_s30 = scalar_lea.vmem %s2298_s0, %s1879_s27  ;;  %942 = vmatpush.bf16.msra.mxu3 %v1896_v5  ;;  %v1959_v23 = vld [vmem:[%s2301_s3] ss:$0 sm:$0xff]  ;;  %vm528_vm6 = vsmask.f32 2306  ;;  %vm570_vm9 = vcmask 1043458   ;;  %s1880_s10 = sshll.u32 %s2313_s22, 3 }
  0x11   : > { %v1918_v8 = vld [vmem:[%s243_s30] sm:$0xff]   ;;  %v1933_v11 = vld [vmem:[%s243_s30 + $0x8] sm:$0xff]   ;;  %v1934_v12 = vld [vmem:[%s243_s30 + $0x10] sm:$0xff]   ;;  %702 = vmatpush.bf16.msra.mxu0 %v1887_v3  ;;  %vm592_vm10 = vsmask.f32 1280  ;;  %s248_s13 = scalar_lea.vmem %s2302_s4, %s1880_s10  ;;  %s1699_s14 = sshll.u32 %s2313_s22, 1 }
  0x12   : > { %v1919_v9 = vunpack.c.l.bf16 %v1918_v8  ;;  %v1920_v10 = vunpack.c.h.bf16 %v1918_v8  ;;  %v1935_v13 = vld [vmem:[%s243_s30 + $0x18] sm:$0xff]   ;;  %v1923_v14 = vunpack.c.l.bf16 %v1933_v11  ;;  %v1924_v15 = vunpack.c.h.bf16 %v1933_v11  ;;  %877 = vmatpush.bf16.msra.mxu2 %v1891_v4  ;;  %v1885_v36 = vld [vmem:[#allocation3 + $0x20] sm:$0xff]  ;;  %vm2150_vm7 = vmand %vm464_vm2, %vm528_vm6  ;;  %s252_s17 = scalar_lea.vmem %s2303_s5, %s1699_s14 }
  0x13   : > { %v1927_v16 = vunpack.c.l.bf16 %v1934_v12  ;;  %v1928_v17 = vunpack.c.h.bf16 %v1934_v12  ;;  %v1931_v21 = vunpack.c.l.bf16 %v1935_v13  ;;  %v1932_v22 = vunpack.c.h.bf16 %v1935_v13  ;;  %754 = vmatpush.bf16.msra.mxu1 %v1883_v6 }
  0x14   : > { %v274_v24 = vmul.f32 %v1958_v18, %v1919_v9  ;;  %v275_v25 = vmul.f32 %v1958_v18, %v1920_v10  ;;  %v276_v26 = vmul.f32 %v1958_v18, %v1923_v14  ;;  %v277_v27 = vmul.f32 %v1958_v18, %v1924_v15  ;;  %943 = vmatpush.bf16.msra.mxu3 %v1895_v7 }
  0x15   : > { %v278_v28 = vmul.f32 %v1958_v18, %v1927_v16  ;;  %v279_v29 = vmul.f32 %v1958_v18, %v1928_v17  ;;  %v280_v30 = vmul.f32 %v1958_v18, %v1931_v21  ;;  %v281_v31 = vmul.f32 %v1958_v18, %v1932_v22  ;;  %703 = vmatpush.bf16.msra.mxu0 %v1886_v19 }
  0x16   : > { %v286_v32 = vadd.f32 %v1959_v23, %v274_v24  ;;  %v287_v33 = vadd.f32 %v1959_v23, %v275_v25  ;;  %v288_v34 = vadd.f32 %v1959_v23, %v276_v26  ;;  %v289_v35 = vadd.f32 %v1959_v23, %v277_v27  ;;  %878 = vmatpush.bf16.msra.mxu2 %v1890_v20 }
  0x17   : > { %v290_v37 = vadd.f32 %v1959_v23, %v278_v28  ;;  %v291_v38 = vadd.f32 %v1959_v23, %v279_v29  ;;  %v292_v39 = vadd.f32 %v1959_v23, %v280_v30  ;;  %v293_v40 = vadd.f32 %v1959_v23, %v281_v31 }
  0x18   : > { %v295_v41 = vsel %vm294_vm0, %v286_v32, -inf  ;;  %v296_v42 = vsel %vm294_vm0, %v287_v33, -inf  ;;  %v298_v43 = vsel %vm294_vm0, %v288_v34, -inf  ;;  %v299_v45 = vsel %vm294_vm0, %v289_v35, -inf }
  0x19   : > { %v297_v44 = vmax.f32 %v295_v41, %v296_v42  ;;  %v301_v46 = vsel %vm294_vm0, %v290_v37, -inf  ;;  %v302_v47 = vsel %vm294_vm0, %v291_v38, -inf  ;;  %v300_v48 = vmax.f32 %v298_v43, %v299_v45  ;;  %704 = vmatpush.bf16.msra.mxu0 %v1885_v36 }
  0x1a   : > { %v2065_v49 = vmax.f32 %v301_v46, %v302_v47  ;;  %v304_v50 = vsel %vm294_vm0, %v292_v39, -inf  ;;  %v305_v51 = vsel %vm294_vm0, %v293_v40, -inf  ;;  %vm593_vm11 = vsmask.f32 3336 }
  0x1b   : > { %v2069_v52 = vmax.f32 %v304_v50, %v305_v51  ;;  %v311_v53 = vrot.slane %v297_v44, 2  ;;  %v312_v54 = vrot.slane %v297_v44, 4  ;;  %v313_v55 = vrot.slane %v297_v44, 6  ;;  %vm594_vm13 = vmor %vm592_vm10, %vm593_vm11 }
  0x1c   : > { %v314_v56 = vrot.slane %v300_v48, 2  ;;  %v315_v57 = vrot.slane %v300_v48, 4  ;;  %v316_v58 = vrot.slane %v300_v48, 6  ;;  %v317_v59 = vrot.slane %v2065_v49, 2 }
  0x1d   : > { %v318_v60 = vrot.slane %v2065_v49, 4  ;;  %v319_v61 = vrot.slane %v2065_v49, 6  ;;  %v320_v62 = vrot.slane %v2069_v52, 2  ;;  %v321_v63 = vrot.slane %v2069_v52, 4 }
  0x1e   : > { %v322_v0 = vrot.slane %v2069_v52, 6  ;;  %v336_v1 = vsel %vm335_vm1, %v297_v44, -inf  ;;  %v343_v2 = vsel %vm335_vm1, %v311_v53, -inf  ;;  %v350_v3 = vsel %vm335_vm1, %v312_v54, -inf }
  0x1f   : > { %v337_v4 = vrot.slane %v336_v1, 4  ;;  %v344_v5 = vrot.slane %v343_v2, 4  ;;  %v351_v6 = vrot.slane %v350_v3, 4  ;;  %v357_v7 = vsel %vm335_vm1, %v313_v55, -inf }
  0x20   : > { %v358_v8 = vrot.slane %v357_v7, 4  ;;  %v364_v9 = vsel %vm335_vm1, %v300_v48, -inf  ;;  %v371_v10 = vsel %vm335_vm1, %v314_v56, -inf  ;;  %v378_v11 = vsel %vm335_vm1, %v315_v57, -inf }
  0x21   : > { %v338_v12 = vmax.f32 %v336_v1, %v337_v4  ;;  %v345_v13 = vmax.f32 %v343_v2, %v344_v5  ;;  %v352_v14 = vmax.f32 %v350_v3, %v351_v6  ;;  %v365_v15 = vrot.slane %v364_v9, 4 }
  0x22   : > { %v359_v16 = vmax.f32 %v357_v7, %v358_v8  ;;  %v372_v17 = vrot.slane %v371_v10, 4  ;;  %v379_v18 = vrot.slane %v378_v11, 4  ;;  %v385_v19 = vsel %vm335_vm1, %v316_v58, -inf }
  0x23   : > { %v339_v20 = vrot.slane %v338_v12, 2  ;;  %v346_v21 = vrot.slane %v345_v13, 2  ;;  %v353_v22 = vrot.slane %v352_v14, 2  ;;  %v366_v23 = vmax.f32 %v364_v9, %v365_v15 }
  0x24   : > { %v360_v24 = vrot.slane %v359_v16, 2  ;;  %v373_v25 = vmax.f32 %v371_v10, %v372_v17  ;;  %v380_v26 = vmax.f32 %v378_v11, %v379_v18  ;;  %v386_v27 = vrot.slane %v385_v19, 4 }
  0x25   : > { %v340_v28 = vmax.f32 %v338_v12, %v339_v20  ;;  %v347_v29 = vmax.f32 %v345_v13, %v346_v21  ;;  %v354_v30 = vmax.f32 %v352_v14, %v353_v22  ;;  %v367_v31 = vrot.slane %v366_v23, 2 }
  0x26   : > { %v361_v32 = vmax.f32 %v359_v16, %v360_v24  ;;  %v374_v33 = vrot.slane %v373_v25, 2  ;;  %v381_v34 = vrot.slane %v380_v26, 2  ;;  %v387_v35 = vmax.f32 %v385_v19, %v386_v27 }
  0x27   : > { %v341_v36 = vrot.slane %v340_v28, 1  ;;  %v348_v37 = vrot.slane %v347_v29, 1  ;;  %v355_v38 = vrot.slane %v354_v30, 1  ;;  %v368_v39 = vmax.f32 %v366_v23, %v367_v31 }
  0x28   : > { %v362_v40 = vrot.slane %v361_v32, 1  ;;  %v375_v41 = vmax.f32 %v373_v25, %v374_v33  ;;  %v382_v42 = vmax.f32 %v380_v26, %v381_v34  ;;  %v388_v43 = vrot.slane %v387_v35, 2 }
  0x29   : > { %v2085_v44 = vmax.f32 %v340_v28, %v341_v36  ;;  %v2087_v45 = vmax.f32 %v347_v29, %v348_v37  ;;  %v2089_v46 = vmax.f32 %v354_v30, %v355_v38  ;;  %v369_v47 = vrot.slane %v368_v39, 1 }
  0x2a   : > { %v2091_v48 = vmax.f32 %v361_v32, %v362_v40  ;;  %v376_v50 = vrot.slane %v375_v41, 1  ;;  %v383_v51 = vrot.slane %v382_v42, 1  ;;  %v389_v53 = vmax.f32 %v387_v35, %v388_v43 }
  0x2b   : > { %v2093_v54 = vmax.f32 %v368_v39, %v369_v47  ;;  %v392_v55 = vsel %vm335_vm1, %v2065_v49, -inf  ;;  %v399_v56 = vsel %vm335_vm1, %v317_v59, -inf  ;;  %v406_v57 = vsel %vm335_vm1, %v318_v60, -inf }
  0x2c   : > { %v2099_v58 = vmax.f32 %v375_v41, %v376_v50  ;;  %v2101_v1 = vmax.f32 %v382_v42, %v383_v51  ;;  %v390_v2 = vrot.slane %v389_v53, 1  ;;  %v393_v3 = vrot.slane %v392_v55, 4 }
  0x2d   : > { %v400_v4 = vrot.slane %v399_v56, 4  ;;  %v407_v5 = vrot.slane %v406_v57, 4  ;;  %v413_v6 = vsel %vm335_vm1, %v319_v61, -inf  ;;  %v420_v7 = vsel %vm335_vm1, %v2069_v52, -inf }
  0x2e   : > { %v2108_v8 = vmax.f32 %v389_v53, %v390_v2  ;;  %v394_v59 = vmax.f32 %v392_v55, %v393_v3  ;;  %v414_v9 = vrot.slane %v413_v6, 4  ;;  %v421_v60 = vrot.slane %v420_v7, 4 }
  0x2f   : > { %v401_v10 = vmax.f32 %v399_v56, %v400_v4  ;;  %v408_v11 = vmax.f32 %v406_v57, %v407_v5  ;;  %v427_v12 = vsel %vm335_vm1, %v320_v62, -inf  ;;  %v434_v49 = vsel %vm335_vm1, %v321_v63, -inf }
  0x30   : > { %v395_v13 = vrot.slane %v394_v59, 2  ;;  %v415_v61 = vmax.f32 %v413_v6, %v414_v9  ;;  %v422_v14 = vmax.f32 %v420_v7, %v421_v60  ;;  %v428_v15 = vrot.slane %v427_v12, 4 }
  0x31   : > { %v402_v16 = vrot.slane %v401_v10, 2  ;;  %v409_v17 = vrot.slane %v408_v11, 2  ;;  %v435_v18 = vrot.slane %v434_v49, 4  ;;  %v441_v19 = vsel %vm335_vm1, %v322_v0, -inf }
  0x32   : > { %v396_v20 = vmax.f32 %v394_v59, %v395_v13  ;;  %v416_v21 = vrot.slane %v415_v61, 2  ;;  %v423_v22 = vrot.slane %v422_v14, 2  ;;  %v429_v23 = vmax.f32 %v427_v12, %v428_v15 }
  0x33   : > { %v403_v62 = vmax.f32 %v401_v10, %v402_v16  ;;  %v410_v24 = vmax.f32 %v408_v11, %v409_v17  ;;  %v436_v25 = vmax.f32 %v434_v49, %v435_v18  ;;  %v442_v26 = vrot.slane %v441_v19, 4 }
  0x34   : > { %v397_v63 = vrot.slane %v396_v20, 1  ;;  %v417_v27 = vmax.f32 %v415_v61, %v416_v21  ;;  %v424_v28 = vmax.f32 %v422_v14, %v423_v22  ;;  %v430_v29 = vrot.slane %v429_v23, 2 }
  0x35   : > { %v404_v30 = vrot.slane %v403_v62, 1  ;;  %v411_v31 = vrot.slane %v410_v24, 1  ;;  %v437_v32 = vrot.slane %v436_v25, 2  ;;  %v443_v33 = vmax.f32 %v441_v19, %v442_v26 }
  0x36   : > { %v398_v34 = vmax.f32 %v396_v20, %v397_v63  ;;  %v418_v52 = vrot.slane %v417_v27, 1  ;;  %v425_v35 = vrot.slane %v424_v28, 1  ;;  %v431_v0 = vmax.f32 %v429_v23, %v430_v29 }
  0x37   : > { %v405_v36 = vmax.f32 %v403_v62, %v404_v30  ;;  %v412_v37 = vmax.f32 %v410_v24, %v411_v31  ;;  %v438_v38 = vmax.f32 %v436_v25, %v437_v32  ;;  %v444_v39 = vrot.slane %v443_v33, 2 }
  0x38   : > { %v419_v40 = vmax.f32 %v417_v27, %v418_v52  ;;  %v426_v41 = vmax.f32 %v424_v28, %v425_v35  ;;  %v432_v42 = vrot.slane %v431_v0, 1  ;;  %v448_v43 = vpack.c.bf16 %v2085_v44, %v2085_v44 }
  0x39   : > { %v439_v47 = vrot.slane %v438_v38, 1  ;;  %v445_v50 = vmax.f32 %v443_v33, %v444_v39  ;;  %v449_v51 = vpack.c.bf16 %v2087_v45, %v2087_v45  ;;  %v450_v53 = vpack.c.bf16 %v2089_v46, %v2089_v46 }
  0x3a   : > { %v433_v55 = vmax.f32 %v431_v0, %v432_v42  ;;  %v451_v56 = vpack.c.bf16 %v2091_v48, %v2091_v48  ;;  %v452_v57 = vpack.c.bf16 %v2093_v54, %v2093_v54  ;;  %v453_v2 = vpack.c.bf16 %v2099_v58, %v2099_v58 }
  0x3b   : > { %v440_v3 = vmax.f32 %v438_v38, %v439_v47  ;;  %v446_v44 = vrot.slane %v445_v50, 1  ;;  %v454_v4 = vpack.c.bf16 %v2101_v1, %v2101_v1  ;;  %v455_v45 = vpack.c.bf16 %v2108_v8, %v2108_v8 }
  0x3c   : > { %v456_v5 = vpack.c.bf16 %v398_v34, %v398_v34  ;;  %v457_v46 = vpack.c.bf16 %v405_v36, %v405_v36  ;;  %v458_v6 = vpack.c.bf16 %v412_v37, %v412_v37  ;;  %v459_v7 = vpack.c.bf16 %v419_v40, %v419_v40 }
  0x3d   : > { %v447_v59 = vmax.f32 %v445_v50, %v446_v44  ;;  %v460_v48 = vpack.c.bf16 %v426_v41, %v426_v41  ;;  %v461_v9 = vpack.c.bf16 %v433_v55, %v433_v55  ;;  %v462_v60 = vpack.c.bf16 %v440_v3, %v440_v3  ;;  %v1882_v3 = vld [vmem:[#allocation3 + $0x8] sm:$0xff] }
  0x3e   : > { %v487_v54 = vunpack.c.l.b16 %v448_v43  ;;  %v488_v10 = vunpack.c.l.b16 %v449_v51  ;;  %v2005_v11 = vmov 0   ;;  %v489_v12 = vunpack.c.l.b16 %v450_v53  ;;  %755 = vmatpush.bf16.msra.mxu1 %v1882_v3 }
  0x3f   : > { %v463_v58 = vpack.c.bf16 %v447_v59, %v447_v59  ;;  %465 = vst.msk [vmem:[#allocation2] sm:$0x7] %vm464_vm2, %v2005_v11  ;;  %v490_v1 = vunpack.c.l.b16 %v451_v56  ;;  %v491_v49 = vunpack.c.l.b16 %v452_v57  ;;  %v492_v8 = vunpack.c.l.b16 %v453_v2 }
  0x40   : > { %466 = vst.msk [vmem:[#allocation2 + $0x4] sm:$0x7] %vm464_vm2, %v2005_v11  ;;  %v493_v13 = vunpack.c.l.b16 %v454_v4  ;;  %v494_v61 = vunpack.c.l.b16 %v455_v45  ;;  %v495_v14 = vunpack.c.l.b16 %v456_v5  ;;  %v496_v15 = vunpack.c.l.b16 %v457_v46  ;;  %v1889_v4 = vld [vmem:[#allocation3 + $0x40] sm:$0xff]  ;;  %v1894_v45 = vld [vmem:[#allocation3 + $0x68] sm:$0xff]  ;;  %v1900_v5 = vld [vmem:[#allocation3 + $0x98] sm:$0xff] }
  0x41   : > { %467 = vst.msk [vmem:[#allocation2 + $0x8] sm:$0x7] %vm464_vm2, %v2005_v11  ;;  %v497_v16 = vunpack.c.l.b16 %v458_v6  ;;  %v498_v17 = vunpack.c.l.b16 %v459_v7  ;;  %v499_v18 = vunpack.c.l.b16 %v460_v48  ;;  %v500_v19 = vunpack.c.l.b16 %v461_v9  ;;  %879 = vmatpush.bf16.msra.mxu2 %v1889_v4  ;;  %944 = vmatpush.bf16.msra.mxu3 %v1894_v45 }
  0x42   : > { %468 = vst.msk [vmem:[#allocation2 + $0xc] sm:$0x7] %vm464_vm2, %v2005_v11  ;;  %v501_v20 = vunpack.c.l.b16 %v462_v60  ;;  %v502_v21 = vunpack.c.l.b16 %v463_v58  ;;  %v504_v22 = vsel %vm503_vm3, %v488_v10, %v487_v54  ;;  %v509_v23 = vsel %vm503_vm3, %v492_v8, %v491_v49  ;;  %1092 = vmatpush.bf16.msrb.mxu0 %v1900_v5  ;;  %v1898_v5 = vld [vmem:[#allocation3 + $0x88] sm:$0xff] }
  0x43   : > { %469 = vst.msk [vmem:[#allocation2 + $0x10] sm:$0x7] %vm464_vm2, %v2005_v11  ;;  %v506_v62 = vsel %vm505_vm4, %v489_v12, %v504_v22  ;;  %v510_v24 = vsel %vm505_vm4, %v493_v13, %v509_v23  ;;  %v512_v25 = vsel %vm503_vm3, %v496_v15, %v495_v14  ;;  %v515_v26 = vsel %vm503_vm3, %v500_v19, %v499_v18 }
  0x44   : > { %470 = vst.msk [vmem:[#allocation2 + $0x14] sm:$0x7] %vm464_vm2, %v2005_v11  ;;  %v508_v63 = vsel %vm507_vm5, %v490_v1, %v506_v62  ;;  %v511_v27 = vsel %vm507_vm5, %v494_v61, %v510_v24  ;;  %v513_v28 = vsel %vm505_vm4, %v497_v16, %v512_v25  ;;  %v516_v29 = vsel %vm505_vm4, %v501_v20, %v515_v26 }
  0x45   : > { %v514_v30 = vsel %vm507_vm5, %v498_v17, %v513_v28  ;;  %v517_v31 = vsel %vm507_vm5, %v502_v21, %v516_v29  ;;  %v518_v32 = vpack.c.b16 %v508_v63, %v508_v63  ;;  %v519_v33 = vpack.c.b16 %v511_v27, %v511_v27 }
  0x46   : > { %v554_v34 = vld [vmem:[#allocation2] sm:$0x7]  ;;  %v520_v52 = vpack.c.b16 %v514_v30, %v514_v30  ;;  %v521_v35 = vpack.c.b16 %v517_v31, %v517_v31  ;;  %vm595_vm12 = vsmask.f32 5392  ;;  %vm597_vm15 = vsmask.f32 7448 }
  0x47   : > { %v530_v0 = vld [vmem:[#allocation2 + $0x4] sm:$0x7]  ;;  %v562_v36 = vrot.slane %v554_v34, 2  ;;  %vm596_vm14 = vmor %vm594_vm13, %vm595_vm12  ;;  %vm803_vm2 = vcmask 1040384  }
  0x48   : > { %v533_v38 = vld [vmem:[#allocation2 + $0x8] sm:$0x7]  ;;  %v531_v39 = vsel %vm2150_vm7, %v518_v32, %v530_v0  ;;  %vm2165_vm1 = vmor %vm596_vm14, %vm597_vm15 }
  0x49   : > { %v534_v40 = vsel %vm2150_vm7, %v519_v33, %v533_v38  ;;  %v536_v41 = vld [vmem:[#allocation2 + $0xc] sm:$0x7]  ;;  %v569_v42 = vsel %vm566_vm8, %v554_v34, %v562_v36  ;;  %v571_v43 = vsel %vm570_vm9, %v554_v34, %v562_v36  ;;  %532 = vst [vmem:[#allocation2 + $0x4] sm:$0x7] %v531_v39  ;;  %v1881_v39 = vld [vmem:[#allocation3] sm:$0xff]  ;;  %vm805_vm4 = vmor %vm803_vm2, %vm503_vm3 }
  0x4a   : > { %v537_v47 = vsel %vm2150_vm7, %v520_v52, %v536_v41  ;;  %v539_v50 = vld [vmem:[#allocation2 + $0x10] sm:$0x7]  ;;  %v573_v51 = vrot.slane %v571_v43, 2  ;;  %v599_v53 = vshrl.u32 %v569_v42, 16  ;;  %535 = vst [vmem:[#allocation2 + $0x8] sm:$0x7] %v534_v40  ;;  %756 = vmatpush.bf16.msra.mxu1 %v1881_v39  ;;  %vm2189_vm6 = vmor %vm805_vm4, %vm507_vm5 }
  0x4b   : > { %v540_v55 = vsel %vm2150_vm7, %v521_v35, %v539_v50  ;;  %538 = vst [vmem:[#allocation2 + $0xc] sm:$0x7] %v537_v47  ;;  %v602_v57 = vshll.u32 %v569_v42, 16  ;;  %v1893_v40 = vld [vmem:[#allocation3 + $0x60] sm:$0xff]  ;;  %v1899_v41 = vld [vmem:[#allocation3 + $0x90] sm:$0xff]  ;;  %vm808_vm7 = vcmask 1046534  }
  0x4c   : > { %v601_v56 = vrot.slane %v599_v53, 6  ;;  %541 = vst [vmem:[#allocation2 + $0x10] sm:$0x7] %v540_v55  ;;  %v608_v2 = vshll.u32 %v573_v51, 16  ;;  %945 = vmatpush.bf16.msra.mxu3 %v1893_v40  ;;  %1093 = vmatpush.bf16.msrb.mxu0 %v1899_v41  ;;  %v763_v43 = vld [vmem:[#allocation2] sm:$0x6]  ;;  %vm2202_vm3 = vmor %vm2189_vm6, %vm808_vm7 }
  0x4d   : > { %v604_v44 = vrot.slane %v602_v57, 7  ;;  %v542_v51 = vld [vmem:[#allocation2] sm:$0x3]  ;;  %v771_v55 = vrot.slane %v763_v43, 2 }
  0x4e   : > { %v610_v6 = vrot.slane %v608_v2, 7 }
  0x4f   : > { %v605_v46 = vor.u32 %v604_v44, %v601_v56 }
  0x50   : > { %v555_v7 = vld [vmem:[#allocation2 + $0x4] sm:$0x7]  ;;  %1094 = vmatpush.bf16.msrb.mxu0 %v1898_v5 }
  0x51   : > { %v556_v48 = vld [vmem:[#allocation2 + $0x8] sm:$0x7]  ;;  %v563_v9 = vrot.slane %v555_v7, 2  ;;  %v606_v60 = vrot.slane %v605_v46, 2  ;;  %v764_v47 = vld [vmem:[#allocation2 + $0x4] sm:$0x6] }
  0x52   : > { %v557_v54 = vld [vmem:[#allocation2 + $0xc] sm:$0x7]  ;;  %v564_v10 = vrot.slane %v556_v48, 2  ;;  %v765_v50 = vld [vmem:[#allocation2 + $0x8] sm:$0x6]  ;;  %v772_v2 = vrot.slane %v764_v47, 2 }
  0x53   : > { %v565_v58 = vrot.slane %v557_v54, 2  ;;  %v576_v11 = vsel %vm566_vm8, %v555_v7, %v563_v9  ;;  %v577_v12 = vsel %vm570_vm9, %v555_v7, %v563_v9  ;;  %v611_v1 = vsel %vm2165_vm1, %v606_v60, %v610_v6  ;;  %v766_v53 = vld [vmem:[#allocation2 + $0xc] sm:$0x6]  ;;  %v543_v56 = vld [vmem:[#allocation2 + $0x4] sm:$0x3]  ;;  %v1904_v46 = vld [vmem:[#allocation3 + $0xb8] sm:$0xff] }
  0x54   : > { %v579_v49 = vrot.slane %v577_v12, 2  ;;  %v582_v8 = vsel %vm566_vm8, %v556_v48, %v564_v10  ;;  %v583_v13 = vsel %vm570_vm9, %v556_v48, %v564_v10  ;;  %v612_v61 = vshrl.u32 %v576_v11, 16  ;;  %660 = vst [vmem:[#allocation1] ss:$4 sm:$0xff] %v611_v1  ;;  %v544_v57 = vld [vmem:[#allocation2 + $0x8] sm:$0x3]  ;;  %1210 = vmatpush.bf16.msrb.mxu1 %v1904_v46 }
  0x55   : > { %v585_v14 = vrot.slane %v583_v13, 2  ;;  %v588_v15 = vsel %vm566_vm8, %v557_v54, %v565_v58  ;;  %v589_v16 = vsel %vm570_vm9, %v557_v54, %v565_v58  ;;  %v615_v17 = vshll.u32 %v576_v11, 16  ;;  %v545_v44 = vld [vmem:[#allocation2 + $0xc] sm:$0x3]  ;;  %v1897_v54 = vld [vmem:[#allocation3 + $0x80] sm:$0xff] }
  0x56   : > { %v591_v18 = vrot.slane %v589_v16, 2  ;;  %v614_v19 = vrot.slane %v612_v61, 6  ;;  %v621_v20 = vshll.u32 %v579_v49, 16  ;;  %v625_v21 = vshrl.u32 %v582_v8, 16  ;;  %v1903_v10 = vld [vmem:[#allocation3 + $0xb0] sm:$0xff]  ;;  %1095 = vmatpush.bf16.msrb.mxu0 %v1897_v54 }
  0x57   : > { %v617_v22 = vrot.slane %v615_v17, 7  ;;  %v628_v23 = vshll.u32 %v582_v8, 16  ;;  %v634_v62 = vshll.u32 %v585_v14, 16  ;;  %v638_v24 = vshrl.u32 %v588_v15, 16  ;;  %v954_v13 = vld [vmem:[#allocation2 + $0x4] sm:$0x7] }
  0x58   : > { %v627_v25 = vrot.slane %v625_v21, 6  ;;  %v641_v26 = vshll.u32 %v588_v15, 16  ;;  %v647_v63 = vshll.u32 %v591_v18, 16  ;;  %v623_v28 = vrot.slane %v621_v20, 7  ;;  %v955_v16 = vld [vmem:[#allocation2 + $0x8] sm:$0x7]  ;;  %1211 = vmatpush.bf16.msrb.mxu1 %v1903_v10 }
  0x59   : > { %v618_v27 = vor.u32 %v617_v22, %v614_v19  ;;  %v630_v29 = vrot.slane %v628_v23, 7  ;;  %v640_v30 = vrot.slane %v638_v24, 6  ;;  %v636_v34 = vrot.slane %v634_v62, 7  ;;  %v956_v19 = vld [vmem:[#allocation2 + $0xc] sm:$0x7] }
  0x5a   : > { %v643_v31 = vrot.slane %v641_v26, 7  ;;  %v649_v35 = vrot.slane %v647_v63, 7  ;;  %v773_v4 = vrot.slane %v765_v50, 2  ;;  %v774_v45 = vrot.slane %v766_v53, 2  ;;  %v957_v22 = vld [vmem:[#allocation2 + $0x10] sm:$0x7] }
  0x5b   : > { %v619_v32 = vrot.slane %v618_v27, 2  ;;  %v631_v33 = vor.u32 %v630_v29, %v627_v25  ;;  %v777_v6 = vsel %vm566_vm8, %v763_v43, %v771_v55  ;;  %v779_v7 = vsel %vm570_vm9, %v763_v43, %v771_v55  ;;  %v889_v55 = vld [vmem:[#allocation2 + $0x8] sm:$0x3]  ;;  %v891_v46 = vld [vmem:[#allocation2 + $0x10] sm:$0x3] }
  0x5c   : > { %v644_v52 = vor.u32 %v643_v31, %v640_v30  ;;  %v784_v9 = vsel %vm566_vm8, %v764_v47, %v772_v2  ;;  %v786_v60 = vsel %vm570_vm9, %v764_v47, %v772_v2  ;;  %v791_v58 = vsel %vm566_vm8, %v765_v50, %v773_v4  ;;  %v1902_v31 = vld [vmem:[#allocation3 + $0xa8] sm:$0xff] }
  0x5d   : > { %v624_v0 = vsel %vm2165_vm1, %v619_v32, %v623_v28  ;;  %v632_v36 = vrot.slane %v631_v33, 2  ;;  %v793_v11 = vsel %vm570_vm9, %v765_v50, %v773_v4  ;;  %v798_v12 = vsel %vm566_vm8, %v766_v53, %v774_v45  ;;  %v1908_v32 = vld [vmem:[#allocation3 + $0xd8] sm:$0xff]  ;;  %1212 = vmatpush.bf16.msrb.mxu1 %v1902_v31  ;;  %v888_v47 = vld [vmem:[#allocation2 + $0x4] sm:$0x3] }
  0x5e   : > { %v645_v37 = vrot.slane %v644_v52, 2  ;;  %663 = vst [vmem:[#allocation1 + $0x1] ss:$4 sm:$0xff] %v624_v0  ;;  %v800_v1 = vsel %vm570_vm9, %v766_v53, %v774_v45  ;;  %v1734_v49 = vrot.slane %v777_v6, 9  ;;  %v1735_v8 = vrot.slane %v779_v7, 9  ;;  %1277 = vmatpush.bf16.msrb.mxu2 %v1908_v32  ;;  %v1901_v52 = vld [vmem:[#allocation3 + $0xa0] sm:$0xff] }
  0x5f   : > { %v637_v38 = vsel %vm2165_vm1, %v632_v36, %v636_v34  ;;  %v1736_v14 = vrot.slane %v784_v9, 9  ;;  %v1737_v15 = vrot.slane %v786_v60, 9  ;;  %v1738_v17 = vrot.slane %v791_v58, 9 }
  0x60   : > { %v650_v42 = vsel %vm2165_vm1, %v645_v37, %v649_v35  ;;  %666 = vst [vmem:[#allocation1 + $0x2] ss:$4 sm:$0xff] %v637_v38  ;;  %v1739_v18 = vrot.slane %v793_v11, 9  ;;  %v1740_v20 = vrot.slane %v798_v12, 9  ;;  %v1741_v21 = vrot.slane %v800_v1, 9  ;;  %v1907_v35 = vld [vmem:[#allocation3 + $0xd0] sm:$0xff] }
  0x61   : > { %669 = vst [vmem:[#allocation1 + $0x3] ss:$4 sm:$0xff] %v650_v42  ;;  %v962_v23 = vrot.slane %v954_v13, 2  ;;  %v813_v62 = vsel %vm2202_vm3, %v1734_v49, %v1735_v8  ;;  %v963_v24 = vrot.slane %v955_v16, 2  ;;  %v817_v25 = vsel %vm2202_vm3, %v1736_v14, %v1737_v15  ;;  %1213 = vmatpush.bf16.msrb.mxu1 %v1901_v52  ;;  %v1912_v12 = vld [vmem:[#allocation3 + $0xf8] sm:$0xff]  ;;  %v1906_v1 = vld [vmem:[#allocation3 + $0xc8] sm:$0xff] }
  0x62   : > { %v964_v26 = vrot.slane %v956_v19, 2  ;;  %v821_v27 = vsel %vm2202_vm3, %v1738_v17, %v1739_v18  ;;  %v965_v28 = vrot.slane %v957_v22, 2  ;;  %v825_v29 = vsel %vm2202_vm3, %v1740_v20, %v1741_v21  ;;  %1278 = vmatpush.bf16.msrb.mxu2 %v1907_v35  ;;  %1427 = vmatpush.bf16.msrb.mxu3 %v1912_v12  ;;  %v1911_v15 = vld [vmem:[#allocation3 + $0xf0] sm:$0xff] }
  0x63   : > { %v968_v30 = vsel %vm566_vm8, %v954_v13, %v962_v23  ;;  %v974_v33 = vsel %vm566_vm8, %v955_v16, %v963_v24  ;;  %v969_v38 = vsel %vm570_vm9, %v954_v13, %v962_v23  ;;  %v975_v41 = vsel %vm570_vm9, %v955_v16, %v963_v24  ;;  %v1905_v16 = vld [vmem:[#allocation3 + $0xc0] sm:$0xff]  ;;  %v1104_v23 = vld [vmem:[#allocation2 + $0x4] sm:$0x6] }
  0x64   : > { %v980_v34 = vsel %vm566_vm8, %v956_v19, %v964_v26  ;;  %v986_v0 = vsel %vm566_vm8, %v957_v22, %v965_v28  ;;  %v990_v36 = vshrl.u32 %v968_v30, 16  ;;  %v993_v37 = vshll.u32 %v968_v30, 16 }
  0x65   : > { %v1003_v39 = vshrl.u32 %v974_v33, 16  ;;  %v1006_v40 = vshll.u32 %v974_v33, 16  ;;  %v1016_v42 = vshrl.u32 %v980_v34, 16  ;;  %v1019_v43 = vshll.u32 %v980_v34, 16 }
  0x66   : > { %v981_v50 = vsel %vm570_vm9, %v956_v19, %v964_v26  ;;  %v1032_v53 = vshll.u32 %v986_v0, 16  ;;  %v992_v2 = vrot.slane %v990_v36, 6  ;;  %v977_v4 = vrot.slane %v975_v41, 2  ;;  %1279 = vmatpush.bf16.msrb.mxu2 %v1906_v1  ;;  %1428 = vmatpush.bf16.msrb.mxu3 %v1911_v15  ;;  %v1910_v36 = vld [vmem:[#allocation3 + $0xe8] sm:$0xff] }
  0x67   : > { %v1005_v45 = vrot.slane %v1003_v39, 6  ;;  %v1008_v5 = vrot.slane %v1006_v40, 7  ;;  %v983_v6 = vrot.slane %v981_v50, 2  ;;  %v1018_v7 = vrot.slane %v1016_v42, 6  ;;  %v1909_v42 = vld [vmem:[#allocation3 + $0xe0] sm:$0xff] }
  0x68   : > { %v670_v3 = vld.sshfl [vmem:[#allocation1] sm:$0xff pattern:$0x73625140]  ;;  %v1021_v48 = vrot.slane %v1019_v43, 7  ;;  %v1034_v10 = vrot.slane %v1032_v53, 7  ;;  %v1012_v8 = vshll.u32 %v977_v4, 16 }
  0x69   : > { %1716 = vmatmul.msk.bf16.vlgmr.msra.gmra.mxu0 %vm294_vm0, %v670_v3  ;;  %712 = vst [vmem:[#allocation1] ss:$4 sm:$0xff] %v542_v51  ;;  %v1029_v51 = vshrl.u32 %v986_v0, 16  ;;  %v995_v3 = vrot.slane %v993_v37, 7  ;;  %v1009_v49 = vor.u32 %v1008_v5, %v1005_v45  ;;  %v1025_v14 = vshll.u32 %v983_v6, 16  ;;  %v1916_v37 = vld [vmem:[#allocation3 + $0x118] sm:$0xff] }
  0x6a   : > { %715 = vst [vmem:[#allocation1 + $0x1] ss:$4 sm:$0xff] %v543_v56  ;;  %v971_v56 = vrot.slane %v969_v38, 2  ;;  %v1022_v13 = vor.u32 %v1021_v48, %v1018_v7  ;;  %1280 = vmatpush.bf16.msrb.mxu2 %v1905_v16  ;;  %v1112_v30 = vrot.slane %v1104_v23, 2  ;;  %1429 = vmatpush.bf16.msrb.mxu3 %v1910_v36  ;;  %v1915_v43 = vld [vmem:[#allocation3 + $0x110] sm:$0xff] }
  0x6b   : > { %718 = vst [vmem:[#allocation1 + $0x2] ss:$4 sm:$0xff] %v544_v57  ;;  %v987_v57 = vsel %vm570_vm9, %v957_v22, %v965_v28  ;;  %v1031_v54 = vrot.slane %v1029_v51, 6  ;;  %v996_v58 = vor.u32 %v995_v3, %v992_v2  ;;  %v1010_v21 = vrot.slane %v1009_v49, 2  ;;  %1545 = vmatpush.bf16.msra.mxu0 %v1916_v37  ;;  %v1291_v5 = vld [vmem:[#allocation2 + $0x10] sm:$0x7] }
  0x6c   : > { %721 = vst [vmem:[#allocation1 + $0x3] ss:$4 sm:$0xff] %v545_v44  ;;  %v890_v44 = vld [vmem:[#allocation2 + $0xc] sm:$0x3]  ;;  %v989_v60 = vrot.slane %v987_v57, 2  ;;  %v999_v11 = vshll.u32 %v971_v56, 16  ;;  %v1118_v38 = vsel %vm566_vm8, %v1104_v23, %v1112_v30  ;;  %v1120_v39 = vsel %vm570_vm9, %v1104_v23, %v1112_v30 }
  0x6d   : > { %v1035_v17 = vor.u32 %v1034_v10, %v1031_v54  ;;  %v997_v19 = vrot.slane %v996_v58, 2  ;;  %v1014_v22 = vrot.slane %v1012_v8, 7  ;;  %v1027_v24 = vrot.slane %v1025_v14, 7  ;;  %v1289_v57 = vld [vmem:[#allocation2 + $0x8] sm:$0x7] }
  0x6e   : > { %v1038_v18 = vshll.u32 %v989_v60, 16  ;;  %v1001_v20 = vrot.slane %v999_v11, 7  ;;  %v1794_v56 = vrot.slane %v1120_v39, 9  ;;  %1430 = vmatpush.bf16.msrb.mxu3 %v1909_v42  ;;  %v1292_v7 = vld [vmem:[#allocation2 + $0x14] sm:$0x7]  ;;  %v1297_v48 = vrot.slane %v1289_v57, 2 }
  0x6f   : > { %v1036_v26 = vrot.slane %v1035_v17, 2  ;;  %v1015_v31 = vsel %vm2165_vm1, %v1010_v21, %v1014_v22  ;;  %1546 = vmatpush.bf16.msra.mxu0 %v1915_v43  ;;  %v1299_v10 = vrot.slane %v1291_v5, 2  ;;  %v1300_v12 = vrot.slane %v1292_v7, 2  ;;  %v1914_v17 = vld [vmem:[#allocation3 + $0x108] sm:$0xff] }
  0x70   : > { %v1002_v28 = vsel %vm2165_vm1, %v997_v19, %v1001_v20  ;;  %v1303_v49 = vsel %vm566_vm8, %v1289_v57, %v1297_v48 }
  0x71   : > { %v1321_v14 = vsel %vm566_vm8, %v1292_v7, %v1300_v12  ;;  %v1325_v15 = vshrl.u32 %v1303_v49, 16  ;;  %v1328_v16 = vshll.u32 %v1303_v49, 16 }
  0x73   : > { %v722_v63 = vld.sshfl [vmem:[#allocation1] sm:$0xff pattern:$0x73625140]  ;;  %1547 = vmatpush.bf16.msra.mxu0 %v1914_v17  ;;  %v1330_v30 = vrot.slane %v1328_v16, 7 }
  0x74   : > { %835 = vst [vmem:[#allocation1] ss:$4 sm:$0xff] %v813_v62  ;;  %1733 = vmatmul.msk.bf16.vlgmr.msra.gmra.mxu1 %vm294_vm0, %v722_v63  ;;  %v1023_v62 = vrot.slane %v1022_v13, 2  ;;  %v1040_v63 = vrot.slane %v1038_v18, 7  ;;  %v1315_v13 = vsel %vm566_vm8, %v1291_v5, %v1299_v10  ;;  %v1304_v18 = vsel %vm570_vm9, %v1289_v57, %v1297_v48  ;;  %v1441_v48 = vld [vmem:[#allocation2 + $0x10] sm:$0x6] }
  0x75   : > { %838 = vst [vmem:[#allocation1 + $0x1] ss:$4 sm:$0xff] %v817_v25  ;;  %v1105_v25 = vld [vmem:[#allocation2 + $0x8] sm:$0x6]  ;;  %v1351_v22 = vshrl.u32 %v1315_v13, 16  ;;  %v1354_v23 = vshll.u32 %v1315_v13, 16 }
  0x76   : > { %841 = vst [vmem:[#allocation1 + $0x2] ss:$4 sm:$0xff] %v821_v27  ;;  %v1106_v27 = vld [vmem:[#allocation2 + $0xc] sm:$0x6]  ;;  %v1113_v32 = vrot.slane %v1105_v25, 2  ;;  %v1028_v34 = vsel %vm2165_vm1, %v1023_v62, %v1027_v24  ;;  %v1041_v35 = vsel %vm2165_vm1, %v1036_v26, %v1040_v63  ;;  %v1913_v62 = vld [vmem:[#allocation3 + $0x100] sm:$0xff]  ;;  %v1316_v24 = vsel %vm570_vm9, %v1291_v5, %v1299_v10 }
  0x77   : > { %844 = vst [vmem:[#allocation1 + $0x3] ss:$4 sm:$0xff] %v825_v29  ;;  %v1107_v29 = vld [vmem:[#allocation2 + $0x10] sm:$0x6]  ;;  %v1114_v52 = vrot.slane %v1106_v27, 2  ;;  %v1367_v26 = vshll.u32 %v1321_v14, 16  ;;  %1548 = vmatpush.bf16.msra.mxu0 %v1913_v62 }
  0x78   : > { %v1115_v0 = vrot.slane %v1107_v29, 2  ;;  %v1125_v40 = vsel %vm566_vm8, %v1105_v25, %v1113_v32  ;;  %v1127_v41 = vsel %vm570_vm9, %v1105_v25, %v1113_v32  ;;  %v1364_v25 = vshrl.u32 %v1321_v14, 16  ;;  %v1223_v63 = vld [vmem:[#allocation2 + $0x8] sm:$0x3] }
  0x79   : > { %v1134_v50 = vsel %vm570_vm9, %v1106_v27, %v1114_v52  ;;  %v1795_v2 = vrot.slane %v1125_v40, 9  ;;  %v1796_v3 = vrot.slane %v1127_v41, 9  ;;  %v1356_v36 = vrot.slane %v1354_v23, 7  ;;  %v1226_v41 = vld [vmem:[#allocation2 + $0x14] sm:$0x3] }
  0x7a   : > { %v1139_v51 = vsel %vm566_vm8, %v1107_v29, %v1115_v0  ;;  %v1141_v53 = vsel %vm570_vm9, %v1107_v29, %v1115_v0  ;;  %v1798_v45 = vrot.slane %v1134_v50, 9  ;;  %v1327_v29 = vrot.slane %v1325_v15, 6 }
  0x7b   : > { %v1800_v6 = vrot.slane %v1141_v53, 9  ;;  %v1151_v54 = vsel %vm2202_vm3, %v1795_v2, %v1796_v3  ;;  %v1353_v0 = vrot.slane %v1351_v22, 6  ;;  %v1366_v39 = vrot.slane %v1364_v25, 6 }
  0x7c   : > { %v1369_v40 = vrot.slane %v1367_v26, 7  ;;  %v1331_v42 = vor.u32 %v1330_v30, %v1327_v29 }
  0x7e   : > { %v845_v9 = vld.sshfl [vmem:[#allocation1] sm:$0xff pattern:$0x73625140]  ;;  %v1332_v57 = vrot.slane %v1331_v42, 2 }
  0x7f   : > { %1758 = vmatmul.msk.bf16.vlgmr.msra.gmra.mxu2 %vm294_vm0, %v845_v9  ;;  %901 = vst [vmem:[#allocation1] ss:$4 sm:$0xff] %v888_v47  ;;  %v1132_v47 = vsel %vm566_vm8, %v1106_v27, %v1114_v52  ;;  %v1306_v27 = vrot.slane %v1304_v18, 2  ;;  %v1225_v52 = vld [vmem:[#allocation2 + $0x10] sm:$0x3] }
  0x80   : > { %904 = vst [vmem:[#allocation1 + $0x1] ss:$4 sm:$0xff] %v889_v55  ;;  %v1793_v55 = vrot.slane %v1118_v38, 9  ;;  %v1797_v4 = vrot.slane %v1132_v47, 9 }
  0x81   : > { %907 = vst [vmem:[#allocation1 + $0x2] ss:$4 sm:$0xff] %v890_v44  ;;  %v1290_v44 = vld [vmem:[#allocation2 + $0xc] sm:$0x7]  ;;  %v1334_v43 = vshll.u32 %v1306_v27, 16 }
  0x82   : > { %910 = vst [vmem:[#allocation1 + $0x3] ss:$4 sm:$0xff] %v891_v46  ;;  %v1799_v46 = vrot.slane %v1139_v51, 9  ;;  %v1147_v9 = vsel %vm2202_vm3, %v1793_v55, %v1794_v56  ;;  %v1298_v60 = vrot.slane %v1290_v44, 2  ;;  %v1155_v11 = vsel %vm2202_vm3, %v1797_v4, %v1798_v45  ;;  %v1439_v4 = vld [vmem:[#allocation2 + $0x8] sm:$0x6] }
  0x83   : > { %v1357_v51 = vor.u32 %v1356_v36, %v1353_v0  ;;  %v1370_v55 = vor.u32 %v1369_v40, %v1366_v39  ;;  %v1336_v2 = vrot.slane %v1334_v43, 7 }
  0x84   : > { %v1159_v1 = vsel %vm2202_vm3, %v1799_v46, %v1800_v6  ;;  %v1309_v8 = vsel %vm566_vm8, %v1290_v44, %v1298_v60  ;;  %v1310_v21 = vsel %vm570_vm9, %v1290_v44, %v1298_v60  ;;  %v1440_v46 = vld [vmem:[#allocation2 + $0xc] sm:$0x6]  ;;  %v1442_v60 = vld [vmem:[#allocation2 + $0x14] sm:$0x6] }
  0x85   : > { %v1338_v19 = vshrl.u32 %v1309_v8, 16  ;;  %v1341_v20 = vshll.u32 %v1309_v8, 16  ;;  %v1312_v32 = vrot.slane %v1310_v21, 2  ;;  %v1358_v45 = vrot.slane %v1357_v51, 2 }
  0x86   : > { %v1371_v6 = vrot.slane %v1370_v55, 2  ;;  %v1450_v8 = vrot.slane %v1442_v60, 2 }
  0x87   : > { %v1347_v50 = vshll.u32 %v1312_v32, 16 }
  0x88   : > { %v1474_v59 = vsel %vm566_vm8, %v1442_v60, %v1450_v8 }
  0x89   : > { %v911_v33 = vld.sshfl [vmem:[#allocation1] sm:$0xff pattern:$0x73625140]  ;;  %v1349_v44 = vrot.slane %v1347_v50, 7  ;;  %v1858_v25 = vrot.slane %v1474_v59, 9 }
  0x8a   : > { %1775 = vmatmul.msk.bf16.vlgmr.msra.gmra.mxu3 %vm294_vm0, %v911_v33  ;;  %1051 = vst [vmem:[#allocation1] ss:$4 sm:$0xff] %v1002_v28  ;;  %v1322_v28 = vsel %vm570_vm9, %v1292_v7, %v1300_v12  ;;  %v1340_v33 = vrot.slane %v1338_v19, 6  ;;  %v1476_v19 = vsel %vm570_vm9, %v1442_v60, %v1450_v8 }
  0x8b   : > { %1054 = vst [vmem:[#allocation1 + $0x1] ss:$4 sm:$0xff] %v1015_v31  ;;  %v1224_v31 = vld [vmem:[#allocation2 + $0xc] sm:$0x3]  ;;  %v1324_v38 = vrot.slane %v1322_v28, 2  ;;  %v1859_v26 = vrot.slane %v1476_v19, 9 }
  0x8c   : > { %1057 = vst [vmem:[#allocation1 + $0x2] ss:$4 sm:$0xff] %v1028_v34  ;;  %v1343_v34 = vrot.slane %v1341_v20, 7 }
  0x8d   : > { %1060 = vst [vmem:[#allocation1 + $0x3] ss:$4 sm:$0xff] %v1041_v35  ;;  %v1318_v35 = vrot.slane %v1316_v24, 2  ;;  %v1373_v56 = vshll.u32 %v1324_v38, 16  ;;  %v1494_v30 = vsel %vm2202_vm3, %v1858_v25, %v1859_v26 }
  0x8e   : > { %v1344_v47 = vor.u32 %v1343_v34, %v1340_v33 }
  0x8f   : > { %v1360_v53 = vshll.u32 %v1318_v35, 16  ;;  %v1375_v7 = vrot.slane %v1373_v56, 7 }
  0x90   : > { %v1345_v3 = vrot.slane %v1344_v47, 2 }
  0x91   : > { %v1362_v5 = vrot.slane %v1360_v53, 7  ;;  %v1376_v49 = vsel %vm2165_vm1, %v1371_v6, %v1375_v7 }
  0x92   : > { %v1350_v10 = vsel %vm2165_vm1, %v1345_v3, %v1349_v44 }
  0x93   : > { %v1363_v12 = vsel %vm2165_vm1, %v1358_v45, %v1362_v5 }
  0x94   : > { %v1061_v58 = vld.sshfl [vmem:[#allocation1] sm:$0xff pattern:$0x73625140] }
  0x95   : > { %1792 = vmatmul.msk.bf16.vlgmr.msrb.gmra.mxu0 %vm294_vm0, %v1061_v58  ;;  %1169 = vst [vmem:[#allocation1] ss:$4 sm:$0xff] %v1147_v9  ;;  %v1337_v9 = vsel %vm2165_vm1, %v1332_v57, %v1336_v2  ;;  %v1448_v58 = vrot.slane %v1440_v46, 2 }
  0x96   : > { %1172 = vst [vmem:[#allocation1 + $0x1] ss:$4 sm:$0xff] %v1151_v54  ;;  %v1447_v54 = vrot.slane %v1439_v4, 2 }
  0x97   : > { %1175 = vst [vmem:[#allocation1 + $0x2] ss:$4 sm:$0xff] %v1155_v11  ;;  %v1460_v15 = vsel %vm566_vm8, %v1440_v46, %v1448_v58  ;;  %v1462_v16 = vsel %vm570_vm9, %v1440_v46, %v1448_v58 }
  0x98   : > { %1178 = vst [vmem:[#allocation1 + $0x3] ss:$4 sm:$0xff] %v1159_v1  ;;  %v1449_v1 = vrot.slane %v1441_v48, 2  ;;  %v1453_v13 = vsel %vm566_vm8, %v1439_v4, %v1447_v54  ;;  %v1455_v14 = vsel %vm570_vm9, %v1439_v4, %v1447_v54  ;;  %v1854_v22 = vrot.slane %v1460_v15, 9 }
  0x99   : > { %v1852_v20 = vrot.slane %v1453_v13, 9  ;;  %v1853_v21 = vrot.slane %v1455_v14, 9  ;;  %v1855_v23 = vrot.slane %v1462_v16, 9 }
  0x9a   : > { %v1467_v17 = vsel %vm566_vm8, %v1441_v48, %v1449_v1  ;;  %v1469_v18 = vsel %vm570_vm9, %v1441_v48, %v1449_v1 }
  0x9b   : > { %v1856_v62 = vrot.slane %v1467_v17, 9  ;;  %v1857_v24 = vrot.slane %v1469_v18, 9  ;;  %v1486_v27 = vsel %vm2202_vm3, %v1854_v22, %v1855_v23 }
  0x9d   : > { %v1490_v29 = vsel %vm2202_vm3, %v1856_v62, %v1857_v24 }
  0x9f   : > { %v1179_v37 = vld.sshfl [vmem:[#allocation1] sm:$0xff pattern:$0x73625140] }
  0xa0   : > { %1817 = vmatmul.msk.bf16.vlgmr.msrb.gmra.mxu1 %vm294_vm0, %v1179_v37  ;;  %1236 = vst [vmem:[#allocation1] ss:$4 sm:$0xff] %v1223_v63  ;;  %v1482_v63 = vsel %vm2202_vm3, %v1852_v20, %v1853_v21 }
  0xa1   : > { %1239 = vst [vmem:[#allocation1 + $0x1] ss:$4 sm:$0xff] %v1224_v31 }
  0xa2   : > { %1242 = vst [vmem:[#allocation1 + $0x2] ss:$4 sm:$0xff] %v1225_v52 }
  0xa3   : > { %1245 = vst [vmem:[#allocation1 + $0x3] ss:$4 sm:$0xff] %v1226_v41 }
  0xaa   : > { %v1246_v11 = vld.sshfl [vmem:[#allocation1] sm:$0xff pattern:$0x73625140] }
  0xab   : > { %1834 = vmatmul.msk.bf16.vlgmr.msrb.gmra.mxu2 %vm294_vm0, %v1246_v11  ;;  %1386 = vst [vmem:[#allocation1] ss:$4 sm:$0xff] %v1337_v9 }
  0xac   : > { %1389 = vst [vmem:[#allocation1 + $0x1] ss:$4 sm:$0xff] %v1350_v10 }
  0xad   : > { %1392 = vst [vmem:[#allocation1 + $0x2] ss:$4 sm:$0xff] %v1363_v12 }
  0xae   : > { %1395 = vst [vmem:[#allocation1 + $0x3] ss:$4 sm:$0xff] %v1376_v49 }
  0xb5   : > { %v1396_v28 = vld.sshfl [vmem:[#allocation1] sm:$0xff pattern:$0x73625140] }
  0xb6   : > { %1851 = vmatmul.msk.bf16.vlgmr.msrb.gmra.mxu3 %vm294_vm0, %v1396_v28  ;;  %1504 = vst [vmem:[#allocation1] ss:$4 sm:$0xff] %v1482_v63 }
  0xb7   : > { %1507 = vst [vmem:[#allocation1 + $0x1] ss:$4 sm:$0xff] %v1486_v27 }
  0xb8   : > { %1510 = vst [vmem:[#allocation1 + $0x2] ss:$4 sm:$0xff] %v1490_v29 }
  0xb9   : > { %1513 = vst [vmem:[#allocation1 + $0x3] ss:$4 sm:$0xff] %v1494_v30 }
  0xc0   : > { %v1514_v31 = vld.sshfl [vmem:[#allocation1] sm:$0xff pattern:$0x73625140] }
  0xc1   : > { %1876 = vmatmul.msk.bf16.vlgmr.msra.gmra.mxu0 %vm294_vm0, %v1514_v31 }
  0xe6   : > { %v706_v32 = vpop.f32.mrf.mxu0 }
  0xee   : > { %v708_v34 = vpop.f32.mrf.mxu0 }
  0xf1   : > { %v758_v33 = vpop.f32.mrf.mxu1 }
  0xf2   : > { %v759_v35 = vadd.f32 %v758_v33, %v706_v32 }
  0xf9   : > { %v760_v36 = vpop.f32.mrf.mxu1 }
  0xfa   : > { %v761_v42 = vadd.f32 %v760_v36, %v708_v34 }
 0x102   : > { %v881_v52 = vpop.f32.mrf.mxu2 }
 0x103   : > { %v886_v37 = vadd.f32 %v881_v52, %v759_v35 }
 0x10a   : > { %v883_v39 = vpop.f32.mrf.mxu2 }
 0x10b   : > { %v887_v51 = vadd.f32 %v883_v39, %v761_v42 }
 0x10d   : > { %v947_v0 = vpop.f32.mrf.mxu3 }
 0x10e   : > { %v952_v61 = vadd.f32 %v947_v0, %v886_v37 }
 0x112   : > { %v1097_v38 = vpop.f32.mrf.mxu0 }
 0x113   : > { %v1102_v43 = vadd.f32 %v1097_v38, %v952_v61 }
 0x115   : > { %v949_v40 = vpop.f32.mrf.mxu3 }
 0x116   : > { %v953_v55 = vadd.f32 %v949_v40, %v887_v51 }
 0x11a   : > { %v1099_v50 = vpop.f32.mrf.mxu0 }
 0x11b   : > { %v1103_v44 = vadd.f32 %v1099_v50, %v953_v55 }
 0x11d   : > { %v1215_v41 = vpop.f32.mrf.mxu1 }
 0x11e   : > { %v1220_v53 = vadd.f32 %v1215_v41, %v1102_v43 }
 0x125   : > { %v1217_v3 = vpop.f32.mrf.mxu1 }
 0x126   : > { %v1221_v5 = vadd.f32 %v1217_v3, %v1103_v44 }
 0x12e   : > { %v1282_v47 = vpop.f32.mrf.mxu2 }
 0x12f   : > { %v1287_v56 = vadd.f32 %v1282_v47, %v1220_v53 }
 0x136   : > { %v1284_v4 = vpop.f32.mrf.mxu2 }
 0x137   : > { %v1288_v6 = vadd.f32 %v1284_v4, %v1221_v5 }
 0x139   : > { %v1432_v57 = vpop.f32.mrf.mxu3 }
 0x13a   : > { %v1437_v2 = vadd.f32 %v1432_v57, %v1287_v56 }
 0x13e   : > { %v1550_v45 = vpop.f32.mrf.mxu0 }
 0x13f   : > { %v1555_v46 = vadd.f32 %v1550_v45, %v1437_v2 }
 0x141   : > { %v1559_v7 = vrot.slane %v1555_v46, 4  ;;  %v1563_v48 = vpack.c.bf16 %v1555_v46, %v1555_v46  ;;  %v1434_v9 = vpop.f32.mrf.mxu3  ;;  %v1578_v11 = vmul.f32 %v1555_v46, %v1555_v46 }
 0x142   : > { %v1438_v54 = vadd.f32 %v1434_v9, %v1288_v6 }
 0x143   : > { %v1564_v60 = vpack.c.bf16 %v1559_v7, %v1559_v7  ;;  %1567 = vst [vmem:[%s248_s13] sm:$0x3] %v1563_v48 }
 0x145   : > { %1568 = vst [vmem:[%s248_s13 + $0x2] sm:$0x3] %v1564_v60 }
 0x146   : > { %v1552_v10 = vpop.f32.mrf.mxu0 }
 0x147   : > { %v1556_v58 = vadd.f32 %v1552_v10, %v1438_v54 }
 0x149   : > { %v1560_v12 = vrot.slane %v1556_v58, 4  ;;  %v1565_v1 = vpack.c.bf16 %v1556_v58, %v1556_v58  ;;  %v1571_v49 = vadd.f32 %v1556_v58, %v1555_v46  ;;  %v1579_v8 = vmul.f32 %v1556_v58, %v1556_v58 }
 0x14b   : > { %v1566_v13 = vpack.c.bf16 %v1560_v12, %v1560_v12  ;;  %1569 = vst [vmem:[%s248_s13 + $0x4] sm:$0x3] %v1565_v1  ;;  %v1572_v14 = vrot.slane %v1571_v49, 4  ;;  %v1580_v15 = vadd.f32 %v1579_v8, %v1578_v11 }
 0x14d   : > { %1570 = vst [vmem:[%s248_s13 + $0x6] sm:$0x3] %v1566_v13  ;;  %v1573_v16 = vadd.f32 %v1572_v14, %v1571_v49  ;;  %v1581_v17 = vrot.slane %v1580_v15, 4 }
 0x14f   : > { %v1574_v18 = vrot.slane %v1573_v16, 2  ;;  %v1582_v59 = vadd.f32 %v1581_v17, %v1580_v15 }
 0x151   : > { %v1575_v19 = vadd.f32 %v1574_v18, %v1573_v16  ;;  %v1583_v20 = vrot.slane %v1582_v59, 2 }
 0x153   : > { %v1576_v21 = vrot.slane %v1575_v19, 1  ;;  %v1584_v22 = vadd.f32 %v1583_v20, %v1582_v59 }
 0x155   : > { %v1585_v23 = vrot.slane %v1584_v22, 1  ;;  %v1577_v62 = vadd.f32 %v1576_v21, %v1575_v19 }
 0x157   : > { %v1586_v24 = vadd.f32 %v1585_v23, %v1584_v22 }
 0x159   : > { %v1588_v25 = vsel %vm803_vm2, %v1577_v62, %v1586_v24 }
 0x15a   : > { %1589 = vst [vmem:[%s252_s17] sm:$0x3] %v1588_v25 }
 0x15b PF: > { %s17_s18 = sadd.s32 1, %s2000_s18  }
 0x15c   : > { %p14_p7 = scmp.ge.s32.totalorder %s17_s18, 4  }
 0x15e   :  { %16 = sbr.rel (!%p14_p7) target bundleno = 1 (0x1), region = 112 }
 0x163   :  { %1625 = vsyncpa [#allocation4], 1 }
 0x164   :  { %1627 = vsyncpa [#allocation4 + $0x1], 1 }

// kernel: darknet_forward.8
= control target key start
LH: loop header
LB: loop body
LE: loop exit
PB: predicated region body
PF: predicated region fallthrough
CT: control target
= control target key end

     0   :  { %s2718_s18 = smov 0   ;;  %s3722_s0 = inlined_call_operand.vmem [shape: bf16[2,4,4,128], index: 0, kind: input, shape index: {}]   ;;  %s3723_s1 = inlined_call_operand.vmem [shape: bf16[1152,256], index: 1, kind: input, shape index: {}]   ;;  %s3724_s2 = inlined_call_operand.vmem [shape: f32[1,128], index: 2, kind: input, shape index: {}]   ;;  %s3725_s3 = inlined_call_operand.vmem [shape: f32[1,128], index: 3, kind: input, shape index: {}]   ;;  %s3726_s4 = inlined_call_operand.vmem [shape: bf16[2,2,2,256], index: 4, kind: output, shape index: {0}]   ;;  %s3727_s5 = inlined_call_operand.vmem [shape: f32[2,2,256], index: 5, kind: output, shape index: {1}]  }
   0x1 LB: > { %s1928_s19 = sadd.s32 4294967295, %s2685_s18   ;;  %p1932_p0 = scmp.ge.s32.totalorder %s2685_s18, 1  ;;  %s2685_s18 = sphi %s2718_s18, %s16_s18  }
   0x2   : > { %p190_p1 = scmp.lt.s32.totalorder %s2685_s18, 3 }
   0x4   : > { %p191_p2 = pnand %p1932_p0, %p190_p1 }
   0x5   : > { %p222_p3 = scmp.lt.s32.totalorder (!%p191_p2), %s1928_s19, 1 }
   0x6   : > { %194 = sbr.rel (%p191_p2) target bundleno = 377 (0x179), region = 36 }
   0xb   : > { %v1998_v0 = vld [vmem:[%s3723_s1 + $0xf0] sm:$0xf]  ;;  %v2555_v1 = vld [vmem:[%s3723_s1 + $0xf4] sm:$0xf0]  ;;  %v2554_v2 = vld [vmem:[%s3723_s1 + $0xf4] sm:$0xf] }
   0xc   : > { %v1999_v3 = vor.u32 %v2555_v1, %v1998_v0  ;;  %v2000_v4 = vld [vmem:[%s3723_s1 + $0xf8] sm:$0xf0]  ;;  %v1990_v5 = vld [vmem:[%s3723_s1 + $0xe0] sm:$0xf]  ;;  %v2553_v6 = vld [vmem:[%s3723_s1 + $0xe4] sm:$0xf0] }
   0xd   : > { %v2003_v7 = vor.u32 %v2554_v2, %v2000_v4  ;;  %v2552_v8 = vld [vmem:[%s3723_s1 + $0xe4] sm:$0xf]  ;;  %v1992_v9 = vld [vmem:[%s3723_s1 + $0xe8] sm:$0xf0]  ;;  %v1991_v10 = vor.u32 %v2553_v6, %v1990_v5  ;;  %v1982_v12 = vld [vmem:[%s3723_s1 + $0xd0] sm:$0xf] }
   0xe   : > { %586 = vmatpush.bf16.msra.mxu0 %v1999_v3  ;;  %v1995_v11 = vor.u32 %v2552_v8, %v1992_v9  ;;  %v2551_v13 = vld [vmem:[%s3723_s1 + $0xd4] sm:$0xf0]  ;;  %v2550_v14 = vld [vmem:[%s3723_s1 + $0xd4] sm:$0xf]  ;;  %v1984_v15 = vld [vmem:[%s3723_s1 + $0xd8] sm:$0xf0] }
   0xf   : > { %599 = vmatpush.bf16.msra.mxu1 %v2003_v7  ;;  %v2062_v16 = vld [vmem:[%s3723_s1 + $0x70] sm:$0xf]  ;;  %v2539_v17 = vld [vmem:[%s3723_s1 + $0x74] sm:$0xf0]  ;;  %v2538_v19 = vld [vmem:[%s3723_s1 + $0x74] sm:$0xf]  ;;  %v1983_v21 = vor.u32 %v2551_v13, %v1982_v12  ;;  %v1987_v25 = vor.u32 %v2550_v14, %v1984_v15 }
  0x10   : > { %v2063_v18 = vor.u32 %v2539_v17, %v2062_v16  ;;  %v2064_v20 = vld [vmem:[%s3723_s1 + $0x78] sm:$0xf0]  ;;  %v1974_v22 = vld [vmem:[%s3723_s1 + $0xc0] sm:$0xf]  ;;  %v2549_v23 = vld [vmem:[%s3723_s1 + $0xc4] sm:$0xf0] }
  0x11   : > { %v2067_v24 = vor.u32 %v2538_v19, %v2064_v20  ;;  %v2054_v26 = vld [vmem:[%s3723_s1 + $0x60] sm:$0xf]  ;;  %v2537_v27 = vld [vmem:[%s3723_s1 + $0x64] sm:$0xf0]  ;;  %v2536_v28 = vld [vmem:[%s3723_s1 + $0x64] sm:$0xf]  ;;  %v1975_v35 = vor.u32 %v2549_v23, %v1974_v22 }
  0x12   : > { %587 = vmatpush.bf16.msra.mxu0 %v1991_v10  ;;  %699 = vmatpush.bf16.msra.mxu2 %v2063_v18  ;;  %v2548_v29 = vld [vmem:[%s3723_s1 + $0xc4] sm:$0xf]  ;;  %v1976_v30 = vld [vmem:[%s3723_s1 + $0xc8] sm:$0xf0]  ;;  %v2055_v31 = vor.u32 %v2537_v27, %v2054_v26  ;;  %v2046_v34 = vld [vmem:[%s3723_s1 + $0x50] sm:$0xf] }
  0x13   : > { %600 = vmatpush.bf16.msra.mxu1 %v1995_v11  ;;  %712 = vmatpush.bf16.msra.mxu3 %v2067_v24  ;;  %v2056_v32 = vld [vmem:[%s3723_s1 + $0x68] sm:$0xf0]  ;;  %v2535_v36 = vld [vmem:[%s3723_s1 + $0x54] sm:$0xf0]  ;;  %v2534_v37 = vld [vmem:[%s3723_s1 + $0x54] sm:$0xf]  ;;  %v1979_v39 = vor.u32 %v2548_v29, %v1976_v30 }
  0x14   : > { %v2059_v33 = vor.u32 %v2536_v28, %v2056_v32  ;;  %v2048_v38 = vld [vmem:[%s3723_s1 + $0x58] sm:$0xf0]  ;;  %v1966_v40 = vld [vmem:[%s3723_s1 + $0xb0] sm:$0xf]  ;;  %v2547_v41 = vld [vmem:[%s3723_s1 + $0xb4] sm:$0xf0]  ;;  %v2047_v43 = vor.u32 %v2535_v36, %v2046_v34 }
  0x15   : > { %v2546_v42 = vld [vmem:[%s3723_s1 + $0xb4] sm:$0xf]  ;;  %v1968_v44 = vld [vmem:[%s3723_s1 + $0xb8] sm:$0xf0]  ;;  %v2051_v45 = vor.u32 %v2534_v37, %v2048_v38  ;;  %v2038_v46 = vld [vmem:[%s3723_s1 + $0x40] sm:$0xf]  ;;  %v1967_v50 = vor.u32 %v2547_v41, %v1966_v40 }
  0x16   : > { %588 = vmatpush.bf16.msra.mxu0 %v1983_v21  ;;  %700 = vmatpush.bf16.msra.mxu2 %v2055_v31  ;;  %v2533_v47 = vld [vmem:[%s3723_s1 + $0x44] sm:$0xf0]  ;;  %v2532_v48 = vld [vmem:[%s3723_s1 + $0x44] sm:$0xf]  ;;  %v2040_v49 = vld [vmem:[%s3723_s1 + $0x48] sm:$0xf0]  ;;  %v1971_v51 = vor.u32 %v2546_v42, %v1968_v44 }
  0x17   : > { %601 = vmatpush.bf16.msra.mxu1 %v1987_v25  ;;  %713 = vmatpush.bf16.msra.mxu3 %v2059_v33  ;;  %v1958_v52 = vld [vmem:[%s3723_s1 + $0xa0] sm:$0xf]  ;;  %v2545_v53 = vld [vmem:[%s3723_s1 + $0xa4] sm:$0xf0]  ;;  %v2544_v54 = vld [vmem:[%s3723_s1 + $0xa4] sm:$0xf]  ;;  %v2039_v55 = vor.u32 %v2533_v47, %v2038_v46  ;;  %v2043_v57 = vor.u32 %v2532_v48, %v2040_v49 }
  0x18   : > { %v1960_v56 = vld [vmem:[%s3723_s1 + $0xa8] sm:$0xf0]  ;;  %v2030_v58 = vld [vmem:[%s3723_s1 + $0x30] sm:$0xf]  ;;  %v2531_v59 = vld [vmem:[%s3723_s1 + $0x34] sm:$0xf0]  ;;  %v1959_v62 = vor.u32 %v2545_v53, %v1958_v52 }
  0x19   : > { %v2530_v60 = vld [vmem:[%s3723_s1 + $0x34] sm:$0xf]  ;;  %v2032_v61 = vld [vmem:[%s3723_s1 + $0x38] sm:$0xf0]  ;;  %v1963_v63 = vor.u32 %v2544_v54, %v1960_v56  ;;  %v1950_v0 = vld [vmem:[%s3723_s1 + $0x90] sm:$0xf]  ;;  %v2031_v3 = vor.u32 %v2531_v59, %v2030_v58 }
  0x1a   : > { %589 = vmatpush.bf16.msra.mxu0 %v1975_v35  ;;  %701 = vmatpush.bf16.msra.mxu2 %v2047_v43  ;;  %v2543_v1 = vld [vmem:[%s3723_s1 + $0x94] sm:$0xf0]  ;;  %v2542_v2 = vld [vmem:[%s3723_s1 + $0x94] sm:$0xf]  ;;  %v1952_v4 = vld [vmem:[%s3723_s1 + $0x98] sm:$0xf0]  ;;  %v2035_v5 = vor.u32 %v2530_v60, %v2032_v61 }
  0x1b   : > { %602 = vmatpush.bf16.msra.mxu1 %v1979_v39  ;;  %714 = vmatpush.bf16.msra.mxu3 %v2051_v45  ;;  %v2022_v6 = vld [vmem:[%s3723_s1 + $0x20] sm:$0xf]  ;;  %v2529_v7 = vld [vmem:[%s3723_s1 + $0x24] sm:$0xf0]  ;;  %v2528_v8 = vld [vmem:[%s3723_s1 + $0x24] sm:$0xf]  ;;  %v1951_v10 = vor.u32 %v2543_v1, %v1950_v0  ;;  %v1955_v12 = vor.u32 %v2542_v2, %v1952_v4 }
  0x1c   : > { %v2024_v9 = vld [vmem:[%s3723_s1 + $0x28] sm:$0xf0]  ;;  %v1942_v11 = vld [vmem:[%s3723_s1 + $0x80] sm:$0xf]  ;;  %v2541_v13 = vld [vmem:[%s3723_s1 + $0x84] sm:$0xf0]  ;;  %v2023_v16 = vor.u32 %v2529_v7, %v2022_v6 }
  0x1d   : > { %v2540_v14 = vld [vmem:[%s3723_s1 + $0x84] sm:$0xf]  ;;  %v1944_v15 = vld [vmem:[%s3723_s1 + $0x88] sm:$0xf0]  ;;  %v2126_v17 = vld [vmem:[%s3723_s1 + $0x170] sm:$0xf]  ;;  %v2027_v20 = vor.u32 %v2528_v8, %v2024_v9  ;;  %v1943_v24 = vor.u32 %v2541_v13, %v1942_v11 }
  0x1e   : > { %590 = vmatpush.bf16.msra.mxu0 %v1967_v50  ;;  %702 = vmatpush.bf16.msra.mxu2 %v2039_v55  ;;  %v2571_v18 = vld [vmem:[%s3723_s1 + $0x174] sm:$0xf0]  ;;  %v2570_v19 = vld [vmem:[%s3723_s1 + $0x174] sm:$0xf]  ;;  %v2128_v21 = vld [vmem:[%s3723_s1 + $0x178] sm:$0xf0]  ;;  %v1947_v27 = vor.u32 %v2540_v14, %v1944_v15 }
  0x1f   : > { %603 = vmatpush.bf16.msra.mxu1 %v1971_v51  ;;  %715 = vmatpush.bf16.msra.mxu3 %v2043_v57  ;;  %v2014_v22 = vld [vmem:[%s3723_s1 + $0x10] sm:$0xf]  ;;  %v2527_v23 = vld [vmem:[%s3723_s1 + $0x14] sm:$0xf0]  ;;  %v2526_v25 = vld [vmem:[%s3723_s1 + $0x14] sm:$0xf]  ;;  %v2127_v28 = vor.u32 %v2571_v18, %v2126_v17  ;;  %v2131_v30 = vor.u32 %v2570_v19, %v2128_v21 }
  0x20   : > { %v2016_v26 = vld [vmem:[%s3723_s1 + $0x18] sm:$0xf0]  ;;  %v2118_v29 = vld [vmem:[%s3723_s1 + $0x160] sm:$0xf]  ;;  %v2569_v31 = vld [vmem:[%s3723_s1 + $0x164] sm:$0xf0]  ;;  %v2015_v34 = vor.u32 %v2527_v23, %v2014_v22 }
  0x21   : > { %v2568_v32 = vld [vmem:[%s3723_s1 + $0x164] sm:$0xf]  ;;  %v2120_v33 = vld [vmem:[%s3723_s1 + $0x168] sm:$0xf0]  ;;  %v2019_v35 = vor.u32 %v2526_v25, %v2016_v26  ;;  %v2006_v36 = vld [vmem:[%s3723_s1] sm:$0xf]  ;;  %v2119_v42 = vor.u32 %v2569_v31, %v2118_v29 }
  0x22   : > { %591 = vmatpush.bf16.msra.mxu0 %v1959_v62  ;;  %703 = vmatpush.bf16.msra.mxu2 %v2031_v3  ;;  %v2525_v37 = vld [vmem:[%s3723_s1 + $0x4] sm:$0xf0]  ;;  %v2524_v38 = vld [vmem:[%s3723_s1 + $0x4] sm:$0xf]  ;;  %v2008_v39 = vld [vmem:[%s3723_s1 + $0x8] sm:$0xf0]  ;;  %v2123_v45 = vor.u32 %v2568_v32, %v2120_v33 }
  0x23   : > { %604 = vmatpush.bf16.msra.mxu1 %v1963_v63  ;;  %716 = vmatpush.bf16.msra.mxu3 %v2035_v5  ;;  %v2190_v40 = vld [vmem:[%s3723_s1 + $0x1f0] sm:$0xf]  ;;  %v2587_v41 = vld [vmem:[%s3723_s1 + $0x1f4] sm:$0xf0]  ;;  %v2586_v43 = vld [vmem:[%s3723_s1 + $0x1f4] sm:$0xf]  ;;  %v2007_v48 = vor.u32 %v2525_v37, %v2006_v36  ;;  %v2011_v51 = vor.u32 %v2524_v38, %v2008_v39 }
  0x24   : > { %v2192_v44 = vld [vmem:[%s3723_s1 + $0x1f8] sm:$0xf0]  ;;  %v2110_v46 = vld [vmem:[%s3723_s1 + $0x150] sm:$0xf]  ;;  %v2567_v47 = vld [vmem:[%s3723_s1 + $0x154] sm:$0xf0]  ;;  %v2191_v52 = vor.u32 %v2587_v41, %v2190_v40 }
  0x25   : > { %v2566_v49 = vld [vmem:[%s3723_s1 + $0x154] sm:$0xf]  ;;  %v2112_v50 = vld [vmem:[%s3723_s1 + $0x158] sm:$0xf0]  ;;  %v2195_v53 = vor.u32 %v2586_v43, %v2192_v44  ;;  %v2182_v54 = vld [vmem:[%s3723_s1 + $0x1e0] sm:$0xf]  ;;  %v2111_v56 = vor.u32 %v2567_v47, %v2110_v46 }
  0x26   : > { %592 = vmatpush.bf16.msra.mxu0 %v1951_v10  ;;  %704 = vmatpush.bf16.msra.mxu2 %v2023_v16  ;;  %v2585_v55 = vld [vmem:[%s3723_s1 + $0x1e4] sm:$0xf0]  ;;  %v2584_v57 = vld [vmem:[%s3723_s1 + $0x1e4] sm:$0xf]  ;;  %v2184_v58 = vld [vmem:[%s3723_s1 + $0x1e8] sm:$0xf0]  ;;  %v2115_v59 = vor.u32 %v2566_v49, %v2112_v50 }
  0x27   : > { %605 = vmatpush.bf16.msra.mxu1 %v1955_v12  ;;  %717 = vmatpush.bf16.msra.mxu3 %v2027_v20  ;;  %v2102_v60 = vld [vmem:[%s3723_s1 + $0x140] sm:$0xf]  ;;  %v2565_v61 = vld [vmem:[%s3723_s1 + $0x144] sm:$0xf0]  ;;  %v2564_v62 = vld [vmem:[%s3723_s1 + $0x144] sm:$0xf]  ;;  %v2183_v0 = vor.u32 %v2585_v55, %v2182_v54  ;;  %v2187_v3 = vor.u32 %v2584_v57, %v2184_v58 }
  0x28   : > { %v2104_v63 = vld [vmem:[%s3723_s1 + $0x148] sm:$0xf0]  ;;  %v2174_v1 = vld [vmem:[%s3723_s1 + $0x1d0] sm:$0xf]  ;;  %v2583_v4 = vld [vmem:[%s3723_s1 + $0x1d4] sm:$0xf0]  ;;  %v2103_v5 = vor.u32 %v2565_v61, %v2102_v60 }
  0x29   : > { %v2094_v2 = vld [vmem:[%s3723_s1 + $0x130] sm:$0xf]  ;;  %v2582_v6 = vld [vmem:[%s3723_s1 + $0x1d4] sm:$0xf]  ;;  %v2176_v7 = vld [vmem:[%s3723_s1 + $0x1d8] sm:$0xf0]  ;;  %v2107_v8 = vor.u32 %v2564_v62, %v2104_v63  ;;  %v2175_v12 = vor.u32 %v2583_v4, %v2174_v1 }
  0x2a   : > { %593 = vmatpush.bf16.msra.mxu0 %v1943_v24  ;;  %705 = vmatpush.bf16.msra.mxu2 %v2015_v34  ;;  %s3773_s19 = smov (!%p222_p3, %s1928_s19), 1  ;;  %v2563_v9 = vld [vmem:[%s3723_s1 + $0x134] sm:$0xf0]  ;;  %v2562_v10 = vld [vmem:[%s3723_s1 + $0x134] sm:$0xf]  ;;  %v2179_v19 = vor.u32 %v2582_v6, %v2176_v7  ;;  %v2687_v36 = vmov 0  }
  0x2b   : > { %606 = vmatpush.bf16.msra.mxu1 %v1947_v27  ;;  %718 = vmatpush.bf16.msra.mxu3 %v2019_v35  ;;  %v2096_v11 = vld [vmem:[%s3723_s1 + $0x138] sm:$0xf0]  ;;  %v2166_v13 = vld [vmem:[%s3723_s1 + $0x1c0] sm:$0xf]  ;;  %v2581_v14 = vld [vmem:[%s3723_s1 + $0x1c4] sm:$0xf0]  ;;  %v2095_v23 = vor.u32 %v2563_v9, %v2094_v2 }
  0x2c   : > { %s2522_s7 = sshll.u32 %s3773_s19, 3  ;;  %v2086_v15 = vld [vmem:[%s3723_s1 + $0x120] sm:$0xf]  ;;  %v2561_v16 = vld [vmem:[%s3723_s1 + $0x124] sm:$0xf0]  ;;  %v2099_v24 = vor.u32 %v2562_v10, %v2096_v11  ;;  %v2167_v33 = vor.u32 %v2581_v14, %v2166_v13  ;;  %vm3729_vm0 = vcmask 1043456  }
  0x2d   : > { %v2560_v17 = vld [vmem:[%s3723_s1 + $0x124] sm:$0xf]  ;;  %v2088_v18 = vld [vmem:[%s3723_s1 + $0x128] sm:$0xf0]  ;;  %s226_s24 = scalar_lea.vmem %s3722_s0, %s2522_s7  ;;  %v2677_v22 = vld [vmem:[%s3724_s2] ss:$0 sm:$0xff] }
  0x2e   : > { %836 = vmatpush.bf16.msrb.mxu0 %v2127_v28  ;;  %706 = vmatpush.bf16.msra.mxu2 %v2007_v48  ;;  %v2580_v20 = vld [vmem:[%s3723_s1 + $0x1c4] sm:$0xf]  ;;  %v2168_v21 = vld [vmem:[%s3723_s1 + $0x1c8] sm:$0xf0]  ;;  %v237_v25 = vld [vmem:[%s226_s24] sm:$0x3]  ;;  %v2091_v43 = vor.u32 %v2560_v17, %v2088_v18 }
  0x2f   : > { %849 = vmatpush.bf16.msrb.mxu1 %v2131_v30  ;;  %719 = vmatpush.bf16.msra.mxu3 %v2011_v51  ;;  %v238_v26 = vld [vmem:[%s226_s24 + $0x2] sm:$0x3]  ;;  %v239_v27 = vld [vmem:[%s226_s24 + $0x4] sm:$0x3]  ;;  %v240_v28 = vld [vmem:[%s226_s24 + $0x6] sm:$0x3]  ;;  %v241_v29 = vunpack.c.l.bf16 %v237_v25  ;;  %v2171_v34 = vor.u32 %v2580_v20, %v2168_v21 }
  0x30   : > { %v242_v30 = vunpack.c.l.bf16 %v238_v26  ;;  %v243_v31 = vunpack.c.l.bf16 %v239_v27  ;;  %v2678_v32 = vld [vmem:[%s3725_s3] ss:$0 sm:$0xff]  ;;  %v244_v35 = vunpack.c.l.bf16 %v240_v28  ;;  %324 = vst [vmem:[#allocation2] sm:$0x3] %v2687_v36  ;;  %v2158_v37 = vld [vmem:[%s3723_s1 + $0x1b0] sm:$0xf] }
  0x31   : > { %v2579_v38 = vld [vmem:[%s3723_s1 + $0x1b4] sm:$0xf0]  ;;  %v249_v39 = vmul.f32 %v2677_v22, %v241_v29  ;;  %325 = vst [vmem:[#allocation2 + $0x2] sm:$0x3] %v2687_v36  ;;  %v2578_v44 = vld [vmem:[%s3723_s1 + $0x1b4] sm:$0xf] }
  0x32   : > { %837 = vmatpush.bf16.msrb.mxu0 %v2119_v42  ;;  %969 = vmatpush.bf16.msrb.mxu2 %v2191_v52  ;;  %v250_v40 = vmul.f32 %v2677_v22, %v242_v30  ;;  %v251_v41 = vmul.f32 %v2677_v22, %v243_v31  ;;  %v2087_v42 = vor.u32 %v2561_v16, %v2086_v15  ;;  %v2078_v47 = vld [vmem:[%s3723_s1 + $0x110] sm:$0xf]  ;;  %v2559_v48 = vld [vmem:[%s3723_s1 + $0x114] sm:$0xf0]  ;;  %v2558_v52 = vld [vmem:[%s3723_s1 + $0x114] sm:$0xf] }
  0x33   : > { %850 = vmatpush.bf16.msrb.mxu1 %v2123_v45  ;;  %982 = vmatpush.bf16.msrb.mxu3 %v2195_v53  ;;  %v2160_v45 = vld [vmem:[%s3723_s1 + $0x1b8] sm:$0xf0]  ;;  %v252_v46 = vmul.f32 %v2677_v22, %v244_v35  ;;  %326 = vst [vmem:[#allocation2 + $0x4] sm:$0x3] %v2687_v36  ;;  %v257_v49 = vadd.f32 %v2678_v32, %v249_v39  ;;  %v2070_v63 = vld [vmem:[%s3723_s1 + $0x100] sm:$0xf] }
  0x34   : > { %v258_v50 = vadd.f32 %v2678_v32, %v250_v40  ;;  %v259_v51 = vadd.f32 %v2678_v32, %v251_v41  ;;  %327 = vst [vmem:[#allocation2 + $0x6] sm:$0x3] %v2687_v36  ;;  %v2080_v53 = vld [vmem:[%s3723_s1 + $0x118] sm:$0xf0]  ;;  %v2159_v54 = vor.u32 %v2579_v38, %v2158_v37  ;;  %v2079_v60 = vor.u32 %v2559_v48, %v2078_v47  ;;  %v2556_v4 = vld [vmem:[%s3723_s1 + $0x104] sm:$0xf] }
  0x35   : > { %v260_v55 = vadd.f32 %v2678_v32, %v252_v46  ;;  %v261_v57 = vmul.f32 0.1, %v257_v49  ;;  %v2083_v62 = vor.u32 %v2558_v52, %v2080_v53  ;;  %vm3733_vm1 = vcmask 1041408   ;;  %s1935_s29 = sshll.u32 %s3773_s19, 2 }
  0x36   : > { %838 = vmatpush.bf16.msrb.mxu0 %v2111_v56  ;;  %970 = vmatpush.bf16.msrb.mxu2 %v2183_v0  ;;  %v2163_v56 = vor.u32 %v2578_v44, %v2160_v45  ;;  %v262_v58 = vmul.f32 0.1, %v258_v50  ;;  %v2557_v0 = vld [vmem:[%s3723_s1 + $0x104] sm:$0xf0]  ;;  %vm3728_vm2 = vcmask 1043458   ;;  %vm369_vm3 = vcmask 1042434   ;;  %s230_s7 = scalar_lea.vmem %s3726_s4, %s1935_s29  ;;  %s235_s9 = scalar_lea.vmem %s3727_s5, %s1935_s29 }
  0x37   : > { %851 = vmatpush.bf16.msrb.mxu1 %v2115_v59  ;;  %983 = vmatpush.bf16.msrb.mxu3 %v2187_v3  ;;  %v263_v59 = vmul.f32 0.1, %v259_v51  ;;  %v264_v61 = vmul.f32 0.1, %v260_v55  ;;  %v265_v1 = vmax.f32 %v257_v49, %v261_v57  ;;  %v2071_v10 = vor.u32 %v2557_v0, %v2070_v63  ;;  %v414_v53 = vld [vmem:[#allocation2] sm:$0x3] }
  0x38   : > { %v266_v2 = vmax.f32 %v258_v50, %v262_v58  ;;  %v419_v57 = vrot.slane %v414_v53, 2  ;;  %vm3731_vm4 = vcmask 1040384   ;;  %vm3730_vm5 = vcmask 1041409  }
  0x39   : > { %v267_v3 = vmax.f32 %v259_v51, %v263_v59  ;;  %v268_v6 = vmax.f32 %v260_v55, %v264_v61  ;;  %v270_v7 = vsel %vm3729_vm0, %v265_v1, -inf  ;;  %vm3732_vm6 = vcmask 1043459  }
  0x3a   : > { %839 = vmatpush.bf16.msrb.mxu0 %v2103_v5  ;;  %971 = vmatpush.bf16.msrb.mxu2 %v2175_v12  ;;  %v2072_v5 = vld [vmem:[%s3723_s1 + $0x108] sm:$0xf0]  ;;  %vm436_vm7 = vcmask 1042433   ;;  %vm452_vm8 = vsmask.f32 256 }
  0x3b   : > { %852 = vmatpush.bf16.msrb.mxu1 %v2107_v8  ;;  %984 = vmatpush.bf16.msrb.mxu3 %v2179_v19  ;;  %v271_v8 = vsel %vm3729_vm0, %v266_v2, -inf  ;;  %v273_v9 = vsel %vm3729_vm0, %v267_v3, -inf  ;;  %v274_v12 = vsel %vm3729_vm0, %v268_v6, -inf  ;;  %v2075_v13 = vor.u32 %v2556_v4, %v2072_v5 }
  0x3c   : > { %v272_v11 = vmax.f32 %v270_v7, %v271_v8  ;;  %v275_v14 = vmax.f32 %v273_v9, %v274_v12  ;;  %vm453_vm9 = vsmask.f32 1284  ;;  %vm455_vm11 = vsmask.f32 2312 }
  0x3d   : > { %vm454_vm10 = vmor %vm452_vm8, %vm453_vm9  ;;  %vm457_vm12 = vsmask.f32 3340  ;;  %vm459_vm14 = vsmask.f32 4368  ;;  %vm461_vm15 = vsmask.f32 5396 }
  0x3e   : > { %840 = vmatpush.bf16.msrb.mxu0 %v2095_v23  ;;  %972 = vmatpush.bf16.msrb.mxu2 %v2167_v33  ;;  %v278_v15 = vrot.slane %v272_v11, 2  ;;  %v279_v16 = vrot.slane %v275_v14, 2  ;;  %vm456_vm13 = vmor %vm454_vm10, %vm455_vm11  ;;  %vm463_vm0 = vsmask.f32 6424  ;;  %vm3742_vm9 = vcmask 1041409  }
  0x3f   : > { %853 = vmatpush.bf16.msrb.mxu1 %v2099_v24  ;;  %985 = vmatpush.bf16.msrb.mxu3 %v2171_v34  ;;  %vm3743_vm10 = vcmask 1043459  }
  0x40   : > { %v281_v17 = vsel %vm3733_vm1, %v272_v11, %v278_v15  ;;  %v283_v18 = vsel %vm3728_vm2, %v272_v11, %v278_v15  ;;  %v285_v20 = vsel %vm3733_vm1, %v275_v14, %v279_v16  ;;  %v286_v21 = vsel %vm3728_vm2, %v275_v14, %v279_v16  ;;  %vm458_vm2 = vmor %vm456_vm13, %vm457_vm12 }
  0x41   : > { %v284_v19 = vrot.slane %v283_v18, 2  ;;  %v292_v22 = vsel %vm3733_vm1, %v281_v17, -inf  ;;  %v287_v23 = vrot.slane %v286_v21, 2  ;;  %v306_v25 = vsel %vm3733_vm1, %v285_v20, -inf  ;;  %vm3745_vm12 = vmmov %vm3742_vm9 }
  0x42   : > { %841 = vmatpush.bf16.msrb.mxu0 %v2087_v42  ;;  %973 = vmatpush.bf16.msrb.mxu2 %v2159_v54  ;;  %v293_v24 = vrot.slane %v292_v22, 4  ;;  %v307_v27 = vrot.slane %v306_v25, 4  ;;  %vm3746_vm13 = vmmov %vm3743_vm10 }
  0x43   : > { %854 = vmatpush.bf16.msrb.mxu1 %v2091_v43  ;;  %986 = vmatpush.bf16.msrb.mxu3 %v2163_v56  ;;  %v299_v26 = vsel %vm3733_vm1, %v284_v19, -inf  ;;  %v313_v30 = vsel %vm3733_vm1, %v287_v23, -inf  ;;  %v418_v56 = vrot.slane %v414_v53, 1 }
  0x44   : > { %v294_v28 = vmax.f32 %v292_v22, %v293_v24  ;;  %v300_v29 = vrot.slane %v299_v26, 4  ;;  %v308_v31 = vmax.f32 %v306_v25, %v307_v27  ;;  %v314_v32 = vrot.slane %v313_v30, 4 }
  0x45   : > { %v427_v63 = vsel %vm3731_vm4, %v414_v53, %v418_v56  ;;  %v433_v3 = vsel %vm3730_vm5, %v414_v53, %v418_v56  ;;  %vm460_vm5 = vmor %vm458_vm2, %vm459_vm14  ;;  %vm465_vm4 = vsmask.f32 7452 }
  0x46   : > { %842 = vmatpush.bf16.msrb.mxu0 %v2079_v60  ;;  %v295_v33 = vrot.slane %v294_v28, 2  ;;  %v301_v34 = vmax.f32 %v299_v26, %v300_v29  ;;  %v309_v35 = vrot.slane %v308_v31, 2  ;;  %v315_v36 = vmax.f32 %v313_v30, %v314_v32  ;;  %v2150_v29 = vld [vmem:[%s3723_s1 + $0x1a0] sm:$0xf]  ;;  %v2577_v30 = vld [vmem:[%s3723_s1 + $0x1a4] sm:$0xf0]  ;;  %vm3747_vm14 = vmmov %vm3742_vm9 }
  0x47   : > { %855 = vmatpush.bf16.msrb.mxu1 %v2083_v62  ;;  %v420_v60 = vrot.slane %v414_v53, 3  ;;  %v2572_v53 = vld [vmem:[%s3723_s1 + $0x184] sm:$0xf] }
  0x48   : > { %v296_v37 = vmax.f32 %v294_v28, %v295_v33  ;;  %v302_v38 = vrot.slane %v301_v34, 2  ;;  %v310_v39 = vmax.f32 %v308_v31, %v309_v35  ;;  %v316_v40 = vrot.slane %v315_v36, 2  ;;  %v2576_v31 = vld [vmem:[%s3723_s1 + $0x1a4] sm:$0xf] }
  0x49   : > { %v430_v2 = vsel %vm369_vm3, %v419_v57, %v420_v60  ;;  %v435_v6 = vsel %vm3732_vm6, %v419_v57, %v420_v60  ;;  %vm462_vm6 = vmor %vm460_vm5, %vm461_vm15  ;;  %v2151_v33 = vor.u32 %v2577_v30, %v2150_v29  ;;  %v2619_v29 = vld [vmem:[%s3723_s1 + $0x2f4] sm:$0xf0]  ;;  %v2618_v30 = vld [vmem:[%s3723_s1 + $0x2f4] sm:$0xf] }
  0x4a   : > { %843 = vmatpush.bf16.msrb.mxu0 %v2071_v10  ;;  %v297_v41 = vrot.slane %v296_v37, 1  ;;  %v303_v42 = vmax.f32 %v301_v34, %v302_v38  ;;  %v311_v43 = vrot.slane %v310_v39, 1  ;;  %v317_v44 = vmax.f32 %v315_v36, %v316_v40  ;;  %v2152_v34 = vld [vmem:[%s3723_s1 + $0x1a8] sm:$0xf0]  ;;  %v2597_v36 = vld [vmem:[%s3723_s1 + $0x244] sm:$0xf0]  ;;  %vm3748_vm15 = vmmov %vm3743_vm10 }
  0x4b   : > { %856 = vmatpush.bf16.msrb.mxu1 %v2075_v13  ;;  %v431_v7 = vsel %vm3733_vm1, %v427_v63, %v430_v2  ;;  %v437_v8 = vsel %vm436_vm7, %v433_v3, %v435_v6  ;;  %v2155_v38 = vor.u32 %v2576_v31, %v2152_v34  ;;  %v393_v40 = vld [vmem:[#allocation2 + $0x4] sm:$0x3]  ;;  %974 = vmatpush.bf16.msrb.mxu2 %v2151_v33  ;;  %v2322_v31 = vld [vmem:[%s3723_s1 + $0x2f8] sm:$0xf0] }
  0x4c   : > { %v298_v45 = vmax.f32 %v296_v37, %v297_v41  ;;  %v304_v46 = vrot.slane %v303_v42, 1  ;;  %v312_v47 = vmax.f32 %v310_v39, %v311_v43  ;;  %v318_v48 = vrot.slane %v317_v44, 1  ;;  %v390_v37 = vld [vmem:[#allocation2 + $0x2] sm:$0x3]  ;;  %v2575_v43 = vld [vmem:[%s3723_s1 + $0x194] sm:$0xf0] }
  0x4d   : > { %v439_v9 = vrot.slane %v437_v8, 1  ;;  %v467_v10 = vshrl.u32 %v431_v7, 16  ;;  %987 = vmatpush.bf16.msrb.mxu3 %v2155_v38  ;;  %v2256_v7 = vld [vmem:[%s3723_s1 + $0x270] sm:$0xf]  ;;  %v2603_v8 = vld [vmem:[%s3723_s1 + $0x274] sm:$0xf0] }
  0x4e   : > { %v305_v49 = vmax.f32 %v303_v42, %v304_v46  ;;  %v320_v50 = vpack.c.bf16 %v298_v45, %v298_v45  ;;  %v319_v51 = vmax.f32 %v317_v44, %v318_v48  ;;  %v322_v52 = vpack.c.bf16 %v312_v47, %v312_v47  ;;  %v2142_v42 = vld [vmem:[%s3723_s1 + $0x190] sm:$0xf]  ;;  %v2574_v44 = vld [vmem:[%s3723_s1 + $0x194] sm:$0xf]  ;;  %v2144_v48 = vld [vmem:[%s3723_s1 + $0x198] sm:$0xf0] }
  0x4f   : > { %v472_v11 = vshll.u32 %v439_v9, 16  ;;  %v2143_v47 = vor.u32 %v2575_v43, %v2142_v42  ;;  %v2602_v9 = vld [vmem:[%s3723_s1 + $0x274] sm:$0xf]  ;;  %v2234_v38 = vld [vmem:[%s3723_s1 + $0x248] sm:$0xf0] }
  0x50   : > { %v321_v54 = vpack.c.bf16 %v305_v49, %v305_v49  ;;  %v332_v55 = vrot.slane %v320_v50, 2  ;;  %v323_v58 = vpack.c.bf16 %v319_v51, %v319_v51  ;;  %v334_v59 = vrot.slane %v322_v52, 2  ;;  %v2134_v51 = vld [vmem:[%s3723_s1 + $0x180] sm:$0xf]  ;;  %v2617_v42 = vld [vmem:[%s3723_s1 + $0x2e4] sm:$0xf0] }
  0x51   : > { %975 = vmatpush.bf16.msrb.mxu2 %v2143_v47 }
  0x52   : > { %v333_v61 = vrot.slane %v321_v54, 2  ;;  %v338_v62 = vsel %vm3733_vm1, %v320_v50, %v332_v55  ;;  %v335_v0 = vrot.slane %v323_v58, 2  ;;  %v344_v1 = vsel %vm3733_vm1, %v322_v52, %v334_v59  ;;  %v2573_v52 = vld [vmem:[%s3723_s1 + $0x184] sm:$0xf0]  ;;  %v2136_v55 = vld [vmem:[%s3723_s1 + $0x188] sm:$0xf0] }
  0x53   : > { %348 = vst [vmem:[#allocation1] ss:$2 sm:$0xff] %v338_v62  ;;  %v2147_v50 = vor.u32 %v2574_v44, %v2144_v48  ;;  %v2139_v56 = vor.u32 %v2572_v53, %v2136_v55  ;;  %v2616_v44 = vld [vmem:[%s3723_s1 + $0x2e4] sm:$0xf]  ;;  %v2615_v55 = vld [vmem:[%s3723_s1 + $0x2d4] sm:$0xf0] }
  0x54   : > { %v341_v4 = vsel %vm3733_vm1, %v321_v54, %v333_v61  ;;  %356 = vst [vmem:[#allocation1 + $0x20] ss:$2 sm:$0xff] %v344_v1  ;;  %v347_v5 = vsel %vm3733_vm1, %v323_v58, %v335_v0  ;;  %vm464_vm1 = vmor %vm462_vm6, %vm463_vm0  ;;  %vm388_vm0 = vsmask.f32 1282  ;;  %v2135_v54 = vor.u32 %v2573_v52, %v2134_v51  ;;  %v2226_v51 = vld [vmem:[%s3723_s1 + $0x238] sm:$0xf0] }
  0x55   : > { %352 = vst [vmem:[#allocation1 + $0x10] ss:$2 sm:$0xff] %v341_v4  ;;  %vm3112_vm8 = vmor %vm464_vm1, %vm465_vm4  ;;  %vm3736_vm1 = vcmask 1041408   ;;  %988 = vmatpush.bf16.msrb.mxu3 %v2147_v50  ;;  %vm3741_vm6 = vcmask 1040384   ;;  %v2594_v50 = vld [vmem:[%s3723_s1 + $0x234] sm:$0xf] }
  0x56   : > { %360 = vst [vmem:[#allocation1 + $0x30] ss:$2 sm:$0xff] %v347_v5  ;;  %v474_v21 = vsel %vm3112_vm8, %v467_v10, %v472_v11  ;;  %vm3133_vm2 = vmand %vm3736_vm1, %vm388_vm0  ;;  %976 = vmatpush.bf16.msrb.mxu2 %v2135_v54  ;;  %v2258_v10 = vld [vmem:[%s3723_s1 + $0x278] sm:$0xf0]  ;;  %v396_v11 = vld [vmem:[#allocation2] sm:$0x1] }
  0x57   : > { %vm3739_vm4 = vmmov %vm3736_vm1  ;;  %v2304_v54 = vld [vmem:[%s3723_s1 + $0x2d0] sm:$0xf] }
  0x58   : > { %vm3740_vm5 = vmmov %vm3736_vm1 }
  0x59   : > { %989 = vmatpush.bf16.msrb.mxu3 %v2139_v56  ;;  %vm3744_vm11 = vmmov %vm3736_vm1 }
  0x5a   : > { %v349_v12 = vld.sshfl [vmem:[#allocation1] sm:$0xff pattern:$0x75643120]  ;;  %vm3749_vm0 = vmmov %vm3741_vm6 }
  0x5b   : > { %v357_v13 = vld.sshfl [vmem:[#allocation1 + $0x20] sm:$0xff pattern:$0x75643120]  ;;  %v363_v14 = vunpack.c.l.b16 %v349_v12  ;;  %v2257_v12 = vor.u32 %v2603_v8, %v2256_v7  ;;  %vm3750_vm1 = vmmov %vm3749_vm0 }
  0x5c   : > { %v353_v15 = vld.sshfl [vmem:[#allocation1 + $0x10] sm:$0xff pattern:$0x75643120]  ;;  %v365_v16 = vunpack.c.l.b16 %v357_v13  ;;  %v2261_v13 = vor.u32 %v2602_v9, %v2258_v10  ;;  %v2613_v9 = vld [vmem:[%s3723_s1 + $0x2c4] sm:$0xf0] }
  0x5d   : > { %v361_v18 = vld.sshfl [vmem:[#allocation1 + $0x30] sm:$0xff pattern:$0x75643120]  ;;  %v364_v19 = vunpack.c.l.b16 %v353_v15  ;;  %v367_v20 = vrot.slane %v363_v14, 7  ;;  %v2248_v14 = vld [vmem:[%s3723_s1 + $0x260] sm:$0xf] }
  0x5e   : > { %v366_v22 = vunpack.c.l.b16 %v361_v18  ;;  %v371_v23 = vrot.slane %v365_v16, 7  ;;  %500 = vst [vmem:[#allocation1] ss:$9 sm:$0xff] %v474_v21  ;;  %v2601_v15 = vld [vmem:[%s3723_s1 + $0x264] sm:$0xf0] }
  0x5f   : > { %v368_v24 = vrot.slane %v364_v19, 6  ;;  %v2600_v18 = vld [vmem:[%s3723_s1 + $0x264] sm:$0xf]  ;;  %v2250_v19 = vld [vmem:[%s3723_s1 + $0x268] sm:$0xf0] }
  0x60   : > { %v372_v25 = vrot.slane %v366_v22, 6  ;;  %v2249_v22 = vor.u32 %v2601_v15, %v2248_v14  ;;  %v2612_v14 = vld [vmem:[%s3723_s1 + $0x2c4] sm:$0xf]  ;;  %v2298_v15 = vld [vmem:[%s3723_s1 + $0x2c8] sm:$0xf0] }
  0x61   : > { %v370_v26 = vsel %vm369_vm3, %v368_v24, %v367_v20  ;;  %v2240_v24 = vld [vmem:[%s3723_s1 + $0x250] sm:$0xf] }
  0x62   : > { %v373_v27 = vsel %vm369_vm3, %v372_v25, %v371_v23  ;;  %v374_v28 = vpack.c.b16 %v370_v26, %v370_v26  ;;  %v2253_v23 = vor.u32 %v2600_v18, %v2250_v19  ;;  %v2599_v25 = vld [vmem:[%s3723_s1 + $0x254] sm:$0xf0]  ;;  %v2598_v26 = vld [vmem:[%s3723_s1 + $0x254] sm:$0xf]  ;;  %v2208_v19 = vld [vmem:[%s3723_s1 + $0x210] sm:$0xf] }
  0x63   : > { %v375_v32 = vpack.c.b16 %v373_v27, %v373_v27  ;;  %v2242_v27 = vld [vmem:[%s3723_s1 + $0x258] sm:$0xf0]  ;;  %v2241_v33 = vor.u32 %v2599_v25, %v2240_v24  ;;  %v2301_v24 = vor.u32 %v2612_v14, %v2298_v15  ;;  %v2606_v14 = vld [vmem:[%s3723_s1 + $0x294] sm:$0xf] }
  0x64   : > { %v376_v35 = vrot.slane %v374_v28, 2  ;;  %v2245_v34 = vor.u32 %v2598_v26, %v2242_v27  ;;  %v2590_v27 = vld [vmem:[%s3723_s1 + $0x214] sm:$0xf]  ;;  %v2274_v15 = vld [vmem:[%s3723_s1 + $0x298] sm:$0xf0] }
  0x65   : > { %v377_v39 = vrot.slane %v375_v32, 2 }
  0x66   : > { %v380_v41 = vsel %vm3739_vm4, %v374_v28, %v376_v35  ;;  %v2320_v28 = vld [vmem:[%s3723_s1 + $0x2f0] sm:$0xf]  ;;  %v2232_v35 = vld [vmem:[%s3723_s1 + $0x240] sm:$0xf] }
  0x67   : > { %v383_v45 = vsel %vm3740_vm5, %v375_v32, %v377_v39  ;;  %v391_v46 = vsel %vm3133_vm2, %v380_v41, %v390_v37  ;;  %v725_v32 = vld [vmem:[#allocation2] sm:$0x2]  ;;  %v2596_v37 = vld [vmem:[%s3723_s1 + $0x244] sm:$0xf]  ;;  %v2321_v39 = vor.u32 %v2619_v29, %v2320_v28  ;;  %v2312_v41 = vld [vmem:[%s3723_s1 + $0x2e0] sm:$0xf]  ;;  %v2233_v47 = vor.u32 %v2597_v36, %v2232_v35 }
  0x68   : > { %392 = vst [vmem:[#allocation2 + $0x2] sm:$0x3] %v391_v46  ;;  %v394_v49 = vsel %vm3133_vm2, %v383_v45, %v393_v40  ;;  %v2325_v40 = vor.u32 %v2618_v30, %v2322_v31  ;;  %v2314_v45 = vld [vmem:[%s3723_s1 + $0x2e8] sm:$0xf0]  ;;  %v2224_v46 = vld [vmem:[%s3723_s1 + $0x230] sm:$0xf]  ;;  %v2237_v48 = vor.u32 %v2596_v37, %v2234_v38  ;;  %v2313_v52 = vor.u32 %v2617_v42, %v2312_v41  ;;  %vm3751_vm2 = vmmov %vm3739_vm4 }
  0x69   : > { %395 = vst [vmem:[#allocation2 + $0x4] sm:$0x3] %v394_v49  ;;  %v2595_v49 = vld [vmem:[%s3723_s1 + $0x234] sm:$0xf0]  ;;  %v2317_v53 = vor.u32 %v2616_v44, %v2314_v45  ;;  %v2210_v28 = vld [vmem:[%s3723_s1 + $0x218] sm:$0xf0]  ;;  %vm3752_vm4 = vmmov %vm3751_vm2 }
  0x6a   : > { %v2288_v29 = vld [vmem:[%s3723_s1 + $0x2b0] sm:$0xf]  ;;  %v2200_v37 = vld [vmem:[%s3723_s1 + $0x200] sm:$0xf]  ;;  %v2589_v38 = vld [vmem:[%s3723_s1 + $0x204] sm:$0xf0] }
  0x6b   : > { %v2202_v44 = vld [vmem:[%s3723_s1 + $0x208] sm:$0xf0]  ;;  %v2384_v45 = vld [vmem:[%s3723_s1 + $0x370] sm:$0xf]  ;;  %vm3753_vm5 = vmmov %vm3742_vm9 }
  0x6f   : > { %v415_v57 = vld [vmem:[#allocation2 + $0x2] sm:$0x3] }
  0x70   : > { %v421_v58 = vrot.slane %v415_v57, 1  ;;  %v422_v59 = vrot.slane %v415_v57, 2  ;;  %v423_v60 = vrot.slane %v415_v57, 3  ;;  %v397_v16 = vld [vmem:[#allocation2 + $0x2] sm:$0x1] }
  0x71   : > { %v726_v21 = vld [vmem:[#allocation2 + $0x2] sm:$0x2]  ;;  %v864_v30 = vld [vmem:[#allocation2 + $0x2] sm:$0x1]  ;;  %v865_v36 = vld [vmem:[#allocation2 + $0x4] sm:$0x1] }
  0x72   : > { %v442_v61 = vsel %vm3741_vm6, %v415_v57, %v421_v58  ;;  %v445_v62 = vsel %vm369_vm3, %v422_v59, %v423_v60  ;;  %v447_v63 = vsel %vm3742_vm9, %v415_v57, %v421_v58  ;;  %v448_v0 = vsel %vm3743_vm10, %v422_v59, %v423_v60  ;;  %v997_v56 = vld [vmem:[#allocation2 + $0x2] sm:$0x3]  ;;  %v2216_v57 = vld [vmem:[%s3723_s1 + $0x220] sm:$0xf]  ;;  %v2614_v59 = vld [vmem:[%s3723_s1 + $0x2d4] sm:$0xf] }
  0x73   : > { %v446_v1 = vsel %vm3744_vm11, %v442_v61, %v445_v62  ;;  %v449_v2 = vsel %vm436_vm7, %v447_v63, %v448_v0  ;;  %v2593_v58 = vld [vmem:[%s3723_s1 + $0x224] sm:$0xf0]  ;;  %v2306_v60 = vld [vmem:[%s3723_s1 + $0x2d8] sm:$0xf0]  ;;  %v3277_v61 = vld [vmem:[#allocation2 + $0x4] sm:$0x3]  ;;  %v2225_v62 = vor.u32 %v2595_v49, %v2224_v46  ;;  %v2229_v63 = vor.u32 %v2594_v50, %v2226_v51 }
  0x74   : > { %v451_v3 = vrot.slane %v449_v2, 1  ;;  %v475_v4 = vshrl.u32 %v446_v1, 16  ;;  %v2592_v0 = vld [vmem:[%s3723_s1 + $0x224] sm:$0xf]  ;;  %v2218_v1 = vld [vmem:[%s3723_s1 + $0x228] sm:$0xf0]  ;;  %v2309_v8 = vor.u32 %v2614_v59, %v2306_v60  ;;  %vm3754_vm6 = vmmov %vm3743_vm10 }
  0x75   : > { %v2296_v2 = vld [vmem:[%s3723_s1 + $0x2c0] sm:$0xf]  ;;  %v1003_v7 = vrot.slane %v997_v56, 3  ;;  %v1004_v10 = vrot.slane %v3277_v61, 1  ;;  %v2221_v18 = vor.u32 %v2592_v0, %v2218_v1  ;;  %v2635_v46 = vld [vmem:[%s3723_s1 + $0x374] sm:$0xf0]  ;;  %vm3755_vm9 = vmmov %vm3753_vm5 }
  0x76   : > { %v480_v5 = vshll.u32 %v451_v3, 16  ;;  %v2634_v51 = vld [vmem:[%s3723_s1 + $0x374] sm:$0xf]  ;;  %v2608_v60 = vld [vmem:[%s3723_s1 + $0x2a4] sm:$0xf]  ;;  %v2385_v1 = vor.u32 %v2635_v46, %v2384_v45  ;;  %vm3756_vm10 = vmmov %vm3754_vm6 }
  0x77   : > { %v1026_v25 = vsel %vm3747_vm14, %v3277_v61, %v1004_v10  ;;  %v2376_v0 = vld [vmem:[%s3723_s1 + $0x360] sm:$0xf]  ;;  %vm3757_vm11 = vmmov %vm3749_vm0 }
  0x78   : > { %v482_v6 = vsel %vm3112_vm8, %v475_v4, %v480_v5  ;;  %v2305_v4 = vor.u32 %v2615_v55, %v2304_v54  ;;  %v1001_v5 = vrot.slane %v997_v56, 1 }
  0x79   : > { %503 = vst [vmem:[#allocation1 + $0x1] ss:$9 sm:$0xff] %v482_v6  ;;  %v1002_v6 = vrot.slane %v997_v56, 2 }
  0x7b   : > { %v1012_v41 = vsel %vm369_vm3, %v1002_v6, %v1003_v7 }
  0x80   : > { %v504_v20 = vld [vmem:[#allocation1] sm:$0xff] }
  0x81   : > { %594 = vmatmul.bf16.vlgmr.msra.gmra.mxu0 %v504_v20  ;;  %613 = vst [vmem:[#allocation1] ss:$9 sm:$0xff] %v396_v11  ;;  %607 = vmatmul.bf16.vlgmr.msra.gmra.mxu1 %v504_v20  ;;  %v1005_v11 = vrot.slane %v3277_v61, 2  ;;  %v2591_v20 = vld [vmem:[%s3723_s1 + $0x214] sm:$0xf0] }
  0x82   : > { %616 = vst [vmem:[#allocation1 + $0x1] ss:$9 sm:$0xff] %v397_v16  ;;  %1150 = vmatpush.bf16.msra.mxu0 %v2257_v12  ;;  %1163 = vmatpush.bf16.msra.mxu1 %v2261_v13  ;;  %v1006_v12 = vrot.slane %v3277_v61, 3  ;;  %v2217_v16 = vor.u32 %v2593_v58, %v2216_v57  ;;  %v2209_v31 = vor.u32 %v2591_v20, %v2208_v19  ;;  %v2280_v57 = vld [vmem:[%s3723_s1 + $0x2a0] sm:$0xf] }
  0x83   : > { %732 = vst [vmem:[#allocation1 + $0x10] sm:$0xff] %v726_v21  ;;  %v2297_v21 = vor.u32 %v2613_v9, %v2296_v2  ;;  %v2609_v58 = vld [vmem:[%s3723_s1 + $0x2a4] sm:$0xf0]  ;;  %v1179_v20 = vld [vmem:[#allocation2 + $0x4] sm:$0x2] }
  0x84   : > { %v1027_v26 = vsel %vm3748_vm15, %v1005_v11, %v1006_v12  ;;  %v2281_v9 = vor.u32 %v2609_v58, %v2280_v57  ;;  %v2354_v57 = vld [vmem:[%s3723_s1 + $0x338] sm:$0xf0]  ;;  %vm3764_vm15 = vmmov %vm3751_vm2 }
  0x85   : > { %v1028_v42 = vsel %vm436_vm7, %v1026_v25, %v1027_v26  ;;  %v2264_v25 = vld [vmem:[%s3723_s1 + $0x280] sm:$0xf] }
  0x86   : > { %1151 = vmatpush.bf16.msra.mxu0 %v2249_v22  ;;  %1164 = vmatpush.bf16.msra.mxu1 %v2253_v23  ;;  %v1014_v22 = vsel %vm3745_vm12, %v997_v56, %v1001_v5  ;;  %v1015_v23 = vsel %vm3746_vm13, %v1002_v6, %v1003_v7  ;;  %v2632_v6 = vld [vmem:[%s3723_s1 + $0x364] sm:$0xf]  ;;  %vm3758_vm12 = vmmov %vm3749_vm0 }
  0x87   : > { %v1016_v35 = vsel %vm436_vm7, %v1014_v22, %v1015_v23  ;;  %v2630_v23 = vld [vmem:[%s3723_s1 + $0x354] sm:$0xf] }
  0x89   : > { %v617_v43 = vld [vmem:[#allocation1] sm:$0xff] }
  0x8a   : > { %707 = vmatmul.bf16.vlgmr.msra.gmra.mxu2 %v617_v43  ;;  %728 = vst [vmem:[#allocation1] sm:$0xff] %v725_v32  ;;  %720 = vmatmul.bf16.vlgmr.msra.gmra.mxu3 %v617_v43  ;;  %v734_v3 = vld [vmem:[#allocation1 + $0x11] ss:$2 sm:$0xff]  ;;  %v2213_v43 = vor.u32 %v2590_v27, %v2210_v28  ;;  %v2277_v28 = vor.u32 %v2606_v14, %v2274_v15  ;;  %v2644_v14 = vld [vmem:[%s3723_s1 + $0x3c4] sm:$0xf] }
  0x8b   : > { %1152 = vmatpush.bf16.msra.mxu0 %v2241_v33  ;;  %1165 = vmatpush.bf16.msra.mxu1 %v2245_v34  ;;  %v2611_v32 = vld [vmem:[%s3723_s1 + $0x2b4] sm:$0xf0]  ;;  %v2610_v33 = vld [vmem:[%s3723_s1 + $0x2b4] sm:$0xf]  ;;  %v2290_v34 = vld [vmem:[%s3723_s1 + $0x2b8] sm:$0xf0] }
  0x8c   : > { %1289 = vmatpush.bf16.msra.mxu2 %v2321_v39  ;;  %1302 = vmatpush.bf16.msra.mxu3 %v2325_v40  ;;  %v2588_v39 = vld [vmem:[%s3723_s1 + $0x204] sm:$0xf]  ;;  %v1009_v40 = vsel %vm3749_vm0, %v997_v56, %v1001_v5  ;;  %v2289_v49 = vor.u32 %v2611_v32, %v2288_v29  ;;  %v2293_v50 = vor.u32 %v2610_v33, %v2290_v34  ;;  %v1030_v56 = vrot.slane %v1028_v42, 1  ;;  %v2633_v5 = vld [vmem:[%s3723_s1 + $0x364] sm:$0xf0] }
  0x8d   : > { %v1013_v55 = vsel %vm3751_vm2, %v1009_v40, %v1012_v41  ;;  %v2605_v29 = vld [vmem:[%s3723_s1 + $0x284] sm:$0xf0]  ;;  %v2450_v33 = vld [vmem:[%s3723_s1 + $0x3f0] sm:$0xf]  ;;  %v2651_v34 = vld [vmem:[%s3723_s1 + $0x3f4] sm:$0xf0] }
  0x8e   : > { %v2360_v41 = vld [vmem:[%s3723_s1 + $0x340] sm:$0xf]  ;;  %v2629_v42 = vld [vmem:[%s3723_s1 + $0x344] sm:$0xf0]  ;;  %v2451_v45 = vor.u32 %v2651_v34, %v2450_v33  ;;  %v2428_v15 = vld [vmem:[%s3723_s1 + $0x3c8] sm:$0xf0] }
  0x8f   : > { %1153 = vmatpush.bf16.msra.mxu0 %v2233_v47  ;;  %1166 = vmatpush.bf16.msra.mxu1 %v2237_v48  ;;  %v1021_v47 = vsel %vm3750_vm1, %v3277_v61, %v1004_v10  ;;  %v1024_v48 = vsel %vm369_vm3, %v1005_v11, %v1006_v12  ;;  %v2282_v61 = vld [vmem:[%s3723_s1 + $0x2a8] sm:$0xf0]  ;;  %v2272_v12 = vld [vmem:[%s3723_s1 + $0x290] sm:$0xf]  ;;  %v2642_v34 = vld [vmem:[%s3723_s1 + $0x3b4] sm:$0xf] }
  0x90   : > { %1290 = vmatpush.bf16.msra.mxu2 %v2313_v52  ;;  %1303 = vmatpush.bf16.msra.mxu3 %v2317_v53  ;;  %v2386_v52 = vld [vmem:[%s3723_s1 + $0x378] sm:$0xf0]  ;;  %v1018_v53 = vrot.slane %v1016_v35, 1  ;;  %v1025_v59 = vsel %vm3752_vm4, %v1021_v47, %v1024_v48  ;;  %v2285_v10 = vor.u32 %v2608_v60, %v2282_v61  ;;  %v2378_v11 = vld [vmem:[%s3723_s1 + $0x368] sm:$0xf0]  ;;  %vm3765_vm0 = vcmask 1043458  }
  0x91   : > { %v730_v13 = vld [vmem:[#allocation1 + $0x1] ss:$2 sm:$0xff]  ;;  %v2389_v2 = vor.u32 %v2634_v51, %v2386_v52  ;;  %v1039_v7 = vshrl.u32 %v1025_v59, 16  ;;  %v2381_v22 = vor.u32 %v2632_v6, %v2378_v11  ;;  %v2650_v35 = vld [vmem:[%s3723_s1 + $0x3f4] sm:$0xf]  ;;  %v2361_v52 = vor.u32 %v2629_v42, %v2360_v41 }
  0x92   : > { %751 = vst [vmem:[#allocation1] ss:$9 sm:$0xff] %v730_v13  ;;  %v2607_v13 = vld [vmem:[%s3723_s1 + $0x294] sm:$0xf0]  ;;  %v2442_v47 = vld [vmem:[%s3723_s1 + $0x3e0] sm:$0xf] }
  0x93   : > { %753 = vst [vmem:[#allocation1 + $0x1] ss:$9 sm:$0xff] %v734_v3  ;;  %1154 = vmatpush.bf16.msra.mxu0 %v2225_v62  ;;  %1167 = vmatpush.bf16.msra.mxu1 %v2229_v63  ;;  %v2201_v62 = vor.u32 %v2589_v38, %v2200_v37  ;;  %v2205_v63 = vor.u32 %v2588_v39, %v2202_v44  ;;  %v1031_v3 = vshrl.u32 %v1013_v55, 16  ;;  %v2362_v44 = vld [vmem:[%s3723_s1 + $0x348] sm:$0xf0] }
  0x94   : > { %1291 = vmatpush.bf16.msra.mxu2 %v2305_v4  ;;  %1304 = vmatpush.bf16.msra.mxu3 %v2309_v8  ;;  %v1036_v4 = vshll.u32 %v1018_v53, 16  ;;  %v1044_v8 = vshll.u32 %v1030_v56, 16  ;;  %v2273_v27 = vor.u32 %v2607_v13, %v2272_v12  ;;  %v2265_v39 = vor.u32 %v2605_v29, %v2264_v25  ;;  %v2649_v48 = vld [vmem:[%s3723_s1 + $0x3e4] sm:$0xf0]  ;;  %v2627_v55 = vld [vmem:[%s3723_s1 + $0x334] sm:$0xf0] }
  0x95   : > { %v1178_v51 = vld [vmem:[#allocation2 + $0x2] sm:$0x2]  ;;  %v2626_v56 = vld [vmem:[%s3723_s1 + $0x334] sm:$0xf]  ;;  %v2443_v58 = vor.u32 %v2649_v48, %v2442_v47  ;;  %v2434_v60 = vld [vmem:[%s3723_s1 + $0x3d0] sm:$0xf] }
  0x96   : > { %v1038_v19 = vsel %vm3112_vm8, %v1031_v3, %v1036_v4  ;;  %v1046_v26 = vsel %vm3112_vm8, %v1039_v7, %v1044_v8  ;;  %v2647_v61 = vld [vmem:[%s3723_s1 + $0x3d4] sm:$0xf0]  ;;  %v2357_v3 = vor.u32 %v2626_v56, %v2354_v57  ;;  %v2625_v4 = vld [vmem:[%s3723_s1 + $0x324] sm:$0xf0]  ;;  %v2346_v6 = vld [vmem:[%s3723_s1 + $0x328] sm:$0xf0] }
  0x97   : > { %1155 = vmatpush.bf16.msra.mxu0 %v2217_v16  ;;  %1168 = vmatpush.bf16.msra.mxu1 %v2221_v18  ;;  %v2368_v16 = vld [vmem:[%s3723_s1 + $0x350] sm:$0xf]  ;;  %v2631_v18 = vld [vmem:[%s3723_s1 + $0x354] sm:$0xf0]  ;;  %v2435_v7 = vor.u32 %v2647_v61, %v2434_v60  ;;  %v1451_v11 = vld [vmem:[#allocation2 + $0x4] sm:$0x3] }
  0x98   : > { %1292 = vmatpush.bf16.msra.mxu2 %v2297_v21  ;;  %1305 = vmatpush.bf16.msra.mxu3 %v2301_v24  ;;  %v2377_v21 = vor.u32 %v2633_v5, %v2376_v0  ;;  %v2370_v24 = vld [vmem:[%s3723_s1 + $0x358] sm:$0xf0]  ;;  %v2369_v37 = vor.u32 %v2631_v18, %v2368_v16  ;;  %v2624_v5 = vld [vmem:[%s3723_s1 + $0x324] sm:$0xf]  ;;  %v2336_v12 = vld [vmem:[%s3723_s1 + $0x310] sm:$0xf] }
  0x99   : > { %v2373_v38 = vor.u32 %v2630_v23, %v2370_v24  ;;  %v2436_v0 = vld [vmem:[%s3723_s1 + $0x3d8] sm:$0xf0]  ;;  %v2623_v13 = vld [vmem:[%s3723_s1 + $0x314] sm:$0xf0]  ;;  %v3516_v16 = vld [vmem:[#allocation2 + $0x6] sm:$0x3] }
  0x9a   : > { %v754_v54 = vld [vmem:[#allocation1] sm:$0xff]  ;;  %v1455_v25 = vrot.slane %v1451_v11, 1  ;;  %v2643_v29 = vld [vmem:[%s3723_s1 + $0x3b4] sm:$0xf0]  ;;  %v2330_v47 = vld [vmem:[%s3723_s1 + $0x308] sm:$0xf0] }
  0x9b   : > { %844 = vmatmul.bf16.vlgmr.msrb.gmra.mxu0 %v754_v54  ;;  %883 = vst [vmem:[#allocation1] ss:$9 sm:$0xff] %v864_v30  ;;  %857 = vmatmul.bf16.vlgmr.msrb.gmra.mxu1 %v754_v54  ;;  %v2604_v30 = vld [vmem:[%s3723_s1 + $0x284] sm:$0xf]  ;;  %v2352_v54 = vld [vmem:[%s3723_s1 + $0x330] sm:$0xf] }
  0x9c   : > { %886 = vst [vmem:[#allocation1 + $0x1] ss:$9 sm:$0xff] %v865_v36  ;;  %1156 = vmatpush.bf16.msra.mxu0 %v2209_v31  ;;  %1169 = vmatpush.bf16.msra.mxu1 %v2213_v43  ;;  %v2266_v31 = vld [vmem:[%s3723_s1 + $0x288] sm:$0xf0]  ;;  %v2452_v36 = vld [vmem:[%s3723_s1 + $0x3f8] sm:$0xf0]  ;;  %v1468_v41 = vsel %vm3753_vm5, %v1451_v11, %v1455_v25 }
  0x9d   : > { %1293 = vmatpush.bf16.msra.mxu2 %v2289_v49  ;;  %1306 = vmatpush.bf16.msra.mxu3 %v2293_v50  ;;  %v2269_v40 = vor.u32 %v2604_v30, %v2266_v31  ;;  %v2628_v43 = vld [vmem:[%s3723_s1 + $0x344] sm:$0xf]  ;;  %v2455_v46 = vor.u32 %v2650_v35, %v2452_v36  ;;  %v2444_v50 = vld [vmem:[%s3723_s1 + $0x3e8] sm:$0xf0]  ;;  %v1458_v30 = vrot.slane %v3516_v16, 1  ;;  %v1459_v31 = vrot.slane %v3516_v16, 2 }
  0x9e   : > { %v2648_v49 = vld [vmem:[%s3723_s1 + $0x3e4] sm:$0xf]  ;;  %v2365_v53 = vor.u32 %v2628_v43, %v2362_v44  ;;  %v2420_v35 = vld [vmem:[%s3723_s1 + $0x3b8] sm:$0xf0]  ;;  %v2337_v36 = vor.u32 %v2623_v13, %v2336_v12  ;;  %v2514_v48 = vld [vmem:[%s3723_s1 + $0x470] sm:$0xf] }
  0x9f   : > { %v2447_v59 = vor.u32 %v2648_v49, %v2444_v50  ;;  %v2620_v43 = vld [vmem:[%s3723_s1 + $0x304] sm:$0xf]  ;;  %v2423_v44 = vor.u32 %v2642_v34, %v2420_v35  ;;  %v2667_v49 = vld [vmem:[%s3723_s1 + $0x474] sm:$0xf0]  ;;  %v1318_v50 = vld [vmem:[#allocation2 + $0x4] sm:$0x1] }
  0xa0   : > { %1157 = vmatpush.bf16.msra.mxu0 %v2201_v62  ;;  %1170 = vmatpush.bf16.msra.mxu1 %v2205_v63  ;;  %v2646_v63 = vld [vmem:[%s3723_s1 + $0x3d4] sm:$0xf]  ;;  %v2641_v56 = vld [vmem:[%s3723_s1 + $0x3a4] sm:$0xf0]  ;;  %v2640_v57 = vld [vmem:[%s3723_s1 + $0x3a4] sm:$0xf] }
  0xa1   : > { %1294 = vmatpush.bf16.msra.mxu2 %v2281_v9  ;;  %1307 = vmatpush.bf16.msra.mxu3 %v2285_v10  ;;  %v2439_v8 = vor.u32 %v2646_v63, %v2436_v0  ;;  %v2426_v9 = vld [vmem:[%s3723_s1 + $0x3c0] sm:$0xf]  ;;  %v2645_v10 = vld [vmem:[%s3723_s1 + $0x3c4] sm:$0xf0]  ;;  %v2333_v63 = vor.u32 %v2620_v43, %v2330_v47  ;;  %v2636_v34 = vld [vmem:[%s3723_s1 + $0x384] sm:$0xf] }
  0xa2   : > { %v2427_v24 = vor.u32 %v2645_v10, %v2426_v9  ;;  %v2506_v0 = vld [vmem:[%s3723_s1 + $0x460] sm:$0xf]  ;;  %v2396_v35 = vld [vmem:[%s3723_s1 + $0x388] sm:$0xf0]  ;;  %v2661_v43 = vld [vmem:[%s3723_s1 + $0x444] sm:$0xf0] }
  0xa3   : > { %v887_v32 = vld [vmem:[#allocation1] sm:$0xff]  ;;  %v1633_v47 = vld [vmem:[#allocation2 + $0x6] sm:$0x2] }
  0xa4   : > { %1423 = vmatpush.bf16.msrb.mxu0 %v2385_v1  ;;  %1436 = vmatpush.bf16.msrb.mxu1 %v2389_v2  ;;  %1064 = vst [vmem:[#allocation1] ss:$9 sm:$0xff] %v1038_v19  ;;  %v2344_v1 = vld [vmem:[%s3723_s1 + $0x320] sm:$0xf]  ;;  %v2353_v2 = vor.u32 %v2627_v55, %v2352_v54  ;;  %v2349_v19 = vor.u32 %v2624_v5, %v2346_v6  ;;  %v2664_v6 = vld [vmem:[%s3723_s1 + $0x464] sm:$0xf] }
  0xa5   : > { %977 = vmatmul.bf16.vlgmr.msrb.gmra.mxu2 %v887_v32  ;;  %990 = vmatmul.bf16.vlgmr.msrb.gmra.mxu3 %v887_v32  ;;  %1067 = vst [vmem:[#allocation1 + $0x1] ss:$9 sm:$0xff] %v1046_v26  ;;  %v2345_v18 = vor.u32 %v2625_v4, %v2344_v1  ;;  %v1456_v26 = vrot.slane %v1451_v11, 2  ;;  %v1460_v32 = vrot.slane %v3516_v16, 3  ;;  %v2410_v54 = vld [vmem:[%s3723_s1 + $0x3a0] sm:$0xf]  ;;  %v2515_v4 = vor.u32 %v2667_v49, %v2514_v48 }
  0xa6   : > { %1185 = vst [vmem:[#allocation1 + $0x10] sm:$0xff] %v1179_v20  ;;  %1295 = vmatpush.bf16.msra.mxu2 %v2273_v27  ;;  %1308 = vmatpush.bf16.msra.mxu3 %v2277_v28  ;;  %v2622_v20 = vld [vmem:[%s3723_s1 + $0x314] sm:$0xf]  ;;  %v1457_v27 = vrot.slane %v1451_v11, 3  ;;  %v2431_v28 = vor.u32 %v2644_v14, %v2428_v15  ;;  %v2665_v1 = vld [vmem:[%s3723_s1 + $0x464] sm:$0xf0]  ;;  %v2411_v10 = vor.u32 %v2641_v56, %v2410_v54 }
  0xa7   : > { %v2402_v14 = vld [vmem:[%s3723_s1 + $0x390] sm:$0xf]  ;;  %v2639_v15 = vld [vmem:[%s3723_s1 + $0x394] sm:$0xf0]  ;;  %v2474_v56 = vld [vmem:[%s3723_s1 + $0x420] sm:$0xf] }
  0xa8   : > { %1424 = vmatpush.bf16.msrb.mxu0 %v2377_v21  ;;  %1437 = vmatpush.bf16.msrb.mxu1 %v2381_v22  ;;  %v2338_v21 = vld [vmem:[%s3723_s1 + $0x318] sm:$0xf0]  ;;  %v2418_v22 = vld [vmem:[%s3723_s1 + $0x3b0] sm:$0xf]  ;;  %v1469_v42 = vsel %vm3754_vm6, %v1456_v26, %v1457_v27  ;;  %v1466_v60 = vsel %vm369_vm3, %v1456_v26, %v1457_v27  ;;  %v2662_v26 = vld [vmem:[%s3723_s1 + $0x454] sm:$0xf] }
  0xa9   : > { %v1470_v55 = vsel %vm436_vm7, %v1468_v41, %v1469_v42  ;;  %v2399_v42 = vor.u32 %v2636_v34, %v2396_v35  ;;  %v2482_v49 = vld [vmem:[%s3723_s1 + $0x430] sm:$0xf] }
  0xaa   : > { %1296 = vmatpush.bf16.msra.mxu2 %v2265_v39  ;;  %1309 = vmatpush.bf16.msra.mxu3 %v2269_v40  ;;  %v2621_v39 = vld [vmem:[%s3723_s1 + $0x304] sm:$0xf0]  ;;  %v2419_v40 = vor.u32 %v2643_v29, %v2418_v22  ;;  %v2403_v29 = vor.u32 %v2639_v15, %v2402_v14 }
  0xac   : > { %1425 = vmatpush.bf16.msrb.mxu0 %v2369_v37  ;;  %1438 = vmatpush.bf16.msrb.mxu1 %v2373_v38  ;;  %v1068_v62 = vld [vmem:[#allocation1] sm:$0xff]  ;;  %v2341_v37 = vor.u32 %v2622_v20, %v2338_v21  ;;  %v2498_v20 = vld [vmem:[%s3723_s1 + $0x450] sm:$0xf]  ;;  %v2507_v21 = vor.u32 %v2665_v1, %v2506_v0  ;;  %v2655_v0 = vld [vmem:[%s3723_s1 + $0x414] sm:$0xf0] }
  0xad   : > { %1158 = vmatmul.bf16.vlgmr.msra.gmra.mxu0 %v1068_v62  ;;  %1181 = vst [vmem:[#allocation1] sm:$0xff] %v1178_v51  ;;  %1171 = vmatmul.bf16.vlgmr.msra.gmra.mxu1 %v1068_v62  ;;  %v1187_v23 = vld [vmem:[#allocation1 + $0x11] ss:$2 sm:$0xff]  ;;  %v2328_v38 = vld [vmem:[%s3723_s1 + $0x300] sm:$0xf] }
  0xae   : > { %1604 = vmatpush.bf16.msrb.mxu2 %v2451_v45  ;;  %1617 = vmatpush.bf16.msrb.mxu3 %v2455_v46  ;;  %v1480_v45 = vsel %vm3755_vm9, %v3516_v16, %v1458_v30  ;;  %v1481_v46 = vsel %vm3756_vm10, %v1459_v31, %v1460_v32  ;;  %v2329_v51 = vor.u32 %v2621_v39, %v2328_v38  ;;  %v1319_v62 = vld [vmem:[#allocation2 + $0x6] sm:$0x1]  ;;  %v2490_v39 = vld [vmem:[%s3723_s1 + $0x440] sm:$0xf]  ;;  %v2654_v1 = vld [vmem:[%s3723_s1 + $0x414] sm:$0xf] }
  0xaf   : > { %v1482_v61 = vsel %vm436_vm7, %v1480_v45, %v1481_v46  ;;  %vm3759_vm7 = vmmov %vm3751_vm2  ;;  %v2492_v45 = vld [vmem:[%s3723_s1 + $0x448] sm:$0xf0]  ;;  %v2491_v17 = vor.u32 %v2661_v43, %v2490_v39 }
  0xb0   : > { %1426 = vmatpush.bf16.msrb.mxu0 %v2361_v52  ;;  %1439 = vmatpush.bf16.msrb.mxu1 %v2365_v53  ;;  %v2666_v52 = vld [vmem:[%s3723_s1 + $0x474] sm:$0xf]  ;;  %v2516_v53 = vld [vmem:[%s3723_s1 + $0x478] sm:$0xf0]  ;;  %v1484_v13 = vrot.slane %v1482_v61, 1 }
  0xb1   : > { %v2519_v5 = vor.u32 %v2666_v52, %v2516_v53  ;;  %v2484_v52 = vld [vmem:[%s3723_s1 + $0x438] sm:$0xf0]  ;;  %v1632_v53 = vld [vmem:[#allocation2 + $0x4] sm:$0x2] }
  0xb2   : > { %1605 = vmatpush.bf16.msrb.mxu2 %v2443_v58  ;;  %1618 = vmatpush.bf16.msrb.mxu3 %v2447_v59  ;;  %v2412_v58 = vld [vmem:[%s3723_s1 + $0x3a8] sm:$0xf0]  ;;  %v1463_v59 = vsel %vm3757_vm11, %v1451_v11, %v1455_v25  ;;  %v2663_v25 = vld [vmem:[%s3723_s1 + $0x454] sm:$0xf0] }
  0xb3   : > { %v2415_v11 = vor.u32 %v2640_v57, %v2412_v58  ;;  %v1467_v12 = vsel %vm3759_vm7, %v1463_v59, %v1466_v60  ;;  %v2657_v57 = vld [vmem:[%s3723_s1 + $0x424] sm:$0xf0]  ;;  %v2656_v58 = vld [vmem:[%s3723_s1 + $0x424] sm:$0xf]  ;;  %v2476_v59 = vld [vmem:[%s3723_s1 + $0x428] sm:$0xf0] }
  0xb4   : > { %1427 = vmatpush.bf16.msrb.mxu0 %v2353_v2  ;;  %1440 = vmatpush.bf16.msrb.mxu1 %v2357_v3  ;;  %v1183_v33 = vld [vmem:[#allocation1 + $0x1] ss:$2 sm:$0xff]  ;;  %v1475_v2 = vsel %vm3758_vm12, %v3516_v16, %v1458_v30  ;;  %v1478_v3 = vsel %vm369_vm3, %v1459_v31, %v1460_v32  ;;  %vm3760_vm3 = vmmov %vm3751_vm2  ;;  %v2500_v31 = vld [vmem:[%s3723_s1 + $0x458] sm:$0xf0]  ;;  %v2475_v61 = vor.u32 %v2657_v57, %v2474_v56 }
  0xb5   : > { %1204 = vst [vmem:[#allocation1] ss:$9 sm:$0xff] %v1183_v33  ;;  %v1479_v16 = vsel %vm3760_vm3, %v1475_v2, %v1478_v3  ;;  %v2394_v32 = vld [vmem:[%s3723_s1 + $0x380] sm:$0xf]  ;;  %v2637_v33 = vld [vmem:[%s3723_s1 + $0x384] sm:$0xf0]  ;;  %v2503_v38 = vor.u32 %v2662_v26, %v2500_v31  ;;  %vm3767_vm2 = vmmov %vm3757_vm11 }
  0xb6   : > { %1606 = vmatpush.bf16.msrb.mxu2 %v2435_v7  ;;  %1619 = vmatpush.bf16.msrb.mxu3 %v2439_v8  ;;  %1206 = vst [vmem:[#allocation1 + $0x1] ss:$9 sm:$0xff] %v1187_v23  ;;  %v2508_v7 = vld [vmem:[%s3723_s1 + $0x468] sm:$0xf0]  ;;  %v1472_v8 = vrot.slane %v1470_v55, 1  ;;  %v1485_v23 = vshrl.u32 %v1467_v12, 16  ;;  %v2395_v41 = vor.u32 %v2637_v33, %v2394_v32  ;;  %vm3768_vm4 = vmmov %vm3767_vm2 }
  0xb7   : > { %v2511_v22 = vor.u32 %v2664_v6, %v2508_v7  ;;  %v1493_v27 = vshrl.u32 %v1479_v16, 16  ;;  %v2468_v2 = vld [vmem:[%s3723_s1 + $0x418] sm:$0xf0]  ;;  %v2458_v6 = vld [vmem:[%s3723_s1 + $0x400] sm:$0xf]  ;;  %vm3769_vm5 = vmmov %vm3767_vm2 }
  0xb8   : > { %1428 = vmatpush.bf16.msrb.mxu0 %v2345_v18  ;;  %1441 = vmatpush.bf16.msrb.mxu1 %v2349_v19  ;;  %v2638_v18 = vld [vmem:[%s3723_s1 + $0x394] sm:$0xf]  ;;  %v2404_v19 = vld [vmem:[%s3723_s1 + $0x398] sm:$0xf0]  ;;  %v2653_v7 = vld [vmem:[%s3723_s1 + $0x404] sm:$0xf0] }
  0xb9   : > { %v2407_v30 = vor.u32 %v2638_v18, %v2404_v19  ;;  %vm3770_vm6 = vmmov %vm3767_vm2 }
  0xba   : > { %1607 = vmatpush.bf16.msrb.mxu2 %v2427_v24  ;;  %1620 = vmatpush.bf16.msrb.mxu3 %v2431_v28  ;;  %v1490_v24 = vshll.u32 %v1472_v8, 16  ;;  %v1498_v28 = vshll.u32 %v1484_v13, 16  ;;  %v2652_v8 = vld [vmem:[%s3723_s1 + $0x404] sm:$0xf]  ;;  %vm3771_vm9 = vmmov %vm3760_vm3 }
  0xbc   : > { %1429 = vmatpush.bf16.msrb.mxu0 %v2337_v36  ;;  %1442 = vmatpush.bf16.msrb.mxu1 %v2341_v37  ;;  %v1492_v36 = vsel %vm3112_vm8, %v1485_v23, %v1490_v24  ;;  %v2499_v37 = vor.u32 %v2663_v25, %v2498_v20 }
  0xbd   : > { %v1207_v9 = vld [vmem:[#allocation1] sm:$0xff] }
  0xbe   : > { %1608 = vmatpush.bf16.msrb.mxu2 %v2419_v40  ;;  %1621 = vmatpush.bf16.msrb.mxu3 %v2423_v44  ;;  %1337 = vst [vmem:[#allocation1] ss:$9 sm:$0xff] %v1318_v50  ;;  %v1500_v40 = vsel %vm3112_vm8, %v1493_v27, %v1498_v28  ;;  %v2660_v44 = vld [vmem:[%s3723_s1 + $0x444] sm:$0xf]  ;;  %v2659_v50 = vld [vmem:[%s3723_s1 + $0x434] sm:$0xf0] }
  0xbf   : > { %1297 = vmatmul.bf16.vlgmr.msra.gmra.mxu2 %v1207_v9  ;;  %1310 = vmatmul.bf16.vlgmr.msra.gmra.mxu3 %v1207_v9  ;;  %1340 = vst [vmem:[#allocation1 + $0x1] ss:$9 sm:$0xff] %v1319_v62  ;;  %v2495_v48 = vor.u32 %v2660_v44, %v2492_v45  ;;  %v2483_v54 = vor.u32 %v2659_v50, %v2482_v49  ;;  %v2460_v9 = vld [vmem:[%s3723_s1 + $0x408] sm:$0xf0]  ;;  %vm3761_vm8 = vcmask 1043456  }
  0xc0   : > { %1430 = vmatpush.bf16.msrb.mxu0 %v2329_v51  ;;  %1443 = vmatpush.bf16.msrb.mxu1 %v2333_v63  ;;  %v2658_v51 = vld [vmem:[%s3723_s1 + $0x434] sm:$0xf]  ;;  %v2479_v62 = vor.u32 %v2656_v58, %v2476_v59  ;;  %v2466_v63 = vld [vmem:[%s3723_s1 + $0x410] sm:$0xf]  ;;  %v2463_v12 = vor.u32 %v2652_v8, %v2460_v9  ;;  %vm3762_vm13 = vmmov %vm3761_vm8 }
  0xc1   : > { %v2487_v55 = vor.u32 %v2658_v51, %v2484_v52  ;;  %vm3763_vm14 = vmmov %vm3761_vm8 }
  0xc2   : > { %1609 = vmatpush.bf16.msrb.mxu2 %v2411_v10  ;;  %1622 = vmatpush.bf16.msrb.mxu3 %v2415_v11  ;;  %v2459_v11 = vor.u32 %v2653_v7, %v2458_v6  ;;  %vm3766_vm1 = vmmov %vm3761_vm8 }
  0xc4   : > { %1743 = vmatpush.bf16.msra.mxu0 %v2515_v4  ;;  %1756 = vmatpush.bf16.msra.mxu1 %v2519_v5  ;;  %v2467_v4 = vor.u32 %v2655_v0, %v2466_v63  ;;  %v2471_v5 = vor.u32 %v2654_v1, %v2468_v2 }
  0xc6   : > { %1610 = vmatpush.bf16.msrb.mxu2 %v2403_v29  ;;  %1623 = vmatpush.bf16.msrb.mxu3 %v2407_v30  ;;  %v1341_v46 = vld [vmem:[#allocation1] sm:$0xff] }
  0xc7   : > { %1431 = vmatmul.bf16.vlgmr.msrb.gmra.mxu0 %v1341_v46  ;;  %1518 = vst [vmem:[#allocation1] ss:$9 sm:$0xff] %v1492_v36  ;;  %1444 = vmatmul.bf16.vlgmr.msrb.gmra.mxu1 %v1341_v46 }
  0xc8   : > { %1744 = vmatpush.bf16.msra.mxu0 %v2507_v21  ;;  %1757 = vmatpush.bf16.msra.mxu1 %v2511_v22  ;;  %1521 = vst [vmem:[#allocation1 + $0x1] ss:$9 sm:$0xff] %v1500_v40 }
  0xc9   : > { %1639 = vst [vmem:[#allocation1 + $0x10] sm:$0xff] %v1633_v47 }
  0xca   : > { %1611 = vmatpush.bf16.msrb.mxu2 %v2395_v41  ;;  %1624 = vmatpush.bf16.msrb.mxu3 %v2399_v42 }
  0xcc   : > { %1745 = vmatpush.bf16.msra.mxu0 %v2499_v37  ;;  %1758 = vmatpush.bf16.msra.mxu1 %v2503_v38 }
  0xcf   : > { %v1522_v60 = vld [vmem:[#allocation1] sm:$0xff] }
  0xd0   : > { %1746 = vmatpush.bf16.msra.mxu0 %v2491_v17  ;;  %1759 = vmatpush.bf16.msra.mxu1 %v2495_v48  ;;  %1635 = vst [vmem:[#allocation1] sm:$0xff] %v1632_v53  ;;  %v1641_v3 = vld [vmem:[#allocation1 + $0x11] ss:$2 sm:$0xff] }
  0xd1   : > { %1612 = vmatmul.bf16.vlgmr.msrb.gmra.mxu2 %v1522_v60  ;;  %1625 = vmatmul.bf16.vlgmr.msrb.gmra.mxu3 %v1522_v60 }
  0xd4   : > { %1747 = vmatpush.bf16.msra.mxu0 %v2483_v54  ;;  %1760 = vmatpush.bf16.msra.mxu1 %v2487_v55 }
  0xd7   : > { %v1637_v10 = vld [vmem:[#allocation1 + $0x1] ss:$2 sm:$0xff] }
  0xd8   : > { %1748 = vmatpush.bf16.msra.mxu0 %v2475_v61  ;;  %1761 = vmatpush.bf16.msra.mxu1 %v2479_v62  ;;  %1658 = vst [vmem:[#allocation1] ss:$9 sm:$0xff] %v1637_v10 }
  0xd9   : > { %1660 = vst [vmem:[#allocation1 + $0x1] ss:$9 sm:$0xff] %v1641_v3 }
  0xdc   : > { %1749 = vmatpush.bf16.msra.mxu0 %v2467_v4  ;;  %1762 = vmatpush.bf16.msra.mxu1 %v2471_v5 }
  0xe0   : > { %1750 = vmatpush.bf16.msra.mxu0 %v2459_v11  ;;  %1763 = vmatpush.bf16.msra.mxu1 %v2463_v12  ;;  %v1661_v13 = vld [vmem:[#allocation1] sm:$0xff] }
  0xe3   : > { %1751 = vmatmul.bf16.vlgmr.msra.gmra.mxu0 %v1661_v13  ;;  %1764 = vmatmul.bf16.vlgmr.msra.gmra.mxu1 %v1661_v13 }
  0xfe   : > { %v595_v14 = vpop.f32.mrf.mxu0  ;;  %v608_v15 = vpop.f32.mrf.mxu1 }
 0x106   : > { %v597_v16 = vpop.f32.mrf.mxu0  ;;  %v610_v18 = vpop.f32.mrf.mxu1 }
 0x10d   : > { %v708_v19 = vpop.f32.mrf.mxu2  ;;  %v721_v20 = vpop.f32.mrf.mxu3 }
 0x10e   : > { %v709_v21 = vadd.f32 %v708_v19, %v595_v14  ;;  %v722_v22 = vadd.f32 %v721_v20, %v608_v15 }
 0x115   : > { %v723_v23 = vpop.f32.mrf.mxu3  ;;  %v710_v24 = vpop.f32.mrf.mxu2 }
 0x118   : > { %v845_v25 = vpop.f32.mrf.mxu0  ;;  %v858_v26 = vpop.f32.mrf.mxu1 }
 0x119   : > { %v862_v45 = vadd.f32 %v845_v25, %v709_v21  ;;  %v863_v46 = vadd.f32 %v858_v26, %v722_v22 }
 0x120   : > { %v847_v27 = vpop.f32.mrf.mxu0  ;;  %v860_v28 = vpop.f32.mrf.mxu1 }
 0x128   : > { %v978_v29 = vpop.f32.mrf.mxu2  ;;  %v991_v30 = vpop.f32.mrf.mxu3 }
 0x129   : > { %v995_v47 = vadd.f32 %v978_v29, %v862_v45  ;;  %v996_v17 = vadd.f32 %v991_v30, %v863_v46 }
 0x12a   : > { %v1159_v31 = vpop.f32.mrf.mxu0  ;;  %v1172_v32 = vpop.f32.mrf.mxu1 }
 0x12b   : > { %v1176_v50 = vadd.f32 %v1159_v31, %v995_v47  ;;  %v1177_v51 = vadd.f32 %v1172_v32, %v996_v17 }
 0x130   : > { %v980_v33 = vpop.f32.mrf.mxu2  ;;  %v993_v34 = vpop.f32.mrf.mxu3 }
 0x132   : > { %v1161_v35 = vpop.f32.mrf.mxu0  ;;  %v1174_v36 = vpop.f32.mrf.mxu1 }
 0x142   : > { %v1298_v37 = vpop.f32.mrf.mxu2  ;;  %v1311_v38 = vpop.f32.mrf.mxu3 }
 0x143   : > { %v1315_v52 = vadd.f32 %v1298_v37, %v1176_v50  ;;  %v1316_v53 = vadd.f32 %v1311_v38, %v1177_v51 }
 0x144   : > { %v1432_v39 = vpop.f32.mrf.mxu0  ;;  %v1445_v40 = vpop.f32.mrf.mxu1 }
 0x145   : > { %v1449_v54 = vadd.f32 %v1432_v39, %v1315_v52  ;;  %v1450_v55 = vadd.f32 %v1445_v40, %v1316_v53 }
 0x14a   : > { %v1300_v41 = vpop.f32.mrf.mxu2  ;;  %v1313_v42 = vpop.f32.mrf.mxu3 }
 0x14c   : > { %v1447_v43 = vpop.f32.mrf.mxu1  ;;  %v1434_v44 = vpop.f32.mrf.mxu0 }
 0x154   : > { %v1613_v48 = vpop.f32.mrf.mxu2  ;;  %v1626_v49 = vpop.f32.mrf.mxu3 }
 0x155   : > { %v1630_v58 = vadd.f32 %v1613_v48, %v1449_v54  ;;  %v1631_v59 = vadd.f32 %v1626_v49, %v1450_v55 }
 0x15c   : > { %v1628_v56 = vpop.f32.mrf.mxu3  ;;  %v1615_v57 = vpop.f32.mrf.mxu2 }
 0x160   : > { %v1752_v60 = vpop.f32.mrf.mxu0  ;;  %v1765_v61 = vpop.f32.mrf.mxu1 }
 0x161   : > { %v1769_v62 = vadd.f32 %v1752_v60, %v1630_v58  ;;  %v1770_v63 = vadd.f32 %v1765_v61, %v1631_v59 }
 0x163   : > { %v1804_v0 = vsel %vm3761_vm8, %v1769_v62, 0.0  ;;  %v1818_v1 = vmul.f32 %v1769_v62, %v1769_v62  ;;  %v1773_v2 = vrot.slane %v1770_v63, 6  ;;  %v1811_v3 = vsel %vm3762_vm13, %v1770_v63, 0.0 }
 0x164   : > { %v1805_v4 = vrot.slane %v1804_v0, 4  ;;  %v1812_v5 = vrot.slane %v1811_v3, 4  ;;  %v1819_v6 = vmul.f32 %v1770_v63, %v1770_v63 }
 0x165   : > { %v1820_v7 = vsel %vm3763_vm14, %v1818_v1, 0.0  ;;  %v1774_v8 = vsel %vm3764_vm15, %v1769_v62, %v1773_v2  ;;  %v1775_v9 = vsel %vm3765_vm0, %v1769_v62, %v1773_v2 }
 0x166   : > { %v1806_v10 = vadd.f32 %v1805_v4, %v1804_v0  ;;  %v1821_v11 = vrot.slane %v1820_v7, 4  ;;  %v1776_v12 = vrot.slane %v1775_v9, 2  ;;  %1777 = vst [vmem:[#allocation1] ss:$4 sm:$0xff] %v1774_v8  ;;  %v1813_v13 = vadd.f32 %v1812_v5, %v1811_v3 }
 0x167   : > { %v1827_v14 = vsel %vm3766_vm1, %v1819_v6, 0.0 }
 0x168   : > { %v1822_v15 = vadd.f32 %v1821_v11, %v1820_v7  ;;  %1781 = vst [vmem:[#allocation1 + $0x20] ss:$4 sm:$0xff] %v1776_v12  ;;  %v1814_v16 = vrot.slane %v1813_v13, 2  ;;  %v1828_v18 = vrot.slane %v1827_v14, 4  ;;  %v1754_v19 = vpop.f32.mrf.mxu0  ;;  %v1767_v20 = vpop.f32.mrf.mxu1  ;;  %v1807_v21 = vrot.slane %v1806_v10, 2 }
 0x16a   : > { %v1823_v22 = vrot.slane %v1822_v15, 2  ;;  %v1815_v23 = vadd.f32 %v1814_v16, %v1813_v13  ;;  %v1829_v24 = vadd.f32 %v1828_v18, %v1827_v14  ;;  %v1808_v27 = vadd.f32 %v1807_v21, %v1806_v10 }
 0x16c   : > { %v1824_v25 = vadd.f32 %v1823_v22, %v1822_v15  ;;  %v1830_v26 = vrot.slane %v1829_v24, 2  ;;  %v1816_v32 = vrot.slane %v1815_v23, 1  ;;  %v1809_v38 = vrot.slane %v1808_v27, 1 }
 0x16d   : > { %v1778_v28 = vld.sshfl [vmem:[#allocation1] sm:$0xff pattern:$0x73625140]  ;;  %v1779_v29 = vld.sshfl [vmem:[#allocation1 + $0x8] sm:$0xff pattern:$0x73625140] }
 0x16e   : > { %v1825_v30 = vrot.slane %v1824_v25, 1  ;;  %v1788_v31 = vpack.c.bf16 %v1779_v29, %v1778_v28  ;;  %v1831_v35 = vadd.f32 %v1830_v26, %v1829_v24  ;;  %v1817_v43 = vadd.f32 %v1816_v32, %v1815_v23 }
 0x16f   : > { %v1782_v33 = vld.sshfl [vmem:[#allocation1 + $0x20] sm:$0xff pattern:$0x73625140]  ;;  %v1783_v34 = vld.sshfl [vmem:[#allocation1 + $0x28] sm:$0xff pattern:$0x73625140]  ;;  %v1810_v46 = vadd.f32 %v1809_v38, %v1808_v27 }
 0x170   : > { %v1789_v36 = vpack.c.bf16 %v1783_v34, %v1782_v33  ;;  %v1792_v37 = vrot.slane %v1788_v31, 3  ;;  %v1832_v39 = vrot.slane %v1831_v35, 1  ;;  %v1826_v42 = vadd.f32 %v1825_v30, %v1824_v25 }
 0x172   : > { %v1793_v40 = vrot.slane %v1789_v36, 3  ;;  %v1796_v41 = vsel %vm3767_vm2, %v1788_v31, %v1792_v37  ;;  %v1833_v44 = vadd.f32 %v1832_v39, %v1831_v35  ;;  %v1834_v48 = vsel %vm3770_vm6, %v1810_v46, %v1826_v42 }
 0x173   : > { %1802 = vst [vmem:[%s230_s7] sm:$0x3] %v1796_v41 }
 0x174   : > { %v1799_v45 = vsel %vm3768_vm4, %v1789_v36, %v1793_v40  ;;  %v1835_v47 = vsel %vm3769_vm5, %v1817_v43, %v1833_v44 }
 0x175   : > { %1803 = vst [vmem:[%s230_s7 + $0x2] sm:$0x3] %v1799_v45  ;;  %v1838_v17 = vrot.slane %v1835_v47, 6 }
 0x177   : > { %v1839_v49 = vsel %vm3771_vm9, %v1834_v48, %v1838_v17 }
 0x178   : > { %1841 = vst [vmem:[%s235_s9] sm:$0xf] %v1839_v49 }
 0x179 PF: > { %s16_s18 = sadd.s32 1, %s2685_s18  }
 0x17a   : > { %p13_p4 = scmp.ge.s32.totalorder %s16_s18, 4  }
 0x17c   :  { %15 = sbr.rel (!%p13_p4) target bundleno = 1 (0x1), region = 99 }

// kernel: darknet_forward.6
= control target key start
LH: loop header
LB: loop body
LE: loop exit
PB: predicated region body
PF: predicated region fallthrough
CT: control target
= control target key end

     0   :  { %s2812_s18 = smov 0   ;;  %s3838_s0 = inlined_call_operand.vmem [shape: bf16[2,16,16,32], index: 0, kind: input, shape index: {}]   ;;  %s3839_s1 = inlined_call_operand.vmem [shape: bf16[288,64], index: 1, kind: input, shape index: {}]   ;;  %s3840_s2 = inlined_call_operand.vmem [shape: f32[1,32], index: 2, kind: input, shape index: {}]   ;;  %s3841_s3 = inlined_call_operand.vmem [shape: f32[1,32], index: 3, kind: input, shape index: {}]   ;;  %s3842_s4 = inlined_call_operand.vmem [shape: bf16[2,8,8,64], index: 4, kind: output, shape index: {0}]   ;;  %s3843_s5 = inlined_call_operand.vmem [shape: f32[2,2,64], index: 5, kind: output, shape index: {1}]  }
   0x1 LB: > { %s2545_s19 = sadd.s32 4294967295, %s2776_s18   ;;  %p2549_p0 = scmp.ge.s32.totalorder %s2776_s18, 1  ;;  %s2776_s18 = sphi %s2812_s18, %s16_s18  }
   0x2   : > { %p190_p1 = scmp.lt.s32.totalorder %s2776_s18, 3 }
   0x4   : > { %p191_p2 = pnand %p2549_p0, %p190_p1 }
   0x6   : > { %194 = sbr.rel (%p191_p2) target bundleno = 595 (0x253), region = 36 }
   0xb   : > { %vm1111_vm0 = vcmask 257024   ;;  %vm1113_vm1 = vcmask 253952   ;;  %v2778_v0 = vmov 0   ;;  %p222_p3 = scmp.lt.s32.totalorder %s2545_s19, 1  ;;  %v2843_v1 = vld [vmem:[%s3840_s2] ss:$0 sm:$0xff] }
   0xc   : > { %1112 = vst.msk [vmem:[#allocation2] sm:$0xf] %vm1111_vm0, %v2778_v0  ;;  %v2848_v2 = vld [vmem:[%s3841_s3] ss:$0 sm:$0xff]  ;;  %vm437_vm2 = vcmask 261120   ;;  %s2779_s28 = smov 64  }
   0xd   : > { %1114 = vst.msk [vmem:[#allocation2 + $0x4] sm:$0x1] %vm1113_vm1, %v2778_v0  ;;  %s3887_s19 = smov (!%p222_p3, %s2545_s19), 1  ;;  %vm598_vm3 = vcmask 254976   ;;  %s2780_s29 = smov 32   ;;  %vm1261_vm4 = vcmask 1042434  }
   0xe   : > { %1115 = vst.msk [vmem:[#allocation2 + $0x8] sm:$0xf] %vm1111_vm0, %v2778_v0  ;;  %s2633_s20 = sshll.u32 %s3887_s19, 7  ;;  %vm1263_vm5 = vcmask 1043459   ;;  %vm1265_vm6 = vcmask 1044484   ;;  %vm1267_vm7 = vcmask 1045509  }
   0xf   : > { %1116 = vst.msk [vmem:[#allocation2 + $0xc] sm:$0x1] %vm1113_vm1, %v2778_v0  ;;  %s2838_s23 = scalar_lea.vmem %s3838_s0, %s2633_s20  ;;  %vm1269_vm8 = vcmask 1046534   ;;  %vm1271_vm9 = vcmask 1047559   ;;  %vm1349_vm10 = vsmask.f32 7938 }
  0x10   : > { %1117 = vst.msk [vmem:[#allocation2 + $0x10] sm:$0xf] %vm1111_vm0, %v2778_v0  ;;  %v2724_v3 = vld [vmem:[%s2838_s23 + $0x40] sm:$0xff]   ;;  %v2725_v4 = vld [vmem:[%s2838_s23 + $0x48] sm:$0xff]   ;;  %vm2964_vm11 = vmand %vm1111_vm0, %vm1349_vm10  ;;  %vm1355_vm12 = vsmask.f32 256 }
  0x11   : > { %1118 = vst.msk [vmem:[#allocation2 + $0x14] sm:$0x1] %vm1113_vm1, %v2778_v0  ;;  %v2654_v5 = vld [vmem:[%s2838_s23] sm:$0xff]   ;;  %v2687_v8 = vunpack.c.l.bf16 %v2724_v3  ;;  %v2688_v9 = vunpack.c.h.bf16 %v2724_v3  ;;  %v2691_v10 = vunpack.c.l.bf16 %v2725_v4  ;;  %v2692_v11 = vunpack.c.h.bf16 %v2725_v4  ;;  %v2717_v25 = vld [vmem:[%s2838_s23 + $0x8] sm:$0xff]   ;;  %vm3003_vm13 = vmand %vm1113_vm1, %vm1355_vm12  ;;  %s2781_s30 = smov 96   ;;  %s2554_s9 = sshll.u32 %s3887_s19, 1 }
  0x12   : > { %1119 = vst.msk [vmem:[#allocation2 + $0x18] sm:$0xf] %vm1111_vm0, %v2778_v0  ;;  %v2655_v20 = vunpack.c.l.bf16 %v2654_v5  ;;  %v2656_v31 = vunpack.c.h.bf16 %v2654_v5  ;;  %v2659_v34 = vunpack.c.l.bf16 %v2717_v25  ;;  %v2660_v35 = vunpack.c.h.bf16 %v2717_v25  ;;  %v2892_v47 = vld [vmem:[%s2838_s23 + $0x20] sm:$0xff]   ;;  %s235_s12 = scalar_lea.vmem %s3843_s5, %s2554_s9 }
  0x13   : > { %v1402_v6 = vld [vmem:[#allocation2] sm:$0xf]  ;;  %1120 = vst.msk [vmem:[#allocation2 + $0x1c] sm:$0x1] %vm1113_vm1, %v2778_v0  ;;  %v321_v16 = vmul.f32 %v2843_v1, %v2687_v8  ;;  %v322_v17 = vmul.f32 %v2843_v1, %v2688_v9  ;;  %v323_v18 = vmul.f32 %v2843_v1, %v2691_v10  ;;  %v324_v19 = vmul.f32 %v2843_v1, %v2692_v11 }
  0x14   : > { %v1418_v7 = vld [vmem:[#allocation2] sm:$0xe]  ;;  %v1410_v12 = vld [vmem:[#allocation2 + $0x4] sm:$0x1]  ;;  %v1491_v13 = vunpack.c.l.b16 %v1402_v6  ;;  %1121 = vst.msk [vmem:[#allocation2 + $0x20] sm:$0xf] %vm1111_vm0, %v2778_v0  ;;  %v305_v38 = vmul.f32 %v2843_v1, %v2655_v20  ;;  %v306_v39 = vmul.f32 %v2843_v1, %v2656_v31  ;;  %v307_v45 = vmul.f32 %v2843_v1, %v2659_v34 }
  0x15   : > { %v1595_v14 = vunpack.c.l.b16 %v1418_v7  ;;  %v1492_v15 = vunpack.c.l.b16 %v1410_v12  ;;  %1122 = vst.msk [vmem:[#allocation2 + $0x24] sm:$0x1] %vm1113_vm1, %v2778_v0  ;;  %v357_v23 = vadd.f32 %v2848_v2, %v321_v16  ;;  %v358_v24 = vadd.f32 %v2848_v2, %v322_v17 }
  0x16   : > { %1123 = vst.msk [vmem:[#allocation2 + $0x28] sm:$0xf] %vm1111_vm0, %v2778_v0  ;;  %v359_v26 = vadd.f32 %v2848_v2, %v323_v18  ;;  %v360_v27 = vadd.f32 %v2848_v2, %v324_v19  ;;  %v308_v46 = vmul.f32 %v2843_v1, %v2660_v35  ;;  %v2899_v51 = vadd.f32 %v2848_v2, %v305_v38 }
  0x17   : > { %v1507_v21 = vpack.c.b16 %v1492_v15, %v1491_v13  ;;  %1124 = vst.msk [vmem:[#allocation2 + $0x2c] sm:$0x1] %vm1113_vm1, %v2778_v0  ;;  %v1603_v22 = vpack.c.b16 %v1492_v15, %v1595_v14  ;;  %v389_v32 = vmul.f32 0.1, %v357_v23  ;;  %v390_v33 = vmul.f32 0.1, %v358_v24 }
  0x18   : > { %1125 = vst.msk [vmem:[#allocation2 + $0x30] sm:$0xf] %vm1111_vm0, %v2778_v0  ;;  %v391_v37 = vmul.f32 0.1, %v359_v26  ;;  %v392_v40 = vmul.f32 0.1, %v360_v27  ;;  %v2906_v53 = vadd.f32 %v2848_v2, %v306_v39  ;;  %v2909_v54 = vadd.f32 %v2848_v2, %v307_v45 }
  0x19   : > { %v1516_v28 = vshrl.u32 %v1507_v21, 16  ;;  %v1518_v29 = vshll.u32 %v1507_v21, 16  ;;  %1126 = vst.msk [vmem:[#allocation2 + $0x34] sm:$0x1] %vm1113_vm1, %v2778_v0  ;;  %v1611_v30 = vrot.slane %v1603_v22, 1  ;;  %v421_v41 = vmax.f32 %v357_v23, %v389_v32 }
  0x1a   : > { %1127 = vst.msk [vmem:[#allocation2 + $0x38] sm:$0xf] %vm1111_vm0, %v2778_v0  ;;  %v422_v42 = vmax.f32 %v358_v24, %v390_v33  ;;  %v423_v44 = vmax.f32 %v359_v26, %v391_v37  ;;  %v424_v48 = vmax.f32 %v360_v27, %v392_v40  ;;  %v2912_v55 = vadd.f32 %v2848_v2, %v308_v46 }
  0x1b   : > { %v1520_v36 = vrot.slane %v1518_v29, 1  ;;  %1128 = vst.msk [vmem:[#allocation2 + $0x3c] sm:$0x1] %vm1113_vm1, %v2778_v0  ;;  %1619 = vrot.lane.b32.xlu2 %v1611_v30, %s2779_s28  ;;  %v462_v49 = vsel %vm437_vm2, %v421_v41, -inf  ;;  %v2916_v58 = vmul.f32 0.1, %v2899_v51  ;;  %v2671_v59 = vunpack.c.l.bf16 %v2892_v47 }
  0x1c   : > { %1129 = vst.msk [vmem:[#allocation2 + $0x40] sm:$0xf] %vm1111_vm0, %v2778_v0  ;;  %v465_v50 = vsel %vm437_vm2, %v422_v42, -inf  ;;  %v463_v52 = vsel %vm437_vm2, %v423_v44, -inf  ;;  %v466_v57 = vsel %vm437_vm2, %v424_v48, -inf  ;;  %vm1995_vm14 = vcmask 523264  }
  0x1d   : > { %v1521_v43 = vor.u32 %v1520_v36, %v1516_v28  ;;  %1130 = vst.msk [vmem:[#allocation2 + $0x44] sm:$0x1] %vm1113_vm1, %v2778_v0  ;;  %v464_v56 = vmax.f32 %v462_v49, %v463_v52  ;;  %v2919_v60 = vmax.f32 %v465_v50, %v466_v57  ;;  %v2922_v61 = vmul.f32 0.1, %v2906_v53 }
  0x1e   : > { %1131 = vst.msk [vmem:[#allocation2 + $0x48] sm:$0xf] %vm1111_vm0, %v2778_v0  ;;  %v2925_v62 = vmul.f32 0.1, %v2909_v54  ;;  %v2928_v63 = vmul.f32 0.1, %v2912_v55  ;;  %v405_v21 = vmax.f32 %v2899_v51, %v2916_v58 }
  0x1f   : > { %1571 = vrot.lane.b32.xlu0 %v1521_v43, %s2780_s29  ;;  %1132 = vst.msk [vmem:[#allocation2 + $0x4c] sm:$0x1] %vm1113_vm1, %v2778_v0  ;;  %v526_v0 = vrot.slane %v464_v56, 2  ;;  %v527_v3 = vrot.slane %v464_v56, 4  ;;  %v528_v4 = vrot.slane %v464_v56, 6  ;;  %v823_v5 = vsel %vm598_vm3, %v464_v56, -inf }
  0x20   : > { %v529_v6 = vrot.slane %v2919_v60, 2  ;;  %v530_v7 = vrot.slane %v2919_v60, 4  ;;  %v824_v8 = vrot.slane %v823_v5, 4  ;;  %v851_v9 = vsel %vm598_vm3, %v2919_v60, -inf }
  0x21   : > { %v830_v10 = vsel %vm598_vm3, %v526_v0, -inf  ;;  %v837_v11 = vsel %vm598_vm3, %v527_v3, -inf  ;;  %v844_v12 = vsel %vm598_vm3, %v528_v4, -inf  ;;  %v852_v13 = vrot.slane %v851_v9, 4 }
  0x22   : > { %v825_v14 = vmax.f32 %v823_v5, %v824_v8  ;;  %v831_v15 = vrot.slane %v830_v10, 4  ;;  %v838_v16 = vrot.slane %v837_v11, 4  ;;  %v845_v17 = vrot.slane %v844_v12, 4 }
  0x23   : > { %v853_v18 = vmax.f32 %v851_v9, %v852_v13  ;;  %v858_v19 = vsel %vm598_vm3, %v529_v6, -inf  ;;  %v865_v20 = vsel %vm598_vm3, %v530_v7, -inf  ;;  %v406_v29 = vmax.f32 %v2906_v53, %v2922_v61 }
  0x24   : > { %v826_v22 = vrot.slane %v825_v14, 2  ;;  %v832_v23 = vmax.f32 %v830_v10, %v831_v15  ;;  %v839_v24 = vmax.f32 %v837_v11, %v838_v16  ;;  %v846_v25 = vmax.f32 %v844_v12, %v845_v17 }
  0x25   : > { %v854_v26 = vrot.slane %v853_v18, 2  ;;  %v859_v27 = vrot.slane %v858_v19, 4  ;;  %v866_v28 = vrot.slane %v865_v20, 4  ;;  %v407_v37 = vmax.f32 %v2909_v54, %v2925_v62 }
  0x26   : > { %v827_v30 = vmax.f32 %v825_v14, %v826_v22  ;;  %v833_v31 = vrot.slane %v832_v23, 2  ;;  %v840_v32 = vrot.slane %v839_v24, 2  ;;  %v847_v33 = vrot.slane %v846_v25, 2 }
  0x27   : > { %v855_v34 = vmax.f32 %v853_v18, %v854_v26  ;;  %v860_v35 = vmax.f32 %v858_v19, %v859_v27  ;;  %v867_v36 = vmax.f32 %v865_v20, %v866_v28  ;;  %v408_v45 = vmax.f32 %v2912_v55, %v2928_v63 }
  0x28   : > { %v828_v38 = vrot.slane %v827_v30, 1  ;;  %v834_v39 = vmax.f32 %v832_v23, %v833_v31  ;;  %v841_v40 = vmax.f32 %v839_v24, %v840_v32  ;;  %v848_v41 = vmax.f32 %v846_v25, %v847_v33 }
  0x29   : > { %v856_v42 = vrot.slane %v855_v34, 1  ;;  %v861_v43 = vrot.slane %v860_v35, 2  ;;  %v868_v44 = vrot.slane %v867_v36, 2  ;;  %v438_v54 = vsel %vm437_vm2, %v405_v21, -inf }
  0x2a   : > { %v829_v46 = vmax.f32 %v827_v30, %v828_v38  ;;  %v835_v48 = vrot.slane %v834_v39, 1  ;;  %v842_v49 = vrot.slane %v841_v40, 1  ;;  %v849_v50 = vrot.slane %v848_v41, 1 }
  0x2b   : > { %v857_v51 = vmax.f32 %v855_v34, %v856_v42  ;;  %v862_v52 = vmax.f32 %v860_v35, %v861_v43  ;;  %v869_v53 = vmax.f32 %v867_v36, %v868_v44  ;;  %v439_v63 = vsel %vm437_vm2, %v407_v37, -inf }
  0x2c   : > { %v836_v56 = vmax.f32 %v834_v39, %v835_v48  ;;  %v843_v57 = vmax.f32 %v841_v40, %v842_v49  ;;  %v850_v58 = vmax.f32 %v848_v41, %v849_v50  ;;  %v1079_v61 = vpack.c.bf16 %v829_v46, %v829_v46  ;;  %v1378_v41 = vld [vmem:[#allocation2 + $0x28] sm:$0xf] }
  0x2d   : > { %v863_v62 = vrot.slane %v862_v52, 1  ;;  %v870_v0 = vrot.slane %v869_v53, 1  ;;  %v1083_v55 = vpack.c.bf16 %v857_v51, %v857_v51  ;;  %v440_v10 = vmax.f32 %v438_v54, %v439_v63 }
  0x2e   : > { %v1080_v3 = vpack.c.bf16 %v836_v56, %v836_v56  ;;  %v1081_v4 = vpack.c.bf16 %v843_v57, %v843_v57  ;;  %v1082_v5 = vpack.c.bf16 %v850_v58, %v850_v58  ;;  %v1229_v6 = vunpack.c.l.b16 %v1079_v61 }
  0x2f   : > { %v864_v7 = vmax.f32 %v862_v52, %v863_v62  ;;  %v871_v8 = vmax.f32 %v869_v53, %v870_v0  ;;  %v1233_v9 = vunpack.c.l.b16 %v1083_v55  ;;  %v441_v14 = vsel %vm437_vm2, %v406_v29, -inf }
  0x30   : > { %v1230_v11 = vunpack.c.l.b16 %v1080_v3  ;;  %v1231_v12 = vunpack.c.l.b16 %v1081_v4  ;;  %v1232_v13 = vunpack.c.l.b16 %v1082_v5  ;;  %v442_v17 = vsel %vm437_vm2, %v408_v45, -inf }
  0x31   : > { %v1084_v15 = vpack.c.bf16 %v864_v7, %v864_v7  ;;  %v1085_v16 = vpack.c.bf16 %v871_v8, %v871_v8  ;;  %v502_v18 = vrot.slane %v440_v10, 2  ;;  %v443_v20 = vmax.f32 %v441_v14, %v442_v17 }
  0x32   : > { %v1291_v19 = vsel %vm1261_vm4, %v1230_v11, %v1229_v6  ;;  %v503_v21 = vrot.slane %v440_v10, 4  ;;  %v504_v22 = vrot.slane %v440_v10, 6  ;;  %v599_v26 = vsel %vm598_vm3, %v440_v10, -inf }
  0x33   : > { %v1234_v23 = vunpack.c.l.b16 %v1084_v15  ;;  %v1235_v24 = vunpack.c.l.b16 %v1085_v16  ;;  %v1292_v25 = vsel %vm1263_vm5, %v1231_v12, %v1291_v19  ;;  %v505_v28 = vrot.slane %v443_v20, 2 }
  0x34   : > { %v1293_v27 = vsel %vm1265_vm6, %v1232_v13, %v1292_v25  ;;  %v506_v29 = vrot.slane %v443_v20, 4  ;;  %v507_v30 = vrot.slane %v443_v20, 6  ;;  %v600_v32 = vrot.slane %v599_v26, 4 }
  0x35   : > { %v1294_v31 = vsel %vm1267_vm7, %v1233_v9, %v1293_v27  ;;  %v606_v33 = vsel %vm598_vm3, %v502_v18, -inf  ;;  %v613_v34 = vsel %vm598_vm3, %v503_v21, -inf  ;;  %v620_v38 = vsel %vm598_vm3, %v504_v22, -inf }
  0x36   : > { %v1295_v35 = vsel %vm1269_vm8, %v1234_v23, %v1294_v31  ;;  %v607_v36 = vrot.slane %v606_v33, 4  ;;  %v614_v37 = vrot.slane %v613_v34, 4  ;;  %v601_v42 = vmax.f32 %v599_v26, %v600_v32 }
  0x37   : > { %v1296_v39 = vsel %vm1271_vm9, %v1235_v24, %v1295_v35  ;;  %v621_v43 = vrot.slane %v620_v38, 4  ;;  %v627_v44 = vsel %vm598_vm3, %v443_v20, -inf  ;;  %v634_v52 = vsel %vm598_vm3, %v505_v28, -inf }
  0x38   : > { %v1323_v45 = vpack.c.b16 %v1296_v39, %v1296_v39  ;;  %v608_v46 = vmax.f32 %v606_v33, %v607_v36  ;;  %v615_v48 = vmax.f32 %v613_v34, %v614_v37  ;;  %v628_v49 = vrot.slane %v627_v44, 4 }
  0x39   : > { %v602_v50 = vrot.slane %v601_v42, 2  ;;  %v622_v51 = vmax.f32 %v620_v38, %v621_v43  ;;  %v641_v53 = vsel %vm598_vm3, %v506_v29, -inf  ;;  %v635_v0 = vrot.slane %v634_v52, 4 }
  0x3a   : > { %v1379_v54 = vsel %vm2964_vm11, %v1323_v45, %v1378_v41  ;;  %v609_v56 = vrot.slane %v608_v46, 2  ;;  %v616_v57 = vrot.slane %v615_v48, 2  ;;  %v629_v58 = vmax.f32 %v627_v44, %v628_v49  ;;  %v2721_v44 = vld [vmem:[%s2838_s23 + $0x28] sm:$0xff]  }
  0x3b   : > { %1380 = vst [vmem:[#allocation2 + $0x28] sm:$0xf] %v1379_v54  ;;  %v603_v61 = vmax.f32 %v601_v42, %v602_v50  ;;  %v623_v62 = vrot.slane %v622_v51, 2  ;;  %v642_v55 = vrot.slane %v641_v53, 4  ;;  %v648_v5 = vsel %vm598_vm3, %v507_v30, -inf }
  0x3c   : > { %v610_v63 = vmax.f32 %v608_v46, %v609_v56  ;;  %v617_v3 = vmax.f32 %v615_v48, %v616_v57  ;;  %v630_v4 = vrot.slane %v629_v58, 2  ;;  %v636_v8 = vmax.f32 %v634_v52, %v635_v0 }
  0x3d   : > { %v604_v6 = vrot.slane %v603_v61, 1  ;;  %v624_v7 = vmax.f32 %v622_v51, %v623_v62  ;;  %v643_v9 = vmax.f32 %v641_v53, %v642_v55  ;;  %v649_v13 = vrot.slane %v648_v5, 4 }
  0x3e   : > { %v611_v10 = vrot.slane %v610_v63, 1  ;;  %v618_v11 = vrot.slane %v617_v3, 1  ;;  %v631_v12 = vmax.f32 %v629_v58, %v630_v4  ;;  %v637_v16 = vrot.slane %v636_v8, 2  ;;  %v2722_v58 = vld [vmem:[%s2838_s23 + $0x30] sm:$0xff]  }
  0x3f   : > { %v605_v14 = vmax.f32 %v603_v61, %v604_v6  ;;  %v625_v15 = vrot.slane %v624_v7, 1  ;;  %v644_v17 = vrot.slane %v643_v9, 2  ;;  %v650_v21 = vmax.f32 %v648_v5, %v649_v13  ;;  %v2723_v6 = vld [vmem:[%s2838_s23 + $0x38] sm:$0xff]   ;;  %v1351_v13 = vld [vmem:[#allocation2 + $0x8] sm:$0xf] }
  0x40   : > { %v612_v18 = vmax.f32 %v610_v63, %v611_v10  ;;  %v619_v19 = vmax.f32 %v617_v3, %v618_v11  ;;  %v632_v20 = vrot.slane %v631_v12, 1  ;;  %v638_v23 = vmax.f32 %v636_v8, %v637_v16 }
  0x41   : > { %v626_v22 = vmax.f32 %v624_v7, %v625_v15  ;;  %v645_v24 = vmax.f32 %v643_v9, %v644_v17  ;;  %v1047_v25 = vpack.c.bf16 %v605_v14, %v605_v14  ;;  %v651_v28 = vrot.slane %v650_v21, 2  ;;  %v1357_v15 = vld [vmem:[#allocation2 + $0xc] sm:$0x1] }
  0x42   : > { %v1454_v26 = vld [vmem:[#allocation2 + $0x28] sm:$0xf]  ;;  %v633_v27 = vmax.f32 %v631_v12, %v632_v20  ;;  %v1048_v29 = vpack.c.bf16 %v612_v18, %v612_v18  ;;  %v1049_v30 = vpack.c.bf16 %v619_v19, %v619_v19  ;;  %v639_v32 = vrot.slane %v638_v23, 1 }
  0x43   : > { %v2974_v31 = vunpack.c.l.b16 %v1454_v26  ;;  %v646_v33 = vrot.slane %v645_v24, 1  ;;  %v1050_v34 = vpack.c.bf16 %v626_v22, %v626_v22  ;;  %v652_v35 = vmax.f32 %v650_v21, %v651_v28 }
  0x44   : > { %v1051_v36 = vpack.c.bf16 %v633_v27, %v633_v27  ;;  %v1197_v37 = vunpack.c.l.b16 %v1047_v25  ;;  %v1198_v38 = vunpack.c.l.b16 %v1048_v29  ;;  %v640_v41 = vmax.f32 %v638_v23, %v639_v32 }
  0x45   : > { %v1822_v39 = vpack.c.b16 %v2974_v31, %v2974_v31  ;;  %v647_v42 = vmax.f32 %v645_v24, %v646_v33  ;;  %v1199_v43 = vunpack.c.l.b16 %v1049_v30  ;;  %v653_v45 = vrot.slane %v652_v35, 1  ;;  %v2641_v24 = vld [vmem:[%s3839_s1 + $0x30] sm:$0xff] }
  0x46   : > { %v1200_v46 = vunpack.c.l.b16 %v1050_v34  ;;  %v1201_v48 = vunpack.c.l.b16 %v1051_v36  ;;  %v1262_v49 = vsel %vm1261_vm4, %v1198_v38, %v1197_v37  ;;  %v1052_v50 = vpack.c.bf16 %v640_v41, %v640_v41 }
  0x47   : > { %1833 = vrot.lane.b32.xlu0 %v1822_v39, %s2779_s28  ;;  %v1053_v51 = vpack.c.bf16 %v647_v42, %v647_v42  ;;  %v1264_v52 = vsel %vm1263_vm5, %v1199_v43, %v1262_v49  ;;  %v654_v53 = vmax.f32 %v652_v35, %v653_v45  ;;  %v2672_v56 = vunpack.c.h.bf16 %v2892_v47 }
  0x48   : > { %v1266_v54 = vsel %vm1265_vm6, %v1200_v46, %v1264_v52  ;;  %v2675_v57 = vunpack.c.l.bf16 %v2721_v44  ;;  %v1202_v61 = vunpack.c.l.b16 %v1052_v50  ;;  %v2676_v55 = vunpack.c.h.bf16 %v2721_v44 }
  0x49   : > { %v1203_v62 = vunpack.c.l.b16 %v1053_v51  ;;  %v1268_v0 = vsel %vm1267_vm7, %v1201_v48, %v1266_v54  ;;  %v1054_v63 = vpack.c.bf16 %v654_v53, %v654_v53  ;;  %v313_v3 = vmul.f32 %v2843_v1, %v2671_v59 }
  0x4a   : > { %v314_v4 = vmul.f32 %v2843_v1, %v2672_v56  ;;  %v315_v5 = vmul.f32 %v2843_v1, %v2675_v57  ;;  %v1270_v7 = vsel %vm1269_vm8, %v1202_v61, %v1268_v0  ;;  %v316_v8 = vmul.f32 %v2843_v1, %v2676_v55 }
  0x4b   : > { %v2679_v9 = vunpack.c.l.bf16 %v2722_v58  ;;  %v2680_v10 = vunpack.c.h.bf16 %v2722_v58  ;;  %v1204_v11 = vunpack.c.l.b16 %v1054_v63  ;;  %v1272_v12 = vsel %vm1271_vm9, %v1203_v62, %v1270_v7 }
  0x4c   : > { %v349_v14 = vadd.f32 %v2848_v2, %v313_v3  ;;  %v350_v47 = vadd.f32 %v2848_v2, %v314_v4  ;;  %v1315_v59 = vpack.c.b16 %v1272_v12, %v1272_v12  ;;  %v351_v16 = vadd.f32 %v2848_v2, %v315_v5 }
  0x4d   : > { %v352_v17 = vadd.f32 %v2848_v2, %v316_v8  ;;  %v2683_v18 = vunpack.c.l.bf16 %v2723_v6  ;;  %v1316_v19 = vpack.c.b16 %v1204_v11, %v1204_v11  ;;  %v2684_v22 = vunpack.c.h.bf16 %v2723_v6 }
  0x4e   : > { %v381_v20 = vmul.f32 0.1, %v349_v14  ;;  %v382_v21 = vmul.f32 0.1, %v350_v47  ;;  %v1352_v23 = vsel %vm2964_vm11, %v1315_v59, %v1351_v13  ;;  %v383_v25 = vmul.f32 0.1, %v351_v16 }
  0x4f   : > { %v384_v26 = vmul.f32 0.1, %v352_v17  ;;  %v317_v27 = vmul.f32 %v2843_v1, %v2679_v9  ;;  %1353 = vst [vmem:[#allocation2 + $0x8] sm:$0xf] %v1352_v23  ;;  %v1358_v28 = vsel %vm3003_vm13, %v1316_v19, %v1357_v15  ;;  %v318_v32 = vmul.f32 %v2843_v1, %v2680_v10  ;;  %v3051_v10 = vld [vmem:[%s2838_s23 + $0x10] sm:$0xff]  }
  0x50   : > { %v413_v29 = vmax.f32 %v349_v14, %v381_v20  ;;  %v414_v30 = vmax.f32 %v350_v47, %v382_v21  ;;  %1359 = vst [vmem:[#allocation2 + $0xc] sm:$0x1] %v1358_v28  ;;  %v415_v33 = vmax.f32 %v351_v16, %v383_v25  ;;  %v319_v35 = vmul.f32 %v2843_v1, %v2683_v18 }
  0x51   : > { %v416_v34 = vmax.f32 %v352_v17, %v384_v26  ;;  %v320_v36 = vmul.f32 %v2843_v1, %v2684_v22  ;;  %v3016_v39 = vadd.f32 %v2848_v2, %v317_v27  ;;  %v3019_v41 = vadd.f32 %v2848_v2, %v318_v32 }
  0x52   : > { %v450_v37 = vsel %vm437_vm2, %v413_v29, -inf  ;;  %v453_v38 = vsel %vm437_vm2, %v414_v30, -inf  ;;  %v451_v42 = vsel %vm437_vm2, %v415_v33, -inf  ;;  %v3024_v44 = vadd.f32 %v2848_v2, %v319_v35 }
  0x53   : > { %v454_v43 = vsel %vm437_vm2, %v416_v34, -inf  ;;  %v452_v45 = vmax.f32 %v450_v37, %v451_v42  ;;  %v3027_v48 = vadd.f32 %v2848_v2, %v320_v36  ;;  %v3030_v49 = vmul.f32 0.1, %v3016_v39 }
  0x54   : > { %v455_v46 = vmax.f32 %v453_v38, %v454_v43  ;;  %v3033_v50 = vmul.f32 0.1, %v3019_v41  ;;  %v3036_v54 = vmul.f32 0.1, %v3024_v44  ;;  %v2663_v20 = vunpack.c.l.bf16 %v3051_v10 }
  0x55   : > { %v514_v51 = vrot.slane %v452_v45, 2  ;;  %v515_v52 = vrot.slane %v452_v45, 4  ;;  %v516_v53 = vrot.slane %v452_v45, 6  ;;  %v711_v58 = vsel %vm598_vm3, %v452_v45, -inf }
  0x56   : > { %v1426_v56 = vld [vmem:[#allocation2 + $0x8] sm:$0xf]  ;;  %v517_v57 = vrot.slane %v455_v46, 2  ;;  %v739_v2 = vsel %vm598_vm3, %v455_v46, -inf  ;;  %v712_v62 = vrot.slane %v711_v58, 4  ;;  %v518_v11 = vrot.slane %v455_v46, 4 }
  0x57   : > { %v3040_v61 = vunpack.c.l.b16 %v1426_v56  ;;  %v718_v0 = vsel %vm598_vm3, %v514_v51, -inf  ;;  %v725_v55 = vsel %vm598_vm3, %v515_v52, -inf  ;;  %v732_v4 = vsel %vm598_vm3, %v516_v53, -inf }
  0x58   : > { %v719_v63 = vrot.slane %v718_v0, 4  ;;  %v726_v3 = vrot.slane %v725_v55, 4  ;;  %v3046_v5 = vmul.f32 0.1, %v3027_v48  ;;  %v713_v7 = vmax.f32 %v711_v58, %v712_v62 }
  0x59   : > { %v1651_v6 = vpack.c.b16 %v3040_v61, %v3040_v61  ;;  %v733_v8 = vrot.slane %v732_v4, 4  ;;  %v740_v9 = vrot.slane %v739_v2, 4  ;;  %v746_v14 = vsel %vm598_vm3, %v517_v57, -inf }
  0x5a   : > { %v720_v12 = vmax.f32 %v718_v0, %v719_v63  ;;  %v727_v13 = vmax.f32 %v725_v55, %v726_v3  ;;  %v714_v47 = vrot.slane %v713_v7, 2  ;;  %v747_v16 = vrot.slane %v746_v14, 4 }
  0x5b   : > { %1659 = vrot.lane.b32.xlu1 %v1651_v6, %s2781_s30  ;;  %v734_v59 = vmax.f32 %v732_v4, %v733_v8  ;;  %v741_v15 = vmax.f32 %v739_v2, %v740_v9  ;;  %v519_v19 = vrot.slane %v455_v46, 6  ;;  %v753_v28 = vsel %vm598_vm3, %v518_v11, -inf  ;;  %v1430_v4 = vld [vmem:[#allocation2 + $0x28] sm:$0xf] }
  0x5c   : > { %v721_v17 = vrot.slane %v720_v12, 2  ;;  %v728_v18 = vrot.slane %v727_v13, 2  ;;  %v715_v21 = vmax.f32 %v713_v7, %v714_v47  ;;  %v748_v25 = vmax.f32 %v746_v14, %v747_v16 }
  0x5d   : > { %v735_v22 = vrot.slane %v734_v59, 2  ;;  %v742_v23 = vrot.slane %v741_v15, 2  ;;  %v2664_v29 = vunpack.c.h.bf16 %v3051_v10  ;;  %v754_v37 = vrot.slane %v753_v28, 4 }
  0x5e   : > { %v722_v26 = vmax.f32 %v720_v12, %v721_v17  ;;  %v729_v27 = vmax.f32 %v727_v13, %v728_v18  ;;  %v716_v30 = vrot.slane %v715_v21, 1  ;;  %v749_v34 = vrot.slane %v748_v25, 2 }
  0x5f   : > { %v736_v32 = vmax.f32 %v734_v59, %v735_v22  ;;  %v743_v33 = vmax.f32 %v741_v15, %v742_v23  ;;  %v760_v38 = vsel %vm598_vm3, %v519_v19, -inf  ;;  %v755_v53 = vmax.f32 %v753_v28, %v754_v37 }
  0x60   : > { %v723_v35 = vrot.slane %v722_v26, 1  ;;  %v730_v36 = vrot.slane %v729_v27, 1  ;;  %v717_v42 = vmax.f32 %v715_v21, %v716_v30  ;;  %v750_v46 = vmax.f32 %v748_v25, %v749_v34 }
  0x61   : > { %v737_v43 = vrot.slane %v736_v32, 1  ;;  %v744_v45 = vrot.slane %v743_v33, 1  ;;  %v761_v56 = vrot.slane %v760_v38, 4  ;;  %v756_v0 = vrot.slane %v755_v53, 2 }
  0x62   : > { %v724_v51 = vmax.f32 %v722_v26, %v723_v35  ;;  %v731_v52 = vmax.f32 %v729_v27, %v730_v36  ;;  %v751_v2 = vrot.slane %v750_v46, 1  ;;  %v1063_v62 = vpack.c.bf16 %v717_v42, %v717_v42 }
  0x63   : > { %v738_v57 = vmax.f32 %v736_v32, %v737_v43  ;;  %v745_v58 = vmax.f32 %v743_v33, %v744_v45  ;;  %v762_v3 = vmax.f32 %v760_v38, %v761_v56  ;;  %v757_v11 = vmax.f32 %v755_v53, %v756_v0  ;;  %v3073_v33 = vld [vmem:[%s2838_s23 + $0x18] sm:$0xff]  }
  0x64   : > { %v1064_v55 = vpack.c.bf16 %v724_v51, %v724_v51  ;;  %v1065_v63 = vpack.c.bf16 %v731_v52, %v731_v52  ;;  %v752_v6 = vmax.f32 %v750_v46, %v751_v2  ;;  %v1213_v9 = vunpack.c.l.b16 %v1063_v62 }
  0x65   : > { %v1066_v7 = vpack.c.bf16 %v738_v57, %v738_v57  ;;  %v1067_v8 = vpack.c.bf16 %v745_v58, %v745_v58  ;;  %v763_v14 = vrot.slane %v762_v3, 2  ;;  %v3059_v16 = vunpack.c.l.b16 %v1430_v4  ;;  %v1366_v57 = vld [vmem:[#allocation2 + $0x18] sm:$0xf] }
  0x66   : > { %v1214_v12 = vunpack.c.l.b16 %v1064_v55  ;;  %v1215_v13 = vunpack.c.l.b16 %v1065_v63  ;;  %v1068_v47 = vpack.c.bf16 %v752_v6, %v752_v6  ;;  %v758_v17 = vrot.slane %v757_v11, 1  ;;  %v1369_v55 = vld [vmem:[#allocation2 + $0x1c] sm:$0x1] }
  0x67   : > { %v1216_v59 = vunpack.c.l.b16 %v1066_v7  ;;  %v1217_v15 = vunpack.c.l.b16 %v1067_v8  ;;  %v764_v19 = vmax.f32 %v762_v3, %v763_v14  ;;  %v417_v21 = vmax.f32 %v3016_v39, %v3030_v49 }
  0x68   : > { %v1279_v18 = vsel %vm1261_vm4, %v1214_v12, %v1213_v9  ;;  %v1218_v22 = vunpack.c.l.b16 %v1068_v47  ;;  %v1655_v25 = vpack.c.b16 %v3059_v16, %v3059_v16  ;;  %v418_v26 = vmax.f32 %v3019_v41, %v3033_v50 }
  0x69   : > { %v1280_v23 = vsel %vm1263_vm5, %v1215_v13, %v1279_v18  ;;  %v759_v27 = vmax.f32 %v757_v11, %v758_v17  ;;  %v765_v30 = vrot.slane %v764_v19, 1  ;;  %v419_v32 = vmax.f32 %v3024_v44, %v3036_v54 }
  0x6a   : > { %v1281_v28 = vsel %vm1265_vm6, %v1216_v59, %v1280_v23  ;;  %1667 = vrot.lane.b32.xlu1 %v1655_v25, %s2781_s30  ;;  %v420_v49 = vmax.f32 %v3027_v48, %v3046_v5  ;;  %v456_v34 = vsel %vm437_vm2, %v417_v21, -inf  ;;  %v459_v41 = vsel %vm437_vm2, %v418_v26, -inf }
  0x6b   : > { %v1282_v39 = vsel %vm1267_vm7, %v1217_v15, %v1281_v28  ;;  %v1069_v50 = vpack.c.bf16 %v759_v27, %v759_v27  ;;  %v766_v36 = vmax.f32 %v764_v19, %v765_v30  ;;  %v457_v37 = vsel %vm437_vm2, %v419_v32, -inf }
  0x6c   : > { %v1283_v35 = vsel %vm1269_vm8, %v1218_v22, %v1282_v39  ;;  %v458_v44 = vmax.f32 %v456_v34, %v457_v37  ;;  %v460_v54 = vsel %vm437_vm2, %v420_v49, -inf  ;;  %v2667_v38 = vunpack.c.l.bf16 %v3073_v33 }
  0x6d   : > { %v2668_v42 = vunpack.c.h.bf16 %v3073_v33  ;;  %v1219_v43 = vunpack.c.l.b16 %v1069_v50  ;;  %v1070_v45 = vpack.c.bf16 %v766_v36, %v766_v36  ;;  %v3086_v48 = vmax.f32 %v459_v41, %v460_v54 }
  0x6e   : > { %v3091_v5 = vmul.f32 %v2843_v1, %v2663_v20  ;;  %v520_v46 = vrot.slane %v458_v44, 2  ;;  %v521_v51 = vrot.slane %v458_v44, 4  ;;  %v522_v52 = vrot.slane %v458_v44, 6 }
  0x6f   : > { %v767_v53 = vsel %vm598_vm3, %v458_v44, -inf  ;;  %v1284_v56 = vsel %vm1271_vm9, %v1219_v43, %v1283_v35  ;;  %v1220_v58 = vunpack.c.l.b16 %v1070_v45  ;;  %v523_v2 = vrot.slane %v3086_v48, 2 }
  0x70   : > { %v524_v62 = vrot.slane %v3086_v48, 4  ;;  %v1319_v0 = vpack.c.b16 %v1284_v56, %v1284_v56  ;;  %v768_v63 = vrot.slane %v767_v53, 4  ;;  %v774_v3 = vsel %vm598_vm3, %v520_v46, -inf }
  0x71   : > { %v781_v20 = vsel %vm598_vm3, %v521_v51, -inf  ;;  %v1320_v4 = vpack.c.b16 %v1220_v58, %v1220_v58  ;;  %v775_v6 = vrot.slane %v774_v3, 4  ;;  %v788_v8 = vsel %vm598_vm3, %v522_v52, -inf }
  0x72   : > { %v782_v7 = vrot.slane %v781_v20, 4  ;;  %v1367_v9 = vsel %vm2964_vm11, %v1319_v0, %v1366_v57  ;;  %v769_v11 = vmax.f32 %v767_v53, %v768_v63  ;;  %v789_v12 = vrot.slane %v788_v8, 4 }
  0x73   : > { %v795_v13 = vsel %vm598_vm3, %v3086_v48, -inf  ;;  %1368 = vst [vmem:[#allocation2 + $0x18] sm:$0xf] %v1367_v9  ;;  %v1370_v14 = vsel %vm3003_vm13, %v1320_v4, %v1369_v55  ;;  %v776_v47 = vmax.f32 %v774_v3, %v775_v6  ;;  %v802_v19 = vsel %vm598_vm3, %v523_v2, -inf }
  0x74   : > { %v783_v59 = vmax.f32 %v781_v20, %v782_v7  ;;  %v796_v15 = vrot.slane %v795_v13, 4  ;;  %1371 = vst [vmem:[#allocation2 + $0x1c] sm:$0x1] %v1370_v14  ;;  %v770_v17 = vrot.slane %v769_v11, 2  ;;  %v790_v18 = vmax.f32 %v788_v8, %v789_v12 }
  0x75   : > { %v809_v21 = vsel %vm598_vm3, %v524_v62, -inf  ;;  %v777_v22 = vrot.slane %v776_v47, 2  ;;  %v803_v26 = vrot.slane %v802_v19, 4  ;;  %v310_v32 = vmul.f32 %v2843_v1, %v2664_v29 }
  0x76   : > { %v784_v23 = vrot.slane %v783_v59, 2  ;;  %v797_v25 = vmax.f32 %v795_v13, %v796_v15  ;;  %v771_v27 = vmax.f32 %v769_v11, %v770_v17  ;;  %v791_v28 = vrot.slane %v790_v18, 2 }
  0x77   : > { %v810_v30 = vrot.slane %v809_v21, 4  ;;  %v778_v33 = vmax.f32 %v776_v47, %v777_v22  ;;  %v804_v34 = vmax.f32 %v802_v19, %v803_v26  ;;  %v311_v36 = vmul.f32 %v2843_v1, %v2667_v38  ;;  %v3119_v19 = vld [vmem:[%s3841_s3] ss:$0 sm:$0xff] }
  0x78   : > { %v785_v39 = vmax.f32 %v783_v59, %v784_v23  ;;  %v798_v49 = vrot.slane %v797_v25, 2  ;;  %v772_v41 = vrot.slane %v771_v27, 1  ;;  %v792_v50 = vmax.f32 %v790_v18, %v791_v28 }
  0x79   : > { %v811_v35 = vmax.f32 %v809_v21, %v810_v30  ;;  %v779_v37 = vrot.slane %v778_v33, 1  ;;  %v805_v43 = vrot.slane %v804_v34, 2  ;;  %v312_v29 = vmul.f32 %v2843_v1, %v2668_v42 }
  0x7a   : > { %v786_v44 = vrot.slane %v785_v39, 1  ;;  %v799_v54 = vmax.f32 %v797_v25, %v798_v49  ;;  %v1428_v45 = vld [vmem:[#allocation2 + $0x18] sm:$0xf]  ;;  %v773_v51 = vmax.f32 %v771_v27, %v772_v41  ;;  %v793_v52 = vrot.slane %v792_v50, 1 }
  0x7b   : > { %v1444_v46 = vld [vmem:[#allocation2 + $0x18] sm:$0xe]  ;;  %v812_v10 = vrot.slane %v811_v35, 2  ;;  %v1645_v53 = vunpack.c.l.b16 %v1428_v45  ;;  %v1436_v56 = vld [vmem:[#allocation2 + $0x1c] sm:$0x1]  ;;  %v780_v58 = vmax.f32 %v778_v33, %v779_v37  ;;  %v806_v38 = vmax.f32 %v804_v34, %v805_v43 }
  0x7c   : > { %v1765_v57 = vunpack.c.l.b16 %v1444_v46  ;;  %v787_v2 = vmax.f32 %v785_v39, %v786_v44  ;;  %v1685_v62 = vunpack.c.l.b16 %v1436_v56  ;;  %v794_v0 = vmax.f32 %v792_v50, %v793_v52  ;;  %v1372_v45 = vld [vmem:[#allocation2 + $0x20] sm:$0xf] }
  0x7d   : > { %v800_v55 = vrot.slane %v799_v54, 1  ;;  %v1653_v63 = vpack.c.b16 %v1645_v53, %v1645_v53  ;;  %v813_v3 = vmax.f32 %v811_v35, %v812_v10  ;;  %v1071_v20 = vpack.c.bf16 %v773_v51, %v773_v51 }
  0x7e   : > { %v1072_v4 = vpack.c.bf16 %v780_v58, %v780_v58  ;;  %v1773_v6 = vpack.c.b16 %v1685_v62, %v1765_v57  ;;  %v3113_v7 = vpack.c.b16 %v1685_v62, %v1645_v53  ;;  %v807_v9 = vrot.slane %v806_v38, 1 }
  0x7f   : > { %v801_v8 = vmax.f32 %v799_v54, %v800_v55  ;;  %1663 = vrot.lane.b32.xlu2 %v1653_v63, %s2781_s30  ;;  %v814_v1 = vrot.slane %v813_v3, 1  ;;  %v1073_v42 = vpack.c.bf16 %v787_v2, %v787_v2  ;;  %v1074_v11 = vpack.c.bf16 %v794_v0, %v794_v0 }
  0x80   : > { %v1221_v12 = vunpack.c.l.b16 %v1071_v20  ;;  %v1781_v13 = vrot.slane %v1773_v6, 1  ;;  %v808_v14 = vmax.f32 %v806_v38, %v807_v9  ;;  %v1222_v59 = vunpack.c.l.b16 %v1072_v4 }
  0x81   : > { %v1075_v47 = vpack.c.bf16 %v801_v8, %v801_v8  ;;  %v815_v15 = vmax.f32 %v813_v3, %v814_v1  ;;  %v1223_v17 = vunpack.c.l.b16 %v1073_v42  ;;  %v1224_v18 = vunpack.c.l.b16 %v1074_v11 }
  0x82   : > { %v345_v21 = vadd.f32 %v3119_v19, %v3091_v5  ;;  %1791 = vrot.lane.b32.xlu0 %v1781_v13, %s2780_s29  ;;  %v1076_v22 = vpack.c.bf16 %v808_v14, %v808_v14  ;;  %v1285_v25 = vsel %vm1261_vm4, %v1222_v59, %v1221_v12  ;;  %v346_v26 = vadd.f32 %v3119_v19, %v310_v32 }
  0x83   : > { %v1225_v23 = vunpack.c.l.b16 %v1075_v47  ;;  %v1077_v27 = vpack.c.bf16 %v815_v15, %v815_v15  ;;  %v1286_v28 = vsel %vm1263_vm5, %v1223_v17, %v1285_v25  ;;  %v347_v30 = vadd.f32 %v3119_v19, %v311_v36 }
  0x84   : > { %v348_v33 = vadd.f32 %v3119_v19, %v312_v29  ;;  %v1226_v39 = vunpack.c.l.b16 %v1076_v22  ;;  %v1287_v49 = vsel %vm1265_vm6, %v1224_v18, %v1286_v28  ;;  %v377_v34 = vmul.f32 0.1, %v345_v21 }
  0x85   : > { %v378_v5 = vmul.f32 0.1, %v346_v26  ;;  %v1227_v41 = vunpack.c.l.b16 %v1077_v27  ;;  %v1288_v50 = vsel %vm1267_vm7, %v1225_v23, %v1287_v49  ;;  %v379_v35 = vmul.f32 0.1, %v347_v30 }
  0x86   : > { %v380_v37 = vmul.f32 0.1, %v348_v33  ;;  %v1289_v44 = vsel %vm1269_vm8, %v1226_v39, %v1288_v50  ;;  %v409_v32 = vmax.f32 %v345_v21, %v377_v34  ;;  %v531_v43 = vrot.slane %v2919_v60, 6 }
  0x87   : > { %v410_v54 = vmax.f32 %v346_v26, %v378_v5  ;;  %v1290_v36 = vsel %vm1271_vm9, %v1227_v41, %v1289_v44  ;;  %v411_v46 = vmax.f32 %v347_v30, %v379_v35  ;;  %v525_v52 = vrot.slane %v3086_v48, 6 }
  0x88   : > { %v412_v51 = vmax.f32 %v348_v33, %v380_v37  ;;  %v1321_v10 = vpack.c.b16 %v1290_v36, %v1290_v36  ;;  %v444_v29 = vsel %vm437_vm2, %v409_v32, -inf  ;;  %v872_v56 = vsel %vm598_vm3, %v531_v43, -inf }
  0x89   : > { %v447_v53 = vsel %vm437_vm2, %v410_v54, -inf  ;;  %v445_v57 = vsel %vm437_vm2, %v411_v46, -inf  ;;  %v873_v2 = vrot.slane %v872_v56, 4  ;;  %v3141_v60 = vsel %vm598_vm3, %v525_v52, -inf }
  0x8a   : > { %v448_v58 = vsel %vm437_vm2, %v412_v51, -inf  ;;  %v1373_v62 = vsel %vm2964_vm11, %v1321_v10, %v1372_v45  ;;  %v446_v0 = vmax.f32 %v444_v29, %v445_v57  ;;  %v817_v38 = vrot.slane %v3141_v60, 4 }
  0x8b   : > { %v449_v48 = vmax.f32 %v447_v53, %v448_v58  ;;  %1374 = vst [vmem:[#allocation2 + $0x20] sm:$0xf] %v1373_v62  ;;  %v3145_v55 = vmax.f32 %v872_v56, %v873_v2  ;;  %vm2012_vm15 = vcmask 785408   ;;  %vm2396_vm0 = vcmask 519168  }
  0x8c   : > { %v508_v63 = vrot.slane %v446_v0, 2  ;;  %v509_v3 = vrot.slane %v446_v0, 4  ;;  %v510_v20 = vrot.slane %v446_v0, 6  ;;  %v655_v9 = vsel %vm598_vm3, %v446_v0, -inf }
  0x8d   : > { %v511_v4 = vrot.slane %v449_v48, 2  ;;  %v512_v6 = vrot.slane %v449_v48, 4  ;;  %v513_v8 = vrot.slane %v449_v48, 6  ;;  %v683_v1 = vsel %vm598_vm3, %v449_v48, -inf }
  0x8e   : > { %v656_v42 = vrot.slane %v655_v9, 4  ;;  %v662_v11 = vsel %vm598_vm3, %v508_v63, -inf  ;;  %v669_v12 = vsel %vm598_vm3, %v509_v3, -inf  ;;  %v676_v13 = vsel %vm598_vm3, %v510_v20, -inf }
  0x8f   : > { %v663_v14 = vrot.slane %v662_v11, 4  ;;  %v670_v47 = vrot.slane %v669_v12, 4  ;;  %v677_v59 = vrot.slane %v676_v13, 4  ;;  %v684_v15 = vrot.slane %v683_v1, 4 }
  0x90   : > { %v657_v17 = vmax.f32 %v655_v9, %v656_v42  ;;  %v690_v18 = vsel %vm598_vm3, %v511_v4, -inf  ;;  %v697_v21 = vsel %vm598_vm3, %v512_v6, -inf  ;;  %v704_v22 = vsel %vm598_vm3, %v513_v8, -inf }
  0x91   : > { %v664_v23 = vmax.f32 %v662_v11, %v663_v14  ;;  %v671_v25 = vmax.f32 %v669_v12, %v670_v47  ;;  %v678_v26 = vmax.f32 %v676_v13, %v677_v59  ;;  %v685_v27 = vmax.f32 %v683_v1, %v684_v15  ;;  %v3161_v13 = vld [vmem:[#allocation2 + $0xc] sm:$0x1] }
  0x92   : > { %v1429_v28 = vld [vmem:[#allocation2 + $0x20] sm:$0xf]  ;;  %v658_v30 = vrot.slane %v657_v17, 2  ;;  %v691_v33 = vrot.slane %v690_v18, 4  ;;  %v698_v39 = vrot.slane %v697_v21, 4  ;;  %v705_v49 = vrot.slane %v704_v22, 4 }
  0x93   : > { %v3156_v34 = vunpack.c.l.b16 %v1429_v28  ;;  %v665_v5 = vrot.slane %v664_v23, 2  ;;  %v672_v41 = vrot.slane %v671_v25, 2  ;;  %v679_v50 = vrot.slane %v678_v26, 2 }
  0x94   : > { %v659_v35 = vmax.f32 %v657_v17, %v658_v30  ;;  %v686_v37 = vrot.slane %v685_v27, 2  ;;  %v692_v44 = vmax.f32 %v690_v18, %v691_v33  ;;  %v699_v32 = vmax.f32 %v697_v21, %v698_v39  ;;  %v1419_v17 = vld [vmem:[#allocation2 + $0x8] sm:$0xe]  ;;  %v1453_v18 = vld [vmem:[#allocation2 + $0x20] sm:$0xf] }
  0x95   : > { %v1654_v54 = vpack.c.b16 %v3156_v34, %v3156_v34  ;;  %v666_v43 = vmax.f32 %v664_v23, %v665_v5  ;;  %v673_v36 = vmax.f32 %v671_v25, %v672_v41  ;;  %v680_v45 = vmax.f32 %v678_v26, %v679_v50  ;;  %v2726_v41 = vld [vmem:[%s2838_s23 + $0x50] sm:$0xff]  }
  0x96   : > { %v660_v46 = vrot.slane %v659_v35, 1  ;;  %v687_v51 = vmax.f32 %v685_v27, %v686_v37  ;;  %v693_v52 = vrot.slane %v692_v44, 2  ;;  %v700_v10 = vrot.slane %v699_v32, 2 }
  0x97   : > { %1665 = vrot.lane.b32.xlu2 %v1654_v54, %s2781_s30  ;;  %v667_v29 = vrot.slane %v666_v43, 1  ;;  %v674_v53 = vrot.slane %v673_v36, 1  ;;  %v681_v56 = vrot.slane %v680_v45, 1  ;;  %v706_v57 = vmax.f32 %v704_v22, %v705_v49 }
  0x98   : > { %v661_v58 = vmax.f32 %v659_v35, %v660_v46  ;;  %v688_v2 = vrot.slane %v687_v51, 1  ;;  %v694_v62 = vmax.f32 %v692_v44, %v693_v52  ;;  %v701_v0 = vmax.f32 %v699_v32, %v700_v10 }
  0x99   : > { %v668_v48 = vmax.f32 %v666_v43, %v667_v29  ;;  %v675_v63 = vmax.f32 %v673_v36, %v674_v53  ;;  %v682_v3 = vmax.f32 %v680_v45, %v681_v56  ;;  %v707_v20 = vrot.slane %v706_v57, 2  ;;  %v2727_v36 = vld [vmem:[%s2838_s23 + $0x58] sm:$0xff]  }
  0x9a   : > { %v689_v4 = vmax.f32 %v687_v51, %v688_v2  ;;  %v695_v6 = vrot.slane %v694_v62, 1  ;;  %v702_v8 = vrot.slane %v701_v0, 1  ;;  %v1055_v9 = vpack.c.bf16 %v661_v58, %v661_v58  ;;  %v1360_v58 = vld [vmem:[#allocation2 + $0x10] sm:$0xf]  ;;  %v1363_v2 = vld [vmem:[#allocation2 + $0x14] sm:$0x1] }
  0x9b   : > { %v708_v1 = vmax.f32 %v706_v57, %v707_v20  ;;  %v1056_v42 = vpack.c.bf16 %v668_v48, %v668_v48  ;;  %v1057_v11 = vpack.c.bf16 %v675_v63, %v675_v63  ;;  %v1058_v12 = vpack.c.bf16 %v682_v3, %v682_v3 }
  0x9c   : > { %v696_v14 = vmax.f32 %v694_v62, %v695_v6  ;;  %v703_v47 = vmax.f32 %v701_v0, %v702_v8  ;;  %v1059_v59 = vpack.c.bf16 %v689_v4, %v689_v4  ;;  %v1205_v15 = vunpack.c.l.b16 %v1055_v9  ;;  %v3188_v6 = vld [vmem:[%s3840_s2] ss:$0 sm:$0xff] }
  0x9d   : > { %v709_v21 = vrot.slane %v708_v1, 1  ;;  %v1206_v22 = vunpack.c.l.b16 %v1056_v42  ;;  %v1207_v23 = vunpack.c.l.b16 %v1057_v11  ;;  %v1208_v25 = vunpack.c.l.b16 %v1058_v12  ;;  %v1421_v42 = vld [vmem:[#allocation2 + $0x18] sm:$0xe] }
  0x9e   : > { %v1060_v26 = vpack.c.bf16 %v696_v14, %v696_v14  ;;  %v1061_v27 = vpack.c.bf16 %v703_v47, %v703_v47  ;;  %v1209_v28 = vunpack.c.l.b16 %v1059_v59  ;;  %v1494_v30 = vunpack.c.l.b16 %v3161_v13 }
  0x9f   : > { %v710_v33 = vmax.f32 %v708_v1, %v709_v21  ;;  %v1273_v39 = vsel %vm1261_vm4, %v1206_v22, %v1205_v15  ;;  %v1596_v49 = vunpack.c.l.b16 %v1419_v17  ;;  %v3165_v5 = vunpack.c.l.b16 %v1453_v18  ;;  %v3196_v1 = vld [vmem:[#allocation2 + $0x1c] sm:$0x1] }
  0xa0   : > { %v1210_v50 = vunpack.c.l.b16 %v1060_v26  ;;  %v1211_v35 = vunpack.c.l.b16 %v1061_v27  ;;  %v1274_v37 = vsel %vm1263_vm5, %v1207_v23, %v1273_v39  ;;  %v875_v46 = vrot.slane %v3145_v55, 2 }
  0xa1   : > { %v1062_v44 = vpack.c.bf16 %v710_v33, %v710_v33  ;;  %v1275_v32 = vsel %vm1265_vm6, %v1208_v25, %v1274_v37  ;;  %v1604_v54 = vpack.c.b16 %v1494_v30, %v1596_v49  ;;  %v1821_v43 = vpack.c.b16 %v3165_v5, %v3165_v5  ;;  %v3205_v33 = vld [vmem:[#allocation2 + $0x28] sm:$0xe] }
  0xa2   : > { %v1276_v45 = vsel %vm1267_vm7, %v1209_v28, %v1275_v32  ;;  %v2695_v51 = vunpack.c.l.bf16 %v2726_v41  ;;  %v2696_v52 = vunpack.c.h.bf16 %v2726_v41  ;;  %v818_v56 = vmax.f32 %v3141_v60, %v817_v38  ;;  %v3207_v32 = vld [vmem:[#allocation2 + $0x20] sm:$0xe] }
  0xa3   : > { %v1212_v10 = vunpack.c.l.b16 %v1062_v44  ;;  %v1277_v29 = vsel %vm1269_vm8, %v1210_v50, %v1276_v45  ;;  %v1612_v53 = vrot.slane %v1604_v54, 1  ;;  %1831 = vrot.lane.b32.xlu2 %v1821_v43, %s2779_s28  ;;  %v876_v62 = vmax.f32 %v3145_v55, %v875_v46  ;;  %v1381_v50 = vld [vmem:[#allocation2 + $0x2c] sm:$0x1]  ;;  %v3209_v54 = vld [vmem:[#allocation2 + $0x28] sm:$0xe] }
  0xa4   : > { %v1278_v57 = vsel %vm1271_vm9, %v1211_v35, %v1277_v29  ;;  %v2699_v0 = vunpack.c.l.bf16 %v2727_v36  ;;  %v819_v3 = vrot.slane %v818_v56, 2  ;;  %v2700_v4 = vunpack.c.h.bf16 %v2727_v36 }
  0xa5   : > { %v1317_v48 = vpack.c.b16 %v1278_v57, %v1278_v57  ;;  %v1318_v63 = vpack.c.b16 %v1212_v10, %v1212_v10  ;;  %1621 = vrot.lane.b32.xlu0 %v1612_v53, %s2779_s28  ;;  %v877_v20 = vrot.slane %v876_v62, 1  ;;  %v325_v60 = vmul.f32 %v3188_v6, %v2695_v51 }
  0xa6   : > { %v820_v8 = vmax.f32 %v818_v56, %v819_v3  ;;  %v326_v9 = vmul.f32 %v3188_v6, %v2696_v52  ;;  %v327_v12 = vmul.f32 %v3188_v6, %v2699_v0  ;;  %v328_v14 = vmul.f32 %v3188_v6, %v2700_v4 }
  0xa7   : > { %v1361_v38 = vsel %vm2964_vm11, %v1317_v48, %v1360_v58  ;;  %v1364_v55 = vsel %vm3003_vm13, %v1318_v63, %v1363_v2  ;;  %v878_v11 = vmax.f32 %v876_v62, %v877_v20  ;;  %v361_v47 = vadd.f32 %v3119_v19, %v325_v60  ;;  %v1375_v62 = vld [vmem:[#allocation2 + $0x24] sm:$0x1] }
  0xa8   : > { %1362 = vst [vmem:[#allocation2 + $0x10] sm:$0xf] %v1361_v38  ;;  %v821_v59 = vrot.slane %v820_v8, 1  ;;  %v362_v15 = vadd.f32 %v3119_v19, %v326_v9  ;;  %v363_v18 = vadd.f32 %v3119_v19, %v327_v12  ;;  %v364_v21 = vadd.f32 %v3119_v19, %v328_v14 }
  0xa9   : > { %1365 = vst [vmem:[#allocation2 + $0x14] sm:$0x1] %v1364_v55  ;;  %v1086_v17 = vpack.c.bf16 %v878_v11, %v878_v11  ;;  %v393_v22 = vmul.f32 0.1, %v361_v47  ;;  %v1498_v23 = vunpack.c.l.b16 %v3196_v1  ;;  %v1598_v25 = vunpack.c.l.b16 %v1421_v42  ;;  %v1422_v1 = vld [vmem:[#allocation2 + $0x20] sm:$0xe] }
  0xaa   : > { %v822_v26 = vmax.f32 %v820_v8, %v821_v59  ;;  %v394_v27 = vmul.f32 0.1, %v362_v15  ;;  %v395_v39 = vmul.f32 0.1, %v363_v18  ;;  %v396_v49 = vmul.f32 0.1, %v364_v21 }
  0xab   : > { %v1236_v28 = vunpack.c.l.b16 %v1086_v17  ;;  %v425_v41 = vmax.f32 %v361_v47, %v393_v22  ;;  %v3214_v51 = vpack.c.b16 %v1498_v23, %v1598_v25  ;;  %v1600_v52 = vunpack.c.l.b16 %v3205_v33 }
  0xac   : > { %v1078_v35 = vpack.c.bf16 %v822_v26, %v822_v26  ;;  %v426_v37 = vmax.f32 %v362_v15, %v394_v27  ;;  %v427_v43 = vmax.f32 %v363_v18, %v395_v39  ;;  %v428_v36 = vmax.f32 %v364_v21, %v396_v49 }
  0xad   : > { %v1324_v44 = vpack.c.b16 %v1236_v28, %v1236_v28  ;;  %v468_v45 = vsel %vm437_vm2, %v425_v41, -inf  ;;  %v1766_v60 = vunpack.c.l.b16 %v3207_v32  ;;  %v1767_v38 = vunpack.c.l.b16 %v3209_v54 }
  0xae   : > { %v1228_v29 = vunpack.c.l.b16 %v1078_v35  ;;  %v471_v53 = vsel %vm437_vm2, %v426_v37, -inf  ;;  %v469_v0 = vsel %vm437_vm2, %v427_v43, -inf  ;;  %v472_v20 = vsel %vm437_vm2, %v428_v36, -inf }
  0xaf   : > { %v1420_v46 = vld [vmem:[#allocation2 + $0x10] sm:$0xe]  ;;  %v1382_v58 = vsel %vm3003_vm13, %v1324_v44, %v1381_v50  ;;  %v470_v3 = vmax.f32 %v468_v45, %v469_v0  ;;  %v3231_v55 = vmax.f32 %v471_v53, %v472_v20  ;;  %v1614_v41 = vrot.slane %v3214_v51, 1 }
  0xb0   : > { %v1427_v10 = vld [vmem:[#allocation2 + $0x10] sm:$0xf]  ;;  %v3218_v56 = vld [vmem:[#allocation2 + $0x14] sm:$0x1]  ;;  %v1597_v57 = vunpack.c.l.b16 %v1420_v46  ;;  %1383 = vst [vmem:[#allocation2 + $0x2c] sm:$0x1] %v1382_v58  ;;  %v1322_v63 = vpack.c.b16 %v1228_v29, %v1228_v29 }
  0xb1   : > { %v3222_v2 = vunpack.c.l.b16 %v1427_v10  ;;  %v1496_v48 = vunpack.c.l.b16 %v3218_v56  ;;  %v532_v42 = vrot.slane %v470_v3, 2  ;;  %v533_v11 = vrot.slane %v470_v3, 4 }
  0xb2   : > { %v1376_v9 = vsel %vm3003_vm13, %v1322_v63, %v1375_v62  ;;  %v534_v12 = vrot.slane %v470_v3, 6  ;;  %v535_v14 = vrot.slane %v3231_v55, 2  ;;  %v536_v47 = vrot.slane %v3231_v55, 4 }
  0xb3   : > { %3864 = vst [vmem:[#allocation3_spill] sm:$0xff] %v3222_v2  ;;  %v1652_v4 = vpack.c.b16 %v3222_v2, %v3222_v2  ;;  %v1605_v8 = vpack.c.b16 %v1496_v48, %v1597_v57  ;;  %v879_v59 = vsel %vm598_vm3, %v470_v3, -inf  ;;  %v886_v18 = vsel %vm598_vm3, %v532_v42, -inf }
  0xb4   : > { %1377 = vst [vmem:[#allocation2 + $0x24] sm:$0x1] %v1376_v9  ;;  %v880_v17 = vrot.slane %v879_v59, 4  ;;  %v893_v21 = vsel %vm598_vm3, %v533_v11, -inf  ;;  %v887_v22 = vrot.slane %v886_v18, 4  ;;  %v900_v26 = vsel %vm598_vm3, %v534_v12, -inf }
  0xb5   : > { %1661 = vrot.lane.b32.xlu2 %v1652_v4, %s2781_s30  ;;  %v1613_v15 = vrot.slane %v1605_v8, 1  ;;  %v894_v25 = vrot.slane %v893_v21, 4  ;;  %v907_v27 = vsel %vm598_vm3, %v3231_v55, -inf  ;;  %v901_v33 = vrot.slane %v900_v26, 4 }
  0xb6   : > { %v881_v28 = vmax.f32 %v879_v59, %v880_v17  ;;  %v908_v39 = vrot.slane %v907_v27, 4  ;;  %v914_v49 = vsel %vm598_vm3, %v535_v14, -inf  ;;  %v888_v37 = vmax.f32 %v886_v18, %v887_v22 }
  0xb7   : > { %1623 = vrot.lane.b32.xlu1 %v1613_v15, %s2779_s28  ;;  %v3249_v50 = vld [vmem:[#allocation2 + $0x2c] sm:$0x1]  ;;  %v895_v44 = vmax.f32 %v893_v21, %v894_v25  ;;  %v915_v32 = vrot.slane %v914_v49, 4  ;;  %v902_v45 = vmax.f32 %v900_v26, %v901_v33  ;;  %v921_v53 = vsel %vm598_vm3, %v536_v47, -inf }
  0xb8   : > { %v3251_v35 = vld [vmem:[#allocation2 + $0x2c] sm:$0x1]  ;;  %v1502_v54 = vunpack.c.l.b16 %v3249_v50  ;;  %v882_v36 = vrot.slane %v881_v28, 2  ;;  %v889_v46 = vrot.slane %v888_v37, 2  ;;  %v909_v29 = vmax.f32 %v907_v27, %v908_v39 }
  0xb9   : > { %v3846_v43 = vunpack.c.l.b16 %v3251_v35  ;;  %v896_v10 = vrot.slane %v895_v44, 2  ;;  %v916_v0 = vmax.f32 %v914_v49, %v915_v32  ;;  %v903_v4 = vrot.slane %v902_v45, 2 }
  0xba   : > { %v1608_v51 = vpack.c.b16 %v1502_v54, %v1600_v52  ;;  %v883_v62 = vmax.f32 %v881_v28, %v882_v36  ;;  %v890_v3 = vmax.f32 %v888_v37, %v889_v46  ;;  %v910_v11 = vrot.slane %v909_v29, 2  ;;  %v1404_v36 = vld [vmem:[#allocation2 + $0x10] sm:$0xf] }
  0xbb   : > { %v1437_v57 = vld [vmem:[#allocation2 + $0x24] sm:$0x1]  ;;  %v1775_v58 = vpack.c.b16 %v3846_v43, %v1767_v38  ;;  %v897_v20 = vmax.f32 %v895_v44, %v896_v10  ;;  %v904_v59 = vmax.f32 %v902_v45, %v903_v4  ;;  %v917_v17 = vrot.slane %v916_v0, 2 }
  0xbc   : > { %v1686_v63 = vunpack.c.l.b16 %v1437_v57  ;;  %v1616_v8 = vrot.slane %v1608_v51, 1  ;;  %v884_v42 = vrot.slane %v883_v62, 1  ;;  %v891_v47 = vrot.slane %v890_v3, 1  ;;  %v2728_v45 = vld [vmem:[%s2838_s23 + $0x60] sm:$0xff]  }
  0xbd   : > { %v1783_v9 = vrot.slane %v1775_v58, 1  ;;  %v898_v52 = vrot.slane %v897_v20, 1  ;;  %v911_v15 = vmax.f32 %v909_v29, %v910_v11  ;;  %v922_v25 = vrot.slane %v921_v53, 4 }
  0xbe   : > { %v3261_v12 = vpack.c.b16 %v1686_v63, %v3156_v34  ;;  %v1774_v14 = vpack.c.b16 %v1686_v63, %v1766_v60  ;;  %1629 = vrot.lane.b32.xlu0 %v1616_v8, %s2779_s28  ;;  %v885_v38 = vmax.f32 %v883_v62, %v884_v42  ;;  %v892_v21 = vmax.f32 %v890_v3, %v891_v47  ;;  %v3269_v3 = vld [vmem:[#allocation2 + $0x24] sm:$0x1]  ;;  %v2729_v47 = vld [vmem:[%s2838_s23 + $0x68] sm:$0xff]  }
  0xbf   : > { %1625 = vrot.lane.b32.xlu1 %v1614_v41, %s2779_s28  ;;  %v899_v22 = vmax.f32 %v897_v20, %v898_v52  ;;  %v905_v26 = vrot.slane %v904_v59, 1  ;;  %v912_v27 = vrot.slane %v911_v15, 1  ;;  %v918_v34 = vmax.f32 %v916_v0, %v917_v17  ;;  %v1405_v20 = vld [vmem:[#allocation2 + $0x18] sm:$0xf] }
  0xc0   : > { %v1782_v18 = vrot.slane %v1774_v14, 1  ;;  %v1087_v28 = vpack.c.bf16 %v885_v38, %v885_v38  ;;  %v923_v60 = vmax.f32 %v921_v53, %v922_v25  ;;  %v1088_v33 = vpack.c.bf16 %v892_v21, %v892_v21 }
  0xc1   : > { %v1089_v39 = vpack.c.bf16 %v899_v22, %v899_v22  ;;  %v537_v49 = vrot.slane %v3231_v55, 6  ;;  %v906_v41 = vmax.f32 %v904_v59, %v905_v26  ;;  %v913_v37 = vmax.f32 %v911_v15, %v912_v27 }
  0xc2   : > { %v919_v44 = vrot.slane %v918_v34, 1  ;;  %v1237_v32 = vunpack.c.l.b16 %v1087_v28  ;;  %v924_v46 = vrot.slane %v923_v60, 2  ;;  %v1238_v10 = vunpack.c.l.b16 %v1088_v33  ;;  %v1414_v28 = vld [vmem:[#allocation2 + $0x24] sm:$0x1] }
  0xc3   : > { %v1239_v29 = vunpack.c.l.b16 %v1089_v39  ;;  %v928_v51 = vsel %vm598_vm3, %v537_v49, -inf  ;;  %v1090_v58 = vpack.c.bf16 %v906_v41, %v906_v41  ;;  %v1091_v62 = vpack.c.bf16 %v913_v37, %v913_v37  ;;  %v1406_v49 = vld [vmem:[#allocation2 + $0x20] sm:$0xf] }
  0xc4   : > { %v920_v57 = vmax.f32 %v918_v34, %v919_v44  ;;  %v929_v53 = vrot.slane %v928_v51, 4  ;;  %v925_v0 = vmax.f32 %v923_v60, %v924_v46  ;;  %v1297_v63 = vsel %vm1261_vm4, %v1238_v10, %v1237_v32 }
  0xc5   : > { %v1495_v55 = vunpack.c.l.b16 %v1404_v36  ;;  %v2703_v4 = vunpack.c.l.bf16 %v2728_v45  ;;  %v1240_v42 = vunpack.c.l.b16 %v1090_v58  ;;  %v1241_v11 = vunpack.c.l.b16 %v1091_v62 }
  0xc6   : > { %1795 = vrot.lane.b32.xlu0 %v1783_v9, %s2780_s29  ;;  %v1092_v8 = vpack.c.bf16 %v920_v57, %v920_v57  ;;  %v1298_v14 = vsel %vm1263_vm5, %v1239_v29, %v1297_v63  ;;  %v926_v52 = vrot.slane %v925_v0, 1  ;;  %v930_v38 = vmax.f32 %v928_v51, %v929_v53  ;;  %v1403_v51 = vld [vmem:[#allocation2 + $0x8] sm:$0xf] }
  0xc7   : > { %1793 = vrot.lane.b32.xlu1 %v1782_v18, %s2780_s29  ;;  %v1509_v59 = vpack.c.b16 %v1496_v48, %v1495_v55  ;;  %v1299_v17 = vsel %vm1265_vm6, %v1240_v42, %v1298_v14  ;;  %v3849_v21 = vunpack.c.l.b16 %v3269_v3  ;;  %v1497_v22 = vunpack.c.l.b16 %v1405_v20 }
  0xc8   : > { %v1242_v15 = vunpack.c.l.b16 %v1092_v8  ;;  %v927_v18 = vmax.f32 %v925_v0, %v926_v52  ;;  %v1300_v9 = vsel %vm1267_vm7, %v1241_v11, %v1299_v17  ;;  %v931_v25 = vrot.slane %v930_v38, 2  ;;  %v1384_v0 = vld [vmem:[#allocation2 + $0x30] sm:$0xf]  ;;  %v1387_v17 = vld [vmem:[#allocation2 + $0x34] sm:$0x1] }
  0xc9   : > { %v2707_v26 = vunpack.c.l.bf16 %v2729_v47  ;;  %v1530_v27 = vshrl.u32 %v1509_v59, 16  ;;  %v1532_v34 = vshll.u32 %v1509_v59, 16  ;;  %v2704_v60 = vunpack.c.h.bf16 %v2728_v45 }
  0xca   : > { %v329_v33 = vmul.f32 %v3188_v6, %v2703_v4  ;;  %v1093_v39 = vpack.c.bf16 %v927_v18, %v927_v18  ;;  %v932_v56 = vmax.f32 %v930_v38, %v931_v25  ;;  %v1510_v48 = vpack.c.b16 %v1498_v23, %v1497_v22  ;;  %v3304_v25 = vld [vmem:[#allocation2 + $0x2c] sm:$0x1] }
  0xcb   : > { %v2708_v41 = vunpack.c.h.bf16 %v2729_v47  ;;  %v1301_v37 = vsel %vm1269_vm8, %v1242_v15, %v1300_v9  ;;  %v1534_v44 = vrot.slane %v1532_v34, 1  ;;  %v3287_v32 = vpack.c.b16 %v3849_v21, %v3165_v5 }
  0xcc   : > { %v1499_v36 = vunpack.c.l.b16 %v1406_v49  ;;  %v1243_v46 = vunpack.c.l.b16 %v1093_v39  ;;  %v933_v45 = vrot.slane %v932_v56, 1  ;;  %v1539_v10 = vshll.u32 %v1510_v48, 16 }
  0xcd   : > { %v1500_v29 = vunpack.c.l.b16 %v1414_v28  ;;  %v1535_v57 = vor.u32 %v1534_v44, %v1530_v27  ;;  %v1537_v58 = vshrl.u32 %v1510_v48, 16  ;;  %v330_v23 = vmul.f32 %v3188_v6, %v2704_v60 }
  0xce   : > { %v331_v62 = vmul.f32 %v3188_v6, %v2707_v26  ;;  %v1302_v53 = vsel %vm1271_vm9, %v1243_v46, %v1301_v37  ;;  %v934_v63 = vmax.f32 %v932_v56, %v933_v45  ;;  %v1541_v55 = vrot.slane %v1539_v10, 1 }
  0xcf   : > { %v1511_v5 = vpack.c.b16 %v1500_v29, %v1499_v36  ;;  %v1325_v20 = vpack.c.b16 %v1302_v53, %v1302_v53  ;;  %1575 = vrot.lane.b32.xlu0 %v1535_v57, %s2780_s29  ;;  %v1493_v4 = vunpack.c.l.b16 %v1403_v51  ;;  %v332_v8 = vmul.f32 %v3188_v6, %v2708_v41 }
  0xd0   : > { %v365_v42 = vadd.f32 %v3119_v19, %v329_v33  ;;  %v1094_v11 = vpack.c.bf16 %v934_v63, %v934_v63  ;;  %v1884_v14 = vshll.u32 %v3287_v32, 16  ;;  %v1599_v47 = vunpack.c.l.b16 %v1422_v1 }
  0xd1   : > { %v1385_v52 = vsel %vm2964_vm11, %v1325_v20, %v1384_v0  ;;  %v366_v38 = vadd.f32 %v3119_v19, %v330_v23  ;;  %v367_v59 = vadd.f32 %v3119_v19, %v331_v62  ;;  %v1542_v22 = vor.u32 %v1541_v55, %v1537_v58 }
  0xd2   : > { %1386 = vst [vmem:[#allocation2 + $0x30] sm:$0xf] %v1385_v52  ;;  %v1244_v15 = vunpack.c.l.b16 %v1094_v11  ;;  %v1546_v18 = vshll.u32 %v1511_v5, 16  ;;  %v3302_v9 = vpack.c.b16 %v1494_v30, %v1493_v4  ;;  %v368_v26 = vadd.f32 %v3119_v19, %v332_v8 }
  0xd3   : > { %v397_v27 = vmul.f32 0.1, %v365_v42  ;;  %v398_v34 = vmul.f32 0.1, %v366_v38  ;;  %v1882_v60 = vshrl.u32 %v3287_v32, 16  ;;  %v1886_v33 = vrot.slane %v1884_v14, 1 }
  0xd4   : > { %v1326_v28 = vpack.c.b16 %v1244_v15, %v1244_v15  ;;  %v3308_v39 = vpack.c.b16 %v1500_v29, %v1599_v47  ;;  %v399_v56 = vmul.f32 0.1, %v367_v59  ;;  %v400_v48 = vmul.f32 0.1, %v368_v26 }
  0xd5   : > { %v429_v49 = vmax.f32 %v365_v42, %v397_v27  ;;  %v430_v41 = vmax.f32 %v366_v38, %v398_v34  ;;  %v1544_v30 = vshrl.u32 %v1511_v5, 16  ;;  %v3848_v37 = vunpack.c.l.b16 %v3304_v25 }
  0xd6   : > { %v1388_v13 = vsel %vm3003_vm13, %v1326_v28, %v1387_v17  ;;  %v1548_v19 = vrot.slane %v1546_v18, 1  ;;  %v1525_v44 = vshll.u32 %v3302_v9, 16  ;;  %v431_v32 = vmax.f32 %v367_v59, %v399_v56 }
  0xd7   : > { %1389 = vst [vmem:[#allocation2 + $0x34] sm:$0x1] %v1388_v13  ;;  %1577 = vrot.lane.b32.xlu0 %v1542_v22, %s2780_s29  ;;  %v432_v36 = vmax.f32 %v368_v26, %v400_v48  ;;  %v1615_v46 = vrot.slane %v3308_v39, 1  ;;  %v1523_v45 = vshrl.u32 %v3302_v9, 16  ;;  %v474_v10 = vsel %vm437_vm2, %v429_v49, -inf }
  0xd8   : > { %v477_v29 = vsel %vm437_vm2, %v430_v41, -inf  ;;  %v3319_v1 = vor.u32 %v1886_v33, %v1882_v60  ;;  %v3326_v53 = vpack.c.b16 %v3848_v37, %v2974_v31  ;;  %v475_v0 = vsel %vm437_vm2, %v431_v32, -inf }
  0xd9   : > { %v1431_v51 = vld [vmem:[#allocation2 + $0x30] sm:$0xf]  ;;  %v1549_v63 = vor.u32 %v1548_v19, %v1544_v30  ;;  %v3329_v55 = vrot.slane %v1525_v44, 1  ;;  %v476_v5 = vmax.f32 %v474_v10, %v475_v0  ;;  %v478_v20 = vsel %vm437_vm2, %v432_v36, -inf  ;;  %v3349_v36 = vld [vmem:[#allocation2 + $0x28] sm:$0xf] }
  0xda   : > { %v1447_v57 = vld [vmem:[#allocation2 + $0x30] sm:$0xe]  ;;  %v1648_v23 = vunpack.c.l.b16 %v1431_v51  ;;  %v3334_v11 = vmax.f32 %v477_v29, %v478_v20  ;;  %vm2455_vm1 = vcmask 1040384  }
  0xdb   : > { %v1455_v58 = vld [vmem:[#allocation2 + $0x30] sm:$0xf]  ;;  %v1768_v8 = vunpack.c.l.b16 %v1447_v57  ;;  %v538_v14 = vrot.slane %v476_v5, 2  ;;  %v539_v47 = vrot.slane %v476_v5, 4  ;;  %v540_v52 = vrot.slane %v476_v5, 6 }
  0xdc   : > { %v3321_v62 = vunpack.c.l.b16 %v1455_v58  ;;  %v1656_v4 = vpack.c.b16 %v1648_v23, %v1648_v23  ;;  %v935_v31 = vsel %vm598_vm3, %v476_v5, -inf  ;;  %v541_v59 = vrot.slane %v3334_v11, 2 }
  0xdd   : > { %v542_v15 = vrot.slane %v3334_v11, 4  ;;  %v936_v17 = vrot.slane %v935_v31, 4  ;;  %v963_v22 = vsel %vm598_vm3, %v3334_v11, -inf  ;;  %v942_v26 = vsel %vm598_vm3, %v538_v14, -inf }
  0xde   : > { %v1823_v42 = vpack.c.b16 %v3321_v62, %v3321_v62  ;;  %1669 = vrot.lane.b32.xlu2 %v1656_v4, %s2781_s30  ;;  %v1439_v38 = vld [vmem:[#allocation2 + $0x34] sm:$0x1]  ;;  %v949_v27 = vsel %vm598_vm3, %v539_v47, -inf  ;;  %v956_v34 = vsel %vm598_vm3, %v540_v52, -inf  ;;  %v943_v60 = vrot.slane %v942_v26, 4 }
  0xdf   : > { %v1688_v18 = vunpack.c.l.b16 %v1439_v38  ;;  %1579 = vrot.lane.b32.xlu0 %v1549_v63, %s2780_s29  ;;  %v937_v28 = vmax.f32 %v935_v31, %v936_v17  ;;  %v950_v33 = vrot.slane %v949_v27, 4  ;;  %v957_v56 = vrot.slane %v956_v34, 4 }
  0xe0   : > { %v964_v41 = vrot.slane %v963_v22, 4  ;;  %v970_v13 = vsel %vm598_vm3, %v541_v59, -inf  ;;  %v944_v19 = vmax.f32 %v942_v26, %v943_v60  ;;  %v977_v57 = vsel %vm598_vm3, %v542_v15, -inf }
  0xe1   : > { %v3346_v48 = vpack.c.b16 %v1688_v18, %v1648_v23  ;;  %v1776_v49 = vpack.c.b16 %v1688_v18, %v1768_v8  ;;  %v938_v30 = vrot.slane %v937_v28, 2  ;;  %v951_v44 = vmax.f32 %v949_v27, %v950_v33 }
  0xe2   : > { %v958_v32 = vmax.f32 %v956_v34, %v957_v56  ;;  %v965_v29 = vmax.f32 %v963_v22, %v964_v41  ;;  %v971_v51 = vrot.slane %v970_v13, 4  ;;  %v945_v0 = vrot.slane %v944_v19, 2 }
  0xe3   : > { %v1784_v10 = vrot.slane %v1776_v49, 1  ;;  %v939_v58 = vmax.f32 %v937_v28, %v938_v30  ;;  %v952_v63 = vrot.slane %v951_v44, 2  ;;  %v978_v4 = vrot.slane %v977_v57, 4 }
  0xe4   : > { %v959_v23 = vrot.slane %v958_v32, 2  ;;  %v966_v5 = vrot.slane %v965_v29, 2  ;;  %v972_v20 = vmax.f32 %v970_v13, %v971_v51  ;;  %v1501_v8 = vunpack.c.l.b16 %v3349_v36 }
  0xe5   : > { %1797 = vrot.lane.b32.xlu1 %v1784_v10, %s2780_s29  ;;  %v940_v14 = vrot.slane %v939_v58, 1  ;;  %v946_v47 = vmax.f32 %v944_v19, %v945_v0  ;;  %v953_v52 = vmax.f32 %v951_v44, %v952_v63  ;;  %v1891_v38 = vshll.u32 %v3326_v53, 16 }
  0xe6   : > { %1835 = vrot.lane.b32.xlu2 %v1823_v42, %s2779_s28  ;;  %v960_v31 = vmax.f32 %v958_v32, %v959_v23  ;;  %v967_v59 = vmax.f32 %v965_v29, %v966_v5  ;;  %v973_v15 = vrot.slane %v972_v20, 2  ;;  %v979_v17 = vmax.f32 %v977_v57, %v978_v4  ;;  %v3359_v57 = vld [vmem:[#allocation2 + $0x34] sm:$0x1] }
  0xe7   : > { %v941_v22 = vmax.f32 %v939_v58, %v940_v14  ;;  %v947_v18 = vrot.slane %v946_v47, 1  ;;  %v954_v26 = vrot.slane %v953_v52, 1  ;;  %v1512_v33 = vpack.c.b16 %v1502_v54, %v1501_v8 }
  0xe8   : > { %v961_v27 = vrot.slane %v960_v31, 1  ;;  %v968_v34 = vrot.slane %v967_v59, 1  ;;  %v974_v28 = vmax.f32 %v972_v20, %v973_v15  ;;  %v980_v60 = vrot.slane %v979_v17, 2 }
  0xe9   : > { %v948_v42 = vmax.f32 %v946_v47, %v947_v18  ;;  %v955_v56 = vmax.f32 %v953_v52, %v954_v26  ;;  %v1095_v41 = vpack.c.bf16 %v941_v22, %v941_v22  ;;  %v1889_v13 = vshrl.u32 %v3326_v53, 16  ;;  %v3373_v22 = vld [vmem:[#allocation2 + $0x14] sm:$0x1]  ;;  %v3375_v18 = vld [vmem:[#allocation2 + $0xc] sm:$0x1] }
  0xea   : > { %v962_v49 = vmax.f32 %v960_v31, %v961_v27  ;;  %v969_v30 = vmax.f32 %v967_v59, %v968_v34  ;;  %v975_v19 = vrot.slane %v974_v28, 1  ;;  %v981_v44 = vmax.f32 %v979_v17, %v980_v60  ;;  %v1451_v17 = vld [vmem:[#allocation2 + $0x10] sm:$0xf]  ;;  %v3382_v34 = vld [vmem:[#allocation2 + $0x14] sm:$0x1] }
  0xeb   : > { %v1096_v32 = vpack.c.bf16 %v948_v42, %v948_v42  ;;  %v1097_v10 = vpack.c.bf16 %v955_v56, %v955_v56  ;;  %v1245_v51 = vunpack.c.l.b16 %v1095_v41  ;;  %v1893_v50 = vrot.slane %v1891_v38, 1  ;;  %3865 = vst [vmem:[#allocation4_spill] sm:$0xff] %v3382_v34  ;;  %v2731_v41 = vld [vmem:[%s2838_s23 + $0x78] sm:$0xff]  }
  0xec   : > { %v1098_v29 = vpack.c.bf16 %v962_v49, %v962_v49  ;;  %v976_v54 = vmax.f32 %v974_v28, %v975_v19  ;;  %v982_v58 = vrot.slane %v981_v44, 1  ;;  %v1099_v0 = vpack.c.bf16 %v969_v30, %v969_v30  ;;  %v2730_v28 = vld [vmem:[%s2838_s23 + $0x70] sm:$0xff]  }
  0xed   : > { %1927 = vrot.lane.b32.xlu1 %v3319_v1, %s2781_s30  ;;  %v1246_v53 = vunpack.c.l.b16 %v1096_v32  ;;  %v1247_v63 = vunpack.c.l.b16 %v1097_v10  ;;  %v1553_v5 = vshll.u32 %v1512_v33, 16  ;;  %v3847_v14 = vunpack.c.l.b16 %v3359_v57  ;;  %v3396_v32 = vld [vmem:[#allocation2 + $0x34] sm:$0x1] }
  0xee   : > { %1627 = vrot.lane.b32.xlu2 %v1615_v46, %s2779_s28  ;;  %v1248_v23 = vunpack.c.l.b16 %v1098_v29  ;;  %v983_v20 = vmax.f32 %v981_v44, %v982_v58  ;;  %v1100_v4 = vpack.c.bf16 %v976_v54, %v976_v54  ;;  %v1249_v8 = vunpack.c.l.b16 %v1099_v0  ;;  %v3394_v44 = vld [vmem:[#allocation2 + $0x30] sm:$0xf] }
  0xef   : > { %v1303_v47 = vsel %vm1261_vm4, %v1246_v53, %v1245_v51  ;;  %v1528_v1 = vor.u32 %v3329_v55, %v1523_v45  ;;  %v1894_v46 = vor.u32 %v1893_v50, %v1889_v13  ;;  %v1551_v59 = vshrl.u32 %v1512_v33, 16  ;;  %v1442_v55 = vld [vmem:[#allocation2 + $0x8] sm:$0xe]  ;;  %v1390_v33 = vld [vmem:[#allocation2 + $0x38] sm:$0xf]  ;;  %3866 = vst [vmem:[#allocation5_spill] sm:$0xff] %v3394_v44 }
  0xf0   : > { %v1101_v52 = vpack.c.bf16 %v983_v20, %v983_v20  ;;  %v1250_v31 = vunpack.c.l.b16 %v1100_v4  ;;  %v1304_v39 = vsel %vm1263_vm5, %v1247_v63, %v1303_v47  ;;  %v1555_v15 = vrot.slane %v1553_v5, 1  ;;  %v1443_v54 = vld [vmem:[#allocation2 + $0x10] sm:$0xe] }
  0xf1   : > { %v1305_v38 = vsel %vm1265_vm6, %v1248_v23, %v1304_v39  ;;  %v1863_v45 = vpack.c.b16 %v3847_v14, %v3321_v62  ;;  %v3387_v42 = vunpack.c.l.b16 %v1451_v17  ;;  %v3851_v56 = vunpack.c.l.b16 %v3373_v22 }
  0xf2   : > { %v1251_v26 = vunpack.c.l.b16 %v1101_v52  ;;  %v1306_v9 = vsel %vm1267_vm7, %v1249_v8, %v1305_v38  ;;  %v543_v49 = vrot.slane %v3334_v11, 6  ;;  %v3845_v62 = vunpack.c.l.b16 %v3375_v18  ;;  %v1452_v38 = vld [vmem:[#allocation2 + $0x18] sm:$0xf] }
  0xf3   : > { %v1307_v27 = vsel %vm1269_vm8, %v1250_v31, %v1306_v9  ;;  %v1556_v30 = vor.u32 %v1555_v15, %v1551_v59  ;;  %v1763_v19 = vunpack.c.l.b16 %v1442_v55  ;;  %v1898_v10 = vshll.u32 %v1863_v45, 16  ;;  %v2764_v15 = vld [vmem:[%s3841_s3] ss:$0 sm:$0xff] }
  0xf4   : > { %v1308_v60 = vsel %vm1271_vm9, %v1251_v26, %v1307_v27  ;;  %v3844_v29 = vunpack.c.l.b16 %v3382_v34  ;;  %v984_v51 = vsel %vm598_vm3, %v543_v49, -inf  ;;  %v2711_v50 = vunpack.c.l.bf16 %v2730_v28 }
  0xf5   : > { %1573 = vrot.lane.b32.xlu1 %v1528_v1, %s2780_s29  ;;  %v1327_v13 = vpack.c.b16 %v1308_v60, %v1308_v60  ;;  %v985_v58 = vrot.slane %v984_v51, 4  ;;  %v2712_v0 = vunpack.c.h.bf16 %v2730_v28  ;;  %v2715_v53 = vunpack.c.l.bf16 %v2731_v41 }
  0xf6   : > { %1929 = vrot.lane.b32.xlu2 %v1894_v46, %s2781_s30  ;;  %v1859_v63 = vpack.c.b16 %v3851_v56, %v3387_v42  ;;  %v1503_v23 = vunpack.c.l.b16 %v3394_v44  ;;  %v3853_v5 = vunpack.c.l.b16 %v3396_v32  ;;  %v2716_v20 = vunpack.c.h.bf16 %v2731_v41 }
  0xf7   : > { %v1391_v11 = vsel %vm2964_vm11, %v1327_v13, %v1390_v33  ;;  %v986_v4 = vmax.f32 %v984_v51, %v985_v58  ;;  %v333_v8 = vmul.f32 %v3188_v6, %v2711_v50  ;;  %v334_v47 = vmul.f32 %v3188_v6, %v2712_v0 }
  0xf8   : > { %1392 = vst [vmem:[#allocation2 + $0x38] sm:$0xf] %v1391_v11  ;;  %v335_v1 = vmul.f32 %v3188_v6, %v2715_v53  ;;  %v1896_v52 = vshrl.u32 %v1863_v45, 16  ;;  %v1900_v31 = vrot.slane %v1898_v10, 1  ;;  %v1764_v39 = vunpack.c.l.b16 %v1443_v54 }
  0xf9   : > { %v336_v46 = vmul.f32 %v3188_v6, %v2716_v20  ;;  %v987_v59 = vrot.slane %v986_v4, 2  ;;  %v369_v17 = vadd.f32 %v2764_v15, %v333_v8  ;;  %v370_v26 = vadd.f32 %v2764_v15, %v334_v47 }
  0xfa   : > { %v371_v9 = vadd.f32 %v2764_v15, %v335_v1  ;;  %v3417_v55 = vpack.c.b16 %v3845_v62, %v1763_v19  ;;  %v1870_v45 = vshll.u32 %v1859_v63, 16  ;;  %v1513_v27 = vpack.c.b16 %v3853_v5, %v1503_v23 }
  0xfb   : > { %v372_v6 = vadd.f32 %v2764_v15, %v336_v46  ;;  %v988_v28 = vmax.f32 %v986_v4, %v987_v59  ;;  %v401_v60 = vmul.f32 0.1, %v369_v17  ;;  %v402_v33 = vmul.f32 0.1, %v370_v26 }
  0xfc   : > { %v403_v49 = vmul.f32 0.1, %v371_v9  ;;  %v1901_v41 = vor.u32 %v1900_v31, %v1896_v52  ;;  %v1772_v13 = vpack.c.b16 %v3844_v29, %v1764_v39  ;;  %v3423_v10 = vunpack.c.l.b16 %v1452_v38 }
  0xfd   : > { %1581 = vrot.lane.b32.xlu1 %v1556_v30, %s2780_s29  ;;  %v404_v30 = vmul.f32 0.1, %v372_v6  ;;  %v989_v50 = vrot.slane %v988_v28, 1  ;;  %v433_v19 = vmax.f32 %v369_v17, %v401_v60  ;;  %v434_v11 = vmax.f32 %v370_v26, %v402_v33  ;;  %v1393_v33 = vld [vmem:[#allocation2 + $0x3c] sm:$0x1] }
  0xfe   : > { %v435_v54 = vmax.f32 %v371_v9, %v403_v49  ;;  %v1868_v0 = vshrl.u32 %v1859_v63, 16  ;;  %v1560_v53 = vshll.u32 %v1513_v27, 16  ;;  %v1872_v20 = vrot.slane %v1870_v45, 1 }
  0xff   : > { %v1456_v51 = vld [vmem:[#allocation2 + $0x38] sm:$0xf]  ;;  %v436_v23 = vmax.f32 %v372_v6, %v404_v30  ;;  %v990_v4 = vmax.f32 %v988_v28, %v989_v50  ;;  %v480_v8 = vsel %vm437_vm2, %v433_v19, -inf  ;;  %v483_v31 = vsel %vm437_vm2, %v434_v11, -inf }
 0x100   : > { %v3425_v58 = vunpack.c.l.b16 %v1456_v51  ;;  %v481_v47 = vsel %vm437_vm2, %v435_v54, -inf  ;;  %v1558_v63 = vshrl.u32 %v1513_v27, 16  ;;  %v1562_v59 = vrot.slane %v1560_v53, 1  ;;  %v3442_v30 = vld [vmem:[#allocation2 + $0x38] sm:$0xf] }
 0x101   : > { %v482_v52 = vmax.f32 %v480_v8, %v481_v47  ;;  %v484_v39 = vsel %vm437_vm2, %v436_v23, -inf  ;;  %v1102_v46 = vpack.c.bf16 %v990_v4, %v990_v4  ;;  %v1779_v45 = vrot.slane %v3417_v55, 1  ;;  %3867 = vst [vmem:[#allocation6_spill] sm:$0xff] %v3442_v30  ;;  %v3452_v54 = vld [vmem:[#allocation2 + $0x38] sm:$0xe] }
 0x102   : > { %v1824_v1 = vpack.c.b16 %v3425_v58, %v3425_v58  ;;  %v3433_v38 = vmax.f32 %v483_v31, %v484_v39  ;;  %v1780_v6 = vrot.slane %v1772_v13, 1  ;;  %v1820_v28 = vpack.c.b16 %v3423_v10, %v3423_v10  ;;  %v3460_v8 = vld [vmem:[#allocation2 + $0x1c] sm:$0x1] }
 0x103   : > { %v544_v15 = vrot.slane %v482_v52, 2  ;;  %v545_v17 = vrot.slane %v482_v52, 4  ;;  %v1252_v26 = vunpack.c.l.b16 %v1102_v46  ;;  %v546_v9 = vrot.slane %v482_v52, 6 }
 0x104   : > { %1837 = vrot.lane.b32.xlu0 %v1824_v1, %s2779_s28  ;;  %v3440_v60 = vor.u32 %v1872_v20, %v1868_v0  ;;  %v991_v27 = vsel %vm598_vm3, %v482_v52, -inf  ;;  %v3447_v50 = vor.u32 %v1562_v59, %v1558_v63  ;;  %v1019_v23 = vsel %vm598_vm3, %v3433_v38, -inf  ;;  %v3457_v20 = vpop.permute.xlu2 %1619 }
 0x105   : > { %1931 = vrot.lane.b32.xlu1 %v1901_v41, %s2781_s30  ;;  %v1328_v49 = vpack.c.b16 %v1252_v26, %v1252_v26  ;;  %v547_v41 = vrot.slane %v3433_v38, 2  ;;  %v998_v51 = vsel %vm598_vm3, %v544_v15, -inf  ;;  %v992_v19 = vrot.slane %v991_v27, 4 }
 0x106   : > { %v999_v55 = vrot.slane %v998_v51, 4  ;;  %v1005_v13 = vsel %vm598_vm3, %v545_v17, -inf  ;;  %v1012_v53 = vsel %vm598_vm3, %v546_v9, -inf  ;;  %v1505_v4 = vunpack.c.l.b16 %v3442_v30 }
 0x107   : > { %v1394_v11 = vsel %vm3003_vm13, %v1328_v49, %v1393_v33  ;;  %v1006_v0 = vrot.slane %v1005_v13, 4  ;;  %v548_v47 = vrot.slane %v3433_v38, 4  ;;  %v993_v1 = vmax.f32 %v991_v27, %v992_v19 }
 0x108   : > { %1395 = vst [vmem:[#allocation2 + $0x3c] sm:$0x1] %v1394_v11  ;;  %v1000_v52 = vmax.f32 %v998_v51, %v999_v55  ;;  %v1013_v39 = vrot.slane %v1012_v53, 4  ;;  %v1020_v46 = vrot.slane %v1019_v23, 4  ;;  %v1026_v63 = vsel %vm598_vm3, %v547_v41, -inf  ;;  %v3469_v11 = vpop.permute.xlu0 %1571 }
 0x109   : > { %v1007_v31 = vmax.f32 %v1005_v13, %v1006_v0  ;;  %v1602_v59 = vunpack.c.l.b16 %v3452_v54  ;;  %v994_v15 = vrot.slane %v993_v1, 2  ;;  %v1027_v26 = vrot.slane %v1026_v63, 4  ;;  %v1432_v51 = vld [vmem:[#allocation2 + $0x38] sm:$0xf] }
 0x10a   : > { %v1001_v17 = vrot.slane %v1000_v52, 2  ;;  %v3850_v9 = vunpack.c.l.b16 %v3460_v8  ;;  %v1014_v49 = vmax.f32 %v1012_v53, %v1013_v39  ;;  %v1021_v27 = vmax.f32 %v1019_v23, %v1020_v46 }
 0x10b   : > { %v1008_v33 = vrot.slane %v1007_v31, 2  ;;  %v995_v19 = vmax.f32 %v993_v1, %v994_v15  ;;  %v1028_v13 = vmax.f32 %v1026_v63, %v1027_v26  ;;  %v1033_v41 = vsel %vm598_vm3, %v548_v47, -inf }
 0x10c   : > { %1787 = vrot.lane.b32.xlu0 %v1779_v45, %s2780_s29  ;;  %v1002_v55 = vmax.f32 %v1000_v52, %v1001_v17  ;;  %v1022_v0 = vrot.slane %v1021_v27, 2  ;;  %v1034_v54 = vrot.slane %v1033_v41, 4  ;;  %v549_v62 = vrot.slane %v3433_v38, 6 }
 0x10d   : > { %1789 = vrot.lane.b32.xlu1 %v1780_v6, %s2780_s29  ;;  %v1009_v45 = vmax.f32 %v1007_v31, %v1008_v33  ;;  %v1015_v6 = vrot.slane %v1014_v49, 2  ;;  %v996_v43 = vrot.slane %v995_v19, 1  ;;  %v3476_v52 = vunpack.c.l.b16 %v1432_v51 }
 0x10e   : > { %v1003_v53 = vrot.slane %v1002_v55, 1  ;;  %v1023_v46 = vmax.f32 %v1021_v27, %v1022_v0  ;;  %v1035_v31 = vmax.f32 %v1033_v41, %v1034_v54  ;;  %v3484_v17 = vpack.c.b16 %v3850_v9, %v3423_v10  ;;  %v3496_v27 = vpop.permute.xlu2 %1663 }
 0x10f   : > { %v3474_v23 = vld [vmem:[#allocation2 + $0x3c] sm:$0x1]  ;;  %v1016_v47 = vmax.f32 %v1014_v49, %v1015_v6  ;;  %v1029_v38 = vrot.slane %v1028_v13, 2  ;;  %v1010_v33 = vrot.slane %v1009_v45, 1  ;;  %v1040_v0 = vsel %vm598_vm3, %v549_v62, -inf }
 0x110   : > { %v1417_v1 = vld [vmem:[#allocation2 + $0x3c] sm:$0x1]  ;;  %v3852_v63 = vunpack.c.l.b16 %v3474_v23  ;;  %v1024_v51 = vrot.slane %v1023_v46, 1  ;;  %v1036_v6 = vrot.slane %v1035_v31, 2  ;;  %v997_v10 = vmax.f32 %v995_v19, %v996_v43  ;;  %v3506_v43 = vpop.permute.xlu1 %1659 }
 0x111   : > { %v3478_v39 = vld [vmem:[#allocation2 + $0x3c] sm:$0x1]  ;;  %v1506_v15 = vunpack.c.l.b16 %v1417_v1  ;;  %v1017_v14 = vrot.slane %v1016_v47, 1  ;;  %v1011_v1 = vmax.f32 %v1009_v45, %v1010_v33  ;;  %v1030_v5 = vmax.f32 %v1028_v13, %v1029_v38  ;;  %v1448_v45 = vld [vmem:[#allocation2 + $0x38] sm:$0xe] }
 0x112   : > { %v3858_v26 = vunpack.c.l.b16 %v3478_v39  ;;  %v1864_v49 = vpack.c.b16 %v3852_v63, %v3425_v58  ;;  %v1025_v63 = vmax.f32 %v1023_v46, %v1024_v51  ;;  %v1037_v30 = vmax.f32 %v1035_v31, %v1036_v6 }
 0x113   : > { %v1514_v41 = vpack.c.b16 %v1506_v15, %v1505_v4  ;;  %v1610_v56 = vpack.c.b16 %v1506_v15, %v1602_v59  ;;  %v1018_v58 = vmax.f32 %v1016_v47, %v1017_v14  ;;  %v1041_v62 = vrot.slane %v1040_v0, 4 }
 0x114   : > { %1829 = vrot.lane.b32.xlu0 %v1820_v28, %s2779_s28  ;;  %v3502_v54 = vpack.c.b16 %v3858_v26, %v3476_v52  ;;  %v1004_v28 = vmax.f32 %v1002_v55, %v1003_v53  ;;  %v1903_v37 = vshrl.u32 %v1864_v49, 16  ;;  %v1031_v44 = vrot.slane %v1030_v5, 1 }
 0x115   : > { %1923 = vrot.lane.b32.xlu1 %v3440_v60, %s2781_s30  ;;  %v1905_v60 = vshll.u32 %v1864_v49, 16  ;;  %v1565_v21 = vshrl.u32 %v1514_v41, 16  ;;  %v1567_v9 = vshll.u32 %v1514_v41, 16  ;;  %v1103_v34 = vpack.c.bf16 %v997_v10, %v997_v10 }
 0x116   : > { %3868 = vst [vmem:[#allocation7_spill] sm:$0xff] %v3502_v54  ;;  %v1104_v2 = vpack.c.bf16 %v1004_v28, %v1004_v28  ;;  %v1105_v26 = vpack.c.bf16 %v1011_v1, %v1011_v1  ;;  %v3504_v54 = vpop.permute.xlu0 %1833  ;;  %v1038_v53 = vrot.slane %v1037_v30, 1  ;;  %v1042_v59 = vmax.f32 %v1040_v0, %v1041_v62  ;;  %v3512_v51 = vpop.permute.xlu2 %1665 }
 0x117   : > { %v1907_v4 = vrot.slane %v1905_v60, 1  ;;  %v1569_v29 = vrot.slane %v1567_v9, 1  ;;  %v1032_v14 = vmax.f32 %v1030_v5, %v1031_v44  ;;  %v1106_v47 = vpack.c.bf16 %v1018_v58, %v1018_v58  ;;  %v2765_v44 = vld [vmem:[#allocation2] sm:$0xf] }
 0x118   : > { %v1107_v13 = vpack.c.bf16 %v1025_v63, %v1025_v63  ;;  %v1253_v46 = vunpack.c.l.b16 %v1103_v34  ;;  %v1039_v9 = vmax.f32 %v1037_v30, %v1038_v53  ;;  %v1043_v31 = vrot.slane %v1042_v59, 2  ;;  %v3529_v60 = vpop.permute.xlu1 %1667 }
 0x119   : > { %v1908_v19 = vor.u32 %v1907_v4, %v1903_v37  ;;  %v1570_v55 = vor.u32 %v1569_v29, %v1565_v21  ;;  %v1254_v15 = vunpack.c.l.b16 %v1104_v2  ;;  %v1255_v38 = vunpack.c.l.b16 %v1105_v26 }
 0x11a   : > { %v1769_v37 = vunpack.c.l.b16 %v1448_v45  ;;  %v1108_v21 = vpack.c.bf16 %v1032_v14, %v1032_v14  ;;  %v1256_v29 = vunpack.c.l.b16 %v1106_v47  ;;  %v1257_v33 = vunpack.c.l.b16 %v1107_v13  ;;  %v1424_v14 = vld [vmem:[#allocation2 + $0x30] sm:$0xe] }
 0x11b   : > { %1933 = vrot.lane.b32.xlu2 %v1908_v19, %s2781_s30  ;;  %v1973_v34 = vsel %vm437_vm2, %v2765_v44, %v3469_v11  ;;  %v1044_v5 = vmax.f32 %v1042_v59, %v1043_v31  ;;  %v1109_v63 = vpack.c.bf16 %v1039_v9, %v1039_v9  ;;  %v1877_v30 = vshll.u32 %v3484_v17, 16  ;;  %v1396_v19 = vld [vmem:[#allocation2 + $0x40] sm:$0xf] }
 0x11c   : > { %1583 = vrot.lane.b32.xlu0 %v3447_v50, %s2780_s29  ;;  %v1309_v50 = vsel %vm1261_vm4, %v1254_v15, %v1253_v46  ;;  %v1258_v2 = vunpack.c.l.b16 %v1108_v21  ;;  %v1618_v49 = vrot.slane %v1610_v56, 1  ;;  %v1657_v10 = vpack.c.b16 %v3476_v52, %v3476_v52 }
 0x11d   : > { %1585 = vrot.lane.b32.xlu1 %v1570_v55, %s2780_s29  ;;  %v1310_v26 = vsel %vm1263_vm5, %v1255_v38, %v1309_v50  ;;  %v1045_v41 = vrot.slane %v1044_v5, 1  ;;  %v1259_v6 = vunpack.c.l.b16 %v1109_v63  ;;  %v3525_v28 = vsel %vm1995_vm14, %v1973_v34, %v3457_v20  ;;  %v1458_v38 = vld [vmem:[#allocation2 + $0x48] sm:$0xf]  ;;  %v2642_v34 = vld [vmem:[%s3839_s1 + $0x38] sm:$0xff] }
 0x11e   : > { %v1311_v0 = vsel %vm1265_vm6, %v1256_v29, %v1310_v26  ;;  %v3527_v1 = vpop.permute.xlu0 %1791  ;;  %v1875_v4 = vshrl.u32 %v3484_v17, 16  ;;  %v3869_v52 = vpack.c.b16 %v3387_v42, %v3387_v42  ;;  %v3870_v20 = vunpack.c.l.b16 %v3478_v39  ;;  %v3544_v17 = vld [vmem:[%s3839_s1 + $0x78] sm:$0xff]  ;;  %v1399_v42 = vld [vmem:[#allocation2 + $0x44] sm:$0x1]  ;;  %v3550_v9 = vpop.permute.xlu2 %1831  ;;  %2732 = vmatpush.bf16.msra.mxu3 %v2642_v34  ;;  %2301 = vmatpush.bf16.msra.mxu0 %v2642_v34 }
 0x11f   : > { %v1312_v11 = vsel %vm1267_vm7, %v1257_v33, %v1311_v0  ;;  %v1046_v58 = vmax.f32 %v1044_v5, %v1045_v41  ;;  %v1879_v45 = vrot.slane %v1877_v30, 1  ;;  %2740 = vmatpush.bf16.msra.mxu1 %v3544_v17  ;;  %v1601_v15 = vunpack.c.l.b16 %v1424_v14  ;;  %v3570_v5 = vld [vmem:[%s3839_s1 + $0x70] sm:$0xff] }
 0x120   : > { %v1313_v56 = vsel %vm1269_vm8, %v1258_v2, %v1312_v11  ;;  %v1777_v55 = vpack.c.b16 %v3870_v20, %v1769_v37  ;;  %v3560_v40 = vunpack.c.l.b16 %v1458_v38  ;;  %v3871_v33 = vunpack.c.l.b16 %v3396_v32  ;;  %v3579_v32 = vld [vmem:[%s3839_s1 + $0x68] sm:$0xff]  ;;  %v1467_v38 = vld [vmem:[#allocation2 + $0x10] sm:$0xe] }
 0x121   : > { %v1314_v62 = vsel %vm1271_vm9, %v1259_v6, %v1313_v56  ;;  %v1110_v53 = vpack.c.bf16 %v1046_v58, %v1046_v58  ;;  %v1880_v46 = vor.u32 %v1879_v45, %v1875_v4  ;;  %v1723_v30 = vshll.u32 %v3261_v12, 16  ;;  %v2640_v58 = vld [vmem:[%s3839_s1 + $0x28] sm:$0xff] }
 0x122   : > { %v1329_v59 = vpack.c.b16 %v1314_v62, %v1314_v62  ;;  %v1785_v39 = vrot.slane %v1777_v55, 1  ;;  %v1609_v44 = vpack.c.b16 %v3871_v33, %v1601_v15  ;;  %v1826_v2 = vpack.c.b16 %v3560_v40, %v3560_v40  ;;  %v2652_v56 = vld [vmem:[%s3839_s1 + $0x88] sm:$0xff]  ;;  %2733 = vmatpush.bf16.msra.mxu3 %v2641_v24  ;;  %2302 = vmatpush.bf16.msra.mxu0 %v2641_v24 }
 0x123   : > { %1827 = vrot.lane.b32.xlu2 %v3869_v52, %s2779_s28  ;;  %v1260_v47 = vunpack.c.l.b16 %v1110_v53  ;;  %2741 = vmatpush.bf16.msra.mxu1 %v3570_v5  ;;  %v1721_v11 = vshrl.u32 %v3261_v12, 16  ;;  %v1725_v52 = vrot.slane %v1723_v30, 1  ;;  %v3605_v12 = vld [vmem:[%s3839_s1 + $0x60] sm:$0xff]  ;;  %v1947_v34 = vunpack.c.l.b16 %v1467_v38  ;;  %v2636_v38 = vld [vmem:[%s3839_s1 + $0x8] sm:$0xff] }
 0x124   : > { %1633 = vrot.lane.b32.xlu0 %v1618_v49, %s2779_s28  ;;  %v1397_v13 = vsel %vm2964_vm11, %v1329_v59, %v1396_v19  ;;  %v1617_v26 = vrot.slane %v1609_v44, 1  ;;  %2365 = vmatpush.bf16.msra.mxu2 %v2652_v56  ;;  %v2651_v53 = vld [vmem:[%s3839_s1 + $0x80] sm:$0xff]  ;;  %v1468_v44 = vld [vmem:[#allocation2 + $0x18] sm:$0xe] }
 0x125   : > { %1671 = vrot.lane.b32.xlu1 %v1657_v10, %s2781_s30  ;;  %1398 = vst [vmem:[#allocation2 + $0x40] sm:$0xf] %v1397_v13  ;;  %v1330_v31 = vpack.c.b16 %v1260_v47, %v1260_v47  ;;  %v3618_v13 = vld [vmem:[#allocation2 + $0x4c] sm:$0x1] }
 0x126   : > { %v3554_v21 = vpop.permute.xlu0 %1621  ;;  %v3597_v62 = vpop.permute.xlu2 %1661  ;;  %2734 = vmatpush.bf16.msra.mxu3 %v2640_v58  ;;  %2303 = vmatpush.bf16.msra.mxu0 %v2640_v58  ;;  %v1858_v33 = vunpack.c.l.b16 %v3618_v13  ;;  %v3643_v58 = vld [vmem:[%s3839_s1 + $0x50] sm:$0xff] }
 0x127   : > { %v1400_v29 = vsel %vm3003_vm13, %v1330_v31, %v1399_v42  ;;  %2742 = vmatpush.bf16.msra.mxu1 %v3579_v32  ;;  %v1726_v42 = vor.u32 %v1725_v52, %v1721_v11 }
 0x128   : > { %1401 = vst [vmem:[#allocation2 + $0x44] sm:$0x1] %v1400_v29  ;;  %2366 = vmatpush.bf16.msra.mxu2 %v2651_v53 }
 0x129   : > { %v3552_v37 = vpop.permute.xlu1 %1623 }
 0x12b   : > { %1925 = vrot.lane.b32.xlu2 %v1880_v46, %s2781_s30  ;;  %2743 = vmatpush.bf16.msra.mxu1 %v3605_v12  ;;  %v3627_v46 = vld [vmem:[%s3839_s1 + $0x58] sm:$0xff] }
 0x12c   : > { %1799 = vrot.lane.b32.xlu0 %v1785_v39, %s2780_s29  ;;  %v1449_v63 = vld [vmem:[#allocation2 + $0x40] sm:$0xe] }
 0x12d   : > { %v1457_v50 = vld [vmem:[#allocation2 + $0x40] sm:$0xf]  ;;  %v1770_v41 = vunpack.c.l.b16 %v1449_v63 }
 0x12e   : > { %v1433_v49 = vld [vmem:[#allocation2 + $0x40] sm:$0xf]  ;;  %v3584_v6 = vunpack.c.l.b16 %v1457_v50 }
 0x12f   : > { %v1441_v4 = vld [vmem:[#allocation2 + $0x44] sm:$0x1]  ;;  %v1650_v45 = vunpack.c.l.b16 %v1433_v49  ;;  %2744 = vmatpush.bf16.msra.mxu1 %v3627_v46  ;;  %v2638_v49 = vld [vmem:[%s3839_s1 + $0x18] sm:$0xff] }
 0x130   : > { %v3588_v10 = vpop.permute.xlu0 %1629  ;;  %v3599_v19 = vld [vmem:[#allocation2 + $0x44] sm:$0x1]  ;;  %v1690_v20 = vunpack.c.l.b16 %v1441_v4  ;;  %v3873_v4 = vunpack.c.l.b16 %v3460_v8  ;;  %v2637_v8 = vld [vmem:[%s3839_s1 + $0x10] sm:$0xff] }
 0x131   : > { %v3586_v0 = vpop.permute.xlu1 %1625  ;;  %v1857_v55 = vunpack.c.l.b16 %v3599_v19  ;;  %v2639_v39 = vld [vmem:[%s3839_s1 + $0x20] sm:$0xff]  ;;  %v1658_v29 = vpack.c.b16 %v1650_v45, %v1650_v45 }
 0x132   : > { %v1778_v59 = vpack.c.b16 %v1690_v20, %v1770_v41  ;;  %v3616_v47 = vpack.c.b16 %v1690_v20, %v1650_v45  ;;  %2735 = vmatpush.bf16.msra.mxu3 %v2639_v39  ;;  %v3872_v41 = vunpack.c.l.b16 %v3373_v22  ;;  %2304 = vmatpush.bf16.msra.mxu0 %v2639_v39  ;;  %v1866_v22 = vpack.c.b16 %v1858_v33, %v3560_v40 }
 0x133   : > { %1631 = vrot.lane.b32.xlu2 %v1617_v26, %s2779_s28  ;;  %v1865_v14 = vpack.c.b16 %v1857_v55, %v3584_v6  ;;  %2745 = vmatpush.bf16.msra.mxu1 %v3643_v58  ;;  %v1825_v40 = vpack.c.b16 %v3584_v6, %v3584_v6 }
 0x134   : > { %1841 = vrot.lane.b32.xlu0 %v1826_v2, %s2779_s28  ;;  %v1786_v31 = vrot.slane %v1778_v59, 1  ;;  %v1948_v2 = vunpack.c.l.b16 %v1468_v44  ;;  %v1955_v11 = vpack.c.b16 %v3872_v41, %v1947_v34  ;;  %v1919_v39 = vshll.u32 %v1866_v22, 16  ;;  %v2766_v34 = vld [vmem:[#allocation2 + $0x10] sm:$0xf]  ;;  %v1470_v41 = vld [vmem:[#allocation2 + $0x28] sm:$0xe] }
 0x135   : > { %v1912_v15 = vshll.u32 %v1865_v14, 16  ;;  %v1910_v24 = vshrl.u32 %v1865_v14, 16  ;;  %v1917_v6 = vshrl.u32 %v1866_v22, 16  ;;  %v2767_v22 = vld [vmem:[#allocation2 + $0x18] sm:$0xf] }
 0x136   : > { %1801 = vrot.lane.b32.xlu1 %v1786_v31, %s2780_s29  ;;  %v1956_v52 = vpack.c.b16 %v3873_v4, %v1948_v2  ;;  %v1963_v45 = vrot.slane %v1955_v11, 1  ;;  %2736 = vmatpush.bf16.msra.mxu3 %v2638_v49  ;;  %v1921_v44 = vrot.slane %v1919_v39, 1 }
 0x137   : > { %v1914_v63 = vrot.slane %v1912_v15, 1  ;;  %2305 = vmatpush.bf16.msra.mxu0 %v2638_v49  ;;  %v1469_v49 = vld [vmem:[#allocation2 + $0x20] sm:$0xe] }
 0x138   : > { %v3631_v30 = vpop.permute.xlu0 %1795  ;;  %v3652_v20 = vpop.permute.xlu2 %1669  ;;  %v1964_v59 = vrot.slane %v1956_v52, 1  ;;  %v2103_v14 = vunpack.c.l.b16 %v1963_v45  ;;  %v1949_v4 = vunpack.c.l.b16 %v1469_v49  ;;  %v1950_v52 = vunpack.c.l.b16 %v1470_v41 }
 0x139   : > { %v1794_v50 = vpop.permute.xlu1 %1793  ;;  %v1915_v53 = vor.u32 %v1914_v63, %v1910_v24 }
 0x13a   : > { %v2040_v26 = vsel %vm437_vm2, %v1726_v42, %v1794_v50  ;;  %v2106_v42 = vunpack.c.l.b16 %v1964_v59  ;;  %2737 = vmatpush.bf16.msra.mxu3 %v2637_v8  ;;  %v2635_v50 = vld [vmem:[%s3839_s1] sm:$0xff] }
 0x13b   : > { %v3647_v56 = vsel %vm1995_vm14, %v2040_v26, %v3504_v54  ;;  %1673 = vrot.lane.b32.xlu2 %v1658_v29, %s2781_s30  ;;  %v3664_v54 = vld [vmem:[%s3839_s1 + $0x48] sm:$0xff]  ;;  %v3676_v29 = vld [vmem:[%s3839_s1 + $0x40] sm:$0xff]  ;;  %2306 = vmatpush.bf16.msra.mxu0 %v2637_v8  ;;  %v1922_v26 = vor.u32 %v1921_v44, %v1917_v6  ;;  %v3875_v8 = vunpack.c.l.b16 %v3304_v25 }
 0x13c   : > { %v2163_v15 = vpack.c.b16 %v2106_v42, %v2103_v14  ;;  %2746 = vmatpush.bf16.msra.mxu1 %v3664_v54 }
 0x13d   : > { %v1958_v42 = vpack.c.b16 %v3875_v8, %v1950_v52 }
 0x13e   : > { %1935 = vrot.lane.b32.xlu1 %v1915_v53, %s2781_s30  ;;  %2627 = vmatmul.msk.bf16.vlgmr.msra.gmra.mxu2 %vm437_vm2, %v2163_v15 }
 0x13f   : > { %2738 = vmatpush.bf16.msra.mxu3 %v2636_v38  ;;  %2307 = vmatpush.bf16.msra.mxu0 %v2636_v38  ;;  %v1966_v15 = vrot.slane %v1958_v42, 1 }
 0x140   : > { %v3681_v63 = vpop.permute.xlu2 %1835  ;;  %2747 = vmatpush.bf16.msra.mxu1 %v3676_v29 }
 0x141   : > { %v1576_v31 = vpop.permute.xlu0 %1575  ;;  %v2112_v6 = vunpack.c.l.b16 %v1966_v15 }
 0x142   : > { %v1979_v24 = vsel %vm437_vm2, %v2766_v34, %v1576_v31  ;;  %v1714_v34 = vshrl.u32 %v3113_v7, 16 }
 0x143   : > { %1839 = vrot.lane.b32.xlu2 %v1825_v40, %s2779_s28  ;;  %v2001_v2 = vsel %vm1995_vm14, %v1979_v24, %v3552_v37  ;;  %2739 = vmatpush.bf16.msra.mxu3 %v2635_v50  ;;  %v3874_v37 = vunpack.c.l.b16 %v3269_v3  ;;  %s2634_s28 = sshll.u32 %s3887_s19, 5 }
 0x144   : > { %v2018_v53 = vsel %vm2012_vm15, %v2001_v2, %v3496_v27  ;;  %2308 = vmatpush.bf16.msra.mxu0 %v2635_v50  ;;  %v1471_v2 = vld [vmem:[#allocation2 + $0x30] sm:$0xe]  ;;  %s3797_s8 = scalar_lea.vmem %s3842_s4, %s2634_s28 }
 0x145   : > { %v1957_v14 = vpack.c.b16 %v3874_v37, %v1949_v4  ;;  %v2107_v39 = vunpack.c.l.b16 %v2018_v53  ;;  %v1951_v49 = vunpack.c.l.b16 %v1471_v2  ;;  %v3877_v4 = vunpack.c.l.b16 %v3474_v23 }
 0x146   : > { %v3878_v23 = vunpack.c.l.b16 %v3251_v35 }
 0x147   : > { %v1965_v27 = vrot.slane %v1957_v14, 1 }
 0x148   : > { %2330 = vmatpush.bf16.msrb.mxu0 %v3544_v17  ;;  %v1628_v44 = vpop.permute.xlu2 %1627  ;;  %v1695_v8 = vpack.c.b16 %v3878_v23, %v3059_v16  ;;  %v2769_v16 = vld [vmem:[#allocation2 + $0x20] sm:$0xf] }
 0x149   : > { %v1578_v11 = vpop.permute.xlu0 %1577  ;;  %v2109_v3 = vunpack.c.l.b16 %v1965_v27 }
 0x14a   : > { %v1982_v45 = vsel %vm437_vm2, %v2767_v22, %v1578_v11 }
 0x14b   : > { %v2003_v59 = vsel %vm1995_vm14, %v1982_v45, %v3586_v0  ;;  %1937 = vrot.lane.b32.xlu2 %v1922_v26, %s2781_s30  ;;  %v1716_v0 = vshll.u32 %v3113_v7, 16  ;;  %v2166_v25 = vpack.c.b16 %v2112_v6, %v2109_v3  ;;  %v1472_v26 = vld [vmem:[#allocation2 + $0x38] sm:$0xe] }
 0x14c   : > { %v2020_v40 = vsel %vm2012_vm15, %v2003_v59, %v3512_v51  ;;  %2331 = vmatpush.bf16.msrb.mxu0 %v3570_v5  ;;  %v1952_v41 = vunpack.c.l.b16 %v1472_v26 }
 0x14d   : > { %v2110_v31 = vunpack.c.l.b16 %v2020_v40  ;;  %v1718_v24 = vrot.slane %v1716_v0, 1  ;;  %v2014_v40 = vsel %vm2012_vm15, %v3525_v28, %v3506_v43  ;;  %v1737_v0 = vshll.u32 %v3346_v48, 16 }
 0x14e   : > { %2628 = vmatmul.msk.bf16.gmra.mxu2 %vm437_vm2, %v2166_v25  ;;  %v1960_v52 = vpack.c.b16 %v3877_v4, %v1952_v41  ;;  %v2101_v15 = vunpack.c.l.b16 %v2014_v40  ;;  %v1728_v43 = vshrl.u32 %v1695_v8, 16  ;;  %v1735_v25 = vshrl.u32 %v3346_v48, 16  ;;  %v3881_v41 = vld [vmem:[#allocation4_spill] sm:$0xff] }
 0x14f   : > { %v2164_v38 = vpack.c.b16 %v2110_v31, %v2107_v39  ;;  %v1719_v17 = vor.u32 %v1718_v24, %v1714_v34  ;;  %v1730_v31 = vshll.u32 %v1695_v8, 16  ;;  %v3879_v48 = vunpack.c.l.b16 %v3375_v18  ;;  %v1473_v8 = vld [vmem:[#allocation2 + $0x40] sm:$0xe] }
 0x150   : > { %2332 = vmatpush.bf16.msrb.mxu0 %v3579_v32  ;;  %v1930_v50 = vpop.permute.xlu2 %1929  ;;  %v3876_v32 = vunpack.c.l.b16 %v3359_v57  ;;  %v1968_v53 = vrot.slane %v1960_v52, 1 }
 0x151   : > { %2314 = vmatmul.bf16.vlgmr.msra.gmra.mxu3 %v2164_v38  ;;  %v2037_v5 = vsel %vm437_vm2, %v1719_v17, %v3527_v1  ;;  %v2076_v7 = vsel %vm2012_vm15, %v3647_v56, %v1930_v50  ;;  %v1732_v28 = vrot.slane %v1730_v31, 1 }
 0x152   : > { %v1959_v11 = vpack.c.b16 %v3876_v32, %v1951_v49  ;;  %v2111_v59 = vunpack.c.l.b16 %v2076_v7  ;;  %v2118_v56 = vunpack.c.l.b16 %v1968_v53  ;;  %v3880_v49 = vld [vmem:[#allocation3_spill] sm:$0xff] }
 0x153   : > { %v1733_v24 = vor.u32 %v1732_v28, %v1728_v43 }
 0x154   : > { %2333 = vmatpush.bf16.msrb.mxu0 %v3605_v12  ;;  %v2058_v12 = vsel %vm1995_vm14, %v2037_v5, %v3550_v9  ;;  %v1967_v1 = vrot.slane %v1959_v11, 1  ;;  %v1580_v9 = vpop.permute.xlu0 %1579  ;;  %v1691_v5 = vpack.c.b16 %v3879_v48, %v3040_v61 }
 0x155   : > { %v1985_v35 = vsel %vm437_vm2, %v2769_v16, %v1580_v9  ;;  %v1474_v9 = vld [vmem:[#allocation2 + $0x48] sm:$0xe] }
 0x156   : > { %v2005_v3 = vsel %vm1995_vm14, %v1985_v35, %v1628_v44  ;;  %v1702_v52 = vshll.u32 %v1691_v5, 16  ;;  %v1954_v40 = vunpack.c.l.b16 %v1474_v9 }
 0x157   : > { %v3707_v51 = vpop.permute.xlu1 %1797 }
 0x158   : > { %2334 = vmatpush.bf16.msrb.mxu0 %v3627_v46  ;;  %v2115_v46 = vunpack.c.l.b16 %v1967_v1 }
 0x15a   : > { %v2169_v57 = vpack.c.b16 %v2118_v56, %v2115_v46 }
 0x15c   : > { %2335 = vmatpush.bf16.msrb.mxu0 %v3643_v58  ;;  %v2768_v58 = vld [vmem:[#allocation2 + $0x8] sm:$0xf] }
 0x15e   : > { %2629 = vmatmul.msk.bf16.gmra.mxu2 %vm437_vm2, %v2169_v57 }
 0x15f   : > { %v1928_v22 = vpop.permute.xlu1 %1927 }
 0x160   : > { %v2074_v45 = vsel %vm2012_vm15, %v2058_v12, %v1928_v22  ;;  %2336 = vmatpush.bf16.msrb.mxu0 %v3664_v54 }
 0x161   : > { %v2108_v37 = vunpack.c.l.b16 %v2074_v45 }
 0x163   : > { %v2165_v14 = vpack.c.b16 %v2111_v59, %v2108_v37  ;;  %v1700_v59 = vshrl.u32 %v1691_v5, 16 }
 0x164   : > { %2337 = vmatpush.bf16.msrb.mxu0 %v3676_v29 }
 0x165   : > { %2343 = vmatmul.bf16.vlgmr.msra.gmra.mxu1 %v2165_v14 }
 0x167   : > { %v1574_v42 = vpop.permute.xlu1 %1573 }
 0x168   : > { %v1976_v39 = vsel %vm437_vm2, %v2768_v58, %v1574_v42  ;;  %v1953_v42 = vunpack.c.l.b16 %v1473_v8 }
 0x169   : > { %v1999_v27 = vsel %vm1995_vm14, %v1976_v39, %v3554_v21  ;;  %v1739_v21 = vrot.slane %v1737_v0, 1 }
 0x16a   : > { %v2016_v54 = vsel %vm2012_vm15, %v1999_v27, %v3597_v62  ;;  %v2022_v62 = vsel %vm2012_vm15, %v2005_v3, %v3529_v60  ;;  %v2043_v60 = vsel %vm437_vm2, %v1733_v24, %v3631_v30  ;;  %v1961_v31 = vpack.c.b16 %v1857_v55, %v1953_v42 }
 0x16b   : > { %v2104_v38 = vunpack.c.l.b16 %v2016_v54  ;;  %v1740_v44 = vor.u32 %v1739_v21, %v1735_v25  ;;  %v2113_v2 = vunpack.c.l.b16 %v2022_v62  ;;  %v2062_v18 = vsel %vm1995_vm14, %v2043_v60, %v3681_v63  ;;  %v3883_v62 = vld [vmem:[#allocation5_spill] sm:$0xff] }
 0x16c   : > { %v1962_v27 = vpack.c.b16 %v1858_v33, %v1954_v40 }
 0x16d   : > { %v2161_v6 = vpack.c.b16 %v2104_v38, %v2101_v15  ;;  %v1969_v38 = vrot.slane %v1961_v31, 1 }
 0x16e   : > { %v1970_v43 = vrot.slane %v1962_v27, 1 }
 0x16f   : > { %2309 = vmatmul.bf16.vlgmr.msra.gmra.mxu0 %v2161_v6  ;;  %v1582_v29 = vpop.permute.xlu1 %1581  ;;  %v2121_v19 = vunpack.c.l.b16 %v1969_v38 }
 0x170   : > { %v1988_v34 = vsel %vm437_vm2, %v3349_v36, %v1582_v29  ;;  %v3882_v36 = vunpack.c.l.b16 %v3881_v41  ;;  %v2124_v55 = vunpack.c.l.b16 %v1970_v43 }
 0x171   : > { %v2007_v17 = vsel %vm1995_vm14, %v1988_v34, %v3588_v10  ;;  %v2046_v10 = vsel %vm437_vm2, %v1740_v44, %v3707_v51  ;;  %v1704_v51 = vrot.slane %v1702_v52, 1 }
 0x172   : > { %v2024_v50 = vsel %vm2012_vm15, %v2007_v17, %v3652_v20  ;;  %v1692_v7 = vpack.c.b16 %v3882_v36, %v3880_v49  ;;  %v2172_v13 = vpack.c.b16 %v2124_v55, %v2121_v19  ;;  %v3884_v17 = vld [vmem:[#allocation6_spill] sm:$0xff] }
 0x173   : > { %v2116_v26 = vunpack.c.l.b16 %v2024_v50  ;;  %v1705_v23 = vor.u32 %v1704_v51, %v1700_v59 }
 0x174   : > { %v1709_v45 = vshll.u32 %v1692_v7, 16  ;;  %v1707_v37 = vshrl.u32 %v1692_v7, 16  ;;  %2630 = vmatmul.msk.bf16.gmra.mxu2 %vm437_vm2, %v2172_v13 }
 0x175   : > { %v2167_v32 = vpack.c.b16 %v2116_v26, %v2113_v2  ;;  %v1934_v20 = vpop.permute.xlu2 %1933 }
 0x176   : > { %v1838_v11 = vpop.permute.xlu0 %1837  ;;  %v1711_v46 = vrot.slane %v1709_v45, 1 }
 0x177   : > { %2319 = vmatmul.bf16.gmra.mxu3 %v2167_v32  ;;  %v2064_v4 = vsel %vm1995_vm14, %v2046_v10, %v1838_v11  ;;  %v1932_v61 = vpop.permute.xlu1 %1931  ;;  %v1751_v32 = vshll.u32 %v3616_v47, 16  ;;  %v3885_v11 = vld [vmem:[#allocation7_spill] sm:$0xff] }
 0x178   : > { %v2080_v12 = vsel %vm2012_vm15, %v2064_v4, %v1934_v20  ;;  %v2078_v22 = vsel %vm2012_vm15, %v2062_v18, %v1932_v61  ;;  %v1712_v63 = vor.u32 %v1711_v46, %v1707_v37  ;;  %v1744_v20 = vshll.u32 %v3885_v11, 16 }
 0x179   : > { %v2117_v30 = vunpack.c.l.b16 %v2080_v12  ;;  %v2114_v1 = vunpack.c.l.b16 %v2078_v22  ;;  %v1749_v4 = vshrl.u32 %v3616_v47, 16  ;;  %v1753_v18 = vrot.slane %v1751_v32, 1 }
 0x17a   : > { %v1742_v52 = vshrl.u32 %v3885_v11, 16  ;;  %v1746_v12 = vrot.slane %v1744_v20, 1 }
 0x17b   : > { %v2168_v53 = vpack.c.b16 %v2117_v30, %v2114_v1  ;;  %v1754_v22 = vor.u32 %v1753_v18, %v1749_v4 }
 0x17c   : > { %v1747_v30 = vor.u32 %v1746_v12, %v1742_v52 }
 0x17d   : > { %2348 = vmatmul.bf16.gmra.mxu1 %v2168_v53  ;;  %v1828_v14 = vpop.permute.xlu2 %1827 }
 0x17e   : > { %v1788_v56 = vpop.permute.xlu0 %1787 }
 0x17f   : > { %v1790_v57 = vpop.permute.xlu1 %1789  ;;  %v2031_v58 = vsel %vm437_vm2, %v1705_v23, %v1788_v56 }
 0x180   : > { %v2034_v39 = vsel %vm437_vm2, %v1712_v63, %v1790_v57  ;;  %v2054_v54 = vsel %vm1995_vm14, %v2031_v58, %v1828_v14 }
 0x185   : > { %v1926_v35 = vpop.permute.xlu2 %1925 }
 0x186   : > { %v1830_v16 = vpop.permute.xlu0 %1829 }
 0x187   : > { %v2056_v15 = vsel %vm1995_vm14, %v2034_v39, %v1830_v16  ;;  %v1924_v0 = vpop.permute.xlu1 %1923 }
 0x188   : > { %v2072_v28 = vsel %vm2012_vm15, %v2056_v15, %v1926_v35  ;;  %v2070_v3 = vsel %vm2012_vm15, %v2054_v54, %v1924_v0 }
 0x189   : > { %v2105_v6 = vunpack.c.l.b16 %v2072_v28  ;;  %v2102_v25 = vunpack.c.l.b16 %v2070_v3 }
 0x18b   : > { %v2162_v21 = vpack.c.b16 %v2105_v6, %v2102_v25 }
 0x18d   : > { %2338 = vmatmul.bf16.vlgmr.msrb.gmra.mxu0 %v2162_v21  ;;  %v1632_v29 = vpop.permute.xlu2 %1631 }
 0x18e   : > { %v1584_v33 = vpop.permute.xlu0 %1583 }
 0x18f   : > { %v1586_v34 = vpop.permute.xlu1 %1585  ;;  %v1991_v24 = vsel %vm437_vm2, %v3883_v62, %v1584_v33 }
 0x190   : > { %v1994_v50 = vsel %vm437_vm2, %v3884_v17, %v1586_v34  ;;  %v2009_v26 = vsel %vm1995_vm14, %v1991_v24, %v1632_v29 }
 0x195   : > { %v1674_v2 = vpop.permute.xlu2 %1673 }
 0x196   : > { %v1634_v44 = vpop.permute.xlu0 %1633 }
 0x197   : > { %v2011_v48 = vsel %vm1995_vm14, %v1994_v50, %v1634_v44  ;;  %v1672_v5 = vpop.permute.xlu1 %1671 }
 0x198   : > { %v2028_v49 = vsel %vm2012_vm15, %v2011_v48, %v1674_v2  ;;  %v2026_v41 = vsel %vm2012_vm15, %v2009_v26, %v1672_v5 }
 0x199   : > { %v2122_v36 = vunpack.c.l.b16 %v2028_v49  ;;  %v2119_v7 = vunpack.c.l.b16 %v2026_v41 }
 0x19b   : > { %v2170_v60 = vpack.c.b16 %v2122_v36, %v2119_v7 }
 0x19d   : > { %2324 = vmatmul.bf16.gmra.mxu3 %v2170_v60  ;;  %v1840_v61 = vpop.permute.xlu2 %1839 }
 0x19e   : > { %v1800_v10 = vpop.permute.xlu0 %1799 }
 0x19f   : > { %v2049_v37 = vsel %vm437_vm2, %v1747_v30, %v1800_v10 }
 0x1a0   : > { %v2066_v47 = vsel %vm1995_vm14, %v2049_v37, %v1840_v61 }
 0x1a5   : > { %v1938_v51 = vpop.permute.xlu2 %1937 }
 0x1a6   : > { %v1842_v53 = vpop.permute.xlu0 %1841 }
 0x1a8   : > { %v1802_v45 = vpop.permute.xlu1 %1801 }
 0x1a9   : > { %v2052_v1 = vsel %vm437_vm2, %v1754_v22, %v1802_v45  ;;  %vm2457_vm2 = vcmask 517120  }
 0x1aa   : > { %v2068_v59 = vsel %vm1995_vm14, %v2052_v1, %v1842_v53 }
 0x1ab   : > { %v2084_v46 = vsel %vm2012_vm15, %v2068_v59, %v1938_v51 }
 0x1ac   : > { %v2123_v57 = vunpack.c.l.b16 %v2084_v46 }
 0x1b0   : > { %v1936_v56 = vpop.permute.xlu1 %1935 }
 0x1b1   : > { %v2082_v14 = vsel %vm2012_vm15, %v2066_v47, %v1936_v56 }
 0x1b2   : > { %v2120_v23 = vunpack.c.l.b16 %v2082_v14 }
 0x1b4   : > { %v2171_v63 = vpack.c.b16 %v2123_v57, %v2120_v23 }
 0x1b6   : > { %2353 = vmatmul.bf16.gmra.mxu1 %v2171_v63 }
 0x1c1   : > { %v2368_v8 = vpop.f32.mrf.mxu2 }
 0x1c9   : > { %v2370_v9 = vpop.f32.mrf.mxu2 }
 0x1d1   : > { %v2373_v40 = vpop.f32.mrf.mxu2 }
 0x1d4   : > { %v2315_v42 = vpop.f32.mrf.mxu3 }
 0x1d9   : > { %v2375_v54 = vpop.f32.mrf.mxu2 }
 0x1dc   : > { %v2317_v16 = vpop.f32.mrf.mxu3 }
 0x1e1   : > { %v2378_v43 = vpop.f32.mrf.mxu2 }
 0x1e2   : > { %v2344_v58 = vpop.f32.mrf.mxu1 }
 0x1e3   : > { %v2345_v39 = vadd.f32 %v2344_v58, %v2315_v42 }
 0x1e5   : > { %v2374_v31 = vadd.f32 %v2373_v40, %v2345_v39 }
 0x1e7   : > { %v2390_v27 = vpack.c.bf16 %v2374_v31, %v2374_v31  ;;  %v2428_v41 = vmul.f32 %v2374_v31, %v2374_v31  ;;  %v2408_v11 = vsel %vm1995_vm14, %v2374_v31, 0.0 }
 0x1e9   : > { %2399 = vst.msk [vmem:[%s3797_s8 + $0x8] sm:$0xf] %vm2396_vm0, %v2390_v27  ;;  %v2380_v13 = vpop.f32.mrf.mxu2  ;;  %v2437_v12 = vsel %vm1995_vm14, %v2428_v41, 0.0 }
 0x1ea   : > { %v2346_v35 = vpop.f32.mrf.mxu1 }
 0x1eb   : > { %v2347_v15 = vadd.f32 %v2346_v35, %v2317_v16 }
 0x1ec   : > { %v2310_v28 = vpop.f32.mrf.mxu0 }
 0x1ed   : > { %v2376_v0 = vadd.f32 %v2375_v54, %v2347_v15 }
 0x1ef   : > { %v2391_v38 = vpack.c.bf16 %v2376_v0, %v2376_v0  ;;  %v2429_v20 = vmul.f32 %v2376_v0, %v2376_v0  ;;  %v2410_v22 = vsel %vm1995_vm14, %v2376_v0, 0.0 }
 0x1f1   : > { %2400 = vst.msk [vmem:[%s3797_s8 + $0xc] sm:$0xf] %vm2396_vm0, %v2391_v38  ;;  %v2439_v1 = vsel %vm1995_vm14, %v2429_v20, 0.0 }
 0x1f4   : > { %v2312_v33 = vpop.f32.mrf.mxu0 }
 0x1f7   : > { %v2383_v46 = vpop.f32.mrf.mxu2 }
 0x1fa   : > { %v2320_v3 = vpop.f32.mrf.mxu3  ;;  %v2349_v6 = vpop.f32.mrf.mxu1 }
 0x1fb   : > { %v2350_v25 = vadd.f32 %v2349_v6, %v2320_v3 }
 0x1fd   : > { %v2379_v19 = vadd.f32 %v2378_v43, %v2350_v25 }
 0x1ff   : > { %v2392_v55 = vpack.c.bf16 %v2379_v19, %v2379_v19  ;;  %v2412_v53 = vsel %vm1995_vm14, %v2379_v19, 0.0  ;;  %v2430_v14 = vmul.f32 %v2379_v19, %v2379_v19  ;;  %v2385_v35 = vpop.f32.mrf.mxu2 }
 0x201   : > { %2401 = vst.msk [vmem:[%s3797_s8 + $0x10] sm:$0xf] %vm2396_vm0, %v2392_v55  ;;  %v2441_v63 = vsel %vm1995_vm14, %v2430_v14, 0.0 }
 0x202   : > { %v2322_v21 = vpop.f32.mrf.mxu3  ;;  %v2351_v29 = vpop.f32.mrf.mxu1 }
 0x203   : > { %v2352_v34 = vadd.f32 %v2351_v29, %v2322_v21 }
 0x205   : > { %v2381_v62 = vadd.f32 %v2380_v13, %v2352_v34 }
 0x207   : > { %v2393_v24 = vpack.c.bf16 %v2381_v62, %v2381_v62  ;;  %v2414_v39 = vsel %vm1995_vm14, %v2381_v62, 0.0 }
 0x209   : > { %2402 = vst.msk [vmem:[%s3797_s8 + $0x14] sm:$0xf] %vm2396_vm0, %v2393_v24 }
 0x20a   : > { %v2339_v17 = vpop.f32.mrf.mxu0 }
 0x20b   : > { %v2340_v50 = vadd.f32 %v2339_v17, %v2310_v28 }
 0x20d   : > { %v2369_v44 = vadd.f32 %v2368_v8, %v2340_v50  ;;  %v2431_v8 = vmul.f32 %v2381_v62, %v2381_v62 }
 0x20f   : > { %v2388_v2 = vpack.c.bf16 %v2369_v44, %v2369_v44  ;;  %v2426_v5 = vmul.f32 %v2369_v44, %v2369_v44  ;;  %v2405_v36 = vsel %vm1995_vm14, %v2369_v44, 0.0  ;;  %v2443_v54 = vsel %vm1995_vm14, %v2431_v8, 0.0 }
 0x211   : > { %2397 = vst.msk [vmem:[%s3797_s8] sm:$0xf] %vm2396_vm0, %v2388_v2  ;;  %v2434_v4 = vsel %vm1995_vm14, %v2426_v5, 0.0 }
 0x212   : > { %v2341_v26 = vpop.f32.mrf.mxu0 }
 0x213   : > { %v2342_v48 = vadd.f32 %v2341_v26, %v2312_v33 }
 0x215   : > { %v2371_v49 = vadd.f32 %v2370_v9, %v2342_v48 }
 0x217   : > { %v2389_v7 = vpack.c.bf16 %v2371_v49, %v2371_v49  ;;  %v2406_v60 = vsel %vm1995_vm14, %v2371_v49, 0.0  ;;  %v2427_v32 = vmul.f32 %v2371_v49, %v2371_v49 }
 0x218   : > { %v2407_v10 = vadd.f32 %v2406_v60, %v2405_v36 }
 0x219   : > { %2398 = vst.msk [vmem:[%s3797_s8 + $0x4] sm:$0xf] %vm2396_vm0, %v2389_v7  ;;  %v2435_v18 = vsel %vm1995_vm14, %v2427_v32, 0.0 }
 0x21a   : > { %v2409_v61 = vadd.f32 %v2408_v11, %v2407_v10  ;;  %v2436_v52 = vadd.f32 %v2435_v18, %v2434_v4 }
 0x21c   : > { %v2411_v45 = vadd.f32 %v2410_v22, %v2409_v61  ;;  %v2438_v30 = vadd.f32 %v2437_v12, %v2436_v52 }
 0x21e   : > { %v2440_v59 = vadd.f32 %v2439_v1, %v2438_v30  ;;  %v2413_v51 = vadd.f32 %v2412_v53, %v2411_v45 }
 0x220   : > { %v2325_v37 = vpop.f32.mrf.mxu3  ;;  %v2442_v40 = vadd.f32 %v2441_v63, %v2440_v59  ;;  %v2415_v16 = vadd.f32 %v2414_v39, %v2413_v51 }
 0x222   : > { %v2444_v43 = vadd.f32 %v2443_v54, %v2442_v40 }
 0x228   : > { %v2327_v42 = vpop.f32.mrf.mxu3 }
 0x233   : > { %v2354_v47 = vpop.f32.mrf.mxu1 }
 0x234   : > { %v2355_v56 = vadd.f32 %v2354_v47, %v2325_v37 }
 0x236   : > { %v2384_v57 = vadd.f32 %v2383_v46, %v2355_v56 }
 0x238   : > { %v2394_v23 = vpack.c.bf16 %v2384_v57, %v2384_v57  ;;  %v2432_v9 = vmul.f32 %v2384_v57, %v2384_v57  ;;  %v2416_v31 = vsel %vm1995_vm14, %v2384_v57, 0.0 }
 0x239   : > { %v2417_v38 = vadd.f32 %v2416_v31, %v2415_v16 }
 0x23a   : > { %2403 = vst.msk [vmem:[%s3797_s8 + $0x18] sm:$0xf] %vm2396_vm0, %v2394_v23  ;;  %v2445_v15 = vsel %vm1995_vm14, %v2432_v9, 0.0 }
 0x23b   : > { %v2356_v58 = vpop.f32.mrf.mxu1  ;;  %v2446_v25 = vadd.f32 %v2445_v15, %v2444_v43 }
 0x23c   : > { %v2357_v27 = vadd.f32 %v2356_v58, %v2327_v42 }
 0x23e   : > { %v2386_v0 = vadd.f32 %v2385_v35, %v2357_v27 }
 0x240   : > { %v2395_v28 = vpack.c.bf16 %v2386_v0, %v2386_v0  ;;  %v2418_v3 = vsel %vm1995_vm14, %v2386_v0, 0.0  ;;  %v2433_v6 = vmul.f32 %v2386_v0, %v2386_v0 }
 0x241   : > { %v2419_v19 = vadd.f32 %v2418_v3, %v2417_v38 }
 0x242   : > { %2404 = vst.msk [vmem:[%s3797_s8 + $0x1c] sm:$0xf] %vm2396_vm0, %v2395_v28  ;;  %v2447_v55 = vsel %vm1995_vm14, %v2433_v6, 0.0 }
 0x243   : > { %v2420_v21 = vrot.slane %v2419_v19, 4  ;;  %v2448_v13 = vadd.f32 %v2447_v55, %v2446_v25 }
 0x245   : > { %v2421_v33 = vadd.f32 %v2420_v21, %v2419_v19  ;;  %v2449_v29 = vrot.slane %v2448_v13, 4 }
 0x247   : > { %v2422_v34 = vrot.slane %v2421_v33, 2  ;;  %v2450_v62 = vadd.f32 %v2449_v29, %v2448_v13 }
 0x249   : > { %v2423_v24 = vadd.f32 %v2422_v34, %v2421_v33  ;;  %v2451_v17 = vrot.slane %v2450_v62, 2 }
 0x24b   : > { %v2424_v50 = vrot.slane %v2423_v24, 1  ;;  %v2452_v44 = vadd.f32 %v2451_v17, %v2450_v62 }
 0x24d   : > { %v2453_v2 = vrot.slane %v2452_v44, 1  ;;  %v2425_v26 = vadd.f32 %v2424_v50, %v2423_v24 }
 0x24f   : > { %v2454_v48 = vadd.f32 %v2453_v2, %v2452_v44 }
 0x251   : > { %v2456_v5 = vsel %vm2455_vm1, %v2425_v26, %v2454_v48 }
 0x252   : > { %2458 = vst.msk [vmem:[%s235_s12] sm:$0x3] %vm2457_vm2, %v2456_v5 }
 0x253 PF: > { %s16_s18 = sadd.s32 1, %s2776_s18  }
 0x254   : > { %p13_p4 = scmp.ge.s32.totalorder %s16_s18, 4  }
 0x256   :  { %15 = sbr.rel (!%p13_p4) target bundleno = 1 (0x1), region = 80 }

// kernel: darknet_forward.5
= control target key start
LH: loop header
LB: loop body
LE: loop exit
PB: predicated region body
PF: predicated region fallthrough
CT: control target
= control target key end

     0   :  { %s3581_s18 = smov 0   ;;  %s5201_s0 = inlined_call_operand.vmem [shape: bf16[2,16,16,3], index: 0, kind: input, shape index: {}]   ;;  %s5202_s1 = inlined_call_operand.vmem [shape: bf16[27,32], index: 1, kind: input, shape index: {}]   ;;  %s5203_s2 = inlined_call_operand.vmem [shape: f32[1,3], index: 2, kind: input, shape index: {}]   ;;  %s5204_s3 = inlined_call_operand.vmem [shape: f32[1,3], index: 3, kind: input, shape index: {}]   ;;  %s5205_s4 = inlined_call_operand.vmem [shape: bf16[2,16,16,32], index: 4, kind: output, shape index: {0}]   ;;  %s5206_s5 = inlined_call_operand.vmem [shape: f32[2,2,32], index: 5, kind: output, shape index: {1}]  }
   0x1 LB: > { %s3199_s2 = sadd.s32 4294967295, %s3539_s18   ;;  %p3203_p0 = scmp.ge.s32.totalorder %s3539_s18, 1  ;;  %s3539_s18 = sphi %s3581_s18, %s16_s18  }
   0x2   : > { %p190_p1 = scmp.lt.s32.totalorder %s3539_s18, 3 }
   0x4   : > { %p191_p2 = pnand %p3203_p0, %p190_p1 }
   0x5   : > { %p222_p3 = scmp.lt.s32.totalorder (!%p191_p2), %s3199_s2, 1  ;;  %s3542_s19 = smov (!%p191_p2), 3  }
   0x6   : > { %194 = sbr.rel (%p191_p2) target bundleno = 717 (0x2cd), region = 36  ;;  %s3543_s23 = smov (!%p191_p2), 6  }
   0x7   : > { %s3544_s24 = smov (!%p191_p2), 12   ;;  %s3545_s25 = smov (!%p191_p2), 9  }
   0x8   : > { %s3546_s26 = smov (!%p191_p2), 15   ;;  %s3547_s27 = smov (!%p191_p2), 21  }
   0x9   : > { %s3548_s28 = smov (!%p191_p2), 18   ;;  %s3549_s29 = smov (!%p191_p2), 24  }
   0xb   : > { %vm269_vm0 = vcmask 19456   ;;  %vm272_vm1 = vcmask 16384   ;;  %v3541_v0 = vmov 0   ;;  %s5214_s2 = smov (!%p222_p3, %s3199_s2), 1  ;;  %vm1087_vm2 = vsmask.f32 7424 }
   0xc   : > { %270 = vst.msk [vmem:[#allocation2] sm:$0xf] %vm269_vm0, %v3541_v0  ;;  %s3235_s3 = sshll.u32 %s5214_s2, 7  ;;  %vm325_vm3 = vsmask.f32 256  ;;  %vm1360_vm9 = vcmask 1046528  }
   0xd   : > { %271 = vst.msk [vmem:[#allocation2 + $0x4] sm:$0xf] %vm269_vm0, %v3541_v0  ;;  %s3648_s22 = scalar_lea.vmem %s5201_s0, %s3235_s3  ;;  %vm326_vm4 = vsmask.f32 4368  ;;  %vm650_vm5 = vsmask.f32 7938  ;;  %vm3726_vm6 = vmand %vm272_vm1, %vm325_vm3  ;;  %s4909_s13 = scalar_lea.vmem %s5205_s4, %s3235_s3 }
   0xe   : > { %273 = vst.msk [vmem:[#allocation2 + $0x8] sm:$0x1] %vm272_vm1, %v3541_v0  ;;  %v247_v12 = vld [vmem:[%s3648_s22 + $0x28] sm:$0xf]  ;;  %v248_v13 = vld [vmem:[%s3648_s22 + $0x2c] sm:$0xf]  ;;  %vm3739_vm7 = vmor %vm325_vm3, %vm326_vm4 }
   0xf   : > { %274 = vst.msk [vmem:[#allocation2 + $0xc] sm:$0xf] %vm269_vm0, %v3541_v0  ;;  %v244_v14 = vld [vmem:[%s3648_s22 + $0x1c] sm:$0xf]  ;;  %v414_v15 = vshrl.u32 %v247_v12, 16  ;;  %v422_v16 = vshrl.u32 %v248_v13, 16  ;;  %vm3759_vm8 = vmand %vm269_vm0, %vm650_vm5 }
  0x10   : > { %275 = vst.msk [vmem:[#allocation2 + $0x10] sm:$0xf] %vm269_vm0, %v3541_v0  ;;  %v243_v17 = vld [vmem:[%s3648_s22 + $0x18] sm:$0xf]  ;;  %v388_v18 = vshrl.u32 %v244_v14, 16  ;;  %v417_v27 = vshll.u32 %v247_v12, 16 }
  0x11   : > { %276 = vst.msk [vmem:[#allocation2 + $0x14] sm:$0x1] %vm272_vm1, %v3541_v0  ;;  %v3671_v19 = vld [vmem:[%s3648_s22 + $0xc] sm:$0xf]  ;;  %v380_v20 = vshrl.u32 %v243_v17, 16  ;;  %v3680_v22 = vrot.slane %v414_v15, 7 }
  0x12   : > { %277 = vst.msk [vmem:[#allocation2 + $0x18] sm:$0xf] %vm269_vm0, %v3541_v0  ;;  %v3676_v21 = vld [vmem:[%s3648_s22 + $0x8] sm:$0xf]  ;;  %v3682_v23 = vrot.slane %v422_v16, 7  ;;  %v3689_v25 = vrot.slane %v388_v18, 7 }
  0x13   : > { %278 = vst.msk [vmem:[#allocation2 + $0x1c] sm:$0xf] %vm269_vm0, %v3541_v0  ;;  %v3685_v24 = vld [vmem:[%s3648_s22 + $0x5c] sm:$0xf]  ;;  %v354_v26 = vshrl.u32 %v3671_v19, 16  ;;  %v346_v28 = vshrl.u32 %v3676_v21, 16  ;;  %v3744_v50 = vor.u32 %v417_v27, %v3680_v22 }
  0x14   : > { %v3240_v1 = vld [vmem:[#allocation2] sm:$0xff]   ;;  %279 = vst.msk [vmem:[#allocation2 + $0x20] sm:$0x1] %vm272_vm1, %v3541_v0  ;;  %v3696_v29 = vld [vmem:[%s3648_s22 + $0x3c] sm:$0xf]  ;;  %v382_v30 = vrot.slane %v380_v20, 7 }
  0x15   : > { %v798_v2 = vld [vmem:[#allocation2 + $0x8] sm:$0x1]  ;;  %v1091_v3 = vshll.u32 %v3240_v1, 16  ;;  %280 = vst.msk [vmem:[#allocation2 + $0x24] sm:$0xf] %vm269_vm0, %v3541_v0  ;;  %v1089_v5 = vshrl.u32 %v3240_v1, 16 }
  0x16   : > { %v1055_v4 = vunpack.c.l.b16 %v798_v2  ;;  %281 = vst.msk [vmem:[#allocation2 + $0x28] sm:$0xf] %vm269_vm0, %v3541_v0  ;;  %v3701_v31 = vld [vmem:[%s3648_s22 + $0x58] sm:$0xf]  ;;  %v524_v32 = vshrl.u32 %v3685_v24, 16  ;;  %v420_v33 = vrot.slane %v3680_v22, 4 }
  0x17   : > { %v1093_v6 = vrot.slane %v1091_v3, 1  ;;  %282 = vst.msk [vmem:[#allocation2 + $0x2c] sm:$0x1] %vm272_vm1, %v3541_v0  ;;  %v425_v34 = vshll.u32 %v248_v13, 16  ;;  %v383_v35 = vshll.u32 %v243_v17, 16  ;;  %v391_v36 = vshll.u32 %v244_v14, 16 }
  0x18   : > { %v3615_v7 = vpack.c.b16 %v1055_v4, %v1055_v4  ;;  %283 = vst.msk [vmem:[#allocation2 + $0x30] sm:$0xf] %vm269_vm0, %v3541_v0  ;;  %v429_v37 = vrot.slane %v3682_v23, 4  ;;  %v395_v38 = vrot.slane %v3689_v25, 4  ;;  %v3711_v39 = vrot.slane %v354_v26, 7  ;;  %s3208_s14 = sshll.u32 %s5214_s2, 1 }
  0x19   : > { %284 = vst.msk [vmem:[#allocation2 + $0x34] sm:$0xf] %vm269_vm0, %v3541_v0  ;;  %v1094_v8 = vor.u32 %v1093_v6, %v1089_v5  ;;  %v456_v40 = vshrl.u32 %v3696_v29, 16  ;;  %v3716_v41 = vrot.slane %v346_v28, 7  ;;  %v516_v42 = vshrl.u32 %v3701_v31, 16  ;;  %s235_s17 = scalar_lea.vmem %s5206_s5, %s3208_s14 }
  0x1a   : > { %v1096_v9 = vshll.u32 %v3615_v7, 16  ;;  %285 = vst.msk [vmem:[#allocation2 + $0x38] sm:$0x1] %vm272_vm1, %v3541_v0  ;;  %v3720_v43 = vld [vmem:[%s3648_s22 + $0x38] sm:$0xf]  ;;  %v386_v45 = vrot.slane %v382_v30, 4  ;;  %v427_v51 = vor.u32 %v425_v34, %v3682_v23  ;;  %v3747_v52 = vor.u32 %v383_v35, %v382_v30 }
  0x1b   : > { %286 = vst.msk [vmem:[#allocation2 + $0x3c] sm:$0xf] %vm269_vm0, %v3541_v0  ;;  %v3730_v47 = vrot.slane %v524_v32, 7  ;;  %v3733_v48 = vld [vmem:[%s3648_s22 + $0x4c] sm:$0xf]  ;;  %v393_v53 = vor.u32 %v391_v36, %v3689_v25  ;;  %v349_v57 = vshll.u32 %v3676_v21, 16 }
  0x1c   : > { %v1098_v10 = vrot.slane %v1096_v9, 1  ;;  %287 = vst.msk [vmem:[#allocation2 + $0x40] sm:$0xf] %vm269_vm0, %v3541_v0  ;;  %v3753_v55 = vld [vmem:[%s3648_s22 + $0x48] sm:$0xf]  ;;  %v357_v58 = vshll.u32 %v3671_v19, 16 }
  0x1d   : > { %288 = vst.msk [vmem:[#allocation2 + $0x44] sm:$0x1] %vm272_vm1, %v3541_v0  ;;  %v448_v59 = vshrl.u32 %v3720_v43, 16  ;;  %v458_v60 = vrot.slane %v456_v40, 7  ;;  %v352_v63 = vrot.slane %v3716_v41, 4  ;;  %v361_v1 = vrot.slane %v3711_v39, 4 }
  0x1e   : > { %v1099_v11 = vsel %vm1087_vm2, %v1094_v8, %v1098_v10  ;;  %289 = vst.msk [vmem:[#allocation2 + $0x48] sm:$0xf] %vm269_vm0, %v3541_v0  ;;  %v518_v2 = vrot.slane %v516_v42, 7  ;;  %v490_v3 = vshrl.u32 %v3733_v48, 16  ;;  %v665_v4 = vld [vmem:[#allocation2 + $0x20] sm:$0x1]  ;;  %v3783_v10 = vsel %vm3739_vm7, %v420_v33, %v427_v51 }
  0x1f   : > { %1280 = vrot.lane.b32.xlu0 %v1099_v11, %s3542_s19  ;;  %290 = vst.msk [vmem:[#allocation2 + $0x4c] sm:$0xf] %vm269_vm0, %v3541_v0  ;;  %v3750_v54 = vld [vmem:[#allocation2 + $0x30] sm:$0xf]  ;;  %v519_v5 = vshll.u32 %v3701_v31, 16  ;;  %v527_v6 = vshll.u32 %v3685_v24, 16  ;;  %v3787_v11 = vsel %vm3739_vm7, %v386_v45, %v393_v53  ;;  %v3812_v21 = vor.u32 %v349_v57, %v3716_v41 }
  0x20   : > { %291 = vst.msk [vmem:[#allocation2 + $0x50] sm:$0x1] %vm272_vm1, %v3541_v0  ;;  %v531_v8 = vrot.slane %v3730_v47, 4  ;;  %v482_v9 = vshrl.u32 %v3753_v55, 16  ;;  %v676_v12 = vsel %vm3759_vm8, %v3747_v52, %v3750_v54  ;;  %v3798_v14 = vld [vmem:[%s3648_s22 + $0x68] sm:$0xf]  ;;  %v359_v22 = vor.u32 %v357_v58, %v3711_v39 }
  0x21   : > { %292 = vst.msk [vmem:[#allocation2 + $0x54] sm:$0xf] %vm269_vm0, %v3541_v0  ;;  %v679_v46 = vld [vmem:[#allocation2 + $0x38] sm:$0x1]  ;;  %v3801_v15 = vld [vmem:[%s3648_s22 + $0x6c] sm:$0xf]  ;;  %v3838_v32 = vsel %vm3726_vm6, %v361_v1, %v665_v4  ;;  %v529_v33 = vor.u32 %v527_v6, %v3730_v47 }
  0x22   : > { %293 = vst.msk [vmem:[#allocation2 + $0x58] sm:$0xf] %vm269_vm0, %v3541_v0  ;;  %v3795_v13 = vsel %vm3726_vm6, %v395_v38, %v679_v46  ;;  %v3805_v16 = vld [vmem:[#allocation2 + $0x18] sm:$0xf]  ;;  %v450_v17 = vrot.slane %v448_v59, 7  ;;  %v451_v18 = vshll.u32 %v3720_v43, 16  ;;  %v3854_v40 = vsel %vm3739_vm7, %v352_v63, %v359_v22 }
  0x23   : > { %294 = vst.msk [vmem:[#allocation2 + $0x5c] sm:$0x1] %vm272_vm1, %v3541_v0  ;;  %v459_v19 = vshll.u32 %v3696_v29, 16  ;;  %v463_v20 = vrot.slane %v458_v60, 4  ;;  %v550_v24 = vshrl.u32 %v3798_v14, 16  ;;  %v558_v25 = vshrl.u32 %v3801_v15, 16 }
  0x24   : > { %295 = vst.msk [vmem:[#allocation2 + $0x60] sm:$0xf] %vm269_vm0, %v3541_v0  ;;  %v3818_v26 = vld [vmem:[%s3648_s22 + $0x10] sm:$0xf]  ;;  %v522_v29 = vrot.slane %v518_v2, 4  ;;  %v3832_v31 = vrot.slane %v482_v9, 7  ;;  %v3848_v36 = vor.u32 %v451_v18, %v450_v17  ;;  %v662_v41 = vsel %vm3759_vm8, %v3812_v21, %v3805_v16 }
  0x25   : > { %296 = vst.msk [vmem:[#allocation2 + $0x64] sm:$0xf] %vm269_vm0, %v3541_v0  ;;  %v3768_v61 = vld [vmem:[#allocation2 + $0x48] sm:$0xf]  ;;  %v485_v34 = vshll.u32 %v3753_v55, 16  ;;  %v363_v35 = vshrl.u32 %v3818_v26, 16  ;;  %v461_v38 = vor.u32 %v459_v19, %v458_v60  ;;  %v3868_v46 = vor.u32 %v519_v5, %v518_v2 }
  0x26   : > { %297 = vst.msk [vmem:[#allocation2 + $0x68] sm:$0x1] %vm272_vm1, %v3541_v0  ;;  %v690_v27 = vsel %vm3759_vm8, %v3744_v50, %v3768_v61  ;;  %v3843_v23 = vld [vmem:[%s3648_s22 + $0x14] sm:$0xf]  ;;  %v492_v39 = vrot.slane %v490_v3, 7  ;;  %v3862_v43 = vrot.slane %v550_v24, 7  ;;  %v3882_v57 = vsel %vm3739_vm7, %v522_v29, %v529_v33 }
  0x27   : > { %298 = vst.msk [vmem:[#allocation2 + $0x6c] sm:$0xf] %vm269_vm0, %v3541_v0  ;;  %v693_v62 = vld [vmem:[#allocation2 + $0x50] sm:$0x1]  ;;  %v3864_v45 = vrot.slane %v558_v25, 7  ;;  %v493_v51 = vshll.u32 %v3733_v48, 16  ;;  %v3885_v58 = vor.u32 %v485_v34, %v3832_v31 }
  0x28   : > { %299 = vst.msk [vmem:[#allocation2 + $0x70] sm:$0xf] %vm269_vm0, %v3541_v0  ;;  %v3830_v28 = vsel %vm3726_vm6, %v429_v37, %v693_v62  ;;  %v454_v37 = vrot.slane %v450_v17, 4  ;;  %v371_v55 = vshrl.u32 %v3843_v23, 16  ;;  %v488_v59 = vrot.slane %v3832_v31, 4 }
  0x29   : > { %300 = vst.msk [vmem:[#allocation2 + $0x74] sm:$0x1] %vm272_vm1, %v3541_v0  ;;  %v3888_v61 = vrot.slane %v363_v35, 7  ;;  %v3891_v48 = vld [vmem:[%s3648_s22] sm:$0xf]  ;;  %v497_v1 = vrot.slane %v492_v39, 4  ;;  %v495_v24 = vor.u32 %v493_v51, %v492_v39 }
  0x2a   : > { %301 = vst.msk [vmem:[#allocation2 + $0x78] sm:$0xf] %vm269_vm0, %v3541_v0  ;;  %v3897_v62 = vsel %vm3739_vm7, %v454_v37, %v461_v38  ;;  %v553_v2 = vshll.u32 %v3798_v14, 16  ;;  %v238_v3 = vld [vmem:[%s3648_s22 + $0x4] sm:$0xf]  ;;  %v556_v4 = vrot.slane %v3862_v43, 4 }
  0x2b   : > { %302 = vst.msk [vmem:[#allocation2 + $0x7c] sm:$0xf] %vm269_vm0, %v3541_v0  ;;  %v3860_v42 = vld [vmem:[#allocation2 + $0x60] sm:$0xf]  ;;  %v561_v5 = vshll.u32 %v3801_v15, 16  ;;  %v565_v6 = vrot.slane %v3864_v45, 4 }
  0x2c   : > { %303 = vst.msk [vmem:[#allocation2 + $0x80] sm:$0x1] %vm272_vm1, %v3541_v0  ;;  %v704_v63 = vsel %vm3759_vm8, %v3848_v36, %v3860_v42  ;;  %v366_v9 = vshll.u32 %v3818_v26, 16  ;;  %v373_v17 = vrot.slane %v371_v55, 7  ;;  %v374_v18 = vshll.u32 %v3843_v23, 16 }
  0x2d   : > { %304 = vst.msk [vmem:[#allocation2 + $0x84] sm:$0xf] %vm269_vm0, %v3541_v0  ;;  %v707_v30 = vld [vmem:[#allocation2 + $0x68] sm:$0x1]  ;;  %v329_v14 = vshrl.u32 %v3891_v48, 16  ;;  %v337_v19 = vshrl.u32 %v238_v3, 16  ;;  %v563_v35 = vor.u32 %v561_v5, %v3864_v45 }
  0x2e   : > { %305 = vst.msk [vmem:[#allocation2 + $0x88] sm:$0xf] %vm269_vm0, %v3541_v0  ;;  %v3872_v50 = vsel %vm3726_vm6, %v463_v20, %v707_v30  ;;  %v369_v25 = vrot.slane %v3888_v61, 4  ;;  %v340_v26 = vshll.u32 %v238_v3, 16  ;;  %v3932_v31 = vld [vmem:[#allocation2 + $0x24] sm:$0xf]  ;;  %v3940_v37 = vor.u32 %v366_v9, %v3888_v61 }
  0x2f   : > { %306 = vst.msk [vmem:[#allocation2 + $0x8c] sm:$0x1] %vm272_vm1, %v3541_v0  ;;  %v331_v33 = vrot.slane %v329_v14, 7  ;;  %v3934_v34 = vrot.slane %v337_v19, 7  ;;  %v246_v23 = vld [vmem:[%s3648_s22 + $0x24] sm:$0xf]  ;;  %v3974_v47 = vsel %vm3739_vm7, %v556_v4, %v563_v35 }
  0x30   : > { %307 = vst.msk [vmem:[#allocation2 + $0x90] sm:$0xf] %vm269_vm0, %v3541_v0  ;;  %v405_v39 = vshrl.u32 %v246_v23, 16  ;;  %v378_v51 = vrot.slane %v373_v17, 4  ;;  %v672_v55 = vld [vmem:[#allocation2 + $0x2c] sm:$0x1] }
  0x31   : > { %308 = vst.msk [vmem:[#allocation2 + $0x94] sm:$0xf] %vm269_vm0, %v3541_v0  ;;  %v3875_v53 = vld [vmem:[#allocation2 + $0x78] sm:$0xf]  ;;  %v3965_v3 = vld [vmem:[%s3648_s22 + $0x34] sm:$0xf] }
  0x32   : > { %309 = vst.msk [vmem:[#allocation2 + $0x98] sm:$0x1] %vm272_vm1, %v3541_v0  ;;  %v718_v15 = vsel %vm3759_vm8, %v3885_v58, %v3875_v53  ;;  %v3988_v16 = vld [vmem:[#allocation2 + $0xc] sm:$0xf]  ;;  %v439_v5 = vshrl.u32 %v3965_v3, 16  ;;  %vm2465_vm10 = vcmask 23552  }
  0x33   : > { %310 = vst.msk [vmem:[#allocation2 + $0x9c] sm:$0xf] %vm269_vm0, %v3541_v0  ;;  %v721_v60 = vld [vmem:[#allocation2 + $0x80] sm:$0x1]  ;;  %v4005_v14 = vld [vmem:[#allocation2 + $0x3c] sm:$0xf] }
  0x34   : > { %311 = vst.msk [vmem:[#allocation2 + $0xa0] sm:$0xf] %vm269_vm0, %v3541_v0  ;;  %v3925_v29 = vsel %vm3726_vm6, %v497_v1, %v721_v60  ;;  %v335_v60 = vrot.slane %v331_v33, 4  ;;  %v407_v1 = vrot.slane %v405_v39, 7  ;;  %v686_v19 = vld [vmem:[#allocation2 + $0x44] sm:$0x1] }
  0x35   : > { %312 = vst.msk [vmem:[#allocation2 + $0xa4] sm:$0x1] %vm272_vm1, %v3541_v0  ;;  %v442_v39 = vshll.u32 %v3965_v3, 16  ;;  %v4049_v42 = vld [vmem:[#allocation2 + $0x54] sm:$0xf]  ;;  %vm2498_vm11 = vcmask 48128  }
  0x36   : > { %313 = vst.msk [vmem:[#allocation2 + $0xa8] sm:$0xf] %vm269_vm0, %v3541_v0  ;;  %v700_v53 = vld [vmem:[#allocation2 + $0x5c] sm:$0x1]  ;;  %vm2777_vm12 = vcmask 1044480   ;;  %vm2778_vm13 = vcmask 1045504  }
  0x37   : > { %314 = vst.msk [vmem:[#allocation2 + $0xac] sm:$0xf] %vm269_vm0, %v3541_v0  ;;  %v731_v20 = vld [vmem:[#allocation2 + $0x90] sm:$0xf]  ;;  %vm2531_vm14 = vcmask 72704   ;;  %vm2564_vm15 = vcmask 97280  }
  0x38   : > { %315 = vst.msk [vmem:[#allocation2 + $0xb0] sm:$0x1] %vm272_vm1, %v3541_v0  ;;  %v732_v52 = vsel %vm3759_vm8, %v3868_v46, %v731_v20  ;;  %v669_v46 = vsel %vm3759_vm8, %v3940_v37, %v3932_v31  ;;  %vm2630_vm3 = vcmask 146432   ;;  %vm2663_vm4 = vcmask 171008  }
  0x39   : > { %316 = vst.msk [vmem:[#allocation2 + $0xb4] sm:$0xf] %vm269_vm0, %v3541_v0  ;;  %v735_v22 = vld [vmem:[#allocation2 + $0x98] sm:$0x1]  ;;  %vm2696_vm5 = vcmask 195584  }
  0x3a   : > { %317 = vst.msk [vmem:[#allocation2 + $0xb8] sm:$0xf] %vm269_vm0, %v3541_v0  ;;  %v736_v54 = vsel %vm3726_vm6, %v531_v8, %v735_v22 }
  0x3b   : > { %318 = vst.msk [vmem:[#allocation2 + $0xbc] sm:$0x1] %vm272_vm1, %v3541_v0 }
  0x3c   : > { %319 = vst.msk [vmem:[#allocation2 + $0xc0] sm:$0xf] %vm269_vm0, %v3541_v0 }
  0x3d   : > { %320 = vst.msk [vmem:[#allocation2 + $0xc4] sm:$0xf] %vm269_vm0, %v3541_v0  ;;  %v3930_v30 = vld [vmem:[#allocation2 + $0xa8] sm:$0xf] }
  0x3e   : > { %321 = vst.msk [vmem:[#allocation2 + $0xc8] sm:$0x1] %vm272_vm1, %v3541_v0 }
  0x3f   : > { %322 = vst.msk [vmem:[#allocation2 + $0xcc] sm:$0xf] %vm269_vm0, %v3541_v0 }
  0x40   : > { %323 = vst.msk [vmem:[#allocation2 + $0xd0] sm:$0xf] %vm269_vm0, %v3541_v0 }
  0x41   : > { %324 = vst.msk [vmem:[#allocation2 + $0xd4] sm:$0x1] %vm272_vm1, %v3541_v0  ;;  %v245_v0 = vld [vmem:[%s3648_s22 + $0x20] sm:$0xf]  ;;  %vm2597_vm1 = vcmask 121856  }
  0x42   : > { %691 = vst [vmem:[#allocation2 + $0x48] sm:$0xf] %v690_v27  ;;  %v3928_v27 = vor.u32 %v553_v2, %v3862_v43  ;;  %v397_v38 = vshrl.u32 %v245_v0, 16  ;;  %v376_v43 = vor.u32 %v374_v18, %v373_v17  ;;  %v400_v45 = vshll.u32 %v245_v0, 16 }
  0x43   : > { %692 = vst.msk [vmem:[#allocation2 + $0x4c] sm:$0xf] %vm269_vm0, %v3783_v10  ;;  %v749_v10 = vld [vmem:[#allocation2 + $0xb0] sm:$0x1]  ;;  %v408_v2 = vshll.u32 %v246_v23, 16  ;;  %v4003_v17 = vsel %vm3726_vm6, %v378_v51, %v672_v55 }
  0x44   : > { %695 = vst [vmem:[#allocation2 + $0x50] sm:$0x1] %v3830_v28  ;;  %v332_v28 = vshll.u32 %v3891_v48, 16  ;;  %v399_v61 = vrot.slane %v397_v38, 7  ;;  %v249_v48 = vld [vmem:[%s3648_s22 + $0x30] sm:$0xf]  ;;  %v746_v8 = vsel %vm3759_vm8, %v3928_v27, %v3930_v30  ;;  %v3999_v9 = vsel %vm3739_vm7, %v369_v25, %v376_v43 }
  0x45   : > { %677 = vst [vmem:[#allocation2 + $0x30] sm:$0xf] %v676_v12  ;;  %v3960_v12 = vsel %vm3739_vm7, %v488_v59, %v495_v24  ;;  %v658_v59 = vld [vmem:[#allocation2 + $0x14] sm:$0x1]  ;;  %v431_v4 = vshrl.u32 %v249_v48, 16  ;;  %v410_v18 = vor.u32 %v408_v2, %v407_v1  ;;  %v412_v25 = vrot.slane %v407_v1, 4 }
  0x46   : > { %678 = vst.msk [vmem:[#allocation2 + $0x34] sm:$0xf] %vm269_vm0, %v3787_v11  ;;  %v342_v11 = vor.u32 %v340_v26, %v3934_v34  ;;  %v3992_v21 = vor.u32 %v332_v28, %v331_v33  ;;  %v4021_v38 = vrot.slane %v439_v5, 7 }
  0x47   : > { %681 = vst [vmem:[#allocation2 + $0x38] sm:$0x1] %v3795_v13  ;;  %v3982_v13 = vsel %vm3726_vm6, %v565_v6, %v749_v10  ;;  %v4015_v33 = vrot.slane %v431_v4, 7  ;;  %v4047_v36 = vsel %vm3726_vm6, %v412_v25, %v686_v19 }
  0x48   : > { %663 = vst [vmem:[#allocation2 + $0x18] sm:$0xf] %v662_v41  ;;  %v344_v41 = vrot.slane %v3934_v34, 4  ;;  %v4009_v24 = vsel %vm3739_vm7, %v335_v60, %v342_v11  ;;  %v434_v34 = vshll.u32 %v249_v48, 16  ;;  %v653_v10 = vsel %vm3759_vm8, %v3992_v21, %v3988_v16 }
  0x49   : > { %664 = vst.msk [vmem:[#allocation2 + $0x1c] sm:$0xf] %vm269_vm0, %v3854_v40  ;;  %v403_v40 = vrot.slane %v399_v61, 4 }
  0x4a   : > { %v3337_v6 = vld [vmem:[#allocation2 + $0x48] sm:$0xff]   ;;  %667 = vst [vmem:[#allocation2 + $0x20] sm:$0x1] %v3838_v32  ;;  %v4011_v32 = vor.u32 %v400_v45, %v399_v61  ;;  %v4033_v55 = vsel %vm3726_vm6, %v344_v41, %v658_v59  ;;  %v437_v41 = vrot.slane %v4015_v33, 4  ;;  %v444_v59 = vor.u32 %v442_v39, %v4021_v38 }
  0x4b   : > { %v804_v20 = vld [vmem:[#allocation2 + $0x50] sm:$0x1]  ;;  %v1163_v22 = vshll.u32 %v3337_v6, 16  ;;  %733 = vst [vmem:[#allocation2 + $0x90] sm:$0xf] %v732_v52  ;;  %v1161_v0 = vshrl.u32 %v3337_v6, 16  ;;  %v4037_v28 = vsel %vm3739_vm7, %v403_v40, %v410_v18 }
  0x4c   : > { %v1061_v26 = vunpack.c.l.b16 %v804_v20  ;;  %734 = vst.msk [vmem:[#allocation2 + $0x94] sm:$0xf] %vm269_vm0, %v3882_v57  ;;  %v683_v61 = vsel %vm3759_vm8, %v4011_v32, %v4005_v14  ;;  %v446_v6 = vrot.slane %v4021_v38, 4 }
  0x4d   : > { %v1165_v23 = vrot.slane %v1163_v22, 1  ;;  %v3336_v35 = vld [vmem:[#allocation2 + $0x30] sm:$0xff]   ;;  %737 = vst [vmem:[#allocation2 + $0x98] sm:$0x1] %v736_v54 }
  0x4e   : > { %v4024_v43 = vpack.c.b16 %v1061_v26, %v1061_v26  ;;  %v802_v51 = vld [vmem:[#allocation2 + $0x38] sm:$0x1]  ;;  %v1139_v57 = vshll.u32 %v3336_v35, 16  ;;  %705 = vst [vmem:[#allocation2 + $0x60] sm:$0xf] %v704_v63  ;;  %v1137_v60 = vshrl.u32 %v3336_v35, 16 }
  0x4f   : > { %v1059_v45 = vunpack.c.l.b16 %v802_v51  ;;  %706 = vst.msk [vmem:[#allocation2 + $0x64] sm:$0xf] %vm269_vm0, %v3897_v62  ;;  %v253_v63 = vld [vmem:[%s3648_s22 + $0x40] sm:$0xf]  ;;  %v1166_v1 = vor.u32 %v1165_v23, %v1161_v0  ;;  %v4055_v62 = vor.u32 %v434_v34, %v4015_v33 }
  0x50   : > { %v1168_v2 = vshll.u32 %v4024_v43, 16  ;;  %v1141_v52 = vrot.slane %v1139_v57, 1  ;;  %v3335_v54 = vld [vmem:[#allocation2 + $0x18] sm:$0xff]   ;;  %709 = vst [vmem:[#allocation2 + $0x68] sm:$0x1] %v3872_v50  ;;  %v465_v58 = vshrl.u32 %v253_v63, 16 }
  0x51   : > { %v4057_v11 = vpack.c.b16 %v1059_v45, %v1059_v45  ;;  %v800_v48 = vld [vmem:[#allocation2 + $0x20] sm:$0x1]  ;;  %v1115_v3 = vshll.u32 %v3335_v54, 16  ;;  %719 = vst [vmem:[#allocation2 + $0x78] sm:$0xf] %v718_v15  ;;  %v1113_v50 = vshrl.u32 %v3335_v54, 16 }
  0x52   : > { %v1170_v4 = vrot.slane %v1168_v2, 1  ;;  %v1057_v5 = vunpack.c.l.b16 %v800_v48  ;;  %720 = vst.msk [vmem:[#allocation2 + $0x7c] sm:$0xf] %vm269_vm0, %v3960_v12  ;;  %v1142_v40 = vor.u32 %v1141_v52, %v1137_v60  ;;  %v697_v12 = vsel %vm3759_vm8, %v4055_v62, %v4049_v42  ;;  %v710_v54 = vld [vmem:[#allocation2 + $0x6c] sm:$0xf] }
  0x53   : > { %v1144_v18 = vshll.u32 %v4057_v11, 16  ;;  %v1117_v19 = vrot.slane %v1115_v3, 1  ;;  %v3340_v20 = vld [vmem:[#allocation2 + $0x90] sm:$0xff]   ;;  %723 = vst [vmem:[#allocation2 + $0x80] sm:$0x1] %v3925_v29  ;;  %v4086_v34 = vrot.slane %v465_v58, 7 }
  0x54   : > { %v1171_v15 = vsel %vm1087_vm2, %v1166_v1, %v1170_v4  ;;  %v4072_v22 = vpack.c.b16 %v1057_v5, %v1057_v5  ;;  %v810_v25 = vld [vmem:[#allocation2 + $0x98] sm:$0x1]  ;;  %v1235_v26 = vshll.u32 %v3340_v20, 16  ;;  %747 = vst [vmem:[#allocation2 + $0xa8] sm:$0xf] %v746_v8  ;;  %v1233_v33 = vshrl.u32 %v3340_v20, 16 }
  0x55   : > { %1292 = vrot.lane.b32.xlu0 %v1171_v15, %s3542_s19  ;;  %v1146_v29 = vrot.slane %v1144_v18, 1  ;;  %v1067_v0 = vunpack.c.l.b16 %v810_v25  ;;  %748 = vst.msk [vmem:[#allocation2 + $0xac] sm:$0xf] %vm269_vm0, %v3974_v47  ;;  %v1118_v23 = vor.u32 %v1117_v19, %v1113_v50  ;;  %v468_v8 = vshll.u32 %v253_v63, 16  ;;  %v254_v1 = vld [vmem:[%s3648_s22 + $0x44] sm:$0xf] }
  0x56   : > { %v1120_v35 = vshll.u32 %v4072_v22, 16  ;;  %v1237_v27 = vrot.slane %v1235_v26, 1  ;;  %v3338_v30 = vld [vmem:[#allocation2 + $0x60] sm:$0xff]   ;;  %751 = vst [vmem:[#allocation2 + $0xb0] sm:$0x1] %v3982_v13  ;;  %v445_v47 = vsel %vm3739_vm7, %v437_v41, %v444_v59  ;;  %v701_v63 = vsel %vm3726_vm6, %v446_v6, %v700_v53 }
  0x57   : > { %v1147_v38 = vsel %vm1087_vm2, %v1142_v40, %v1146_v29  ;;  %v4091_v39 = vpack.c.b16 %v1067_v0, %v1067_v0  ;;  %v806_v51 = vld [vmem:[#allocation2 + $0x68] sm:$0x1]  ;;  %v1187_v57 = vshll.u32 %v3338_v30, 16  ;;  %670 = vst [vmem:[#allocation2 + $0x24] sm:$0xf] %v669_v46  ;;  %v1185_v60 = vshrl.u32 %v3338_v30, 16 }
  0x58   : > { %1288 = vrot.lane.b32.xlu2 %v1147_v38, %s3542_s19  ;;  %v1122_v45 = vrot.slane %v1120_v35, 1  ;;  %v1063_v13 = vunpack.c.l.b16 %v806_v51  ;;  %671 = vst.msk [vmem:[#allocation2 + $0x28] sm:$0xf] %vm269_vm0, %v3999_v9  ;;  %v1238_v2 = vor.u32 %v1237_v27, %v1233_v33  ;;  %v470_v52 = vor.u32 %v468_v8, %v4086_v34  ;;  %v4119_v4 = vld [vmem:[%s3648_s22 + $0x50] sm:$0xf] }
  0x59   : > { %v1240_v31 = vshll.u32 %v4091_v39, 16  ;;  %v1189_v37 = vrot.slane %v1187_v57, 1  ;;  %v3339_v46 = vld [vmem:[#allocation2 + $0x78] sm:$0xff]   ;;  %674 = vst [vmem:[#allocation2 + $0x2c] sm:$0x1] %v4003_v17  ;;  %v471_v59 = vrot.slane %v4086_v34, 4 }
  0x5a   : > { %v1123_v48 = vsel %vm1087_vm2, %v1118_v23, %v1122_v45  ;;  %v4110_v3 = vpack.c.b16 %v1063_v13, %v1063_v13  ;;  %v808_v9 = vld [vmem:[#allocation2 + $0x80] sm:$0x1]  ;;  %v1211_v41 = vshll.u32 %v3339_v46, 16  ;;  %654 = vst [vmem:[#allocation2 + $0xc] sm:$0xf] %v653_v10  ;;  %v1209_v50 = vshrl.u32 %v3339_v46, 16 }
  0x5b   : > { %1284 = vrot.lane.b32.xlu1 %v1123_v48, %s3542_s19  ;;  %v1242_v17 = vrot.slane %v1240_v31, 1  ;;  %v1065_v5 = vunpack.c.l.b16 %v808_v9  ;;  %655 = vst.msk [vmem:[#allocation2 + $0x10] sm:$0xf] %vm269_vm0, %v4009_v24  ;;  %v473_v6 = vshrl.u32 %v254_v1, 16  ;;  %v1190_v40 = vor.u32 %v1189_v37, %v1185_v60  ;;  %v714_v38 = vld [vmem:[#allocation2 + $0x74] sm:$0x1] }
  0x5c   : > { %v1192_v18 = vshll.u32 %v4110_v3, 16  ;;  %v1213_v19 = vrot.slane %v1211_v41, 1  ;;  %v3341_v20 = vld [vmem:[#allocation2 + $0xa8] sm:$0xff]   ;;  %660 = vst [vmem:[#allocation2 + $0x14] sm:$0x1] %v4033_v55  ;;  %v476_v16 = vshll.u32 %v254_v1, 16  ;;  %v711_v26 = vsel %vm3759_vm8, %v470_v52, %v710_v54 }
  0x5d   : > { %v1243_v21 = vsel %vm1087_vm2, %v1238_v2, %v1242_v17  ;;  %v4127_v10 = vpack.c.b16 %v1065_v5, %v1065_v5  ;;  %v812_v53 = vld [vmem:[#allocation2 + $0xb0] sm:$0x1]  ;;  %v1257_v58 = vshrl.u32 %v3341_v20, 16  ;;  %v1259_v15 = vshll.u32 %v3341_v20, 16  ;;  %684 = vst [vmem:[#allocation2 + $0x3c] sm:$0xf] %v683_v61 }
  0x5e   : > { %1304 = vrot.lane.b32.xlu0 %v1243_v21, %s3542_s19  ;;  %v1194_v24 = vrot.slane %v1192_v18, 1  ;;  %v1069_v25 = vunpack.c.l.b16 %v812_v53  ;;  %685 = vst.msk [vmem:[#allocation2 + $0x40] sm:$0xf] %vm269_vm0, %v4037_v28  ;;  %v475_v55 = vrot.slane %v473_v6, 7  ;;  %v1214_v29 = vor.u32 %v1213_v19, %v1209_v50 }
  0x5f   : > { %v1216_v0 = vshll.u32 %v4127_v10, 16  ;;  %v1261_v33 = vrot.slane %v1259_v15, 1  ;;  %v4140_v23 = vld [vmem:[#allocation2 + $0x24] sm:$0xff]   ;;  %688 = vst [vmem:[#allocation2 + $0x44] sm:$0x1] %v4047_v36  ;;  %v499_v14 = vshrl.u32 %v4119_v4, 16 }
  0x60   : > { %v4142_v35 = vld [vmem:[#allocation2 + $0x24] sm:$0xf0]  ;;  %v1195_v32 = vsel %vm1087_vm2, %v1190_v40, %v1194_v24  ;;  %v4147_v61 = vpack.c.b16 %v1069_v25, %v1069_v25  ;;  %v801_v28 = vld [vmem:[#allocation2 + $0x2c] sm:$0x1]  ;;  %698 = vst [vmem:[#allocation2 + $0x54] sm:$0xf] %v697_v12  ;;  %v478_v36 = vor.u32 %v476_v16, %v475_v55 }
  0x61   : > { %1296 = vrot.lane.b32.xlu2 %v1195_v32, %s3542_s19  ;;  %v1218_v27 = vrot.slane %v1216_v0, 1  ;;  %v1262_v30 = vor.u32 %v1261_v33, %v1257_v58  ;;  %v1058_v8 = vunpack.c.l.b16 %v801_v28  ;;  %699 = vst.msk [vmem:[#allocation2 + $0x58] sm:$0xf] %vm269_vm0, %v445_v47  ;;  %v480_v13 = vrot.slane %v475_v55, 4  ;;  %v258_v0 = vld [vmem:[%s3648_s22 + $0x54] sm:$0xf] }
  0x62   : > { %v1264_v51 = vshll.u32 %v4147_v61, 16  ;;  %v4157_v57 = vld [vmem:[#allocation2 + $0xc] sm:$0xff]   ;;  %702 = vst [vmem:[#allocation2 + $0x5c] sm:$0x1] %v701_v63  ;;  %v4161_v60 = vrot.slane %v499_v14, 7  ;;  %v1125_v1 = vshrl.u32 %v4140_v23, 16  ;;  %v479_v52 = vsel %vm3739_vm7, %v471_v59, %v478_v36 }
  0x63   : > { %v4159_v45 = vld [vmem:[#allocation2 + $0xc] sm:$0xf0]  ;;  %v1219_v42 = vsel %vm1087_vm2, %v1214_v29, %v1218_v27  ;;  %v4164_v62 = vpack.c.b16 %v1058_v8, %v1058_v8  ;;  %v799_v12 = vld [vmem:[#allocation2 + $0x14] sm:$0x1]  ;;  %712 = vst [vmem:[#allocation2 + $0x6c] sm:$0xf] %v711_v26  ;;  %v715_v54 = vsel %vm3726_vm6, %v480_v13, %v714_v38 }
  0x64   : > { %1300 = vrot.lane.b32.xlu1 %v1219_v42, %s3542_s19  ;;  %v1266_v47 = vrot.slane %v1264_v51, 1  ;;  %v1127_v2 = vshll.u32 %v4140_v23, 16  ;;  %v1056_v31 = vunpack.c.l.b16 %v799_v12  ;;  %713 = vst.msk [vmem:[#allocation2 + $0x70] sm:$0xf] %vm269_vm0, %v479_v52  ;;  %v1101_v50 = vshrl.u32 %v4157_v57, 16 }
  0x65   : > { %v1132_v37 = vshll.u32 %v4164_v62, 16  ;;  %v4170_v63 = vld [vmem:[#allocation2 + $0x3c] sm:$0xff]   ;;  %v1103_v6 = vshll.u32 %v4157_v57, 16  ;;  %716 = vst [vmem:[#allocation2 + $0x74] sm:$0x1] %v715_v54  ;;  %v502_v20 = vshll.u32 %v4119_v4, 16 }
  0x66   : > { %v4172_v46 = vld [vmem:[#allocation2 + $0x3c] sm:$0xf0]  ;;  %v1267_v48 = vsel %vm1087_vm2, %v1262_v30, %v1266_v47  ;;  %v1129_v9 = vrot.slane %v1127_v2, 1  ;;  %v4181_v41 = vpack.c.b16 %v1056_v31, %v1056_v31  ;;  %v803_v17 = vld [vmem:[#allocation2 + $0x44] sm:$0x1]  ;;  %v1149_v55 = vshrl.u32 %v4170_v63, 16 }
  0x67   : > { %v1134_v5 = vrot.slane %v1132_v37, 1  ;;  %v1060_v40 = vunpack.c.l.b16 %v803_v17  ;;  %v1105_v16 = vrot.slane %v1103_v6, 1  ;;  %v1151_v26 = vshll.u32 %v4170_v63, 16  ;;  %v724_v38 = vld [vmem:[#allocation2 + $0x84] sm:$0xf] }
  0x68   : > { %v1130_v34 = vor.u32 %v1129_v9, %v1125_v1  ;;  %v1108_v59 = vshll.u32 %v4181_v41, 16  ;;  %v4187_v18 = vld [vmem:[#allocation2 + $0x54] sm:$0xff]   ;;  %v504_v33 = vor.u32 %v502_v20, %v4161_v60  ;;  %v505_v14 = vrot.slane %v4161_v60, 4  ;;  %v261_v2 = vld [vmem:[%s3648_s22 + $0x60] sm:$0xf] }
  0x69   : > { %v4189_v19 = vld [vmem:[#allocation2 + $0x54] sm:$0xf0]  ;;  %1308 = vrot.lane.b32.xlu2 %v1267_v48, %s3542_s19  ;;  %v805_v21 = vld [vmem:[#allocation2 + $0x5c] sm:$0x1]  ;;  %v4194_v15 = vpack.c.b16 %v1060_v40, %v1060_v40  ;;  %v1106_v25 = vor.u32 %v1105_v16, %v1101_v50  ;;  %v1153_v28 = vrot.slane %v1151_v26, 1  ;;  %v1173_v27 = vshrl.u32 %v4187_v18, 16 }
  0x6a   : > { %v1135_v53 = vsel %vm1087_vm2, %v1130_v34, %v1134_v5  ;;  %v1110_v58 = vrot.slane %v1108_v59, 1  ;;  %v1062_v24 = vunpack.c.l.b16 %v805_v21  ;;  %v1175_v30 = vshll.u32 %v4187_v18, 16  ;;  %v728_v54 = vld [vmem:[#allocation2 + $0x8c] sm:$0x1]  ;;  %v262_v50 = vld [vmem:[%s3648_s22 + $0x64] sm:$0xf] }
  0x6b   : > { %v1156_v29 = vshll.u32 %v4194_v15, 16  ;;  %v4208_v8 = vld [vmem:[#allocation2 + $0x6c] sm:$0xff]   ;;  %v1154_v42 = vor.u32 %v1153_v28, %v1149_v55  ;;  %v507_v1 = vshrl.u32 %v258_v0, 16  ;;  %v510_v37 = vshll.u32 %v258_v0, 16  ;;  %v738_v28 = vld [vmem:[#allocation2 + $0x9c] sm:$0xf] }
  0x6c   : > { %1286 = vrot.lane.b32.xlu1 %v1135_v53, %s3542_s19  ;;  %v4200_v4 = vpack.c.b16 %v1062_v24, %v1062_v24  ;;  %v1111_v32 = vsel %vm1087_vm2, %v1106_v25, %v1110_v58  ;;  %v4210_v36 = vld [vmem:[#allocation2 + $0x6c] sm:$0xf0]  ;;  %v807_v60 = vld [vmem:[#allocation2 + $0x74] sm:$0x1]  ;;  %v1177_v12 = vrot.slane %v1175_v30, 1  ;;  %v725_v52 = vsel %vm3759_vm8, %v504_v33, %v724_v38 }
  0x6d   : > { %1282 = vrot.lane.b32.xlu0 %v1111_v32, %s3542_s19  ;;  %v1158_v51 = vrot.slane %v1156_v29, 1  ;;  %v1064_v47 = vunpack.c.l.b16 %v807_v60  ;;  %v509_v5 = vrot.slane %v507_v1, 7  ;;  %726 = vst [vmem:[#allocation2 + $0x84] sm:$0xf] %v725_v52  ;;  %v1197_v6 = vshrl.u32 %v4208_v8, 16 }
  0x6e   : > { %v1180_v13 = vshll.u32 %v4200_v4, 16  ;;  %v1178_v9 = vor.u32 %v1177_v12, %v1173_v27  ;;  %v1199_v34 = vshll.u32 %v4208_v8, 16  ;;  %v533_v59 = vshrl.u32 %v261_v2, 16  ;;  %v265_v20 = vld [vmem:[%s3648_s22 + $0x70] sm:$0xf] }
  0x6f   : > { %v1159_v48 = vsel %vm1087_vm2, %v1154_v42, %v1158_v51  ;;  %v4218_v17 = vpack.c.b16 %v1064_v47, %v1064_v47  ;;  %v536_v40 = vshll.u32 %v261_v2, 16  ;;  %v512_v53 = vor.u32 %v510_v37, %v509_v5  ;;  %v266_v29 = vld [vmem:[%s3648_s22 + $0x74] sm:$0xf]  ;;  %v742_v60 = vld [vmem:[#allocation2 + $0xa4] sm:$0x1] }
  0x70   : > { %v1182_v31 = vrot.slane %v1180_v13, 1  ;;  %v514_v58 = vrot.slane %v509_v5, 4  ;;  %v1201_v24 = vrot.slane %v1199_v34, 1  ;;  %v535_v25 = vrot.slane %v533_v59, 7  ;;  %v752_v52 = vld [vmem:[#allocation2 + $0xb4] sm:$0xf] }
  0x71   : > { %1290 = vrot.lane.b32.xlu2 %v1159_v48, %s3542_s19  ;;  %v1204_v21 = vshll.u32 %v4218_v17, 16  ;;  %v541_v55 = vshrl.u32 %v262_v50, 16  ;;  %v544_v26 = vshll.u32 %v262_v50, 16  ;;  %v513_v33 = vsel %vm3739_vm7, %v505_v14, %v512_v53 }
  0x72   : > { %v1183_v16 = vsel %vm1087_vm2, %v1178_v9, %v1182_v31  ;;  %v729_v32 = vsel %vm3726_vm6, %v514_v58, %v728_v54  ;;  %v567_v27 = vshrl.u32 %v265_v20, 16  ;;  %v1202_v30 = vor.u32 %v1201_v24, %v1197_v6  ;;  %727 = vst.msk [vmem:[#allocation2 + $0x88] sm:$0xf] %vm269_vm0, %v513_v33  ;;  %v756_v6 = vld [vmem:[#allocation2 + $0xbc] sm:$0x1] }
  0x73   : > { %v1206_v0 = vrot.slane %v1204_v21, 1  ;;  %v538_v38 = vor.u32 %v536_v40, %v535_v25  ;;  %v539_v51 = vrot.slane %v535_v25, 4  ;;  %v543_v13 = vrot.slane %v541_v55, 7  ;;  %730 = vst [vmem:[#allocation2 + $0x8c] sm:$0x1] %v729_v32 }
  0x74   : > { %1294 = vrot.lane.b32.xlu1 %v1183_v16, %s3542_s19  ;;  %v569_v42 = vrot.slane %v567_v27, 7  ;;  %v570_v12 = vshll.u32 %v265_v20, 16  ;;  %v575_v47 = vshrl.u32 %v266_v29, 16  ;;  %v578_v1 = vshll.u32 %v266_v29, 16  ;;  %v3462_v24 = vld [vmem:[#allocation2 + $0xc] sm:$0xe] }
  0x75   : > { %v1207_v2 = vsel %vm1087_vm2, %v1202_v30, %v1206_v0  ;;  %v546_v14 = vor.u32 %v544_v26, %v543_v13  ;;  %v548_v31 = vrot.slane %v543_v13, 4  ;;  %v739_v37 = vsel %vm3759_vm8, %v538_v38, %v738_v28 }
  0x76   : > { %1298 = vrot.lane.b32.xlu0 %v1207_v2, %s3542_s19  ;;  %740 = vst [vmem:[#allocation2 + $0x9c] sm:$0xf] %v739_v37  ;;  %v572_v54 = vor.u32 %v570_v12, %v569_v42  ;;  %v573_v48 = vrot.slane %v569_v42, 4  ;;  %v577_v9 = vrot.slane %v575_v47, 7 }
  0x77   : > { %v547_v5 = vsel %vm3739_vm7, %v539_v51, %v546_v14  ;;  %v743_v50 = vsel %vm3726_vm6, %v548_v31, %v742_v60  ;;  %v3463_v60 = vor.u32 %v3462_v24, %v4159_v45  ;;  %v1365_v45 = vrot.slane %v4181_v41, 1  ;;  %v3363_v24 = vld [vmem:[#allocation2 + $0x30] sm:$0xf0] }
  0x78   : > { %741 = vst.msk [vmem:[#allocation2 + $0xa0] sm:$0xf] %vm269_vm0, %v547_v5  ;;  %v580_v34 = vor.u32 %v578_v1, %v577_v9  ;;  %v582_v59 = vrot.slane %v577_v9, 4  ;;  %v753_v40 = vsel %vm3759_vm8, %v572_v54, %v752_v52  ;;  %v3357_v52 = vld [vmem:[#allocation2] sm:$0xf0] }
  0x79   : > { %744 = vst [vmem:[#allocation2 + $0xa4] sm:$0x1] %v743_v50  ;;  %v4245_v20 = vld [vmem:[#allocation2 + $0x84] sm:$0xff]   ;;  %v3358_v54 = vld [vmem:[#allocation2] sm:$0xe] }
  0x7a   : > { %v4247_v16 = vld [vmem:[#allocation2 + $0x84] sm:$0xf0]  ;;  %v581_v21 = vsel %vm3739_vm7, %v573_v48, %v580_v34  ;;  %754 = vst [vmem:[#allocation2 + $0xb4] sm:$0xf] %v753_v40  ;;  %v757_v53 = vsel %vm3726_vm6, %v582_v59, %v756_v6  ;;  %v809_v58 = vld [vmem:[#allocation2 + $0x8c] sm:$0x1] }
  0x7b   : > { %755 = vst.msk [vmem:[#allocation2 + $0xb8] sm:$0xf] %vm269_vm0, %v581_v21  ;;  %v1066_v25 = vunpack.c.l.b16 %v809_v58  ;;  %v1221_v26 = vshrl.u32 %v4245_v20, 16  ;;  %v1223_v29 = vshll.u32 %v4245_v20, 16  ;;  %v3360_v5 = vld [vmem:[#allocation2 + $0x18] sm:$0xf0]  ;;  %v3359_v58 = vor.u32 %v3358_v54, %v3357_v52 }
  0x7c   : > { %758 = vst [vmem:[#allocation2 + $0xbc] sm:$0x1] %v757_v53  ;;  %v1364_v59 = vrot.slane %v3463_v60, 1  ;;  %v3361_v40 = vld [vmem:[#allocation2 + $0x18] sm:$0xe]  ;;  %v1374_v52 = vrot.slane %v4057_v11, 1 }
  0x7d   : > { %v4254_v55 = vpack.c.b16 %v1066_v25, %v1066_v25  ;;  %v1225_v27 = vrot.slane %v1223_v29, 1  ;;  %v3364_v25 = vld [vmem:[#allocation2 + $0x30] sm:$0xe]  ;;  %v3465_v29 = vld [vmem:[#allocation2 + $0x24] sm:$0xe]  ;;  %v1361_v60 = vrot.slane %v3359_v58, 1 }
  0x7e   : > { %v3369_v11 = vld [vmem:[#allocation2 + $0x60] sm:$0xf0]  ;;  %v3370_v58 = vld [vmem:[#allocation2 + $0x60] sm:$0xe] }
  0x7f   : > { %v4258_v0 = vld [vmem:[#allocation2 + $0x9c] sm:$0xff]   ;;  %v1228_v32 = vshll.u32 %v4254_v55, 16  ;;  %v1226_v42 = vor.u32 %v1225_v27, %v1221_v26 }
  0x80   : > { %v4260_v33 = vld [vmem:[#allocation2 + $0x9c] sm:$0xf0]  ;;  %v811_v28 = vld [vmem:[#allocation2 + $0xa4] sm:$0x1]  ;;  %v1245_v1 = vshrl.u32 %v4258_v0, 16  ;;  %v1247_v2 = vshll.u32 %v4258_v0, 16 }
  0x81   : > { %v1068_v30 = vunpack.c.l.b16 %v811_v28  ;;  %v1230_v38 = vrot.slane %v1228_v32, 1  ;;  %v3362_v28 = vor.u32 %v3361_v40, %v3360_v5  ;;  %v1377_v40 = vrot.slane %v4194_v15, 1  ;;  %v3480_v15 = vld [vmem:[#allocation2 + $0x9c] sm:$0xe] }
  0x82   : > { %v4263_v51 = vld [vmem:[#allocation2 + $0xb4] sm:$0xff]   ;;  %v1249_v48 = vrot.slane %v1247_v2, 1 }
  0x83   : > { %v4265_v13 = vld [vmem:[#allocation2 + $0xb4] sm:$0xf0]  ;;  %v4268_v12 = vpack.c.b16 %v1068_v30, %v1068_v30  ;;  %v813_v47 = vld [vmem:[#allocation2 + $0xbc] sm:$0x1]  ;;  %v1231_v31 = vsel %vm1087_vm2, %v1226_v42, %v1230_v38  ;;  %v1269_v6 = vshrl.u32 %v4263_v51, 16  ;;  %v1271_v34 = vshll.u32 %v4263_v51, 16 }
  0x84   : > { %v1070_v14 = vunpack.c.l.b16 %v813_v47  ;;  %1302 = vrot.lane.b32.xlu2 %v1231_v31, %s3542_s19  ;;  %v1250_v21 = vor.u32 %v1249_v48, %v1245_v1  ;;  %v1366_v30 = vsel %vm1360_vm9, %v1364_v59, %v1365_v45  ;;  %v3365_v38 = vor.u32 %v3364_v25, %v3363_v24  ;;  %v3468_v47 = vld [vmem:[#allocation2 + $0x3c] sm:$0xe]  ;;  %v3471_v1 = vld [vmem:[#allocation2 + $0x54] sm:$0xe]  ;;  %v3367_v59 = vld [vmem:[#allocation2 + $0x48] sm:$0xe] }
  0x85   : > { %v1252_v37 = vshll.u32 %v4268_v12, 16  ;;  %v1273_v26 = vrot.slane %v1271_v34, 1  ;;  %v1362_v42 = vrot.slane %v3615_v7, 1  ;;  %v1368_v31 = vrot.slane %v4072_v22, 1  ;;  %v3366_v34 = vld [vmem:[#allocation2 + $0x48] sm:$0xf0] }
  0x86   : > { %v4275_v9 = vpack.c.b16 %v1070_v14, %v1070_v14  ;;  %v1367_v14 = vrot.slane %v3362_v28, 1  ;;  %v3466_v48 = vor.u32 %v3465_v29, %v4142_v35  ;;  %v3469_v5 = vor.u32 %v3468_v47, %v4172_v46  ;;  %v3372_v24 = vld [vmem:[#allocation2 + $0x78] sm:$0xf0]  ;;  %v3373_v25 = vld [vmem:[#allocation2 + $0x78] sm:$0xe] }
  0x87   : > { %v1254_v50 = vrot.slane %v1252_v37, 1  ;;  %v1274_v27 = vor.u32 %v1273_v26, %v1269_v6  ;;  %v1373_v37 = vrot.slane %v3365_v38, 1  ;;  %v1363_v54 = vsel %vm1360_vm9, %v1361_v60, %v1362_v42  ;;  %v3477_v28 = vld [vmem:[#allocation2 + $0x84] sm:$0xe]  ;;  %v4309_v38 = vld [vmem:[#allocation2 + $0xc] sm:$0xf0] }
  0x88   : > { %v1276_v53 = vshll.u32 %v4275_v9, 16  ;;  %v1369_v7 = vsel %vm1360_vm9, %v1367_v14, %v1368_v31  ;;  %v1370_v6 = vrot.slane %v3466_v48, 1  ;;  %v1371_v22 = vrot.slane %v4164_v62, 1  ;;  %v3474_v62 = vld [vmem:[#allocation2 + $0x6c] sm:$0xe] }
  0x89   : > { %v1255_v32 = vsel %vm1087_vm2, %v1250_v21, %v1254_v50  ;;  %v1375_v45 = vsel %vm1360_vm9, %v1373_v37, %v1374_v52  ;;  %v3472_v50 = vor.u32 %v3471_v1, %v4189_v19  ;;  %v1376_v35 = vrot.slane %v3469_v5, 1  ;;  %v862_v31 = vld [vmem:[#allocation2 + $0x14] sm:$0x1] }
  0x8a   : > { %v1278_v41 = vrot.slane %v1276_v53, 1  ;;  %1306 = vrot.lane.b32.xlu1 %v1255_v32, %s3542_s19  ;;  %v1383_v53 = vrot.slane %v4200_v4, 1  ;;  %v1372_v46 = vsel %vm1360_vm9, %v1370_v6, %v1371_v22  ;;  %v3368_v19 = vor.u32 %v3367_v59, %v3366_v34  ;;  %v3379_v6 = vld [vmem:[#allocation2 + $0xa8] sm:$0xe] }
  0x8b   : > { %v1382_v21 = vrot.slane %v3472_v50, 1  ;;  %v3371_v26 = vor.u32 %v3370_v58, %v3369_v11  ;;  %v1378_v29 = vsel %vm1360_vm9, %v1376_v35, %v1377_v40  ;;  %v1380_v4 = vrot.slane %v4024_v43, 1  ;;  %v3378_v50 = vld [vmem:[#allocation2 + $0xa8] sm:$0xf0]  ;;  %v927_v11 = vld [vmem:[#allocation2 + $0x20] sm:$0x1] }
  0x8c   : > { %v1279_v2 = vsel %vm1087_vm2, %v1274_v27, %v1278_v41  ;;  %1411 = vrot.lane.b32.xlu2 %v1366_v30, %s3543_s23  ;;  %v3374_v41 = vor.u32 %v3373_v25, %v3372_v24  ;;  %v1379_v27 = vrot.slane %v3368_v19, 1  ;;  %v4307_v30 = vld [vmem:[#allocation2 + $0xc] sm:$0xff]   ;;  %v1386_v42 = vrot.slane %v4110_v3, 1  ;;  %v4334_v25 = vld [vmem:[#allocation2 + $0x18] sm:$0xff]  }
  0x8d   : > { %1310 = vrot.lane.b32.xlu0 %v1279_v2, %s3542_s19  ;;  %v1384_v32 = vsel %vm1360_vm9, %v1382_v21, %v1383_v53  ;;  %v1385_v60 = vrot.slane %v3371_v26, 1  ;;  %v1392_v1 = vrot.slane %v4127_v10, 1  ;;  %v3475_v14 = vor.u32 %v3474_v62, %v4210_v36  ;;  %v3375_v10 = vld [vmem:[#allocation2 + $0x90] sm:$0xf0]  ;;  %v3483_v58 = vld [vmem:[#allocation2 + $0xc] sm:$0xe] }
  0x8e   : > { %v1391_v47 = vrot.slane %v3374_v41, 1  ;;  %v1381_v2 = vsel %vm1360_vm9, %v1379_v27, %v1380_v4  ;;  %v3478_v43 = vor.u32 %v3477_v28, %v4247_v16  ;;  %v3481_v37 = vor.u32 %v3480_v15, %v4260_v33 }
  0x8f   : > { %v1387_v52 = vsel %vm1360_vm9, %v1385_v60, %v1386_v42  ;;  %v1569_v48 = vunpack.c.l.b16 %v862_v31  ;;  %v1388_v3 = vrot.slane %v3475_v14, 1  ;;  %v1395_v16 = vrot.slane %v4254_v55, 1  ;;  %v3405_v31 = vld [vmem:[#allocation2 + $0x18] sm:$0xf0] }
  0x90   : > { %v1394_v36 = vrot.slane %v3478_v43, 1  ;;  %v1400_v33 = vrot.slane %v3481_v37, 1  ;;  %v1401_v5 = vrot.slane %v4268_v12, 1  ;;  %v1604_v22 = vshll.u32 %v4307_v30, 16  ;;  %v3406_v43 = vld [vmem:[#allocation2 + $0x18] sm:$0xe] }
  0x91   : > { %v1585_v34 = vpack.c.b16 %v1569_v48, %v1569_v48  ;;  %v3380_v21 = vor.u32 %v3379_v6, %v3378_v50  ;;  %v1602_v55 = vshrl.u32 %v4307_v30, 16  ;;  %v1398_v24 = vrot.slane %v4091_v39, 1  ;;  %v863_v37 = vld [vmem:[#allocation2 + $0x20] sm:$0x1]  ;;  %v3381_v50 = vld [vmem:[#allocation2 + $0x18] sm:$0xf0] }
  0x92   : > { %1409 = vrot.lane.b32.xlu1 %v1363_v54, %s3543_s23  ;;  %v1393_v54 = vsel %vm1360_vm9, %v1391_v47, %v1392_v1  ;;  %v1396_v35 = vsel %vm1360_vm9, %v1394_v36, %v1395_v16  ;;  %v1402_v40 = vsel %vm1360_vm9, %v1400_v33, %v1401_v5  ;;  %v1606_v53 = vrot.slane %v1604_v22, 1  ;;  %v3382_v6 = vld [vmem:[#allocation2 + $0x18] sm:$0xe] }
  0x93   : > { %v1609_v12 = vshll.u32 %v1585_v34, 16  ;;  %v1403_v62 = vrot.slane %v3380_v21, 1  ;;  %v1404_v26 = vrot.slane %v4147_v61, 1  ;;  %v2116_v41 = vshll.u32 %v4334_v25, 16  ;;  %v3486_v21 = vld [vmem:[#allocation2 + $0x3c] sm:$0xe] }
  0x94   : > { %1417 = vrot.lane.b32.xlu2 %v1375_v45, %s3543_s23  ;;  %v3376_v45 = vld [vmem:[#allocation2 + $0x90] sm:$0xe]  ;;  %v3484_v39 = vor.u32 %v3483_v58, %v4309_v38  ;;  %v2114_v60 = vshrl.u32 %v4334_v25, 16  ;;  %v1874_v1 = vrot.slane %v1585_v34, 1  ;;  %v4365_v58 = vpop.permute.xlu0 %1280 }
  0x95   : > { %1413 = vrot.lane.b32.xlu0 %v1369_v7, %s3543_s23  ;;  %v1389_v7 = vrot.slane %v4218_v17, 1  ;;  %v3377_v17 = vor.u32 %v3376_v45, %v3375_v10  ;;  %v1405_v27 = vsel %vm1360_vm9, %v1403_v62, %v1404_v26  ;;  %v2118_v42 = vrot.slane %v2116_v41, 1  ;;  %v866_v45 = vld [vmem:[#allocation2 + $0x44] sm:$0x1] }
  0x96   : > { %v1873_v61 = vrot.slane %v3484_v39, 1  ;;  %v1570_v10 = vunpack.c.l.b16 %v863_v37  ;;  %v1573_v5 = vunpack.c.l.b16 %v866_v45 }
  0x97   : > { %v1390_v59 = vsel %vm1360_vm9, %v1388_v3, %v1389_v7  ;;  %v1397_v19 = vrot.slane %v3377_v17, 1  ;;  %v3407_v7 = vor.u32 %v3406_v43, %v3405_v31  ;;  %v4361_v17 = vld [vmem:[#allocation2 + $0x24] sm:$0xff]   ;;  %v870_v31 = vld [vmem:[#allocation2 + $0x74] sm:$0x1] }
  0x98   : > { %v1875_v48 = vsel %vm1360_vm9, %v1873_v61, %v1874_v1  ;;  %v1586_v33 = vpack.c.b16 %v1570_v10, %v1570_v10  ;;  %v4381_v43 = vld [vmem:[#allocation2 + $0x48] sm:$0xff]   ;;  %v1577_v10 = vunpack.c.l.b16 %v870_v31 }
  0x99   : > { %v1399_v15 = vsel %vm1360_vm9, %v1397_v19, %v1398_v24  ;;  %v2385_v36 = vrot.slane %v3407_v7, 1  ;;  %v2164_v45 = vshll.u32 %v4381_v43, 16 }
  0x9a   : > { %1415 = vrot.lane.b32.xlu1 %v1372_v46, %s3543_s23  ;;  %v2081_v46 = vunpack.c.l.b16 %v927_v11  ;;  %v1621_v34 = vshll.u32 %v1586_v33, 16  ;;  %v3488_v11 = vld [vmem:[#allocation2 + $0x24] sm:$0xf0] }
  0x9c   : > { %1423 = vrot.lane.b32.xlu2 %v1384_v32, %s3543_s23  ;;  %v1611_v32 = vrot.slane %v1609_v12, 1  ;;  %v2097_v28 = vpack.c.b16 %v2081_v46, %v2081_v46  ;;  %v1877_v12 = vrot.slane %v1586_v33, 1  ;;  %v928_v46 = vld [vmem:[#allocation2 + $0x2c] sm:$0x1] }
  0x9d   : > { %1419 = vrot.lane.b32.xlu0 %v1378_v29, %s3543_s23  ;;  %v1607_v29 = vor.u32 %v1606_v53, %v1602_v55  ;;  %v1623_v55 = vrot.slane %v1621_v34, 1  ;;  %v2082_v26 = vunpack.c.l.b16 %v928_v46  ;;  %v3411_v34 = vld [vmem:[#allocation2 + $0x48] sm:$0xf0] }
  0x9e   : > { %v2121_v47 = vshll.u32 %v2097_v28, 16  ;;  %v2386_v16 = vrot.slane %v2097_v28, 1  ;;  %v3489_v28 = vld [vmem:[#allocation2 + $0x24] sm:$0xe] }
  0x9f   : > { %v1612_v4 = vsel %vm1087_vm2, %v1607_v29, %v1611_v32 }
  0xa0   : > { %v2123_v14 = vrot.slane %v2121_v47, 1  ;;  %v2387_v22 = vsel %vm1360_vm9, %v2385_v36, %v2386_v16  ;;  %v2098_v47 = vpack.c.b16 %v2082_v26, %v2082_v26 }
  0xa2   : > { %1421 = vrot.lane.b32.xlu1 %v1381_v2, %s3543_s23  ;;  %v2119_v2 = vor.u32 %v2118_v42, %v2114_v60  ;;  %v4375_v60 = vld [vmem:[#allocation2 + $0x6c] sm:$0xf0] }
  0xa3   : > { %v931_v42 = vld [vmem:[#allocation2 + $0x50] sm:$0x1] }
  0xa4   : > { %1429 = vrot.lane.b32.xlu2 %v1393_v54, %s3543_s23  ;;  %v3485_v54 = vld [vmem:[#allocation2 + $0x3c] sm:$0xf0]  ;;  %v2124_v3 = vsel %vm1087_vm2, %v2119_v2, %v2123_v14  ;;  %v1624_v29 = vsel %vm1087_vm2, %v2119_v2, %v1623_v55  ;;  %v2085_v14 = vunpack.c.l.b16 %v931_v42 }
  0xa5   : > { %1425 = vrot.lane.b32.xlu0 %v1387_v52, %s3543_s23  ;;  %v838_v52 = vld [vmem:[#allocation2 + $0x3c] sm:$0xff]   ;;  %v3487_v41 = vor.u32 %v3486_v21, %v3485_v54  ;;  %v2166_v21 = vrot.slane %v2164_v45, 1  ;;  %v834_v45 = vld [vmem:[#allocation2 + $0x24] sm:$0xff]  }
  0xa6   : > { %v1650_v19 = vshrl.u32 %v838_v52, 16  ;;  %v2101_v36 = vpack.c.b16 %v2085_v14, %v2085_v14 }
  0xa7   : > { %v1885_v61 = vrot.slane %v3487_v41, 1 }
  0xa8   : > { %v2169_v55 = vshll.u32 %v2101_v36, 16 }
  0xaa   : > { %1427 = vrot.lane.b32.xlu1 %v1390_v59, %s3543_s23  ;;  %v3383_v59 = vor.u32 %v3382_v6, %v3381_v50 }
  0xac   : > { %1435 = vrot.lane.b32.xlu2 %v1402_v40, %s3543_s23  ;;  %v1589_v40 = vpack.c.b16 %v1573_v5, %v1573_v5  ;;  %v1876_v53 = vrot.slane %v3383_v59, 1  ;;  %v3412_v59 = vld [vmem:[#allocation2 + $0x48] sm:$0xe] }
  0xad   : > { %1431 = vrot.lane.b32.xlu0 %v1396_v35, %s3543_s23  ;;  %v1652_v35 = vshll.u32 %v838_v52, 16 }
  0xae   : > { %v1657_v62 = vshll.u32 %v1589_v40, 16  ;;  %v1878_v32 = vsel %vm1360_vm9, %v1876_v53, %v1877_v12  ;;  %v1886_v1 = vrot.slane %v1589_v40, 1  ;;  %v2162_v40 = vshrl.u32 %v4381_v43, 16  ;;  %v935_v53 = vld [vmem:[#allocation2 + $0x80] sm:$0x1] }
  0xaf   : > { %v1654_v24 = vrot.slane %v1652_v35, 1  ;;  %v1593_v35 = vpack.c.b16 %v1577_v10, %v1577_v10  ;;  %v2089_v41 = vunpack.c.l.b16 %v935_v53 }
  0xb0   : > { %v1887_v7 = vsel %vm1360_vm9, %v1885_v61, %v1886_v1 }
  0xb2   : > { %1433 = vrot.lane.b32.xlu1 %v1399_v15, %s3543_s23  ;;  %v4348_v38 = vpop.permute.xlu2 %1288  ;;  %v1655_v15 = vor.u32 %v1654_v24, %v1650_v19  ;;  %v3413_v19 = vor.u32 %v3412_v59, %v3411_v34  ;;  %v864_v59 = vld [vmem:[#allocation2 + $0x2c] sm:$0x1] }
  0xb4   : > { %1793 = vrot.lane.b32.xlu2 %v1612_v4, %s3544_s24  ;;  %v4373_v4 = vld [vmem:[#allocation2 + $0x6c] sm:$0xff]   ;;  %v2397_v42 = vrot.slane %v3413_v19, 1  ;;  %v3495_v19 = vld [vmem:[#allocation2 + $0x24] sm:$0xe] }
  0xb5   : > { %1437 = vrot.lane.b32.xlu0 %v1405_v27, %s3543_s23  ;;  %v1659_v27 = vrot.slane %v1657_v62, 1  ;;  %v1698_v62 = vshrl.u32 %v4373_v4, 16 }
  0xb7   : > { %v1660_v2 = vsel %vm1087_vm2, %v1655_v15, %v1659_v27  ;;  %v2171_v15 = vrot.slane %v2169_v55, 1  ;;  %v4407_v27 = vld [vmem:[#allocation2 + $0x78] sm:$0xff]  }
  0xb8   : > { %v2212_v1 = vshll.u32 %v4407_v27, 16 }
  0xba   : > { %1521 = vrot.lane.b32.xlu1 %v4307_v30, %s3545_s25 }
  0xbb   : > { %v4356_v30 = vpop.permute.xlu2 %1296 }
  0xbc   : > { %2305 = vrot.lane.b32.xlu2 %v2124_v3, %s3547_s27  ;;  %v3490_v3 = vor.u32 %v3489_v28, %v3488_v11  ;;  %v1700_v11 = vshll.u32 %v4373_v4, 16  ;;  %v4405_v28 = vor.u32 %v2166_v21, %v2162_v40  ;;  %v3417_v40 = vld [vmem:[#allocation2 + $0x78] sm:$0xf0]  ;;  %v3418_v21 = vld [vmem:[#allocation2 + $0x78] sm:$0xe] }
  0xbd   : > { %1921 = vrot.lane.b32.xlu0 %v1875_v48, %s3546_s26  ;;  %v2133_v48 = vshll.u32 %v2098_v47, 16 }
  0xbe   : > { %v2388_v6 = vrot.slane %v3490_v3, 1  ;;  %v1702_v26 = vrot.slane %v1700_v11, 1  ;;  %v2172_v14 = vsel %vm1087_vm2, %v4405_v28, %v2171_v15  ;;  %v2210_v3 = vshrl.u32 %v4407_v27, 16  ;;  %v3453_v15 = vld [vmem:[#allocation2 + $0x30] sm:$0xff]  }
  0xbf   : > { %v2135_v5 = vrot.slane %v2133_v48, 1 }
  0xc2   : > { %2033 = vrot.lane.b32.xlu1 %v4334_v25, %s3548_s28 }
  0xc3   : > { %v4371_v39 = vpop.permute.xlu2 %1308 }
  0xc4   : > { %1529 = vrot.lane.b32.xlu2 %v838_v52, %s3545_s25  ;;  %v2126_v52 = vshrl.u32 %v4361_v17, 16 }
  0xc5   : > { %2433 = vrot.lane.b32.xlu0 %v2387_v22, %s3549_s29  ;;  %v2389_v22 = vrot.slane %v2098_v47, 1  ;;  %v1703_v47 = vor.u32 %v1702_v26, %v1698_v62  ;;  %v867_v62 = vld [vmem:[#allocation2 + $0x50] sm:$0x1]  ;;  %v1628_v26 = vshll.u32 %v834_v45, 16 }
  0xc7   : > { %v4383_v37 = vpop.permute.xlu0 %1292  ;;  %v2390_v46 = vsel %vm1360_vm9, %v2388_v6, %v2389_v22  ;;  %v1898_v6 = vrot.slane %v1593_v35, 1 }
  0xca   : > { %1523 = vrot.lane.b32.xlu1 %v4334_v25, %s3545_s25  ;;  %v2128_v25 = vshll.u32 %v4361_v17, 16 }
  0xcb   : > { %v4394_v50 = vpop.permute.xlu2 %1290 }
  0xcc   : > { %1923 = vrot.lane.b32.xlu2 %v1878_v32, %s3546_s26  ;;  %v2130_v54 = vrot.slane %v2128_v25, 1  ;;  %v3492_v32 = vld [vmem:[#allocation2 + $0x6c] sm:$0xe]  ;;  %v2398_v25 = vrot.slane %v2101_v36, 1  ;;  %v3494_v36 = vld [vmem:[#allocation2 + $0x24] sm:$0xf0] }
  0xcd   : > { %1795 = vrot.lane.b32.xlu0 %v1624_v29, %s3544_s24  ;;  %v4389_v16 = vpop.permute.xlu1 %1284  ;;  %v1705_v29 = vshll.u32 %v1593_v35, 16 }
  0xce   : > { %v2131_v33 = vor.u32 %v2130_v54, %v2126_v52  ;;  %v2399_v52 = vsel %vm1360_vm9, %v2397_v42, %v2398_v25  ;;  %v3493_v54 = vor.u32 %v3492_v32, %v4375_v60  ;;  %v1574_v25 = vunpack.c.l.b16 %v867_v62 }
  0xcf   : > { %v1707_v61 = vrot.slane %v1705_v29, 1 }
  0xd0   : > { %v2136_v12 = vsel %vm1087_vm2, %v2131_v33, %v2135_v5  ;;  %v4402_v24 = vpop.permute.xlu0 %1304  ;;  %v1897_v60 = vrot.slane %v3493_v54, 1 }
  0xd1   : > { %v1708_v48 = vsel %vm1087_vm2, %v1703_v47, %v1707_v61  ;;  %v1626_v61 = vshrl.u32 %v834_v45, 16 }
  0xd2   : > { %1801 = vrot.lane.b32.xlu1 %v1660_v2, %s3544_s24  ;;  %v2105_v2 = vpack.c.b16 %v2089_v41, %v2089_v41 }
  0xd4   : > { %2041 = vrot.lane.b32.xlu2 %v4381_v43, %s3548_s28  ;;  %v2217_v10 = vshll.u32 %v2105_v2, 16  ;;  %v2410_v41 = vrot.slane %v2105_v2, 1  ;;  %v1590_v2 = vpack.c.b16 %v1574_v25, %v1574_v25 }
  0xd5   : > { %1929 = vrot.lane.b32.xlu0 %v1887_v7, %s3546_s26  ;;  %v2214_v7 = vrot.slane %v2212_v1, 1  ;;  %v1630_v1 = vrot.slane %v1628_v26, 1 }
  0xd6   : > { %v2219_v34 = vrot.slane %v2217_v10, 1 }
  0xd7   : > { %v4427_v22 = vor.u32 %v2214_v7, %v2210_v3 }
  0xd9   : > { %v2220_v35 = vsel %vm1087_vm2, %v4427_v22, %v2219_v34  ;;  %v1669_v34 = vshll.u32 %v1590_v2, 16 }
  0xda   : > { %2035 = vrot.lane.b32.xlu1 %v4361_v17, %s3548_s28  ;;  %v4411_v17 = vpop.permute.xlu1 %1300 }
  0xdc   : > { %2435 = vrot.lane.b32.xlu2 %v2390_v46, %s3549_s29  ;;  %v3419_v46 = vor.u32 %v3418_v21, %v3417_v40  ;;  %v4456_v40 = vld [vmem:[#allocation2 + $0x54] sm:$0xf0] }
  0xdd   : > { %2307 = vrot.lane.b32.xlu0 %v2136_v12, %s3547_s27  ;;  %v1571_v12 = vunpack.c.l.b16 %v864_v59  ;;  %v3387_v59 = vld [vmem:[#allocation2 + $0x48] sm:$0xf0] }
  0xde   : > { %v4416_v31 = vpop.permute.xlu2 %1302  ;;  %v2409_v32 = vrot.slane %v3419_v46, 1  ;;  %v4464_v46 = vld [vmem:[#allocation2 + $0x30] sm:$0xff]  }
  0xdf   : > { %v1283_v33 = vpop.permute.xlu0 %1282  ;;  %v1587_v29 = vpack.c.b16 %v1571_v12, %v1571_v12  ;;  %v2140_v26 = vshll.u32 %v4464_v46, 16 }
  0xe0   : > { %v2469_v5 = vsel %vm2465_vm10, %v4157_v57, %v1283_v33  ;;  %v1899_v57 = vsel %vm1360_vm9, %v1897_v60, %v1898_v6 }
  0xe1   : > { %v1880_v33 = vrot.slane %v1587_v29, 1 }
  0xe2   : > { %2313 = vrot.lane.b32.xlu1 %v2172_v14, %s3547_s27  ;;  %v4429_v55 = vpop.permute.xlu1 %1286  ;;  %v1633_v14 = vshll.u32 %v1587_v29, 16 }
  0xe4   : > { %1809 = vrot.lane.b32.xlu2 %v1708_v48, %s3544_s24  ;;  %v3496_v48 = vor.u32 %v3495_v19, %v3494_v36  ;;  %v1635_v7 = vrot.slane %v1633_v14, 1  ;;  %v3388_v36 = vld [vmem:[#allocation2 + $0x48] sm:$0xe]  ;;  %v932_v19 = vld [vmem:[#allocation2 + $0x5c] sm:$0x1] }
  0xe5   : > { %2441 = vrot.lane.b32.xlu0 %v2399_v52, %s3549_s29  ;;  %v2411_v52 = vsel %vm1360_vm9, %v2409_v32, %v2410_v41  ;;  %v1889_v41 = vrot.slane %v1590_v2, 1  ;;  %v3409_v14 = vld [vmem:[#allocation2 + $0x30] sm:$0xe] }
  0xe6   : > { %v1412_v11 = vpop.permute.xlu2 %1411  ;;  %v1879_v10 = vrot.slane %v3496_v48, 1  ;;  %v2142_v48 = vrot.slane %v2140_v26, 1 }
  0xe7   : > { %v4432_v53 = vsel %vm2498_vm11, %v2469_v5, %v1412_v11  ;;  %v929_v5 = vld [vmem:[#allocation2 + $0x38] sm:$0x1] }
  0xe8   : > { %v4450_v3 = vpop.permute.xlu0 %1298  ;;  %v905_v11 = vld [vmem:[#allocation2 + $0x54] sm:$0xff]   ;;  %v2083_v12 = vunpack.c.l.b16 %v929_v5 }
  0xea   : > { %1537 = vrot.lane.b32.xlu1 %v4373_v4, %s3545_s25  ;;  %v2475_v4 = vsel %vm2465_vm10, %v3453_v15, %v4348_v38  ;;  %v1295_v54 = vpop.permute.xlu1 %1294  ;;  %v1631_v38 = vor.u32 %v1630_v1, %v1626_v61  ;;  %v2099_v29 = vpack.c.b16 %v2083_v12, %v2083_v12  ;;  %v2086_v15 = vunpack.c.l.b16 %v932_v19  ;;  %v3408_v1 = vld [vmem:[#allocation2 + $0x30] sm:$0xf0]  ;;  %v871_v12 = vld [vmem:[#allocation2 + $0x80] sm:$0x1] }
  0xeb   : > { %v2481_v60 = vsel %vm2465_vm10, %v4187_v18, %v1295_v54  ;;  %v1671_v18 = vrot.slane %v1669_v34, 1  ;;  %v2138_v54 = vshrl.u32 %v4464_v46, 16 }
  0xec   : > { %2321 = vrot.lane.b32.xlu2 %v2220_v35, %s3547_s27  ;;  %v3389_v35 = vor.u32 %v3388_v36, %v3387_v59  ;;  %v2145_v2 = vshll.u32 %v2099_v29, 16 }
  0xed   : > { %1937 = vrot.lane.b32.xlu0 %v1899_v57, %s3546_s26  ;;  %v1881_v57 = vsel %vm1360_vm9, %v1879_v10, %v1880_v33  ;;  %v1672_v25 = vsel %vm1087_vm2, %v4405_v28, %v1671_v18  ;;  %v3410_v10 = vor.u32 %v3409_v14, %v3408_v1  ;;  %v3498_v33 = vld [vmem:[#allocation2 + $0x54] sm:$0xe]  ;;  %v4484_v28 = vor.u32 %v2142_v48, %v2138_v54  ;;  %v874_v1 = vld [vmem:[#allocation2 + $0xa4] sm:$0x1] }
  0xee   : > { %v1418_v42 = vpop.permute.xlu2 %1417  ;;  %v1888_v32 = vrot.slane %v3389_v35, 1  ;;  %v2477_v48 = vsel %vm2465_vm10, %v4170_v63, %v4394_v50 }
  0xef   : > { %v4444_v47 = vsel %vm2498_vm11, %v2475_v4, %v1418_v42  ;;  %v3454_v4 = vld [vmem:[#allocation2 + $0x78] sm:$0xff]   ;;  %v2391_v36 = vrot.slane %v3410_v10, 1 }
  0xf2   : > { %2049 = vrot.lane.b32.xlu1 %v4407_v27, %s3548_s28 }
  0xf4   : > { %1531 = vrot.lane.b32.xlu2 %v4381_v43, %s3545_s25  ;;  %v1636_v43 = vsel %vm1087_vm2, %v1631_v38, %v1635_v7  ;;  %v1890_v38 = vsel %vm1360_vm9, %v1888_v32, %v1889_v41  ;;  %v2102_v7 = vpack.c.b16 %v2086_v15, %v2086_v15  ;;  %v4499_v15 = vld [vmem:[#allocation2 + $0x9c] sm:$0xf0] }
  0xf5   : > { %2449 = vrot.lane.b32.xlu0 %v2411_v52, %s3549_s29 }
  0xf6   : > { %v1424_v6 = vpop.permute.xlu2 %1423  ;;  %v2181_v59 = vshll.u32 %v2102_v7, 16 }
  0xf7   : > { %v4459_v21 = vsel %vm2498_vm11, %v2481_v60, %v1424_v6  ;;  %v2147_v60 = vrot.slane %v2145_v2, 1  ;;  %v2174_v6 = vshrl.u32 %v905_v11, 16 }
  0xfa   : > { %1525 = vrot.lane.b32.xlu1 %v834_v45, %s3545_s25  ;;  %v2487_v45 = vsel %vm2465_vm10, %v3454_v4, %v4411_v17  ;;  %v2176_v17 = vshll.u32 %v905_v11, 16  ;;  %v1578_v4 = vunpack.c.l.b16 %v871_v12 }
  0xfc   : > { %v1307_v62 = vpop.permute.xlu1 %1306  ;;  %1925 = vrot.lane.b32.xlu2 %v1881_v57, %s3546_s26  ;;  %v2178_v34 = vrot.slane %v2176_v17, 1  ;;  %v3455_v57 = vld [vmem:[#allocation2 + $0x18] sm:$0xff]   ;;  %v1594_v54 = vpack.c.b16 %v1578_v4, %v1578_v4  ;;  %v3456_v4 = vld [vmem:[#allocation2 + $0x48] sm:$0xff]  }
  0xfd   : > { %1797 = vrot.lane.b32.xlu0 %v1636_v43, %s3544_s24  ;;  %v2392_v43 = vrot.slane %v2099_v29, 1  ;;  %v2471_v35 = vsel %vm2465_vm10, %v3455_v57, %v4389_v16  ;;  %v2493_v18 = vsel %vm2465_vm10, %v4258_v0, %v1307_v62  ;;  %v2148_v29 = vsel %vm1087_vm2, %v4484_v28, %v2147_v60  ;;  %v3393_v17 = vld [vmem:[#allocation2 + $0x78] sm:$0xf0]  ;;  %v3215_v60 = vld [vmem:[%s5202_s1 + $0x8] sm:$0xf] }
  0xfe   : > { %v1430_v61 = vpop.permute.xlu2 %1429  ;;  %v2179_v0 = vor.u32 %v2178_v34, %v2174_v6  ;;  %v2183_v16 = vrot.slane %v2181_v59, 1  ;;  %v3238_v6 = vld [vmem:[%s5202_s1 + $0x8] sm:$0x30]  ;;  %v1717_v59 = vshll.u32 %v1594_v54, 16  ;;  %v3501_v57 = vld [vmem:[#allocation2 + $0x9c] sm:$0xe] }
  0xff   : > { %v4471_v42 = vpop.permute.xlu0 %1310  ;;  %v4476_v52 = vsel %vm2498_vm11, %v2487_v45, %v1430_v61  ;;  %v2393_v62 = vsel %vm1360_vm9, %v2391_v36, %v2392_v43  ;;  %v3499_v45 = vor.u32 %v3498_v33, %v4456_v40  ;;  %v1581_v33 = vunpack.c.l.b16 %v874_v1 }
 0x100   : > { %v2184_v40 = vsel %vm1087_vm2, %v2179_v0, %v2183_v16  ;;  %v3216_v50 = vor.u32 %v3238_v6, %v3215_v60  ;;  %v2479_v0 = vsel %vm2465_vm10, %v3456_v4, %v4383_v37  ;;  %v1901_v1 = vrot.slane %v1594_v54, 1  ;;  %v3457_v37 = vld [vmem:[#allocation2 + $0x60] sm:$0xff]  }
 0x101   : > { %v2400_v2 = vrot.slane %v3499_v45, 1  ;;  %v1719_v45 = vrot.slane %v1717_v59, 1  ;;  %v3502_v54 = vor.u32 %v3501_v57, %v4499_v15  ;;  %v939_v15 = vld [vmem:[#allocation2 + $0xb0] sm:$0x1]  ;;  %v2489_v57 = vsel %vm2465_vm10, %v4245_v20, %v4416_v31 }
 0x102   : > { %1803 = vrot.lane.b32.xlu1 %v1672_v25, %s3544_s24  ;;  %v2473_v25 = vsel %vm2465_vm10, %v4140_v23, %v4429_v55  ;;  %v3394_v23 = vld [vmem:[#allocation2 + $0x78] sm:$0xe] }
 0x103   : > { %v3395_v12 = vor.u32 %v3394_v23, %v3393_v17 }
 0x104   : > { %v4481_v5 = vpop.permute.xlu1 %1409  ;;  %2043 = vrot.lane.b32.xlu2 %v905_v11, %s3548_s28  ;;  %v4497_v11 = vld [vmem:[#allocation2 + $0x9c] sm:$0xff]  }
 0x105   : > { %1931 = vrot.lane.b32.xlu0 %v1890_v38, %s3546_s26  ;;  %v2401_v38 = vrot.slane %v2102_v7, 1  ;;  %v3550_v7 = vmov 65535  }
 0x106   : > { %v1436_v26 = vpop.permute.xlu2 %1435  ;;  %v2779_v34 = vsel %vm2777_vm12, 4294967295, %v3550_v7  ;;  %v3504_v7 = vld [vmem:[#allocation2 + $0x84] sm:$0xe]  ;;  %vm2744_vm12 = vcmask 220160  }
 0x107   : > { %v1414_v19 = vpop.permute.xlu0 %1413  ;;  %v4495_v41 = vsel %vm2498_vm11, %v2493_v18, %v1436_v26  ;;  %v2780_v36 = vsel %vm2778_vm13, %v2779_v34, 0  ;;  %v2402_v43 = vsel %vm1360_vm9, %v2400_v2, %v2401_v38  ;;  %v1748_v18 = vshll.u32 %v4497_v11, 16  ;;  %v4533_v26 = vld [vmem:[#allocation2 + $0x84] sm:$0xff]  }
 0x108   : > { %v4492_v32 = vsel %vm2498_vm11, %v2471_v35, %v1414_v19  ;;  %v2782_v35 = vand.u32 %v3216_v50, %v2780_v36  ;;  %v1597_v19 = vpack.c.b16 %v1581_v33, %v1581_v33  ;;  %v1746_v38 = vshrl.u32 %v4497_v11, 16 }
 0x109   : > { %v1750_v17 = vrot.slane %v1748_v18, 1  ;;  %v2485_v34 = vsel %vm2465_vm10, %v4208_v8, %v4450_v3  ;;  %v2093_v18 = vunpack.c.l.b16 %v939_v15  ;;  %v4603_v15 = vld [vmem:[#allocation2 + $0x54] sm:$0xff]  }
 0x10a   : > { %2037 = vrot.lane.b32.xlu1 %v4464_v46, %s3548_s28  ;;  %2790 = vmatpush.bf16.msra.mxu0 %v2782_v35  ;;  %v1753_v23 = vshll.u32 %v1597_v19, 16  ;;  %v1910_v36 = vrot.slane %v1597_v19, 1 }
 0x10b   : > { %3429 = vmatpush.bf16.msra.mxu1 %v2782_v35  ;;  %3430 = vmatpush.bf16.msra.mxu2 %v2782_v35 }
 0x10c   : > { %v1416_v61 = vpop.permute.xlu1 %1415  ;;  %2437 = vrot.lane.b32.xlu2 %v2393_v62, %s3549_s29  ;;  %3431 = vmatpush.bf16.msra.mxu3 %v2782_v35  ;;  %v1755_v50 = vrot.slane %v1753_v23, 1 }
 0x10d   : > { %2309 = vrot.lane.b32.xlu0 %v2148_v29, %s3547_s27  ;;  %v4512_v14 = vsel %vm2498_vm11, %v2473_v25, %v1416_v61  ;;  %v4535_v29 = vld [vmem:[#allocation2 + $0x84] sm:$0xf0]  ;;  %v3237_v25 = vld [vmem:[%s5202_s1] sm:$0xff]  ;;  %v1900_v61 = vrot.slane %v3395_v12, 1 }
 0x10e   : > { %v4519_v10 = vpop.permute.xlu2 %1793  ;;  %2791 = vmatpush.bf16.msra.mxu0 %v3237_v25  ;;  %v3505_v20 = vor.u32 %v3504_v7, %v4535_v29  ;;  %v3423_v7 = vld [vmem:[#allocation2 + $0xa8] sm:$0xf0] }
 0x10f   : > { %v1420_v55 = vpop.permute.xlu0 %1419  ;;  %3432 = vmatpush.bf16.msra.mxu1 %v3237_v25  ;;  %v1902_v60 = vsel %vm1360_vm9, %v1900_v61, %v1901_v1  ;;  %3433 = vmatpush.bf16.msra.mxu2 %v3237_v25  ;;  %v2109_v61 = vpack.c.b16 %v2093_v18, %v2093_v18  ;;  %v3458_v1 = vld [vmem:[#allocation2 + $0x90] sm:$0xff]  }
 0x110   : > { %v4528_v63 = vsel %vm2498_vm11, %v2477_v48, %v1420_v55  ;;  %v2483_v48 = vsel %vm2465_vm10, %v3457_v37, %v4356_v30  ;;  %v936_v55 = vld [vmem:[#allocation2 + $0x8c] sm:$0x1]  ;;  %v1720_v30 = vsel %vm1087_vm2, %v4427_v22, %v1719_v45  ;;  %3434 = vmatpush.bf16.msra.mxu3 %v3237_v25  ;;  %v1909_v22 = vrot.slane %v3502_v54, 1  ;;  %v865_v54 = vld [vmem:[#allocation2 + $0x38] sm:$0x1] }
 0x111   : > { %v2090_v6 = vunpack.c.l.b16 %v936_v55  ;;  %v2491_v37 = vsel %vm2465_vm10, %v3458_v1, %v4402_v24  ;;  %v2412_v23 = vrot.slane %v3505_v20, 1 }
 0x112   : > { %2315 = vrot.lane.b32.xlu1 %v2184_v40, %s3547_s27  ;;  %v1911_v19 = vsel %vm1360_vm9, %v1909_v22, %v1910_v36  ;;  %v4605_v22 = vld [vmem:[#allocation2 + $0x54] sm:$0xf0]  ;;  %v1572_v36 = vunpack.c.l.b16 %v865_v54  ;;  %v3509_v54 = vld [vmem:[#allocation2 + $0x3c] sm:$0xf0] }
 0x113   : > { %v2106_v12 = vpack.c.b16 %v2090_v6, %v2090_v6 }
 0x114   : > { %v1422_v16 = vpop.permute.xlu1 %1421  ;;  %1545 = vrot.lane.b32.xlu2 %v4497_v11, %s3545_s25  ;;  %v1751_v11 = vor.u32 %v1750_v17, %v1746_v38 }
 0x115   : > { %2443 = vrot.lane.b32.xlu0 %v2402_v43, %s3549_s29  ;;  %v4541_v62 = vsel %vm2498_vm11, %v2479_v0, %v1422_v16  ;;  %v2224_v43 = vshll.u32 %v4533_v26, 16  ;;  %v4580_v0 = vld [vmem:[#allocation2 + $0xa8] sm:$0xff]   ;;  %v2222_v16 = vshrl.u32 %v4533_v26, 16  ;;  %v2229_v25 = vshll.u32 %v2106_v12, 16 }
 0x116   : > { %v4550_v2 = vpop.permute.xlu2 %2305  ;;  %v1756_v8 = vsel %vm1087_vm2, %v1751_v11, %v1755_v50  ;;  %v2260_v31 = vshll.u32 %v4580_v0, 16  ;;  %v2258_v38 = vshrl.u32 %v4580_v0, 16  ;;  %v2413_v55 = vrot.slane %v2106_v12, 1 }
 0x117   : > { %v1426_v40 = vpop.permute.xlu0 %1425  ;;  %v2226_v45 = vrot.slane %v2224_v43, 1  ;;  %v2231_v29 = vrot.slane %v2229_v25, 1  ;;  %v2265_v50 = vshll.u32 %v2109_v61, 16 }
 0x118   : > { %v4554_v33 = vsel %vm2498_vm11, %v2483_v48, %v1426_v40  ;;  %v2262_v6 = vrot.slane %v2260_v31, 1  ;;  %v2414_v43 = vsel %vm1360_vm9, %v2412_v23, %v2413_v55  ;;  %v2422_v31 = vrot.slane %v2109_v61, 1  ;;  %v4628_v55 = vld [vmem:[#allocation2 + $0x3c] sm:$0xff]  }
 0x119   : > { %v2227_v17 = vor.u32 %v2226_v45, %v2222_v16  ;;  %v868_v16 = vld [vmem:[#allocation2 + $0x5c] sm:$0x1] }
 0x11a   : > { %1539 = vrot.lane.b32.xlu1 %v4407_v27, %s3545_s25 }
 0x11c   : > { %v1428_v59 = vpop.permute.xlu1 %1427  ;;  %1939 = vrot.lane.b32.xlu2 %v1902_v60, %s3546_s26 }
 0x11d   : > { %1811 = vrot.lane.b32.xlu0 %v1720_v30, %s3544_s24  ;;  %v4567_v27 = vsel %vm2498_vm11, %v2485_v34, %v1428_v59  ;;  %v3459_v30 = vld [vmem:[#allocation2 + $0xa8] sm:$0xff]  }
 0x11e   : > { %v4575_v3 = vpop.permute.xlu2 %1529  ;;  %v2495_v24 = vsel %vm2465_vm10, %v3459_v30, %v4371_v39  ;;  %v3424_v34 = vld [vmem:[#allocation2 + $0xa8] sm:$0xe]  ;;  %v2232_v39 = vsel %vm1087_vm2, %v2227_v17, %v2231_v29  ;;  %v1676_v30 = vshll.u32 %v4603_v15, 16 }
 0x11f   : > { %v1432_v35 = vpop.permute.xlu0 %1431  ;;  %v3425_v12 = vor.u32 %v3424_v34, %v3423_v7 }
 0x120   : > { %v4578_v4 = vsel %vm2498_vm11, %v2489_v57, %v1432_v35  ;;  %v4611_v57 = vor.u32 %v2262_v6, %v2258_v38  ;;  %v2267_v35 = vrot.slane %v2265_v50, 1  ;;  %v3384_v38 = vld [vmem:[#allocation2 + $0x30] sm:$0xf0] }
 0x121   : > { %v2421_v20 = vrot.slane %v3425_v12, 1 }
 0x122   : > { %1817 = vrot.lane.b32.xlu1 %v1756_v8, %s3544_s24  ;;  %v3460_v8 = vld [vmem:[#allocation2] sm:$0xff]  }
 0x123   : > { %v2467_v18 = vsel %vm2465_vm10, %v3460_v8, %v4365_v58  ;;  %v2268_v58 = vsel %vm1087_vm2, %v4611_v57, %v2267_v35  ;;  %v2423_v23 = vsel %vm1360_vm9, %v2421_v20, %v2422_v31  ;;  %v1674_v8 = vshrl.u32 %v4603_v15, 16  ;;  %v3510_v20 = vld [vmem:[#allocation2 + $0x3c] sm:$0xe] }
 0x124   : > { %v1434_v48 = vpop.permute.xlu1 %1433  ;;  %2057 = vrot.lane.b32.xlu2 %v4580_v0, %s3548_s28  ;;  %v2500_v45 = vsel %vm2498_vm11, %v2467_v18, %v4481_v5  ;;  %v3385_v5 = vld [vmem:[#allocation2 + $0x30] sm:$0xe]  ;;  %v1678_v18 = vrot.slane %v1676_v30, 1 }
 0x125   : > { %1945 = vrot.lane.b32.xlu0 %v1911_v19, %s3546_s26  ;;  %v4591_v40 = vsel %vm2498_vm11, %v2491_v37, %v1434_v48  ;;  %v1575_v48 = vunpack.c.l.b16 %v868_v16  ;;  %v3386_v61 = vor.u32 %v3385_v5, %v3384_v38 }
 0x126   : > { %v4598_v11 = vpop.permute.xlu2 %1923  ;;  %v1679_v31 = vor.u32 %v1678_v18, %v1674_v8  ;;  %v3414_v18 = vld [vmem:[#allocation2 + $0x60] sm:$0xf0] }
 0x127   : > { %v1438_v60 = vpop.permute.xlu0 %1437 }
 0x128   : > { %v4601_v59 = vsel %vm2498_vm11, %v2495_v24, %v1438_v60  ;;  %v1591_v24 = vpack.c.b16 %v1575_v48, %v1575_v48  ;;  %v3507_v60 = vld [vmem:[#allocation2 + $0x54] sm:$0xe]  ;;  %v2152_v48 = vshll.u32 %v4628_v55, 16 }
 0x12a   : > { %2051 = vrot.lane.b32.xlu1 %v4533_v26, %s3548_s28  ;;  %v1588_v26 = vpack.c.b16 %v1572_v36, %v1572_v36  ;;  %v1882_v36 = vrot.slane %v3386_v61, 1  ;;  %v1892_v5 = vrot.slane %v1591_v24, 1  ;;  %v2150_v61 = vshrl.u32 %v4628_v55, 16 }
 0x12b   : > { %v2154_v30 = vrot.slane %v2152_v48, 1 }
 0x12c   : > { %v1522_v19 = vpop.permute.xlu1 %1521  ;;  %2451 = vrot.lane.b32.xlu2 %v2414_v43, %s3549_s29  ;;  %v1645_v29 = vshll.u32 %v1588_v26, 16  ;;  %v930_v43 = vld [vmem:[#allocation2 + $0x44] sm:$0x1] }
 0x12d   : > { %2323 = vrot.lane.b32.xlu0 %v2232_v39, %s3547_s27  ;;  %v2533_v25 = vsel %vm2531_vm14, %v2500_v45, %v1522_v19  ;;  %v1883_v39 = vrot.slane %v1588_v26, 1  ;;  %v1681_v19 = vshll.u32 %v1591_v24, 16  ;;  %v2084_v45 = vunpack.c.l.b16 %v930_v43 }
 0x12e   : > { %v4622_v37 = vpop.permute.xlu2 %2041  ;;  %v2566_v17 = vsel %vm2564_vm15, %v2533_v25, %v4519_v10  ;;  %v1647_v7 = vrot.slane %v1645_v29, 1  ;;  %v3508_v25 = vor.u32 %v3507_v60, %v4605_v22 }
 0x12f   : > { %v1922_v1 = vpop.permute.xlu0 %1921  ;;  %v1884_v26 = vsel %vm1360_vm9, %v1882_v36, %v1883_v39  ;;  %v2100_v38 = vpack.c.b16 %v2084_v45, %v2084_v45  ;;  %v2155_v39 = vor.u32 %v2154_v30, %v2150_v61 }
 0x130   : > { %v2599_v6 = vsel %vm2597_vm1, %v2566_v17, %v1922_v1 }
 0x131   : > { %v2157_v60 = vshll.u32 %v2100_v38, 16  ;;  %v2395_v8 = vrot.slane %v2100_v38, 1 }
 0x132   : > { %2329 = vrot.lane.b32.xlu1 %v2268_v58, %s3547_s27  ;;  %v933_v58 = vld [vmem:[#allocation2 + $0x68] sm:$0x1] }
 0x133   : > { %v2087_v22 = vunpack.c.l.b16 %v933_v58  ;;  %v2159_v43 = vrot.slane %v2157_v60, 1 }
 0x134   : > { %v2034_v50 = vpop.permute.xlu1 %2033  ;;  %1533 = vrot.lane.b32.xlu2 %v4603_v15, %s3545_s25  ;;  %v1683_v15 = vrot.slane %v1681_v19, 1  ;;  %v3415_v19 = vld [vmem:[#allocation2 + $0x60] sm:$0xe] }
 0x135   : > { %2457 = vrot.lane.b32.xlu0 %v2423_v23, %s3549_s29  ;;  %v2632_v10 = vsel %vm2630_vm3, %v2599_v6, %v2034_v50  ;;  %v4655_v23 = vld [vmem:[#allocation2 + $0x60] sm:$0xff]   ;;  %v3511_v6 = vor.u32 %v3510_v20, %v3509_v54  ;;  %v2103_v24 = vpack.c.b16 %v2087_v22, %v2087_v22  ;;  %v872_v20 = vld [vmem:[#allocation2 + $0x8c] sm:$0x1]  ;;  %v2160_v58 = vsel %vm1087_vm2, %v2155_v39, %v2159_v43  ;;  %v875_v22 = vld [vmem:[#allocation2 + $0xb0] sm:$0x1] }
 0x136   : > { %v2665_v34 = vsel %vm2663_vm4, %v2632_v10, %v4550_v2  ;;  %v4638_v35 = vpop.permute.xlu2 %2435  ;;  %v1648_v2 = vsel %vm1087_vm2, %v4484_v28, %v1647_v7  ;;  %v1684_v28 = vsel %vm1087_vm2, %v1679_v31, %v1683_v15  ;;  %v2188_v10 = vshll.u32 %v4655_v23, 16  ;;  %v4661_v7 = vld [vmem:[#allocation2 + $0x84] sm:$0xff]  }
 0x137   : > { %v2434_v12 = vpop.permute.xlu0 %2433  ;;  %v2186_v45 = vshrl.u32 %v4655_v23, 16  ;;  %v3416_v15 = vor.u32 %v3415_v19, %v3414_v18  ;;  %v2404_v30 = vrot.slane %v2103_v24, 1 }
 0x138   : > { %v2698_v16 = vsel %vm2696_vm5, %v2665_v34, %v2434_v12  ;;  %v3512_v34 = vld [vmem:[#allocation2 + $0x84] sm:$0xf0]  ;;  %v2394_v12 = vrot.slane %v3511_v6, 1  ;;  %v1724_v6 = vshll.u32 %v4661_v7, 16 }
 0x139   : > { %3217 = vmatmul.msk.bf16.vlgmr.msra.gmra.mxu0 %vm2744_vm12, %v2698_v16  ;;  %v2403_v61 = vrot.slane %v3416_v15, 1 }
 0x13a   : > { %1527 = vrot.lane.b32.xlu1 %v4464_v46, %s3545_s25  ;;  %v1891_v46 = vrot.slane %v3508_v25, 1  ;;  %v2193_v25 = vshll.u32 %v2103_v24, 16 }
 0x13b   : > { %v2405_v24 = vsel %vm1360_vm9, %v2403_v61, %v2404_v30 }
 0x13c   : > { %v1524_v1 = vpop.permute.xlu1 %1523  ;;  %1927 = vrot.lane.b32.xlu2 %v1884_v26, %s3546_s26  ;;  %v1893_v50 = vsel %vm1360_vm9, %v1891_v46, %v1892_v5  ;;  %v2195_v38 = vrot.slane %v2193_v25, 1  ;;  %v3513_v46 = vld [vmem:[#allocation2 + $0x84] sm:$0xe] }
 0x13d   : > { %1799 = vrot.lane.b32.xlu0 %v1648_v2, %s3544_s24  ;;  %v2535_v54 = vsel %vm2531_vm14, %v4432_v53, %v1524_v1  ;;  %v2190_v2 = vrot.slane %v2188_v10, 1  ;;  %v2396_v53 = vsel %vm1360_vm9, %v2394_v12, %v2395_v8  ;;  %v1579_v1 = vunpack.c.l.b16 %v872_v20 }
 0x13e   : > { %v4653_v29 = vpop.permute.xlu2 %1809  ;;  %v3514_v18 = vor.u32 %v3513_v46, %v3512_v34  ;;  %v4709_v46 = vld [vmem:[#allocation2 + $0xb4] sm:$0xff]  }
 0x13f   : > { %v1796_v17 = vpop.permute.xlu0 %1795  ;;  %v4676_v48 = vor.u32 %v2190_v2, %v2186_v45 }
 0x140   : > { %v2568_v31 = vsel %vm2564_vm15, %v2535_v54, %v1796_v17  ;;  %v2541_v17 = vsel %vm2531_vm14, %v4444_v47, %v4575_v3  ;;  %v1582_v47 = vunpack.c.l.b16 %v875_v22  ;;  %v1726_v54 = vrot.slane %v1724_v6, 1 }
 0x142   : > { %1805 = vrot.lane.b32.xlu1 %v1684_v28, %s3544_s24  ;;  %v2601_v28 = vsel %vm2597_vm1, %v2568_v31, %v4598_v11  ;;  %v2196_v11 = vsel %vm1087_vm2, %v4676_v48, %v2195_v38  ;;  %v1598_v19 = vpack.c.b16 %v1582_v47, %v1582_v47  ;;  %v1903_v31 = vrot.slane %v3514_v18, 1  ;;  %v3400_v38 = vld [vmem:[#allocation2 + $0xa8] sm:$0xe] }
 0x144   : > { %v1802_v36 = vpop.permute.xlu1 %1801  ;;  %2045 = vrot.lane.b32.xlu2 %v4655_v23, %s3548_s28  ;;  %v1765_v34 = vshll.u32 %v1598_v19, 16 }
 0x145   : > { %1933 = vrot.lane.b32.xlu0 %v1893_v50, %s3546_s26  ;;  %v2574_v60 = vsel %vm2564_vm15, %v2541_v17, %v1802_v36  ;;  %v1595_v50 = vpack.c.b16 %v1579_v1, %v1579_v1  ;;  %v1722_v36 = vshrl.u32 %v4661_v7, 16  ;;  %v3399_v1 = vld [vmem:[#allocation2 + $0xa8] sm:$0xf0] }
 0x146   : > { %v4669_v26 = vpop.permute.xlu2 %2321  ;;  %v1767_v61 = vrot.slane %v1765_v34, 1 }
 0x147   : > { %v1930_v16 = vpop.permute.xlu0 %1929  ;;  %v1729_v8 = vshll.u32 %v1595_v50, 16  ;;  %v1727_v25 = vor.u32 %v1726_v54, %v1722_v36  ;;  %v1904_v15 = vrot.slane %v1595_v50, 1  ;;  %v940_v50 = vld [vmem:[#allocation2 + $0xbc] sm:$0x1]  ;;  %v3421_v36 = vld [vmem:[#allocation2 + $0x90] sm:$0xe] }
 0x148   : > { %v2607_v43 = vsel %vm2597_vm1, %v2574_v60, %v1930_v16  ;;  %v937_v16 = vld [vmem:[#allocation2 + $0x98] sm:$0x1]  ;;  %v869_v54 = vld [vmem:[#allocation2 + $0x68] sm:$0x1] }
 0x149   : > { %v2640_v2 = vsel %vm2630_vm3, %v2607_v43, %v4622_v37  ;;  %v1731_v20 = vrot.slane %v1729_v8, 1  ;;  %v1905_v17 = vsel %vm1360_vm9, %v1903_v31, %v1904_v15 }
 0x14a   : > { %2039 = vrot.lane.b32.xlu1 %v4628_v55, %s3548_s28 }
 0x14b   : > { %v1732_v22 = vsel %vm1087_vm2, %v1727_v25, %v1731_v20  ;;  %v4736_v25 = vld [vmem:[#allocation2 + $0x6c] sm:$0xf0]  ;;  %v2272_v20 = vshll.u32 %v4709_v46, 16 }
 0x14c   : > { %v2036_v5 = vpop.permute.xlu1 %2035  ;;  %2439 = vrot.lane.b32.xlu2 %v2396_v53, %s3549_s29 }
 0x14d   : > { %2311 = vrot.lane.b32.xlu0 %v2160_v58, %s3547_s27  ;;  %v2634_v55 = vsel %vm2630_vm3, %v2601_v28, %v2036_v5  ;;  %v4711_v5 = vld [vmem:[#allocation2 + $0xb4] sm:$0xf0]  ;;  %v2091_v28 = vunpack.c.l.b16 %v937_v16  ;;  %v4734_v16 = vld [vmem:[#allocation2 + $0x6c] sm:$0xff]  }
 0x14e   : > { %v4690_v39 = vpop.permute.xlu2 %1531 }
 0x14f   : > { %v2308_v10 = vpop.permute.xlu0 %2307  ;;  %v2107_v6 = vpack.c.b16 %v2091_v28, %v2091_v28 }
 0x150   : > { %v2667_v3 = vsel %vm2663_vm4, %v2634_v55, %v2308_v10  ;;  %v3401_v55 = vor.u32 %v3400_v38, %v3399_v1 }
 0x151   : > { %v2700_v12 = vsel %vm2696_vm5, %v2667_v3, %v4638_v35  ;;  %v1768_v3 = vsel %vm1087_vm2, %v4611_v57, %v1767_v61  ;;  %v1576_v57 = vunpack.c.l.b16 %v869_v54  ;;  %v2416_v28 = vrot.slane %v2107_v6, 1  ;;  %v3391_v54 = vld [vmem:[#allocation2 + $0x60] sm:$0xe] }
 0x152   : > { %3218 = vmatmul.msk.bf16.gmra.mxu0 %vm2744_vm12, %v2700_v12  ;;  %2317 = vrot.lane.b32.xlu1 %v2196_v11, %s3547_s27  ;;  %v1912_v11 = vrot.slane %v3401_v55, 1  ;;  %v2094_v12 = vunpack.c.l.b16 %v940_v50 }
 0x154   : > { %v2314_v45 = vpop.permute.xlu1 %2313  ;;  %1547 = vrot.lane.b32.xlu2 %v4580_v0, %s3545_s25  ;;  %v4714_v0 = vld [vmem:[#allocation2 + $0x90] sm:$0xff]   ;;  %v2110_v31 = vpack.c.b16 %v2094_v12, %v2094_v12 }
 0x155   : > { %2445 = vrot.lane.b32.xlu0 %v2405_v24, %s3549_s29  ;;  %v2673_v35 = vsel %vm2663_vm4, %v2640_v2, %v2314_v45  ;;  %v2236_v60 = vshll.u32 %v4714_v0, 16  ;;  %v3420_v24 = vld [vmem:[#allocation2 + $0x90] sm:$0xf0]  ;;  %v2234_v8 = vshrl.u32 %v4714_v0, 16  ;;  %v2241_v45 = vshll.u32 %v2107_v6, 16 }
 0x156   : > { %v4706_v53 = vpop.permute.xlu2 %1925  ;;  %v2277_v50 = vshll.u32 %v2110_v31, 16 }
 0x157   : > { %v2442_v58 = vpop.permute.xlu0 %2441  ;;  %v2238_v18 = vrot.slane %v2236_v60, 1  ;;  %v2274_v60 = vrot.slane %v2272_v20, 1 }
 0x158   : > { %v2706_v37 = vsel %vm2696_vm5, %v2673_v35, %v2442_v58  ;;  %v3516_v35 = vld [vmem:[#allocation2 + $0xb4] sm:$0xe] }
 0x159   : > { %3221 = vmatmul.msk.bf16.vlgmr.msra.gmra.mxu1 %vm2744_vm12, %v2706_v37  ;;  %v4740_v34 = vor.u32 %v2238_v18, %v2234_v8  ;;  %v2200_v8 = vshll.u32 %v4734_v16, 16 }
 0x15a   : > { %1541 = vrot.lane.b32.xlu1 %v4661_v7, %s3545_s25  ;;  %v1913_v7 = vrot.slane %v1598_v19, 1  ;;  %v3422_v19 = vor.u32 %v3421_v36, %v3420_v24  ;;  %v268_v24 = vld [vmem:[%s3648_s22 + $0x7c] sm:$0xf]  ;;  %v3390_v36 = vld [vmem:[#allocation2 + $0x60] sm:$0xf0] }
 0x15c   : > { %v1538_v30 = vpop.permute.xlu1 %1537  ;;  %1941 = vrot.lane.b32.xlu2 %v1905_v17, %s3546_s26  ;;  %v2415_v37 = vrot.slane %v3422_v19, 1  ;;  %v934_v17 = vld [vmem:[#allocation2 + $0x74] sm:$0x1]  ;;  %v267_v19 = vld [vmem:[%s3648_s22 + $0x78] sm:$0xf] }
 0x15d   : > { %1813 = vrot.lane.b32.xlu0 %v1732_v22, %s3544_s24  ;;  %v2549_v10 = vsel %vm2531_vm14, %v4554_v33, %v1538_v30  ;;  %v1914_v33 = vsel %vm1360_vm9, %v1912_v11, %v1913_v7  ;;  %v4748_v22 = vpack.c.b16 %v1576_v57, %v1576_v57  ;;  %v2270_v30 = vshrl.u32 %v4709_v46, 16 }
 0x15e   : > { %v4727_v43 = vpop.permute.xlu2 %2043  ;;  %v2582_v2 = vsel %vm2564_vm15, %v2549_v10, %v4653_v29  ;;  %v2243_v29 = vrot.slane %v2241_v45, 1  ;;  %v2088_v11 = vunpack.c.l.b16 %v934_v17  ;;  %v2417_v6 = vsel %vm1360_vm9, %v2415_v37, %v2416_v28 }
 0x15f   : > { %v1938_v47 = vpop.permute.xlu0 %1937  ;;  %v3517_v7 = vor.u32 %v3516_v35, %v4711_v5  ;;  %v592_v45 = vshrl.u32 %v268_v24, 16  ;;  %v2425_v5 = vrot.slane %v2110_v31, 1 }
 0x160   : > { %v2615_v15 = vsel %vm2597_vm1, %v2582_v2, %v1938_v47  ;;  %v2275_v47 = vor.u32 %v2274_v60, %v2270_v30  ;;  %v4766_v18 = vpack.c.b16 %v2088_v11, %v2088_v11  ;;  %v587_v30 = vshll.u32 %v267_v19, 16 }
 0x161   : > { %v2424_v2 = vrot.slane %v3517_v7, 1  ;;  %v595_v60 = vshll.u32 %v268_v24, 16  ;;  %v873_v24 = vld [vmem:[#allocation2 + $0x98] sm:$0x1] }
 0x162   : > { %1819 = vrot.lane.b32.xlu1 %v1768_v3, %s3544_s24  ;;  %v2279_v3 = vrot.slane %v2277_v50, 1  ;;  %v2205_v37 = vshll.u32 %v4766_v18, 16  ;;  %v1895_v50 = vrot.slane %v4748_v22, 1 }
 0x163   : > { %v2426_v31 = vsel %vm1360_vm9, %v2424_v2, %v2425_v5 }
 0x164   : > { %v2050_v58 = vpop.permute.xlu1 %2049  ;;  %2059 = vrot.lane.b32.xlu2 %v4709_v46, %s3548_s28  ;;  %v1693_v46 = vshll.u32 %v4748_v22, 16  ;;  %v2280_v57 = vsel %vm1087_vm2, %v2275_v47, %v2279_v3  ;;  %v759_v47 = vld [vmem:[#allocation2 + $0xc0] sm:$0xf] }
 0x165   : > { %1947 = vrot.lane.b32.xlu0 %v1914_v33, %s3546_s26  ;;  %v2648_v1 = vsel %vm2630_vm3, %v2615_v15, %v2050_v58  ;;  %v584_v15 = vshrl.u32 %v267_v19, 16  ;;  %v3392_v58 = vor.u32 %v3391_v54, %v3390_v36  ;;  %v2207_v54 = vrot.slane %v2205_v37, 1  ;;  %v4791_v19 = vld [vmem:[#allocation2 + $0xb4] sm:$0xf0] }
 0x166   : > { %v2681_v38 = vsel %vm2663_vm4, %v2648_v1, %v4669_v26  ;;  %v4750_v61 = vpop.permute.xlu2 %2437  ;;  %v2244_v26 = vsel %vm1087_vm2, %v4740_v34, %v2243_v29  ;;  %v1695_v33 = vrot.slane %v1693_v46, 1  ;;  %v594_v29 = vrot.slane %v592_v45, 7 }
 0x167   : > { %v2450_v55 = vpop.permute.xlu0 %2449  ;;  %v2198_v1 = vshrl.u32 %v4734_v16, 16  ;;  %v586_v28 = vrot.slane %v584_v15, 7  ;;  %v1894_v3 = vrot.slane %v3392_v58, 1  ;;  %v876_v58 = vld [vmem:[#allocation2 + $0xbc] sm:$0x1] }
 0x168   : > { %v2714_v10 = vsel %vm2696_vm5, %v2681_v38, %v2450_v55  ;;  %v2202_v38 = vrot.slane %v2200_v8, 1  ;;  %v1696_v17 = vsel %vm1087_vm2, %v4676_v48, %v1695_v33  ;;  %v3519_v55 = vld [vmem:[#allocation2 + $0x6c] sm:$0xe]  ;;  %v597_v7 = vor.u32 %v595_v60, %v594_v29  ;;  %v858_v33 = vld [vmem:[#allocation2 + $0xb4] sm:$0xff]  }
 0x169   : > { %3225 = vmatmul.msk.bf16.vlgmr.msra.gmra.mxu2 %vm2744_vm12, %v2714_v10  ;;  %v763_v10 = vld [vmem:[#allocation2 + $0xc8] sm:$0x1]  ;;  %v599_v46 = vrot.slane %v594_v29, 4  ;;  %v1896_v49 = vsel %vm1360_vm9, %v1894_v3, %v1895_v50  ;;  %v3520_v56 = vor.u32 %v3519_v55, %v4736_v25  ;;  %v2407_v25 = vrot.slane %v4766_v18, 1  ;;  %v3396_v55 = vld [vmem:[#allocation2 + $0x90] sm:$0xf0] }
 0x16a   : > { %2053 = vrot.lane.b32.xlu1 %v4714_v0, %s3548_s28  ;;  %v2203_v36 = vor.u32 %v2202_v38, %v2198_v1  ;;  %v3522_v60 = vld [vmem:[#allocation2 + $0xb4] sm:$0xe] }
 0x16b   : > { %v764_v45 = vsel %vm3726_vm6, %v599_v46, %v763_v10  ;;  %v2406_v38 = vrot.slane %v3520_v56, 1  ;;  %v1772_v10 = vshll.u32 %v858_v33, 16  ;;  %vm3109_vm6 = vcmask 1040384  }
 0x16c   : > { %v1526_v12 = vpop.permute.xlu1 %1525  ;;  %2453 = vrot.lane.b32.xlu2 %v2417_v6, %s3549_s29  ;;  %v590_v6 = vrot.slane %v586_v28, 4  ;;  %765 = vst [vmem:[#allocation2 + $0xc8] sm:$0x1] %v764_v45  ;;  %v2208_v44 = vsel %vm1087_vm2, %v2203_v36, %v2207_v54 }
 0x16d   : > { %2325 = vrot.lane.b32.xlu0 %v2244_v26, %s3547_s27  ;;  %v589_v26 = vor.u32 %v587_v30, %v586_v28  ;;  %v2537_v48 = vsel %vm2531_vm14, %v4492_v32, %v1526_v12  ;;  %v1580_v12 = vunpack.c.l.b16 %v873_v24  ;;  %v3397_v30 = vld [vmem:[#allocation2 + $0x90] sm:$0xe]  ;;  %v2408_v18 = vsel %vm1360_vm9, %v2406_v38, %v2407_v25 }
 0x16e   : > { %v4770_v20 = vpop.permute.xlu2 %1545  ;;  %v598_v22 = vsel %vm3739_vm7, %v590_v6, %v597_v7  ;;  %v3398_v50 = vor.u32 %v3397_v30, %v3396_v55  ;;  %v3524_v6 = vld [vmem:[#allocation2 + $0x9c] sm:$0xf0]  ;;  %v1770_v24 = vshrl.u32 %v858_v33, 16  ;;  %vm3111_vm7 = vcmask 254976  }
 0x16f   : > { %v1798_v35 = vpop.permute.xlu0 %1797  ;;  %v760_v8 = vsel %vm3759_vm8, %v589_v26, %v759_v47  ;;  %762 = vst.msk [vmem:[#allocation2 + $0xc4] sm:$0xf] %vm269_vm0, %v598_v22  ;;  %v4820_v26 = vld [vmem:[#allocation2 + $0x9c] sm:$0xff]   ;;  %v938_v47 = vld [vmem:[#allocation2 + $0xa4] sm:$0x1]  ;;  %v1774_v22 = vrot.slane %v1772_v10, 1 }
 0x170   : > { %761 = vst [vmem:[#allocation2 + $0xc0] sm:$0xf] %v760_v8  ;;  %v2570_v32 = vsel %vm2564_vm15, %v2537_v48, %v1798_v35  ;;  %v2543_v35 = vsel %vm2531_vm14, %v4528_v63, %v4690_v39  ;;  %v1906_v3 = vrot.slane %v3398_v50, 1  ;;  %vm2905_vm0 = vcmask 257024  }
 0x171   : > { %v2603_v15 = vsel %vm2597_vm1, %v2570_v32, %v4706_v53  ;;  %v1583_v53 = vunpack.c.l.b16 %v876_v58  ;;  %v3523_v32 = vor.u32 %v3522_v60, %v4791_v19 }
 0x172   : > { %2331 = vrot.lane.b32.xlu1 %v2280_v57, %s3547_s27 }
 0x173   : > { %v941_v56 = vld [vmem:[#allocation2 + $0xc8] sm:$0x1] }
 0x174   : > { %v1804_v11 = vpop.permute.xlu1 %1803  ;;  %1807 = vrot.lane.b32.xlu2 %v1696_v17, %s3544_s24  ;;  %v2095_v19 = vunpack.c.l.b16 %v941_v56 }
 0x175   : > { %2459 = vrot.lane.b32.xlu0 %v2426_v31, %s3549_s29  ;;  %v2576_v1 = vsel %vm2564_vm15, %v2543_v35, %v1804_v11  ;;  %v1599_v11 = vpack.c.b16 %v1583_v53, %v1583_v53 }
 0x176   : > { %v4789_v5 = vpop.permute.xlu2 %1939  ;;  %v3426_v60 = vld [vmem:[#allocation2 + $0xc0] sm:$0xf0] }
 0x177   : > { %v1932_v2 = vpop.permute.xlu0 %1931  ;;  %v1777_v8 = vshll.u32 %v1599_v11, 16  ;;  %v1916_v58 = vrot.slane %v1599_v11, 1  ;;  %v3427_v50 = vld [vmem:[#allocation2 + $0xc0] sm:$0xe] }
 0x178   : > { %v2609_v63 = vsel %vm2597_vm1, %v2576_v1, %v1932_v2  ;;  %v4843_v1 = vld [vmem:[#allocation2 + $0xc0] sm:$0xff]  }
 0x17a   : > { %1535 = vrot.lane.b32.xlu1 %v4655_v23, %s3545_s25  ;;  %v1596_v23 = vpack.c.b16 %v1580_v12, %v1580_v12 }
 0x17c   : > { %v2038_v57 = vpop.permute.xlu1 %2037  ;;  %2319 = vrot.lane.b32.xlu2 %v2208_v44, %s3547_s27  ;;  %v1741_v17 = vshll.u32 %v1596_v23, 16  ;;  %v1907_v36 = vrot.slane %v1596_v23, 1  ;;  %v1779_v44 = vrot.slane %v1777_v8, 1  ;;  %v3525_v23 = vld [vmem:[#allocation2 + $0x9c] sm:$0xe] }
 0x17d   : > { %1935 = vrot.lane.b32.xlu0 %v1896_v49, %s3546_s26  ;;  %v2636_v29 = vsel %vm2630_vm3, %v2603_v15, %v2038_v57  ;;  %v1775_v49 = vor.u32 %v1774_v22, %v1770_v24  ;;  %v1915_v15 = vrot.slane %v3523_v32, 1 }
 0x17e   : > { %v4810_v28 = vpop.permute.xlu2 %2057  ;;  %v1908_v12 = vsel %vm1360_vm9, %v1906_v3, %v1907_v36  ;;  %v3528_v3 = vld [vmem:[#allocation2 + $0xb4] sm:$0xe] }
 0x17f   : > { %v2310_v37 = vpop.permute.xlu0 %2309  ;;  %v1917_v25 = vsel %vm1360_vm9, %v1915_v15, %v1916_v58 }
 0x180   : > { %v2669_v31 = vsel %vm2663_vm4, %v2636_v29, %v2310_v37  ;;  %v2246_v37 = vshrl.u32 %v4820_v26, 16 }
 0x181   : > { %v2702_v39 = vsel %vm2696_vm5, %v2669_v31, %v4750_v61  ;;  %v2642_v61 = vsel %vm2630_vm3, %v2609_v63, %v4727_v43  ;;  %v2092_v43 = vunpack.c.l.b16 %v938_v47  ;;  %v2111_v31 = vpack.c.b16 %v2095_v19, %v2095_v19 }
 0x182   : > { %3219 = vmatmul.msk.bf16.gmra.mxu0 %vm2744_vm12, %v2702_v39  ;;  %2047 = vrot.lane.b32.xlu1 %v4734_v16, %s3548_s28  ;;  %v1743_v16 = vrot.slane %v1741_v17, 1  ;;  %v2284_v63 = vshll.u32 %v4843_v1, 16  ;;  %v3526_v39 = vor.u32 %v3525_v23, %v3524_v6 }
 0x183   : > { %v2108_v57 = vpack.c.b16 %v2092_v43, %v2092_v43  ;;  %v2289_v6 = vshll.u32 %v2111_v31, 16  ;;  %v925_v43 = vld [vmem:[#allocation2 + $0xcc] sm:$0xff]  }
 0x184   : > { %v2316_v7 = vpop.permute.xlu1 %2315  ;;  %1549 = vrot.lane.b32.xlu2 %v858_v33, %s3545_s25  ;;  %v1744_v2 = vsel %vm1087_vm2, %v4740_v34, %v1743_v16  ;;  %v1780_v34 = vsel %vm1087_vm2, %v1775_v49, %v1779_v44  ;;  %v2418_v10 = vrot.slane %v3526_v39, 1  ;;  %v877_v16 = vld [vmem:[#allocation2 + $0xc8] sm:$0x1]  ;;  %v2557_v49 = vsel %vm2531_vm14, %v4591_v40, %v4770_v20 }
 0x185   : > { %2447 = vrot.lane.b32.xlu0 %v2408_v18, %s3549_s29  ;;  %v2675_v46 = vsel %vm2663_vm4, %v2642_v61, %v2316_v7  ;;  %v2253_v38 = vshll.u32 %v2108_v57, 16  ;;  %v2419_v11 = vrot.slane %v2108_v57, 1  ;;  %v2282_v61 = vshrl.u32 %v4843_v1, 16 }
 0x186   : > { %v4827_v48 = vpop.permute.xlu2 %2451  ;;  %v1584_v24 = vunpack.c.l.b16 %v877_v16 }
 0x187   : > { %v2444_v54 = vpop.permute.xlu0 %2443  ;;  %v2255_v55 = vrot.slane %v2253_v38, 1  ;;  %v2420_v22 = vsel %vm1360_vm9, %v2418_v10, %v2419_v11  ;;  %v2294_v10 = vshrl.u32 %v925_v43, 16 }
 0x188   : > { %v2708_v45 = vsel %vm2696_vm5, %v2675_v46, %v2444_v54  ;;  %v2286_v46 = vrot.slane %v2284_v63, 1  ;;  %v3428_v54 = vor.u32 %v3427_v50, %v3426_v60  ;;  %v1600_v57 = vpack.c.b16 %v1584_v24, %v1584_v24  ;;  %v3403_v63 = vld [vmem:[#allocation2 + $0xc0] sm:$0xe]  ;;  %v3531_v50 = vld [vmem:[#allocation2 + $0xcc] sm:$0xe] }
 0x189   : > { %3222 = vmatmul.msk.bf16.gmra.mxu1 %vm2744_vm12, %v2708_v45  ;;  %v2291_v45 = vrot.slane %v2289_v6, 1 }
 0x18a   : > { %1543 = vrot.lane.b32.xlu1 %v4714_v0, %s3545_s25  ;;  %v2248_v0 = vshll.u32 %v4820_v26, 16  ;;  %v2287_v8 = vor.u32 %v2286_v46, %v2282_v61  ;;  %v2427_v44 = vrot.slane %v3428_v54, 1  ;;  %v1789_v23 = vshll.u32 %v1600_v57, 16 }
 0x18b   : > { %v1919_v61 = vrot.slane %v1600_v57, 1 }
 0x18c   : > { %v1540_v33 = vpop.permute.xlu1 %1539  ;;  %1943 = vrot.lane.b32.xlu2 %v1908_v12, %s3546_s26  ;;  %v2250_v53 = vrot.slane %v2248_v0, 1  ;;  %v2292_v58 = vsel %vm1087_vm2, %v2287_v8, %v2291_v45  ;;  %v942_v0 = vld [vmem:[#allocation2 + $0xd4] sm:$0x1]  ;;  %v1791_v39 = vrot.slane %v1789_v23, 1 }
 0x18d   : > { %1815 = vrot.lane.b32.xlu0 %v1744_v2, %s3544_s24  ;;  %v2551_v30 = vsel %vm2531_vm14, %v4567_v27, %v1540_v33  ;;  %v3530_v2 = vld [vmem:[#allocation2 + $0xcc] sm:$0xf0]  ;;  %v2428_v33 = vrot.slane %v2111_v31, 1  ;;  %v2096_v38 = vunpack.c.l.b16 %v942_v0  ;;  %v3402_v31 = vld [vmem:[#allocation2 + $0xc0] sm:$0xf0] }
 0x18e   : > { %v4841_v29 = vpop.permute.xlu2 %1533  ;;  %v2251_v18 = vor.u32 %v2250_v53, %v2246_v37 }
 0x18f   : > { %v1812_v35 = vpop.permute.xlu0 %1811 }
 0x190   : > { %v2584_v36 = vsel %vm2564_vm15, %v2551_v30, %v1812_v35  ;;  %v2256_v27 = vsel %vm1087_vm2, %v2251_v18, %v2255_v55  ;;  %v2296_v55 = vshll.u32 %v925_v43, 16 }
 0x191   : > { %v2617_v12 = vsel %vm2597_vm1, %v2584_v36, %v4789_v5  ;;  %v3529_v5 = vor.u32 %v3528_v3, %v4265_v13  ;;  %v1407_v13 = vrot.slane %v4275_v9, 1  ;;  %v3404_v9 = vor.u32 %v3403_v63, %v3402_v31 }
 0x192   : > { %1821 = vrot.lane.b32.xlu1 %v1780_v34, %s3544_s24  ;;  %v2429_v34 = vsel %vm1360_vm9, %v2427_v44, %v2428_v33  ;;  %v2298_v11 = vrot.slane %v2296_v55, 1 }
 0x194   : > { %v1818_v17 = vpop.permute.xlu1 %1817  ;;  %2061 = vrot.lane.b32.xlu2 %v4843_v1, %s3548_s28  ;;  %v2299_v16 = vor.u32 %v2298_v11, %v2294_v10 }
 0x195   : > { %1949 = vrot.lane.b32.xlu0 %v1917_v25, %s3546_s26  ;;  %v2590_v56 = vsel %vm2564_vm15, %v2557_v49, %v1818_v17  ;;  %v1406_v25 = vrot.slane %v3529_v5, 1  ;;  %v2112_v17 = vpack.c.b16 %v2096_v38, %v2096_v38 }
 0x196   : > { %v4855_v47 = vpop.permute.xlu2 %1927 }
 0x197   : > { %v1946_v7 = vpop.permute.xlu0 %1945  ;;  %v1408_v18 = vsel %vm1360_vm9, %v1406_v25, %v1407_v13 }
 0x198   : > { %v2623_v40 = vsel %vm2597_vm1, %v2590_v56, %v1946_v7  ;;  %v2301_v7 = vshll.u32 %v2112_v17, 16  ;;  %v2545_v56 = vsel %vm2531_vm14, %v4541_v62, %v4841_v29 }
 0x199   : > { %v2656_v53 = vsel %vm2630_vm3, %v2623_v40, %v4810_v28  ;;  %v1792_v28 = vsel %vm1087_vm2, %v2287_v8, %v1791_v39  ;;  %v2431_v8 = vrot.slane %v2112_v17, 1 }
 0x19a   : > { %2055 = vrot.lane.b32.xlu1 %v4820_v26, %s3548_s28  ;;  %v2303_v3 = vrot.slane %v2301_v7, 1 }
 0x19c   : > { %v2052_v32 = vpop.permute.xlu1 %2051  ;;  %2455 = vrot.lane.b32.xlu2 %v2420_v22, %s3549_s29  ;;  %v2304_v24 = vsel %vm1087_vm2, %v2299_v16, %v2303_v3  ;;  %vm2938_vm2 = vcmask 261120  }
 0x19d   : > { %2327 = vrot.lane.b32.xlu0 %v2256_v27, %s3547_s27  ;;  %v2650_v26 = vsel %vm2630_vm3, %v2617_v12, %v2052_v32  ;;  %v3532_v27 = vor.u32 %v3531_v50, %v3530_v2 }
 0x19e   : > { %v4880_v19 = vpop.permute.xlu2 %2045 }
 0x19f   : > { %v2324_v15 = vpop.permute.xlu0 %2323  ;;  %v2430_v22 = vrot.slane %v3532_v27, 1 }
 0x1a0   : > { %v2683_v35 = vsel %vm2663_vm4, %v2650_v26, %v2324_v15 }
 0x1a1   : > { %v2716_v20 = vsel %vm2696_vm5, %v2683_v35, %v4827_v48  ;;  %v2432_v26 = vsel %vm1360_vm9, %v2430_v22, %v2431_v8 }
 0x1a2   : > { %3226 = vmatmul.msk.bf16.gmra.mxu2 %vm2744_vm12, %v2716_v20  ;;  %2333 = vrot.lane.b32.xlu1 %v2292_v58, %s3547_s27 }
 0x1a4   : > { %v2330_v37 = vpop.permute.xlu1 %2329  ;;  %1551 = vrot.lane.b32.xlu2 %v4843_v1, %s3545_s25  ;;  %v1918_v1 = vrot.slane %v3404_v9, 1 }
 0x1a5   : > { %2461 = vrot.lane.b32.xlu0 %v2429_v34, %s3549_s29  ;;  %v2689_v48 = vsel %vm2663_vm4, %v2656_v53, %v2330_v37 }
 0x1a6   : > { %v2440_v6 = vpop.permute.xlu2 %2439  ;;  %v1920_v54 = vsel %vm1360_vm9, %v1918_v1, %v1919_v61 }
 0x1a7   : > { %v2458_v30 = vpop.permute.xlu0 %2457 }
 0x1a8   : > { %v2722_v60 = vsel %vm2696_vm5, %v2689_v48, %v2458_v30 }
 0x1a9   : > { %3229 = vmatmul.msk.bf16.vlgmr.msra.gmra.mxu3 %vm2744_vm12, %v2722_v60 }
 0x1aa   : > { %1439 = vrot.lane.b32.xlu1 %v1408_v18, %s3543_s23 }
 0x1ac   : > { %v1528_v46 = vpop.permute.xlu1 %1527  ;;  %2063 = vrot.lane.b32.xlu2 %v925_v43, %s3548_s28 }
 0x1ad   : > { %1823 = vrot.lane.b32.xlu0 %v1792_v28, %s3544_s24  ;;  %v2539_v32 = vsel %vm2531_vm14, %v4512_v14, %v1528_v46 }
 0x1ae   : > { %v4902_v12 = vpop.permute.xlu2 %1547 }
 0x1af   : > { %v1800_v36 = vpop.permute.xlu0 %1799 }
 0x1b0   : > { %v2572_v44 = vsel %vm2564_vm15, %v2539_v32, %v1800_v36  ;;  %v2559_v32 = vsel %vm2531_vm14, %v4495_v41, %v4902_v12 }
 0x1b1   : > { %v2605_v33 = vsel %vm2597_vm1, %v2572_v44, %v4855_v47 }
 0x1b2   : > { %1951 = vrot.lane.b32.xlu1 %v1920_v54, %s3546_s26 }
 0x1b4   : > { %v1806_v45 = vpop.permute.xlu1 %1805 }
 0x1b5   : > { %2335 = vrot.lane.b32.xlu0 %v2304_v24, %s3547_s27  ;;  %v2578_v58 = vsel %vm2564_vm15, %v2545_v56, %v1806_v45 }
 0x1b6   : > { %v2793_v43 = vpop.f32.mrf.mxu0  ;;  %v1942_v23 = vpop.permute.xlu2 %1941 }
 0x1b7   : > { %v2873_v2 = vpack.c.bf16 %v2793_v43, %v2793_v43  ;;  %v1934_v49 = vpop.permute.xlu0 %1933  ;;  %v3008_v57 = vmul.f32 %v2793_v43, %v2793_v43  ;;  %v2939_v0 = vsel %vm2938_vm2, %v2793_v43, 0.0 }
 0x1b8   : > { %v2611_v62 = vsel %vm2597_vm1, %v2578_v58, %v1934_v49 }
 0x1b9   : > { %2906 = vst.msk [vmem:[%s4909_s13] sm:$0xf] %vm2905_vm0, %v2873_v2  ;;  %v3040_v25 = vsel %vm2938_vm2, %v3008_v57, 0.0  ;;  %v2644_v31 = vsel %vm2630_vm3, %v2611_v62, %v4880_v19 }
 0x1ba   : > { %2463 = vrot.lane.b32.xlu1 %v2432_v26, %s3549_s29 }
 0x1bc   : > { %v2040_v14 = vpop.permute.xlu1 %2039 }
 0x1bd   : > { %v2638_v15 = vsel %vm2630_vm3, %v2605_v33, %v2040_v14 }
 0x1be   : > { %v2795_v5 = vpop.f32.mrf.mxu0  ;;  %v2060_v17 = vpop.permute.xlu2 %2059 }
 0x1bf   : > { %v2874_v35 = vpack.c.bf16 %v2795_v5, %v2795_v5  ;;  %v2940_v40 = vsel %vm2938_vm2, %v2795_v5, 0.0  ;;  %v3009_v20 = vmul.f32 %v2795_v5, %v2795_v5  ;;  %v2312_v34 = vpop.permute.xlu0 %2311 }
 0x1c0   : > { %v2941_v47 = vadd.f32 %v2940_v40, %v2939_v0  ;;  %v2671_v38 = vsel %vm2663_vm4, %v2638_v15, %v2312_v34 }
 0x1c1   : > { %2907 = vst.msk [vmem:[%s4909_s13 + $0x4] sm:$0xf] %vm2905_vm0, %v2874_v35  ;;  %v3041_v29 = vsel %vm2938_vm2, %v3009_v20, 0.0  ;;  %v2704_v13 = vsel %vm2696_vm5, %v2671_v38, %v2440_v6 }
 0x1c2   : > { %v3042_v37 = vadd.f32 %v3041_v29, %v3040_v25  ;;  %3220 = vmatmul.msk.bf16.gmra.mxu0 %vm2744_vm12, %v2704_v13 }
 0x1c4   : > { %v2318_v53 = vpop.permute.xlu1 %2317 }
 0x1c5   : > { %v2677_v63 = vsel %vm2663_vm4, %v2644_v31, %v2318_v53 }
 0x1c6   : > { %v2454_v11 = vpop.permute.xlu2 %2453 }
 0x1c7   : > { %v2446_v48 = vpop.permute.xlu0 %2445 }
 0x1c8   : > { %v2710_v39 = vsel %vm2696_vm5, %v2677_v63, %v2446_v48 }
 0x1c9   : > { %3223 = vmatmul.msk.bf16.gmra.mxu1 %vm2744_vm12, %v2710_v39 }
 0x1cc   : > { %v1542_v55 = vpop.permute.xlu1 %1541 }
 0x1cd   : > { %v2553_v1 = vsel %vm2531_vm14, %v4476_v52, %v1542_v55 }
 0x1ce   : > { %v1808_v49 = vpop.permute.xlu2 %1807 }
 0x1cf   : > { %v2798_v30 = vpop.f32.mrf.mxu0  ;;  %v1814_v18 = vpop.permute.xlu0 %1813 }
 0x1d0   : > { %v2875_v9 = vpack.c.bf16 %v2798_v30, %v2798_v30  ;;  %v2942_v60 = vsel %vm2938_vm2, %v2798_v30, 0.0  ;;  %v3010_v50 = vmul.f32 %v2798_v30, %v2798_v30  ;;  %v2586_v27 = vsel %vm2564_vm15, %v2553_v1, %v1814_v18 }
 0x1d1   : > { %v2943_v28 = vadd.f32 %v2942_v60, %v2941_v47  ;;  %v2619_v45 = vsel %vm2597_vm1, %v2586_v27, %v1942_v23 }
 0x1d2   : > { %2908 = vst.msk [vmem:[%s4909_s13 + $0x8] sm:$0xf] %vm2905_vm0, %v2875_v9  ;;  %v3043_v19 = vsel %vm2938_vm2, %v3010_v50, 0.0 }
 0x1d3   : > { %v3044_v10 = vadd.f32 %v3043_v19, %v3042_v37 }
 0x1d4   : > { %v1820_v7 = vpop.permute.xlu1 %1819 }
 0x1d5   : > { %v2592_v2 = vsel %vm2564_vm15, %v2559_v32, %v1820_v7 }
 0x1d6   : > { %v4944_v61 = vpop.f32.mrf.mxu1  ;;  %v2320_v5 = vpop.permute.xlu2 %2319 }
 0x1d7   : > { %v2881_v46 = vpack.c.bf16 %v4944_v61, %v4944_v61  ;;  %v2800_v6 = vpop.f32.mrf.mxu0  ;;  %v1948_v16 = vpop.permute.xlu0 %1947 }
 0x1d8   : > { %v2876_v3 = vpack.c.bf16 %v2800_v6, %v2800_v6  ;;  %v2944_v36 = vsel %vm2938_vm2, %v2800_v6, 0.0  ;;  %v3011_v54 = vmul.f32 %v2800_v6, %v2800_v6  ;;  %v2625_v56 = vsel %vm2597_vm1, %v2592_v2, %v1948_v16 }
 0x1d9   : > { %2914 = vst.msk [vmem:[%s4909_s13 + $0x20] sm:$0xf] %vm2905_vm0, %v2881_v46  ;;  %v2945_v24 = vadd.f32 %v2944_v36, %v2943_v28  ;;  %v2658_v57 = vsel %vm2630_vm3, %v2625_v56, %v2060_v17 }
 0x1da   : > { %2909 = vst.msk [vmem:[%s4909_s13 + $0xc] sm:$0xf] %vm2905_vm0, %v2876_v3  ;;  %v3045_v52 = vsel %vm2938_vm2, %v3011_v54, 0.0 }
 0x1db   : > { %v3046_v22 = vadd.f32 %v3045_v52, %v3044_v10 }
 0x1dc   : > { %v2054_v8 = vpop.permute.xlu1 %2053 }
 0x1dd   : > { %v2652_v43 = vsel %vm2630_vm3, %v2619_v45, %v2054_v8 }
 0x1de   : > { %v4961_v26 = vpop.f32.mrf.mxu1  ;;  %v1550_v38 = vpop.permute.xlu2 %1549 }
 0x1df   : > { %v2882_v44 = vpack.c.bf16 %v4961_v26, %v4961_v26  ;;  %v2326_v14 = vpop.permute.xlu0 %2325 }
 0x1e0   : > { %v2685_v33 = vsel %vm2663_vm4, %v2652_v43, %v2326_v14 }
 0x1e1   : > { %2915 = vst.msk [vmem:[%s4909_s13 + $0x24] sm:$0xf] %vm2905_vm0, %v2882_v44  ;;  %v2718_v41 = vsel %vm2696_vm5, %v2685_v33, %v2454_v11 }
 0x1e2   : > { %3227 = vmatmul.msk.bf16.gmra.mxu2 %vm2744_vm12, %v2718_v41 }
 0x1e4   : > { %v2332_v12 = vpop.permute.xlu1 %2331 }
 0x1e5   : > { %v2691_v15 = vsel %vm2663_vm4, %v2658_v57, %v2332_v12 }
 0x1e6   : > { %v1944_v63 = vpop.permute.xlu2 %1943 }
 0x1e7   : > { %v2460_v58 = vpop.permute.xlu0 %2459 }
 0x1e8   : > { %v2724_v0 = vsel %vm2696_vm5, %v2691_v15, %v2460_v58 }
 0x1e9   : > { %3230 = vmatmul.msk.bf16.gmra.mxu3 %vm2744_vm12, %v2724_v0 }
 0x1ec   : > { %v4975_v35 = vpop.f32.mrf.mxu2  ;;  %v1536_v40 = vpop.permute.xlu1 %1535 }
 0x1ed   : > { %v2889_v20 = vpack.c.bf16 %v4975_v35, %v4975_v35  ;;  %v2547_v34 = vsel %vm2531_vm14, %v4459_v21, %v1536_v40 }
 0x1ee   : > { %v2580_v47 = vsel %vm2564_vm15, %v2547_v34, %v1808_v49  ;;  %v2062_v19 = vpop.permute.xlu2 %2061 }
 0x1ef   : > { %2922 = vst.msk [vmem:[%s4909_s13 + $0x40] sm:$0xf] %vm2905_vm0, %v2889_v20  ;;  %v1936_v23 = vpop.permute.xlu0 %1935 }
 0x1f0   : > { %v2613_v25 = vsel %vm2597_vm1, %v2580_v47, %v1936_v23 }
 0x1f4   : > { %v4985_v62 = vpop.f32.mrf.mxu2  ;;  %v2048_v29 = vpop.permute.xlu1 %2047 }
 0x1f5   : > { %v2890_v13 = vpack.c.bf16 %v4985_v62, %v4985_v62  ;;  %v2646_v37 = vsel %vm2630_vm3, %v2613_v25, %v2048_v29 }
 0x1f6   : > { %v2679_v53 = vsel %vm2663_vm4, %v2646_v37, %v2320_v5  ;;  %v2456_v43 = vpop.permute.xlu2 %2455  ;;  %v2497_v5 = vsel %vm2465_vm10, %v4263_v51, %v4471_v42 }
 0x1f7   : > { %2923 = vst.msk [vmem:[%s4909_s13 + $0x44] sm:$0xf] %vm2905_vm0, %v2890_v13  ;;  %v2448_v21 = vpop.permute.xlu0 %2447 }
 0x1f8   : > { %v2712_v31 = vsel %vm2696_vm5, %v2679_v53, %v2448_v21 }
 0x1f9   : > { %3224 = vmatmul.msk.bf16.gmra.mxu1 %vm2744_vm12, %v2712_v31 }
 0x1fc   : > { %v1544_v48 = vpop.permute.xlu1 %1543 }
 0x1fd   : > { %v2555_v10 = vsel %vm2531_vm14, %v4578_v4, %v1544_v48 }
 0x1fe   : > { %v1552_v58 = vpop.permute.xlu2 %1551 }
 0x1ff   : > { %v2803_v39 = vpop.f32.mrf.mxu0  ;;  %v1816_v17 = vpop.permute.xlu0 %1815 }
 0x200   : > { %v2877_v55 = vpack.c.bf16 %v2803_v39, %v2803_v39  ;;  %v2946_v30 = vsel %vm2938_vm2, %v2803_v39, 0.0  ;;  %v3012_v18 = vmul.f32 %v2803_v39, %v2803_v39  ;;  %v2588_v36 = vsel %vm2564_vm15, %v2555_v10, %v1816_v17 }
 0x201   : > { %v2947_v9 = vadd.f32 %v2946_v30, %v2945_v24  ;;  %v2621_v24 = vsel %vm2597_vm1, %v2588_v36, %v1944_v63  ;;  %v2954_v36 = vsel %vm2938_vm2, %v4944_v61, 0.0 }
 0x202   : > { %2910 = vst.msk [vmem:[%s4909_s13 + $0x10] sm:$0xf] %vm2905_vm0, %v2877_v55  ;;  %v3047_v60 = vsel %vm2938_vm2, %v3012_v18, 0.0 }
 0x203   : > { %v3048_v50 = vadd.f32 %v3047_v60, %v3046_v22  ;;  %v2561_v22 = vsel %vm2531_vm14, %v4601_v59, %v1550_v38 }
 0x204   : > { %v1822_v28 = vpop.permute.xlu1 %1821 }
 0x205   : > { %v2594_v45 = vsel %vm2564_vm15, %v2561_v22, %v1822_v28  ;;  %v2956_v22 = vsel %vm2938_vm2, %v4961_v26, 0.0 }
 0x206   : > { %v5001_v11 = vpop.f32.mrf.mxu1  ;;  %v2064_v29 = vpop.permute.xlu2 %2063 }
 0x207   : > { %v2883_v7 = vpack.c.bf16 %v5001_v11, %v5001_v11  ;;  %v2805_v1 = vpop.f32.mrf.mxu0  ;;  %v1950_v46 = vpop.permute.xlu0 %1949 }
 0x208   : > { %v2878_v6 = vpack.c.bf16 %v2805_v1, %v2805_v1  ;;  %v2948_v16 = vsel %vm2938_vm2, %v2805_v1, 0.0  ;;  %v3013_v3 = vmul.f32 %v2805_v1, %v2805_v1  ;;  %v2627_v14 = vsel %vm2597_vm1, %v2594_v45, %v1950_v46 }
 0x209   : > { %2916 = vst.msk [vmem:[%s4909_s13 + $0x28] sm:$0xf] %vm2905_vm0, %v2883_v7  ;;  %v2949_v54 = vadd.f32 %v2948_v16, %v2947_v9  ;;  %v2660_v59 = vsel %vm2630_vm3, %v2627_v14, %v2062_v19  ;;  %v3016_v1 = vmul.f32 %v4944_v61, %v4944_v61 }
 0x20a   : > { %2911 = vst.msk [vmem:[%s4909_s13 + $0x14] sm:$0xf] %vm2905_vm0, %v2878_v6  ;;  %v3049_v4 = vsel %vm2938_vm2, %v3013_v3, 0.0 }
 0x20b   : > { %v3050_v27 = vadd.f32 %v3049_v4, %v3048_v50 }
 0x20c   : > { %v2056_v52 = vpop.permute.xlu1 %2055 }
 0x20d   : > { %v2654_v8 = vsel %vm2630_vm3, %v2621_v24, %v2056_v52  ;;  %v3055_v52 = vsel %vm2938_vm2, %v3016_v1, 0.0 }
 0x20e   : > { %v5017_v32 = vpop.f32.mrf.mxu1 }
 0x20f   : > { %v2884_v2 = vpack.c.bf16 %v5017_v32, %v5017_v32  ;;  %v2328_v49 = vpop.permute.xlu0 %2327 }
 0x210   : > { %v2687_v44 = vsel %vm2663_vm4, %v2654_v8, %v2328_v49  ;;  %v3018_v8 = vmul.f32 %v5001_v11, %v5001_v11  ;;  %v3019_v49 = vmul.f32 %v5017_v32, %v5017_v32 }
 0x211   : > { %2917 = vst.msk [vmem:[%s4909_s13 + $0x2c] sm:$0xf] %vm2905_vm0, %v2884_v2  ;;  %v2720_v33 = vsel %vm2696_vm5, %v2687_v44, %v2456_v43  ;;  %v2958_v2 = vsel %vm2938_vm2, %v5001_v11, 0.0 }
 0x212   : > { %3228 = vmatmul.msk.bf16.gmra.mxu2 %vm2744_vm12, %v2720_v33  ;;  %v3061_v11 = vsel %vm2938_vm2, %v3019_v49, 0.0 }
 0x214   : > { %v2334_v56 = vpop.permute.xlu1 %2333 }
 0x215   : > { %v2693_v41 = vsel %vm2663_vm4, %v2660_v59, %v2334_v56  ;;  %v3059_v56 = vsel %vm2938_vm2, %v3018_v8, 0.0 }
 0x217   : > { %v2462_v12 = vpop.permute.xlu0 %2461 }
 0x218   : > { %v2726_v57 = vsel %vm2696_vm5, %v2693_v41, %v2462_v12 }
 0x219   : > { %3231 = vmatmul.msk.bf16.gmra.mxu3 %vm2744_vm12, %v2726_v57 }
 0x21c   : > { %v1440_v15 = vpop.permute.xlu1 %1439 }
 0x21d   : > { %v2530_v0 = vsel %vm2498_vm11, %v2497_v5, %v1440_v15 }
 0x21e   : > { %v2563_v20 = vsel %vm2531_vm14, %v2530_v0, %v1552_v58 }
 0x21f   : > { %v1824_v40 = vpop.permute.xlu0 %1823 }
 0x220   : > { %v2596_v23 = vsel %vm2564_vm15, %v2563_v20, %v1824_v40 }
 0x224   : > { %v1952_v34 = vpop.permute.xlu1 %1951 }
 0x225   : > { %v5037_v47 = vpop.f32.mrf.mxu2  ;;  %v2629_v25 = vsel %vm2597_vm1, %v2596_v23, %v1952_v34 }
 0x226   : > { %v2891_v38 = vpack.c.bf16 %v5037_v47, %v5037_v47  ;;  %v2662_v51 = vsel %vm2630_vm3, %v2629_v25, %v2064_v29 }
 0x227   : > { %v2336_v42 = vpop.permute.xlu0 %2335 }
 0x228   : > { %2924 = vst.msk [vmem:[%s4909_s13 + $0x48] sm:$0xf] %vm2905_vm0, %v2891_v38  ;;  %v2695_v13 = vsel %vm2663_vm4, %v2662_v51, %v2336_v42 }
 0x22c   : > { %v5046_v37 = vpop.f32.mrf.mxu3  ;;  %v2464_v53 = vpop.permute.xlu1 %2463 }
 0x22d   : > { %v2897_v21 = vpack.c.bf16 %v5046_v37, %v5046_v37  ;;  %v5050_v31 = vpop.f32.mrf.mxu2  ;;  %v2728_v63 = vsel %vm2696_vm5, %v2695_v13, %v2464_v53 }
 0x22e   : > { %v2892_v48 = vpack.c.bf16 %v5050_v31, %v5050_v31  ;;  %3232 = vmatmul.msk.bf16.gmra.mxu3 %vm2744_vm12, %v2728_v63  ;;  %v3027_v8 = vmul.f32 %v5050_v31, %v5050_v31 }
 0x22f   : > { %2930 = vst.msk [vmem:[%s4909_s13 + $0x60] sm:$0xf] %vm2905_vm0, %v2897_v21 }
 0x230   : > { %2925 = vst.msk [vmem:[%s4909_s13 + $0x4c] sm:$0xf] %vm2905_vm0, %v2892_v48 }
 0x234   : > { %v5060_v39 = vpop.f32.mrf.mxu3 }
 0x235   : > { %v2898_v17 = vpack.c.bf16 %v5060_v39, %v5060_v39 }
 0x237   : > { %2931 = vst.msk [vmem:[%s4909_s13 + $0x64] sm:$0xf] %vm2905_vm0, %v2898_v17 }
 0x23f   : > { %v2808_v55 = vpop.f32.mrf.mxu0 }
 0x240   : > { %v2879_v30 = vpack.c.bf16 %v2808_v55, %v2808_v55  ;;  %v2950_v18 = vsel %vm2938_vm2, %v2808_v55, 0.0  ;;  %v3014_v9 = vmul.f32 %v2808_v55, %v2808_v55 }
 0x241   : > { %v2951_v60 = vadd.f32 %v2950_v18, %v2949_v54  ;;  %v3017_v54 = vmul.f32 %v4961_v26, %v4961_v26  ;;  %v2960_v26 = vsel %vm2938_vm2, %v5017_v32, 0.0 }
 0x242   : > { %2912 = vst.msk [vmem:[%s4909_s13 + $0x18] sm:$0xf] %vm2905_vm0, %v2879_v30  ;;  %v3051_v50 = vsel %vm2938_vm2, %v3014_v9, 0.0 }
 0x243   : > { %v3052_v28 = vadd.f32 %v3051_v50, %v3050_v27  ;;  %v3057_v43 = vsel %vm2938_vm2, %v3017_v54, 0.0  ;;  %v3024_v50 = vmul.f32 %v4975_v35, %v4975_v35 }
 0x245   : > { %v3071_v54 = vsel %vm2938_vm2, %v3024_v50, 0.0 }
 0x246   : > { %v2823_v19 = vpop.f32.mrf.mxu1 }
 0x247   : > { %v2885_v10 = vpack.c.bf16 %v2823_v19, %v2823_v19  ;;  %v2810_v7 = vpop.f32.mrf.mxu0  ;;  %v3020_v41 = vmul.f32 %v2823_v19, %v2823_v19  ;;  %v2962_v15 = vsel %vm2938_vm2, %v2823_v19, 0.0 }
 0x248   : > { %v2880_v46 = vpack.c.bf16 %v2810_v7, %v2810_v7  ;;  %v2952_v6 = vsel %vm2938_vm2, %v2810_v7, 0.0  ;;  %v3015_v16 = vmul.f32 %v2810_v7, %v2810_v7 }
 0x249   : > { %2918 = vst.msk [vmem:[%s4909_s13 + $0x30] sm:$0xf] %vm2905_vm0, %v2885_v10  ;;  %v2953_v3 = vadd.f32 %v2952_v6, %v2951_v60  ;;  %v3063_v40 = vsel %vm2938_vm2, %v3020_v41, 0.0  ;;  %v3025_v6 = vmul.f32 %v4985_v62, %v4985_v62 }
 0x24a   : > { %2913 = vst.msk [vmem:[%s4909_s13 + $0x1c] sm:$0xf] %vm2905_vm0, %v2880_v46  ;;  %v3053_v4 = vsel %vm2938_vm2, %v3015_v16, 0.0  ;;  %v2970_v46 = vsel %vm2938_vm2, %v4975_v35, 0.0 }
 0x24b   : > { %v2955_v27 = vadd.f32 %v2954_v36, %v2953_v3  ;;  %v3054_v24 = vadd.f32 %v3053_v4, %v3052_v28  ;;  %v2972_v4 = vsel %vm2938_vm2, %v4985_v62, 0.0  ;;  %v3073_v35 = vsel %vm2938_vm2, %v3025_v6, 0.0 }
 0x24c   : > { %v2976_v62 = vsel %vm2938_vm2, %v5050_v31, 0.0 }
 0x24d   : > { %v2957_v45 = vadd.f32 %v2956_v22, %v2955_v27  ;;  %v3056_v61 = vadd.f32 %v3055_v52, %v3054_v24  ;;  %v3026_v27 = vmul.f32 %v5037_v47, %v5037_v47  ;;  %v2974_v22 = vsel %vm2938_vm2, %v5037_v47, 0.0 }
 0x24e   : > { %v2825_v44 = vpop.f32.mrf.mxu1 }
 0x24f   : > { %v2959_v14 = vadd.f32 %v2958_v2, %v2957_v45  ;;  %v3058_v33 = vadd.f32 %v3057_v43, %v3056_v61  ;;  %v2886_v59 = vpack.c.bf16 %v2825_v44, %v2825_v44  ;;  %v3021_v58 = vmul.f32 %v2825_v44, %v2825_v44 }
 0x250   : > { %v2964_v20 = vsel %vm2938_vm2, %v2825_v44, 0.0  ;;  %v3075_v43 = vsel %vm2938_vm2, %v3026_v27, 0.0  ;;  %v3077_v44 = vsel %vm2938_vm2, %v3027_v8, 0.0 }
 0x251   : > { %v3060_v12 = vadd.f32 %v3059_v56, %v3058_v33  ;;  %2919 = vst.msk [vmem:[%s4909_s13 + $0x34] sm:$0xf] %vm2905_vm0, %v2886_v59  ;;  %v2961_v57 = vadd.f32 %v2960_v26, %v2959_v14  ;;  %v3065_v23 = vsel %vm2938_vm2, %v3021_v58, 0.0 }
 0x253   : > { %v2963_v5 = vadd.f32 %v2962_v15, %v2961_v57  ;;  %v3062_v0 = vadd.f32 %v3061_v11, %v3060_v12 }
 0x255   : > { %v2965_v32 = vadd.f32 %v2964_v20, %v2963_v5  ;;  %v3064_v34 = vadd.f32 %v3063_v40, %v3062_v0 }
 0x257   : > { %v3066_v38 = vadd.f32 %v3065_v23, %v3064_v34 }
 0x265   : > { %v2843_v25 = vpop.f32.mrf.mxu2 }
 0x266   : > { %v2893_v29 = vpack.c.bf16 %v2843_v25, %v2843_v25  ;;  %v2978_v14 = vsel %vm2938_vm2, %v2843_v25, 0.0  ;;  %v3028_v47 = vmul.f32 %v2843_v25, %v2843_v25 }
 0x268   : > { %2926 = vst.msk [vmem:[%s4909_s13 + $0x50] sm:$0xf] %vm2905_vm0, %v2893_v29  ;;  %v3079_v41 = vsel %vm2938_vm2, %v3028_v47, 0.0 }
 0x26c   : > { %v5104_v51 = vpop.f32.mrf.mxu3 }
 0x26d   : > { %v2899_v42 = vpack.c.bf16 %v5104_v51, %v5104_v51  ;;  %v2845_v13 = vpop.f32.mrf.mxu2 }
 0x26e   : > { %v2894_v53 = vpack.c.bf16 %v2845_v13, %v2845_v13  ;;  %v3029_v12 = vmul.f32 %v2845_v13, %v2845_v13  ;;  %v2980_v31 = vsel %vm2938_vm2, %v2845_v13, 0.0 }
 0x26f   : > { %2932 = vst.msk [vmem:[%s4909_s13 + $0x68] sm:$0xf] %vm2905_vm0, %v2899_v42 }
 0x270   : > { %2927 = vst.msk [vmem:[%s4909_s13 + $0x54] sm:$0xf] %vm2905_vm0, %v2894_v53  ;;  %v3081_v5 = vsel %vm2938_vm2, %v3029_v12, 0.0 }
 0x274   : > { %v5112_v21 = vpop.f32.mrf.mxu3 }
 0x275   : > { %v2900_v63 = vpack.c.bf16 %v5112_v21, %v5112_v21 }
 0x276   : > { %v2828_v48 = vpop.f32.mrf.mxu1 }
 0x277   : > { %2933 = vst.msk [vmem:[%s4909_s13 + $0x6c] sm:$0xf] %vm2905_vm0, %v2900_v63  ;;  %v2887_v17 = vpack.c.bf16 %v2828_v48, %v2828_v48  ;;  %v3022_v55 = vmul.f32 %v2828_v48, %v2828_v48  ;;  %v2966_v30 = vsel %vm2938_vm2, %v2828_v48, 0.0  ;;  %v2986_v63 = vsel %vm2938_vm2, %v5046_v37, 0.0 }
 0x278   : > { %v2967_v9 = vadd.f32 %v2966_v30, %v2965_v32  ;;  %v3033_v48 = vmul.f32 %v5060_v39, %v5060_v39 }
 0x279   : > { %2920 = vst.msk [vmem:[%s4909_s13 + $0x38] sm:$0xf] %vm2905_vm0, %v2887_v17  ;;  %v3067_v18 = vsel %vm2938_vm2, %v3022_v55, 0.0 }
 0x27a   : > { %v3068_v7 = vadd.f32 %v3067_v18, %v3066_v38  ;;  %v3032_v38 = vmul.f32 %v5046_v37, %v5046_v37 }
 0x27c   : > { %v3087_v18 = vsel %vm2938_vm2, %v3032_v38, 0.0 }
 0x27e   : > { %v2830_v60 = vpop.f32.mrf.mxu1 }
 0x27f   : > { %v2888_v28 = vpack.c.bf16 %v2830_v60, %v2830_v60  ;;  %v2968_v19 = vsel %vm2938_vm2, %v2830_v60, 0.0  ;;  %v3023_v10 = vmul.f32 %v2830_v60, %v2830_v60  ;;  %v3034_v60 = vmul.f32 %v5104_v51, %v5104_v51 }
 0x280   : > { %v2969_v1 = vadd.f32 %v2968_v19, %v2967_v9  ;;  %v2988_v9 = vsel %vm2938_vm2, %v5060_v39, 0.0  ;;  %v2990_v19 = vsel %vm2938_vm2, %v5104_v51, 0.0  ;;  %v3035_v39 = vmul.f32 %v5112_v21, %v5112_v21 }
 0x281   : > { %2921 = vst.msk [vmem:[%s4909_s13 + $0x3c] sm:$0xf] %vm2905_vm0, %v2888_v28  ;;  %v3069_v16 = vsel %vm2938_vm2, %v3023_v10, 0.0  ;;  %v3089_v28 = vsel %vm2938_vm2, %v3033_v48, 0.0  ;;  %v3091_v6 = vsel %vm2938_vm2, %v3034_v60, 0.0 }
 0x282   : > { %v2971_v3 = vadd.f32 %v2970_v46, %v2969_v1  ;;  %v3070_v36 = vadd.f32 %v3069_v16, %v3068_v7 }
 0x284   : > { %v2973_v24 = vadd.f32 %v2972_v4, %v2971_v3  ;;  %v3072_v52 = vadd.f32 %v3071_v54, %v3070_v36  ;;  %v2992_v3 = vsel %vm2938_vm2, %v5112_v21, 0.0  ;;  %v3093_v54 = vsel %vm2938_vm2, %v3035_v39, 0.0 }
 0x286   : > { %v2975_v45 = vadd.f32 %v2974_v22, %v2973_v24  ;;  %v3074_v61 = vadd.f32 %v3073_v35, %v3072_v52 }
 0x288   : > { %v3076_v2 = vadd.f32 %v3075_v43, %v3074_v61  ;;  %v2977_v49 = vadd.f32 %v2976_v62, %v2975_v45 }
 0x28a   : > { %v2979_v33 = vadd.f32 %v2978_v14, %v2977_v49  ;;  %v3078_v59 = vadd.f32 %v3077_v44, %v3076_v2 }
 0x28c   : > { %v3080_v11 = vadd.f32 %v3079_v41, %v3078_v59  ;;  %v2981_v58 = vadd.f32 %v2980_v31, %v2979_v33 }
 0x28e   : > { %v3082_v32 = vadd.f32 %v3081_v5, %v3080_v11 }
 0x295   : > { %v2848_v56 = vpop.f32.mrf.mxu2 }
 0x296   : > { %v2895_v26 = vpack.c.bf16 %v2848_v56, %v2848_v56  ;;  %v3030_v57 = vmul.f32 %v2848_v56, %v2848_v56  ;;  %v2982_v15 = vsel %vm2938_vm2, %v2848_v56, 0.0 }
 0x297   : > { %v2983_v20 = vadd.f32 %v2982_v15, %v2981_v58 }
 0x298   : > { %2928 = vst.msk [vmem:[%s4909_s13 + $0x58] sm:$0xf] %vm2905_vm0, %v2895_v26  ;;  %v3083_v0 = vsel %vm2938_vm2, %v3030_v57, 0.0 }
 0x299   : > { %v3084_v13 = vadd.f32 %v3083_v0, %v3082_v32 }
 0x29c   : > { %v2863_v40 = vpop.f32.mrf.mxu3 }
 0x29d   : > { %v2901_v34 = vpack.c.bf16 %v2863_v40, %v2863_v40  ;;  %v2850_v23 = vpop.f32.mrf.mxu2  ;;  %v3036_v51 = vmul.f32 %v2863_v40, %v2863_v40  ;;  %v2994_v24 = vsel %vm2938_vm2, %v2863_v40, 0.0 }
 0x29e   : > { %v2896_v25 = vpack.c.bf16 %v2850_v23, %v2850_v23  ;;  %v2984_v29 = vsel %vm2938_vm2, %v2850_v23, 0.0  ;;  %v3031_v42 = vmul.f32 %v2850_v23, %v2850_v23 }
 0x29f   : > { %2934 = vst.msk [vmem:[%s4909_s13 + $0x70] sm:$0xf] %vm2905_vm0, %v2901_v34  ;;  %v2985_v53 = vadd.f32 %v2984_v29, %v2983_v20  ;;  %v3095_v22 = vsel %vm2938_vm2, %v3036_v51, 0.0 }
 0x2a0   : > { %2929 = vst.msk [vmem:[%s4909_s13 + $0x5c] sm:$0xf] %vm2905_vm0, %v2896_v25  ;;  %v3085_v17 = vsel %vm2938_vm2, %v3031_v42, 0.0 }
 0x2a1   : > { %v2987_v55 = vadd.f32 %v2986_v63, %v2985_v53  ;;  %v3086_v30 = vadd.f32 %v3085_v17, %v3084_v13 }
 0x2a3   : > { %v2989_v50 = vadd.f32 %v2988_v9, %v2987_v55  ;;  %v3088_v37 = vadd.f32 %v3087_v18, %v3086_v30 }
 0x2a4   : > { %v2865_v10 = vpop.f32.mrf.mxu3 }
 0x2a5   : > { %v2991_v7 = vadd.f32 %v2990_v19, %v2989_v50  ;;  %v3090_v1 = vadd.f32 %v3089_v28, %v3088_v37  ;;  %v2902_v46 = vpack.c.bf16 %v2865_v10, %v2865_v10  ;;  %v3037_v8 = vmul.f32 %v2865_v10, %v2865_v10 }
 0x2a6   : > { %v2996_v21 = vsel %vm2938_vm2, %v2865_v10, 0.0 }
 0x2a7   : > { %v3092_v16 = vadd.f32 %v3091_v6, %v3090_v1  ;;  %2935 = vst.msk [vmem:[%s4909_s13 + $0x74] sm:$0xf] %vm2905_vm0, %v2902_v46  ;;  %v2993_v36 = vadd.f32 %v2992_v3, %v2991_v7  ;;  %v3097_v2 = vsel %vm2938_vm2, %v3037_v8, 0.0 }
 0x2a9   : > { %v3094_v4 = vadd.f32 %v3093_v54, %v3092_v16  ;;  %v2995_v35 = vadd.f32 %v2994_v24, %v2993_v36 }
 0x2ab   : > { %v3096_v61 = vadd.f32 %v3095_v22, %v3094_v4  ;;  %v2997_v62 = vadd.f32 %v2996_v21, %v2995_v35 }
 0x2ad   : > { %v3098_v44 = vadd.f32 %v3097_v2, %v3096_v61 }
 0x2b1   : > { %v2868_v27 = vpop.f32.mrf.mxu3 }
 0x2b2   : > { %v2903_v52 = vpack.c.bf16 %v2868_v27, %v2868_v27  ;;  %v3038_v45 = vmul.f32 %v2868_v27, %v2868_v27  ;;  %v2998_v43 = vsel %vm2938_vm2, %v2868_v27, 0.0 }
 0x2b3   : > { %v2999_v14 = vadd.f32 %v2998_v43, %v2997_v62 }
 0x2b4   : > { %2936 = vst.msk [vmem:[%s4909_s13 + $0x78] sm:$0xf] %vm2905_vm0, %v2903_v52  ;;  %v3099_v49 = vsel %vm2938_vm2, %v3038_v45, 0.0 }
 0x2b5   : > { %v3100_v26 = vadd.f32 %v3099_v49, %v3098_v44 }
 0x2b9   : > { %v2870_v33 = vpop.f32.mrf.mxu3 }
 0x2ba   : > { %v2904_v59 = vpack.c.bf16 %v2870_v33, %v2870_v33  ;;  %v3000_v47 = vsel %vm2938_vm2, %v2870_v33, 0.0  ;;  %v3039_v56 = vmul.f32 %v2870_v33, %v2870_v33 }
 0x2bb   : > { %v3001_v41 = vadd.f32 %v3000_v47, %v2999_v14 }
 0x2bc   : > { %2937 = vst.msk [vmem:[%s4909_s13 + $0x7c] sm:$0xf] %vm2905_vm0, %v2904_v59  ;;  %v3101_v12 = vsel %vm2938_vm2, %v3039_v56, 0.0 }
 0x2bd   : > { %v3002_v57 = vrot.slane %v3001_v41, 4  ;;  %v3102_v11 = vadd.f32 %v3101_v12, %v3100_v26 }
 0x2bf   : > { %v3003_v31 = vadd.f32 %v3002_v57, %v3001_v41  ;;  %v3103_v15 = vrot.slane %v3102_v11, 4 }
 0x2c1   : > { %v3004_v58 = vrot.slane %v3003_v31, 2  ;;  %v3104_v5 = vadd.f32 %v3103_v15, %v3102_v11 }
 0x2c3   : > { %v3005_v0 = vadd.f32 %v3004_v58, %v3003_v31  ;;  %v3105_v40 = vrot.slane %v3104_v5, 2 }
 0x2c5   : > { %v3006_v20 = vrot.slane %v3005_v0, 1  ;;  %v3106_v32 = vadd.f32 %v3105_v40, %v3104_v5 }
 0x2c7   : > { %v3107_v34 = vrot.slane %v3106_v32, 1  ;;  %v3007_v23 = vadd.f32 %v3006_v20, %v3005_v0 }
 0x2c9   : > { %v3108_v38 = vadd.f32 %v3107_v34, %v3106_v32 }
 0x2cb   : > { %v3110_v25 = vsel %vm3109_vm6, %v3007_v23, %v3108_v38 }
 0x2cc   : > { %3112 = vst.msk [vmem:[%s235_s17] sm:$0x3] %vm3111_vm7, %v3110_v25 }
 0x2cd PF: > { %s16_s18 = sadd.s32 1, %s3539_s18  }
 0x2ce   : > { %p13_p4 = scmp.ge.s32.totalorder %s16_s18, 4  }
 0x2d0   :  { %15 = sbr.rel (!%p13_p4) target bundleno = 1 (0x1), region = 80 }

// kernel: darknet_forward.9
= control target key start
LH: loop header
LB: loop body
LE: loop exit
PB: predicated region body
PF: predicated region fallthrough
CT: control target
= control target key end

     0   :  { %8 = vsyncpa [#allocation3], 0  ;;  %s507_s0 = inlined_call_operand.vmem [shape: bf16[2,2,2,256], index: 0, kind: input, shape index: {}]   ;;  %s508_s1 = inlined_call_operand.vmem [shape: f32[1,256], index: 1, kind: input, shape index: {}]   ;;  %s509_s2 = inlined_call_operand.vmem [shape: f32[1,256], index: 2, kind: input, shape index: {}]   ;;  %s510_s3 = inlined_call_operand.hbm [shape: f32[2,2,2,256], index: 3, kind: output, shape index: {}]  }
   0x1   :  { %10 = vsyncpa [#allocation3 + $0x1], 0  ;;  %s412_s12 = smov 0   ;;  %s414_s13 = smov 0  }
   0x2   :  { %s416_s14 = smov 0   ;;  %s418_s15 = smov 0  }
   0x3 LB: > { %s433_s16 = sadd.s32 4294967295, %s388_s15   ;;  %s273_s17 = sadd.s32 4294967294, %s388_s15   ;;  %s388_s15 = sphi %s418_s15, %s516_s15   ;;  %s384_s14 = sphi %s416_s14, %s515_s14   ;;  %s380_s13 = sphi %s414_s13, %s514_s13   ;;  %s376_s12 = sphi %s412_s12, %s513_s12  }
   0x4   : > { %s437_s18 = sadd.s32 1, %s388_s15   ;;  %s91_s19 = sadd.s32 1, %s384_s14 }
   0x5   : > { %s88_s20 = ssub.s32 %s388_s15, %s437_s18  ;;  %p101_p0 = scmp.ne.s32.totalorder %s384_s14, %s380_s13 }
   0x6   : > { %p89_p1 = scmp.eq.s32.totalorder %s88_s20, 0  ;;  %p102_p2 = scmp.eq.s32.totalorder %s433_s16, 1 }
   0x7   : > { %p107_p3 = scmp.ne.s32.totalorder %s380_s13, %s376_s12  ;;  %p108_p4 = scmp.eq.s32.totalorder %s273_s17, 1 }
   0x8   : > { %s448_s21 = scalar_select %p89_p1, %s384_s14, %s91_s19  }
   0x9   : > { %p450_p5 = por %p102_p2, %p101_p0  ;;  %p454_p6 = por %p108_p4, %p107_p3 }
   0xa   : > { %p276_p7 = scmp.ge.s32.totalorder %s388_s15, 1  ;;  %p139_p8 = scmp.lt.s32.totalorder %s388_s15, 3 }
   0xc   : > { %p140_p9 = pnand %p276_p7, %p139_p8 }
   0xd   : > { %p162_p10 = scmp.lt.s32.totalorder (!%p140_p9), %s433_s16, 1  ;;  %s159_s29 = sand.u32 (!%p140_p9), 1, %s380_s13  }
   0xe   : > { %143 = sbr.rel (%p140_p9) target bundleno = 39 (0x27), region = 32  ;;  %s277_s7 = sshll.u32 (!%p140_p9), %s159_s29, 3 }
   0xf   : > { %s284_s8 = sshll.u32 (!%p140_p9), %s433_s16, 3  ;;  %s161_s17 = scalar_lea.vmem (!%p140_p9), [#allocation2], %s277_s7 }
  0x10   : > { %s207_s11 = scalar_lea.hbm (!%p140_p9), %s510_s3, %s284_s8  ;;  %s208_s19 = sshll.u32 (!%p140_p9), %s161_s17, 4  ;;  %s209_s19 = int_to_ptr.vmem [resolvable:$true] %s208_s19 }
  0x11   : > { %s210_s20 = sshll.u32 (!%p140_p9), %s207_s11, 4  ;;  %s211_s20 = int_to_ptr.hbm [resolvable:$true] %s210_s20 }
  0x12   : > { %s340_s24 = sshra.s32 (!%p140_p9), %s211_s20, 4  ;;  %s341_s24 = int_to_ptr.hbm [resolvable:$true] %s340_s24 }
  0x13   : > { %v170_v0 = vld [vmem:[%s508_s1] sm:$0x3]  ;;  %s163_s28 = scalar_select %p162_p10, %s433_s16, 1  ;;  %vm175_vm0 = vcmask 1041408  }
  0x14   : > { %v173_v1 = vperm.slane %v170_v0, 1  ;;  %v180_v2 = vld [vmem:[%s509_s2] sm:$0x3]  ;;  %v172_v4 = vperm.slane %v170_v0, 0  ;;  %s196_s16 = scalar_lea.sflag [#allocation3], %s159_s29  ;;  %s342_s25 = scalar_lea.hbm %s341_s24, 8 }
  0x15   : > { %v183_v3 = vperm.slane %v180_v2, 1  ;;  %s278_s30 = sshll.u32 %s163_s28, 2  ;;  %v182_v6 = vperm.slane %v180_v2, 0  ;;  %p343_p11 = scmp.ne.s32.totalorder %s341_s24, %s342_s25 }
  0x16   : > { %v174_v5 = vrot.slane %v173_v1, 6  ;;  %s165_s6 = scalar_lea.vmem %s507_s0, %s278_s30  ;;  %s346_s28 = scalar_lea.hbm %s510_s3, 16 }
  0x17   : > { %v184_v7 = vrot.slane %v183_v3, 6  ;;  %v166_v8 = vld [vmem:[%s165_s6] sm:$0x3]  ;;  %v167_v10 = vld [vmem:[%s165_s6 + $0x2] sm:$0x3]  ;;  %p344_p12 = pnand %p343_p11, %p450_p5  ;;  %p347_p0 = scmp.lt.s32.totalorder %s341_s24, %s510_s3 }
  0x18   : > { %v176_v9 = vsel %vm175_vm0, %v172_v4, %v174_v5  ;;  %v168_v11 = vunpack.c.l.bf16 %v166_v8  ;;  %v169_v12 = vunpack.c.l.bf16 %v167_v10  ;;  %p348_p1 = scmp.lt.s32.totalorder %s346_s28, %s342_s25 }
  0x19   : > { %v185_v13 = vsel %vm175_vm0, %v182_v6, %v184_v7  ;;  %p345_p13 = pneg %p344_p12 }
  0x1a   : > { %v178_v14 = vmul.f32 %v176_v9, %v168_v11  ;;  %v179_v15 = vmul.f32 %v176_v9, %v169_v12  ;;  %p349_p2 = por %p348_p1, %p347_p0 }
  0x1c   : > { %v187_v16 = vadd.f32 %v185_v13, %v178_v14  ;;  %v188_v17 = vadd.f32 %v185_v13, %v179_v15  ;;  %p350_p3 = pnand %p349_p2, %p345_p13 }
  0x1e   : > { %v189_v18 = vmul.f32 0.1, %v187_v16  ;;  %v190_v19 = vmul.f32 0.1, %v188_v17 }
  0x20   : > { %v191_v20 = vmax.f32 %v187_v16, %v189_v18  ;;  %v192_v21 = vmax.f32 %v188_v17, %v190_v19 }
  0x22   : > { %193 = vst [vmem:[%s161_s17] sm:$0xf] %v191_v20 }
  0x23   : > { %194 = vst [vmem:[%s161_s17 + $0x4] sm:$0xf] %v192_v21 }
  0x24   : > { %353 = shalt.err (!%p350_p3)
}
  0x25   : > { %s390_s29 = smov 64   ;;  %s391_s5 = smov 4  }
  0x26   : > { %285 = dma.vmem_to_hbm [thread:$0]  (%p450_p5), %s209_s19, 128, %s211_s20, %s196_s16, %s390_s29, %s390_s29, %s391_s5  }
  0x27 PF: > { %p291_p4 = scmp.ge.s32.totalorder %s388_s15, 2  ;;  %s225_s6 = sand.u32 1, %s376_s12  }
  0x28   : > { %s226_s7 = scalar_lea.sflag [#allocation3], %s225_s6 }
  0x29   : > { %p288_p7 = pnand %p291_p4, %p454_p6 }
  0x2b   : > { %p289_p8 = pneg %p288_p7 }
  0x2d   : > { %371 = dma.done.wait (%p289_p8), %s226_s7, 128  }
  0x2e   : > { %373 = vsyncadd (%p289_p8), %s226_s7, 4294967168  ;;  %p13_p9 = scmp.ge.s32.totalorder %s437_s18, 4   ;;  %s513_s12 = smov %s380_s13 }
  0x2f   : > { %s514_s13 = smov %s384_s14  ;;  %s515_s14 = smov %s448_s21 }
  0x30   : > { %s516_s15 = smov %s437_s18  ;;  %15 = sbr.rel (!%p13_p9) target bundleno = 3 (0x3), region = 67 }
  0x35   :  { %232 = vsyncpa [#allocation3], 1 }
  0x36   :  { %234 = vsyncpa [#allocation3 + $0x1], 1 }

</bundles_post_ra>
